<compile_context>
chip_gen: v7x
topology: tpu7x:2x2x1
jax: 0.10.0
libtpu: 0.0.40
codegen_flags: <defaults>
</compile_context>

<pallas_src>
import jax
import jax.numpy as jnp
from jax.experimental import pallas as pl
from jax.experimental.pallas import tpu as pltpu

THRESH = 0.5
DECAY = 0.25
BN_EPS = 1e-5
VMEM_LIMIT = 48 * 1024 * 1024  # safe on v7x (64 MiB physical), fine on v5e/v6e


# ---------------------------------------------------------------------------
# In-kernel LIF membrane update. `mem_ref` is a VMEM scratch carried across the
# T grid axis; reset at t == 0. Returns the boolean spike for this time step.
# Single jnp.where instead of float spike / (1-spike) / two muls (review item).
# ---------------------------------------------------------------------------
def _lif_spike(t, x, mem_ref):
    @pl.when(t == 0)
    def _():
        mem_ref[...] = x

    @pl.when(t > 0)
    def _():
        prev = mem_ref[...]
        mem_ref[...] = jnp.where(prev > THRESH, x, prev * DECAY + x)

    return mem_ref[...] > THRESH


# ---------------------------------------------------------------------------
# Fused kernel 1: LIF spike -> 1x1 conv (GEMM, bf16 on MXU) -> BN shift.
#   * n_in inputs  : spike(cat(x_a, x_b)) @ W == spike(x_a) @ W_top + spike(x_b) @ W_bot
#                    (used for conv3 without materializing the channel concat).
#   * n_out outputs: one GEMM with N = sum(out_widths), result split in-register
#                    (used for conv1+conv2 sharing one spike of the same input).
# ---------------------------------------------------------------------------
def _make_fused_conv1x1_kernel(n_in, out_widths):
    n_out = len(out_widths)

    def kernel(*refs):
        x_refs = refs[:n_in]
        w_refs = refs[n_in:2 * n_in]
        shift_ref = refs[2 * n_in]
        o_refs = refs[2 * n_in + 1: 2 * n_in + 1 + n_out]
        mem_refs = refs[2 * n_in + 1 + n_out:]

        t = pl.program_id(1)
        acc = None
        for x_ref, w_ref, mem_ref in zip(x_refs, w_refs, mem_refs):
            spk = _lif_spike(t, x_ref[0], mem_ref).astype(jnp.bfloat16)
            part = jnp.dot(spk, w_ref[...], preferred_element_type=jnp.float32)
            acc = part if acc is None else acc + part
        res = acc + shift_ref[...]

        off = 0
        for o_ref, wdt in zip(o_refs, out_widths):
            o_ref[0] = res[:, off:off + wdt]
            off += wdt

    return kernel


def _pick_tm(M, cap=512):
    """Largest multiple-of-8 divisor of M (<= cap), preferring >= 2 tiles (v7x)."""
    best = None
    best_multi = None
    for t in range(8, min(cap, M) + 1, 8):
        if M % t == 0:
            best = t
            if M // t >= 2:
                best_multi = t
    return best_multi if best_multi is not None else best


def fused_spike_conv1x1(xs, ws, shift, out_widths, tm_cap=512):
    """xs: list of [T, M, Cin_i] f32; ws: list of [Cin_i, Cout] bf16 (BN scale folded);
    shift: [Cout] f32; out_widths: channel split of the result.
    Returns a tuple of [T, M, w] f32 arrays."""
    n_in = len(xs)
    T, M, _ = xs[0].shape
    Cout = ws[0].shape[-1]
    assert sum(out_widths) == Cout
    cws = [x.shape[-1] for x in xs]

    tm = _pick_tm(M, tm_cap)
    if tm is None:                      # fallback: pad M up to a multiple of 8
        tm = min(tm_cap, -(-M // 8) * 8)
    n_tiles = -(-M // tm)
    Mpad = n_tiles * tm
    if Mpad != M:  # zero rows -> zero spikes -> only shift, sliced off afterwards
        xs = [jnp.pad(x, ((0, 0), (0, Mpad - M), (0, 0))) for x in xs]

    in_specs = [pl.BlockSpec((1, tm, cw), lambda i, t: (t, i, 0)) for cw in cws]
    in_specs += [pl.BlockSpec(w.shape, lambda i, t: (0, 0)) for w in ws]
    in_specs += [pl.BlockSpec((1, Cout), lambda i, t: (0, 0))]

    out_shape = tuple(jax.ShapeDtypeStruct((T, Mpad, w), jnp.float32)
                      for w in out_widths)
    out_specs = tuple(pl.BlockSpec((1, tm, w), lambda i, t: (t, i, 0))
                      for w in out_widths)

    outs = pl.pallas_call(
        _make_fused_conv1x1_kernel(n_in, tuple(out_widths)),
        out_shape=out_shape,
        grid=(n_tiles, T),
        in_specs=in_specs,
        out_specs=out_specs,
        scratch_shapes=[pltpu.VMEM((tm, cw), jnp.float32) for cw in cws],
        compiler_params=pltpu.CompilerParams(
            dimension_semantics=("parallel", "arbitrary"),
            vmem_limit_bytes=VMEM_LIMIT,
        ),
    )(*xs, *ws, shift.reshape(1, Cout))

    outs = tuple(outs) if isinstance(outs, (tuple, list)) else (outs,)
    if Mpad != M:
        outs = tuple(o[:, :M, :] for o in outs)
    return outs


# ---------------------------------------------------------------------------
# Fused kernel 2: the whole Snn_Bottleneck, one image per grid step, grid (B, T).
#   spike(x1) -> 1x1 GEMM + shift -> z (VMEM only) -> spike(z) -> 3x3 conv as nine
#   row-shifted GEMMs on a dense bf16 spike buffer -> + shift -> + x1 residual.
# Horizontal zero-padding of the conv: two pre-masked spike copies (last column
# zeroed for left-neighbor taps, first column zeroed for right-neighbor taps).
# Vertical zero-padding: zeroed margin rows around the dense spike buffer.
# ---------------------------------------------------------------------------
def _make_bottleneck_kernel(W, HW, P, h):
    def kernel(x1_ref, mL_ref, mR_ref, w1_ref, s1_ref, w2_ref, s2_ref, o_ref,
               mem1, mem2, spC, spL, spR):
        t = pl.program_id(1)
        x1 = x1_ref[0]                                            # (HW, h) f32

        # m[0].conv1 : LIF -> 1x1 conv -> BN shift   (z stays in registers/VMEM)
        spk1 = _lif_spike(t, x1, mem1).astype(jnp.bfloat16)
        z = jnp.dot(spk1, w1_ref[...],
                    preferred_element_type=jnp.float32) + s1_ref[...]

        # m[0].conv2 : LIF -> 3x3 conv -> BN shift
        spk2 = _lif_spike(t, z, mem2).astype(jnp.bfloat16)        # (HW, h)

        @pl.when(t == 0)                                          # zero margins once per image
        def _():
            zeros = jnp.zeros((P, h), jnp.bfloat16)
            for buf in (spC, spL, spR):
                buf[0:P, :] = zeros
                buf[P + HW:P + HW + P, :] = zeros

        spC[P:P + HW, :] = spk2
        spL[P:P + HW, :] = spk2 * mL_ref[...]   # last column zeroed (dx = -1 taps)
        spR[P:P + HW, :] = spk2 * mR_ref[...]   # first column zeroed (dx = +1 taps)

        acc = x1 + s2_ref[...]                  # residual + BN shift
        bufs = (spL, spC, spR)                  # dx = 0 (left), 1 (center), 2 (right)
        for dy in range(3):
            for dx in range(3):
                start = P + (dy - 1) * W + (dx - 1)
                patch = bufs[dx][start:start + HW, :]
                acc = acc + jnp.dot(patch, w2_ref[3 * dy + dx],
                                    preferred_element_type=jnp.float32)
        o_ref[0] = acc

    return kernel


def fused_bottleneck(x1, B, H, W, pm1, pm2):
    """x1: [T, M, h] f32 (M = B*H*W); pm1: 1x1 conv params; pm2: 3x3 conv params
    (w: [9, h, h] bf16, tap order dy,dx, BN scale folded).  -> [T, M, h] f32."""
    T, M, h = x1.shape
    HW = H * W
    P = -(-(W + 1) // 8) * 8            # margin rows, multiple of 8, >= W+1
    rows = P + HW + P

    # Column masks (built once in XLA, tiny): zero the column that would wrap
    # around the image edge in the flat row-shifted layout.
    col = jnp.tile(jnp.arange(W), H).reshape(HW, 1)
    mask_l = (col != (W - 1)).astype(jnp.bfloat16)
    mask_r = (col != 0).astype(jnp.bfloat16)

    out = pl.pallas_call(
        _make_bottleneck_kernel(W, HW, P, h),
        out_shape=jax.ShapeDtypeStruct((T, M, h), jnp.float32),
        grid=(B, T),
        in_specs=[
            pl.BlockSpec((1, HW, h), lambda b, t: (t, b, 0)),        # x1
            pl.BlockSpec((HW, 1), lambda b, t: (0, 0)),              # mask_l
            pl.BlockSpec((HW, 1), lambda b, t: (0, 0)),              # mask_r
            pl.BlockSpec(pm1["w"].shape, lambda b, t: (0, 0)),       # (h, h)
            pl.BlockSpec((1, h), lambda b, t: (0, 0)),               # shift pm1
            pl.BlockSpec(pm2["w"].shape, lambda b, t: (0, 0, 0)),    # (9, h, h)
            pl.BlockSpec((1, h), lambda b, t: (0, 0)),               # shift pm2
        ],
        out_specs=pl.BlockSpec((1, HW, h), lambda b, t: (t, b, 0)),
        scratch_shapes=[
            pltpu.VMEM((HW, h), jnp.float32),       # membrane of m[0].conv1
            pltpu.VMEM((HW, h), jnp.float32),       # membrane of m[0].conv2
            pltpu.VMEM((rows, h), jnp.bfloat16),    # spike buffer (center)
            pltpu.VMEM((rows, h), jnp.bfloat16),    # spike buffer (left-masked)
            pltpu.VMEM((rows, h), jnp.bfloat16),    # spike buffer (right-masked)
        ],
        compiler_params=pltpu.CompilerParams(
            dimension_semantics=("parallel", "arbitrary"),
            vmem_limit_bytes=VMEM_LIMIT,
        ),
    )(x1, mask_l, mask_r, pm1["w"], pm1["shift"].reshape(1, h),
      pm2["w"], pm2["shift"].reshape(1, h))
    return out


# ---------------------------------------------------------------------------
# Snn_CSPLayer forward (n=1, shortcut=True, expansion=0.5, depthwise=False)
# ---------------------------------------------------------------------------
@jax.jit
def snn_csplayer_forward(x_tbchw, params):
    # [T, B, C, H, W] -> channel-last [T, B, H, W, C]
    x = jnp.transpose(x_tbchw, (0, 1, 3, 4, 2))
    T, B, H, W, Cin = x.shape
    M = B * H * W
    xf = x.reshape(T, M, Cin)

    p1, p2, p3 = params["conv1"], params["conv2"], params["conv3"]
    pm1, pm2 = params["m0_conv1"], params["m0_conv2"]
    h = p1["w"].shape[-1]

    # conv1 + conv2: identical LIF on the same input -> one spike, one GEMM (N = 2h),
    # result split into x1 / x2 in-register inside the kernel.
    w12 = jnp.concatenate([p1["w"], p2["w"]], axis=-1)       # (Cin, 2h) bf16
    shift12 = jnp.concatenate([p1["shift"], p2["shift"]])    # (2h,) f32
    x1, x2 = fused_spike_conv1x1([xf], [w12], shift12, out_widths=(h, h))

    # Snn_Bottleneck: fully fused (1x1 -> 3x3 -> + residual) in one kernel.
    y = fused_bottleneck(x1, B, H, W, pm1, pm2)

    # conv3 on the channel concat (y, x2) without materializing the concat.
    w3_top, w3_bot = p3["w"][:h], p3["w"][h:]
    cout = p3["w"].shape[-1]
    (out,) = fused_spike_conv1x1([y, x2], [w3_top, w3_bot], p3["shift"],
                                 out_widths=(cout,))

    out = out.reshape(T, B, H, W, cout)
    return jnp.transpose(out, (0, 1, 4, 2, 3))  # back to [T, B, C, H, W]


# ---------------------------------------------------------------------------
# Deterministic parameter construction (BN folded into weights at build time)
# ---------------------------------------------------------------------------
def _make_bn(key, c):
    k1, k2, k3, k4 = jax.random.split(key, 4)
    gamma = 1.0 + 0.1 * jax.random.normal(k1, (c,))
    beta = 0.1 * jax.random.normal(k2, (c,))
    mean = 0.1 * jax.random.normal(k3, (c,))
    var = 1.0 + 0.1 * jnp.abs(jax.random.normal(k4, (c,)))
    scale = gamma / jnp.sqrt(var + BN_EPS)
    shift = beta - mean * scale
    return scale.astype(jnp.float32), shift.astype(jnp.float32)


def _make_conv(key, cin, cout, k):
    kw_, kb = jax.random.split(key)
    fan = cin * k * k
    w = jax.random.normal(kw_, (k, k, cin, cout)) / jnp.sqrt(float(fan))
    scale, shift = _make_bn(kb, cout)
    # Fold BN scale into the conv weight; bf16 is lossless on 0/1 spikes and
    # doubles MXU throughput. Accumulation stays f32 in the kernels.
    wf = (w * scale[None, None, None, :]).astype(jnp.bfloat16)
    wk = wf.reshape(cin, cout) if k == 1 else wf.reshape(k * k, cin, cout)
    return {"w": wk, "shift": shift}


if __name__ == "__main__":
    T, B, C_IN, H, W = 4, 2, 32, 16, 16
    C_OUT = 64
    hidden = int(C_OUT * 0.5)

    root = jax.random.PRNGKey(0)
    ks = jax.random.split(root, 6)
    params = {
        "conv1": _make_conv(ks[0], C_IN, hidden, 1),
        "conv2": _make_conv(ks[1], C_IN, hidden, 1),
        "m0_conv1": _make_conv(ks[2], hidden, hidden, 1),
        "m0_conv2": _make_conv(ks[3], hidden, hidden, 3),
        "conv3": _make_conv(ks[4], 2 * hidden, C_OUT, 1),
    }

    x = jax.random.normal(ks[5], (T, B, C_IN, H, W), dtype=jnp.float32)

    out = jax.block_until_ready(snn_csplayer_forward(x, params))
    assert out.shape == (T, B, C_OUT, H, W), out.shape
    assert bool(jnp.all(jnp.isfinite(out)))
    print("KERNEL_OK")
</pallas_src>

<mosaic_0001>
module attributes {stable_mosaic.version = 11 : i64} {
  func.func @kernel(%arg0: i32, %arg1: i32, %arg2: memref<1x256x32xf32, #tpu.memory_space<vmem>>, %arg3: memref<32x64xbf16, #tpu.memory_space<vmem>>, %arg4: memref<1x64xf32, #tpu.memory_space<vmem>>, %arg5: memref<1x256x32xf32, #tpu.memory_space<vmem>>, %arg6: memref<1x256x32xf32, #tpu.memory_space<vmem>>, %arg7: memref<256x32xf32, #tpu.memory_space<vmem>>) attributes {dimension_semantics = [#tpu.dimension_semantics<parallel>, #tpu.dimension_semantics<arbitrary>], iteration_bounds = array<i64: 2, 4>, scalar_prefetch = 0 : i64, scratch_operands = 1 : i64, tpu.core_type = #tpu.core_type<tc>, window_params = [{transform_indices = @transform_0, window_bounds = array<i64: 1, 256, 32>}, {pipeline_mode = #tpu.pipeline_mode<synchronous>, transform_indices = @transform_1, window_bounds = array<i64: 32, 64>}, {pipeline_mode = #tpu.pipeline_mode<synchronous>, transform_indices = @transform_2, window_bounds = array<i64: 1, 64>}, {transform_indices = @transform_3, window_bounds = array<i64: 1, 256, 32>}, {transform_indices = @transform_4, window_bounds = array<i64: 1, 256, 32>}]} {
    %c0 = arith.constant 0 : index
    %c0_0 = arith.constant 0 : index
    %c0_1 = arith.constant 0 : index
    %0 = vector.load %arg2[%c0, %c0_0, %c0_1] : memref<1x256x32xf32, #tpu.memory_space<vmem>>, vector<1x256x32xf32>
    %1 = vector.shape_cast %0 : vector<1x256x32xf32> to vector<256x32xf32>
    %c0_i32 = arith.constant 0 : i32
    %2 = arith.cmpi eq, %arg1, %c0_i32 : i32
    %3 = arith.extui %2 : i1 to i32
    %c0_i32_2 = arith.constant 0 : i32
    %4 = arith.cmpi ne, %3, %c0_i32_2 : i32
    scf.if %4 {
      %c0_18 = arith.constant 0 : index
      %c0_19 = arith.constant 0 : index
      %27 = vector.load %arg7[%c0_18, %c0_19] : memref<256x32xf32, #tpu.memory_space<vmem>>, vector<256x32xf32>
      tpu.vector_store %arg7[%c0_18, %c0_19], %1 {strides = array<i32>} : memref<256x32xf32, #tpu.memory_space<vmem>>, vector<256x32xf32>,
    } else {
    }
    %c0_i32_3 = arith.constant 0 : i32
    %5 = arith.cmpi sgt, %arg1, %c0_i32_3 : i32
    %6 = arith.extui %5 : i1 to i32
    %c0_i32_4 = arith.constant 0 : i32
    %7 = arith.cmpi ne, %6, %c0_i32_4 : i32
    scf.if %7 {
      %c0_18 = arith.constant 0 : index
      %c0_19 = arith.constant 0 : index
      %27 = vector.load %arg7[%c0_18, %c0_19] : memref<256x32xf32, #tpu.memory_space<vmem>>, vector<256x32xf32>
      %cst_20 = arith.constant 5.000000e-01 : f32
      %28 = vector.broadcast %cst_20 : f32 to vector<256x32xf32>
      %29 = arith.cmpf ogt, %27, %28 : vector<256x32xf32>
      %cst_21 = arith.constant 2.500000e-01 : f32
      %30 = vector.broadcast %cst_21 : f32 to vector<256x32xf32>
      %31 = arith.mulf %27, %30 : vector<256x32xf32>
      %32 = arith.addf %31, %1 : vector<256x32xf32>
      %33 = arith.select %29, %1, %32 : vector<256x32xi1>, vector<256x32xf32>
      %c0_22 = arith.constant 0 : index
      %c0_23 = arith.constant 0 : index
      %34 = vector.load %arg7[%c0_22, %c0_23] : memref<256x32xf32, #tpu.memory_space<vmem>>, vector<256x32xf32>
      tpu.vector_store %arg7[%c0_22, %c0_23], %33 {strides = array<i32>} : memref<256x32xf32, #tpu.memory_space<vmem>>, vector<256x32xf32>,
    } else {
    }
    %c0_5 = arith.constant 0 : index
    %c0_6 = arith.constant 0 : index
    %8 = vector.load %arg7[%c0_5, %c0_6] : memref<256x32xf32, #tpu.memory_space<vmem>>, vector<256x32xf32>
    %cst = arith.constant 5.000000e-01 : f32
    %9 = vector.broadcast %cst : f32 to vector<256x32xf32>
    %10 = arith.cmpf ogt, %8, %9 : vector<256x32xf32>
    %11 = arith.extui %10 : vector<256x32xi1> to vector<256x32xi32>
    %12 = arith.sitofp %11 : vector<256x32xi32> to vector<256x32xf32>
    %13 = arith.truncf %12 : vector<256x32xf32> to vector<256x32xbf16>
    %c0_7 = arith.constant 0 : index
    %c0_8 = arith.constant 0 : index
    %14 = vector.load %arg3[%c0_7, %c0_8] : memref<32x64xbf16, #tpu.memory_space<vmem>>, vector<32x64xbf16>
    %cst_9 = arith.constant dense<0.000000e+00> : vector<256x64xf32>
    %15 = tpu.matmul %13, %14, %cst_9 {dimension_numbers = #tpu.dot_dimension_numbers<[1], [0], [0], [1], [0, 0, 1, 1], [], []>} : vector<256x32xbf16>, vector<32x64xbf16>, vector<256x64xf32> -> vector<256x64xf32>
    %c0_10 = arith.constant 0 : index
    %c0_11 = arith.constant 0 : index
    %16 = vector.load %arg4[%c0_10, %c0_11] : memref<1x64xf32, #tpu.memory_space<vmem>>, vector<1x64xf32>
    %17 = vector.broadcast %16 : vector<1x64xf32> to vector<256x64xf32>
    %18 = arith.addf %15, %17 : vector<256x64xf32>
    %19 = vector.extract_strided_slice %18 {offsets = [0, 0], sizes = [256, 32], strides = [1, 1]} : vector<256x64xf32> to vector<256x32xf32>
    %c0_12 = arith.constant 0 : index
    %c0_13 = arith.constant 0 : index
    %c0_14 = arith.constant 0 : index
    %20 = vector.load %arg5[%c0_12, %c0_13, %c0_14] : memref<1x256x32xf32, #tpu.memory_space<vmem>>, vector<1x256x32xf32>
    %21 = vector.shape_cast %20 : vector<1x256x32xf32> to vector<256x32xf32>
    %22 = vector.shape_cast %19 : vector<256x32xf32> to vector<1x256x32xf32>
    tpu.vector_store %arg5[%c0_12, %c0_13, %c0_14], %22 {strides = array<i32>} : memref<1x256x32xf32, #tpu.memory_space<vmem>>, vector<1x256x32xf32>,
    %23 = vector.extract_strided_slice %18 {offsets = [0, 32], sizes = [256, 32], strides = [1, 1]} : vector<256x64xf32> to vector<256x32xf32>
    %c0_15 = arith.constant 0 : index
    %c0_16 = arith.constant 0 : index
    %c0_17 = arith.constant 0 : index
    %24 = vector.load %arg6[%c0_15, %c0_16, %c0_17] : memref<1x256x32xf32, #tpu.memory_space<vmem>>, vector<1x256x32xf32>
    %25 = vector.shape_cast %24 : vector<1x256x32xf32> to vector<256x32xf32>
    %26 = vector.shape_cast %23 : vector<256x32xf32> to vector<1x256x32xf32>
    tpu.vector_store %arg6[%c0_15, %c0_16, %c0_17], %26 {strides = array<i32>} : memref<1x256x32xf32, #tpu.memory_space<vmem>>, vector<1x256x32xf32>,
    return
  }
  func.func @transform_0(%arg0: i32, %arg1: i32) -> (i32, i32, i32) {
    %c0_i32 = arith.constant 0 : i32
    %c0_i32_0 = arith.constant 0 : i32
    return %arg1, %arg0, %c0_i32 : i32, i32, i32
  }
  func.func @transform_1(%arg0: i32, %arg1: i32) -> (i32, i32) {
    %c0_i32 = arith.constant 0 : i32
    %c0_i32_0 = arith.constant 0 : i32
    %c0_i32_1 = arith.constant 0 : i32
    return %c0_i32, %c0_i32_0 : i32, i32
  }
  func.func @transform_2(%arg0: i32, %arg1: i32) -> (i32, i32) {
    %c0_i32 = arith.constant 0 : i32
    %c0_i32_0 = arith.constant 0 : i32
    %c0_i32_1 = arith.constant 0 : i32
    return %c0_i32, %c0_i32_0 : i32, i32
  }
  func.func @transform_3(%arg0: i32, %arg1: i32) -> (i32, i32, i32) {
    %c0_i32 = arith.constant 0 : i32
    %c0_i32_0 = arith.constant 0 : i32
    return %arg1, %arg0, %c0_i32 : i32, i32, i32
  }
  func.func @transform_4(%arg0: i32, %arg1: i32) -> (i32, i32, i32) {
    %c0_i32 = arith.constant 0 : i32
    %c0_i32_0 = arith.constant 0 : i32
    return %arg1, %arg0, %c0_i32 : i32, i32, i32
  }
}

module attributes {stable_mosaic.version = 11 : i64} {
  func.func @kernel(%arg0: i32, %arg1: i32, %arg2: memref<1x256x32xf32, #tpu.memory_space<vmem>>, %arg3: memref<256x1xbf16, #tpu.memory_space<vmem>>, %arg4: memref<256x1xbf16, #tpu.memory_space<vmem>>, %arg5: memref<32x32xbf16, #tpu.memory_space<vmem>>, %arg6: memref<1x32xf32, #tpu.memory_space<vmem>>, %arg7: memref<9x32x32xbf16, #tpu.memory_space<vmem>>, %arg8: memref<1x32xf32, #tpu.memory_space<vmem>>, %arg9: memref<1x256x32xf32, #tpu.memory_space<vmem>>, %arg10: memref<256x32xf32, #tpu.memory_space<vmem>>, %arg11: memref<256x32xf32, #tpu.memory_space<vmem>>, %arg12: memref<304x32xbf16, #tpu.memory_space<vmem>>, %arg13: memref<304x32xbf16, #tpu.memory_space<vmem>>, %arg14: memref<304x32xbf16, #tpu.memory_space<vmem>>) attributes {dimension_semantics = [#tpu.dimension_semantics<parallel>, #tpu.dimension_semantics<arbitrary>], iteration_bounds = array<i64: 2, 4>, scalar_prefetch = 0 : i64, scratch_operands = 5 : i64, tpu.core_type = #tpu.core_type<tc>, window_params = [{transform_indices = @transform_0, window_bounds = array<i64: 1, 256, 32>}, {pipeline_mode = #tpu.pipeline_mode<synchronous>, transform_indices = @transform_1, window_bounds = array<i64: 256, 1>}, {pipeline_mode = #tpu.pipeline_mode<synchronous>, transform_indices = @transform_2, window_bounds = array<i64: 256, 1>}, {pipeline_mode = #tpu.pipeline_mode<synchronous>, transform_indices = @transform_3, window_bounds = array<i64: 32, 32>}, {pipeline_mode = #tpu.pipeline_mode<synchronous>, transform_indices = @transform_4, window_bounds = array<i64: 1, 32>}, {pipeline_mode = #tpu.pipeline_mode<synchronous>, transform_indices = @transform_5, window_bounds = array<i64: 9, 32, 32>}, {pipeline_mode = #tpu.pipeline_mode<synchronous>, transform_indices = @transform_6, window_bounds = array<i64: 1, 32>}, {transform_indices = @transform_7, window_bounds = array<i64: 1, 256, 32>}]} {
    %c0 = arith.constant 0 : index
    %c0_0 = arith.constant 0 : index
    %c0_1 = arith.constant 0 : index
    %0 = vector.load %arg2[%c0, %c0_0, %c0_1] : memref<1x256x32xf32, #tpu.memory_space<vmem>>, vector<1x256x32xf32>
    %1 = vector.shape_cast %0 : vector<1x256x32xf32> to vector<256x32xf32>
    %c0_i32 = arith.constant 0 : i32
    %2 = arith.cmpi eq, %arg1, %c0_i32 : i32
    %3 = arith.extui %2 : i1 to i32
    %c0_i32_2 = arith.constant 0 : i32
    %4 = arith.cmpi ne, %3, %c0_i32_2 : i32
    scf.if %4 {
      %c0_75 = arith.constant 0 : index
      %c0_76 = arith.constant 0 : index
      %94 = vector.load %arg10[%c0_75, %c0_76] : memref<256x32xf32, #tpu.memory_space<vmem>>, vector<256x32xf32>
      tpu.vector_store %arg10[%c0_75, %c0_76], %1 {strides = array<i32>} : memref<256x32xf32, #tpu.memory_space<vmem>>, vector<256x32xf32>,
    } else {
    }
    %c0_i32_3 = arith.constant 0 : i32
    %5 = arith.cmpi sgt, %arg1, %c0_i32_3 : i32
    %6 = arith.extui %5 : i1 to i32
    %c0_i32_4 = arith.constant 0 : i32
    %7 = arith.cmpi ne, %6, %c0_i32_4 : i32
    scf.if %7 {
      %c0_75 = arith.constant 0 : index
      %c0_76 = arith.constant 0 : index
      %94 = vector.load %arg10[%c0_75, %c0_76] : memref<256x32xf32, #tpu.memory_space<vmem>>, vector<256x32xf32>
      %cst_77 = arith.constant 5.000000e-01 : f32
      %95 = vector.broadcast %cst_77 : f32 to vector<256x32xf32>
      %96 = arith.cmpf ogt, %94, %95 : vector<256x32xf32>
      %cst_78 = arith.constant 2.500000e-01 : f32
      %97 = vector.broadcast %cst_78 : f32 to vector<256x32xf32>
      %98 = arith.mulf %94, %97 : vector<256x32xf32>
      %99 = arith.addf %98, %1 : vector<256x32xf32>
      %100 = arith.select %96, %1, %99 : vector<256x32xi1>, vector<256x32xf32>
      %c0_79 = arith.constant 0 : index
      %c0_80 = arith.constant 0 : index
      %101 = vector.load %arg10[%c0_79, %c0_80] : memref<256x32xf32, #tpu.memory_space<vmem>>, vector<256x32xf32>
      tpu.vector_store %arg10[%c0_79, %c0_80], %100 {strides = array<i32>} : memref<256x32xf32, #tpu.memory_space<vmem>>, vector<256x32xf32>,
    } else {
    }
    %c0_5 = arith.constant 0 : index
    %c0_6 = arith.constant 0 : index
    %8 = vector.load %arg10[%c0_5, %c0_6] : memref<256x32xf32, #tpu.memory_space<vmem>>, vector<256x32xf32>
    %cst = arith.constant 5.000000e-01 : f32
    %9 = vector.broadcast %cst : f32 to vector<256x32xf32>
    %10 = arith.cmpf ogt, %8, %9 : vector<256x32xf32>
    %11 = arith.extui %10 : vector<256x32xi1> to vector<256x32xi32>
    %12 = arith.sitofp %11 : vector<256x32xi32> to vector<256x32xf32>
    %13 = arith.truncf %12 : vector<256x32xf32> to vector<256x32xbf16>
    %c0_7 = arith.constant 0 : index
    %c0_8 = arith.constant 0 : index
    %14 = vector.load %arg5[%c0_7, %c0_8] : memref<32x32xbf16, #tpu.memory_space<vmem>>, vector<32x32xbf16>
    %cst_9 = arith.constant dense<0.000000e+00> : vector<256x32xf32>
    %15 = tpu.matmul %13, %14, %cst_9 {dimension_numbers = #tpu.dot_dimension_numbers<[1], [0], [0], [1], [0, 0, 1, 1], [], []>} : vector<256x32xbf16>, vector<32x32xbf16>, vector<256x32xf32> -> vector<256x32xf32>
    %c0_10 = arith.constant 0 : index
    %c0_11 = arith.constant 0 : index
    %16 = vector.load %arg6[%c0_10, %c0_11] : memref<1x32xf32, #tpu.memory_space<vmem>>, vector<1x32xf32>
    %17 = vector.broadcast %16 : vector<1x32xf32> to vector<256x32xf32>
    %18 = arith.addf %15, %17 : vector<256x32xf32>
    %c0_i32_12 = arith.constant 0 : i32
    %19 = arith.cmpi eq, %arg1, %c0_i32_12 : i32
    %20 = arith.extui %19 : i1 to i32
    %c0_i32_13 = arith.constant 0 : i32
    %21 = arith.cmpi ne, %20, %c0_i32_13 : i32
    scf.if %21 {
      %c0_75 = arith.constant 0 : index
      %c0_76 = arith.constant 0 : index
      %94 = vector.load %arg11[%c0_75, %c0_76] : memref<256x32xf32, #tpu.memory_space<vmem>>, vector<256x32xf32>
      tpu.vector_store %arg11[%c0_75, %c0_76], %18 {strides = array<i32>} : memref<256x32xf32, #tpu.memory_space<vmem>>, vector<256x32xf32>,
    } else {
    }
    %c0_i32_14 = arith.constant 0 : i32
    %22 = arith.cmpi sgt, %arg1, %c0_i32_14 : i32
    %23 = arith.extui %22 : i1 to i32
    %c0_i32_15 = arith.constant 0 : i32
    %24 = arith.cmpi ne, %23, %c0_i32_15 : i32
    scf.if %24 {
      %c0_75 = arith.constant 0 : index
      %c0_76 = arith.constant 0 : index
      %94 = vector.load %arg11[%c0_75, %c0_76] : memref<256x32xf32, #tpu.memory_space<vmem>>, vector<256x32xf32>
      %cst_77 = arith.constant 5.000000e-01 : f32
      %95 = vector.broadcast %cst_77 : f32 to vector<256x32xf32>
      %96 = arith.cmpf ogt, %94, %95 : vector<256x32xf32>
      %cst_78 = arith.constant 2.500000e-01 : f32
      %97 = vector.broadcast %cst_78 : f32 to vector<256x32xf32>
      %98 = arith.mulf %94, %97 : vector<256x32xf32>
      %99 = arith.addf %98, %18 : vector<256x32xf32>
      %100 = arith.select %96, %18, %99 : vector<256x32xi1>, vector<256x32xf32>
      %c0_79 = arith.constant 0 : index
      %c0_80 = arith.constant 0 : index
      %101 = vector.load %arg11[%c0_79, %c0_80] : memref<256x32xf32, #tpu.memory_space<vmem>>, vector<256x32xf32>
      tpu.vector_store %arg11[%c0_79, %c0_80], %100 {strides = array<i32>} : memref<256x32xf32, #tpu.memory_space<vmem>>, vector<256x32xf32>,
    } else {
    }
    %c0_16 = arith.constant 0 : index
    %c0_17 = arith.constant 0 : index
    %25 = vector.load %arg11[%c0_16, %c0_17] : memref<256x32xf32, #tpu.memory_space<vmem>>, vector<256x32xf32>
    %cst_18 = arith.constant 5.000000e-01 : f32
    %26 = vector.broadcast %cst_18 : f32 to vector<256x32xf32>
    %27 = arith.cmpf ogt, %25, %26 : vector<256x32xf32>
    %28 = arith.extui %27 : vector<256x32xi1> to vector<256x32xi32>
    %29 = arith.sitofp %28 : vector<256x32xi32> to vector<256x32xf32>
    %30 = arith.truncf %29 : vector<256x32xf32> to vector<256x32xbf16>
    %c0_i32_19 = arith.constant 0 : i32
    %31 = arith.cmpi eq, %arg1, %c0_i32_19 : i32
    %32 = arith.extui %31 : i1 to i32
    %c0_i32_20 = arith.constant 0 : i32
    %33 = arith.cmpi ne, %32, %c0_i32_20 : i32
    scf.if %33 {
      %cst_75 = arith.constant 0.000000e+00 : bf16
      %94 = vector.broadcast %cst_75 : bf16 to vector<24x32xbf16>
      %c0_76 = arith.constant 0 : index
      %c0_77 = arith.constant 0 : index
      %95 = vector.load %arg12[%c0_76, %c0_77] : memref<304x32xbf16, #tpu.memory_space<vmem>>, vector<24x32xbf16>
      tpu.vector_store %arg12[%c0_76, %c0_77], %94 {strides = array<i32>} : memref<304x32xbf16, #tpu.memory_space<vmem>>, vector<24x32xbf16>,
      %c280 = arith.constant 280 : index
      %c0_78 = arith.constant 0 : index
      %96 = vector.load %arg12[%c280, %c0_78] : memref<304x32xbf16, #tpu.memory_space<vmem>>, vector<24x32xbf16>
      tpu.vector_store %arg12[%c280, %c0_78], %94 {strides = array<i32>} : memref<304x32xbf16, #tpu.memory_space<vmem>>, vector<24x32xbf16>,
      %c0_79 = arith.constant 0 : index
      %c0_80 = arith.constant 0 : index
      %97 = vector.load %arg13[%c0_79, %c0_80] : memref<304x32xbf16, #tpu.memory_space<vmem>>, vector<24x32xbf16>
      tpu.vector_store %arg13[%c0_79, %c0_80], %94 {strides = array<i32>} : memref<304x32xbf16, #tpu.memory_space<vmem>>, vector<24x32xbf16>,
      %c280_81 = arith.constant 280 : index
      %c0_82 = arith.constant 0 : index
      %98 = vector.load %arg13[%c280_81, %c0_82] : memref<304x32xbf16, #tpu.memory_space<vmem>>, vector<24x32xbf16>
      tpu.vector_store %arg13[%c280_81, %c0_82], %94 {strides = array<i32>} : memref<304x32xbf16, #tpu.memory_space<vmem>>, vector<24x32xbf16>,
      %c0_83 = arith.constant 0 : index
      %c0_84 = arith.constant 0 : index
      %99 = vector.load %arg14[%c0_83, %c0_84] : memref<304x32xbf16, #tpu.memory_space<vmem>>, vector<24x32xbf16>
      tpu.vector_store %arg14[%c0_83, %c0_84], %94 {strides = array<i32>} : memref<304x32xbf16, #tpu.memory_space<vmem>>, vector<24x32xbf16>,
      %c280_85 = arith.constant 280 : index
      %c0_86 = arith.constant 0 : index
      %100 = vector.load %arg14[%c280_85, %c0_86] : memref<304x32xbf16, #tpu.memory_space<vmem>>, vector<24x32xbf16>
      tpu.vector_store %arg14[%c280_85, %c0_86], %94 {strides = array<i32>} : memref<304x32xbf16, #tpu.memory_space<vmem>>, vector<24x32xbf16>,
    } else {
    }
    %c24 = arith.constant 24 : index
    %c0_21 = arith.constant 0 : index
    %34 = vector.load %arg12[%c24, %c0_21] : memref<304x32xbf16, #tpu.memory_space<vmem>>, vector<256x32xbf16>
    tpu.vector_store %arg12[%c24, %c0_21], %30 {strides = array<i32>} : memref<304x32xbf16, #tpu.memory_space<vmem>>, vector<256x32xbf16>,
    %c0_22 = arith.constant 0 : index
    %c0_23 = arith.constant 0 : index
    %35 = vector.load %arg3[%c0_22, %c0_23] : memref<256x1xbf16, #tpu.memory_space<vmem>>, vector<256x1xbf16>
    %36 = vector.broadcast %35 : vector<256x1xbf16> to vector<256x32xbf16>
    %37 = arith.mulf %30, %36 : vector<256x32xbf16>
    %c24_24 = arith.constant 24 : index
    %c0_25 = arith.constant 0 : index
    %38 = vector.load %arg13[%c24_24, %c0_25] : memref<304x32xbf16, #tpu.memory_space<vmem>>, vector<256x32xbf16>
    tpu.vector_store %arg13[%c24_24, %c0_25], %37 {strides = array<i32>} : memref<304x32xbf16, #tpu.memory_space<vmem>>, vector<256x32xbf16>,
    %c0_26 = arith.constant 0 : index
    %c0_27 = arith.constant 0 : index
    %39 = vector.load %arg4[%c0_26, %c0_27] : memref<256x1xbf16, #tpu.memory_space<vmem>>, vector<256x1xbf16>
    %40 = vector.broadcast %39 : vector<256x1xbf16> to vector<256x32xbf16>
    %41 = arith.mulf %30, %40 : vector<256x32xbf16>
    %c24_28 = arith.constant 24 : index
    %c0_29 = arith.constant 0 : index
    %42 = vector.load %arg14[%c24_28, %c0_29] : memref<304x32xbf16, #tpu.memory_space<vmem>>, vector<256x32xbf16>
    tpu.vector_store %arg14[%c24_28, %c0_29], %41 {strides = array<i32>} : memref<304x32xbf16, #tpu.memory_space<vmem>>, vector<256x32xbf16>,
    %c0_30 = arith.constant 0 : index
    %c0_31 = arith.constant 0 : index
    %43 = vector.load %arg8[%c0_30, %c0_31] : memref<1x32xf32, #tpu.memory_space<vmem>>, vector<1x32xf32>
    %44 = vector.broadcast %43 : vector<1x32xf32> to vector<256x32xf32>
    %45 = arith.addf %1, %44 : vector<256x32xf32>
    %c7 = arith.constant 7 : index
    %c0_32 = arith.constant 0 : index
    %46 = vector.load %arg13[%c7, %c0_32] : memref<304x32xbf16, #tpu.memory_space<vmem>>, vector<256x32xbf16>
    %c0_33 = arith.constant 0 : index
    %c0_34 = arith.constant 0 : index
    %c0_35 = arith.constant 0 : index
    %47 = vector.load %arg7[%c0_33, %c0_34, %c0_35] : memref<9x32x32xbf16, #tpu.memory_space<vmem>>, vector<1x32x32xbf16>
    %48 = vector.shape_cast %47 : vector<1x32x32xbf16> to vector<32x32xbf16>
    %cst_36 = arith.constant dense<0.000000e+00> : vector<256x32xf32>
    %49 = tpu.matmul %46, %48, %cst_36 {dimension_numbers = #tpu.dot_dimension_numbers<[1], [0], [0], [1], [0, 0, 1, 1], [], []>} : vector<256x32xbf16>, vector<32x32xbf16>, vector<256x32xf32> -> vector<256x32xf32>
    %50 = arith.addf %45, %49 : vector<256x32xf32>
    %c8 = arith.constant 8 : index
    %c0_37 = arith.constant 0 : index
    %51 = vector.load %arg12[%c8, %c0_37] : memref<304x32xbf16, #tpu.memory_space<vmem>>, vector<256x32xbf16>
    %c1 = arith.constant 1 : index
    %c0_38 = arith.constant 0 : index
    %c0_39 = arith.constant 0 : index
    %52 = vector.load %arg7[%c1, %c0_38, %c0_39] : memref<9x32x32xbf16, #tpu.memory_space<vmem>>, vector<1x32x32xbf16>
    %53 = vector.shape_cast %52 : vector<1x32x32xbf16> to vector<32x32xbf16>
    %cst_40 = arith.constant dense<0.000000e+00> : vector<256x32xf32>
    %54 = tpu.matmul %51, %53, %cst_40 {dimension_numbers = #tpu.dot_dimension_numbers<[1], [0], [0], [1], [0, 0, 1, 1], [], []>} : vector<256x32xbf16>, vector<32x32xbf16>, vector<256x32xf32> -> vector<256x32xf32>
    %55 = arith.addf %50, %54 : vector<256x32xf32>
    %c9 = arith.constant 9 : index
    %c0_41 = arith.constant 0 : index
    %56 = vector.load %arg14[%c9, %c0_41] : memref<304x32xbf16, #tpu.memory_space<vmem>>, vector<256x32xbf16>
    %c2 = arith.constant 2 : index
    %c0_42 = arith.constant 0 : index
    %c0_43 = arith.constant 0 : index
    %57 = vector.load %arg7[%c2, %c0_42, %c0_43] : memref<9x32x32xbf16, #tpu.memory_space<vmem>>, vector<1x32x32xbf16>
    %58 = vector.shape_cast %57 : vector<1x32x32xbf16> to vector<32x32xbf16>
    %cst_44 = arith.constant dense<0.000000e+00> : vector<256x32xf32>
    %59 = tpu.matmul %56, %58, %cst_44 {dimension_numbers = #tpu.dot_dimension_numbers<[1], [0], [0], [1], [0, 0, 1, 1], [], []>} : vector<256x32xbf16>, vector<32x32xbf16>, vector<256x32xf32> -> vector<256x32xf32>
    %60 = arith.addf %55, %59 : vector<256x32xf32>
    %c23 = arith.constant 23 : index
    %c0_45 = arith.constant 0 : index
    %61 = vector.load %arg13[%c23, %c0_45] : memref<304x32xbf16, #tpu.memory_space<vmem>>, vector<256x32xbf16>
    %c3 = arith.constant 3 : index
    %c0_46 = arith.constant 0 : index
    %c0_47 = arith.constant 0 : index
    %62 = vector.load %arg7[%c3, %c0_46, %c0_47] : memref<9x32x32xbf16, #tpu.memory_space<vmem>>, vector<1x32x32xbf16>
    %63 = vector.shape_cast %62 : vector<1x32x32xbf16> to vector<32x32xbf16>
    %cst_48 = arith.constant dense<0.000000e+00> : vector<256x32xf32>
    %64 = tpu.matmul %61, %63, %cst_48 {dimension_numbers = #tpu.dot_dimension_numbers<[1], [0], [0], [1], [0, 0, 1, 1], [], []>} : vector<256x32xbf16>, vector<32x32xbf16>, vector<256x32xf32> -> vector<256x32xf32>
    %65 = arith.addf %60, %64 : vector<256x32xf32>
    %c24_49 = arith.constant 24 : index
    %c0_50 = arith.constant 0 : index
    %66 = vector.load %arg12[%c24_49, %c0_50] : memref<304x32xbf16, #tpu.memory_space<vmem>>, vector<256x32xbf16>
    %c4 = arith.constant 4 : index
    %c0_51 = arith.constant 0 : index
    %c0_52 = arith.constant 0 : index
    %67 = vector.load %arg7[%c4, %c0_51, %c0_52] : memref<9x32x32xbf16, #tpu.memory_space<vmem>>, vector<1x32x32xbf16>
    %68 = vector.shape_cast %67 : vector<1x32x32xbf16> to vector<32x32xbf16>
    %cst_53 = arith.constant dense<0.000000e+00> : vector<256x32xf32>
    %69 = tpu.matmul %66, %68, %cst_53 {dimension_numbers = #tpu.dot_dimension_numbers<[1], [0], [0], [1], [0, 0, 1, 1], [], []>} : vector<256x32xbf16>, vector<32x32xbf16>, vector<256x32xf32> -> vector<256x32xf32>
    %70 = arith.addf %65, %69 : vector<256x32xf32>
    %c25 = arith.constant 25 : index
    %c0_54 = arith.constant 0 : index
    %71 = vector.load %arg14[%c25, %c0_54] : memref<304x32xbf16, #tpu.memory_space<vmem>>, vector<256x32xbf16>
    %c5 = arith.constant 5 : index
    %c0_55 = arith.constant 0 : index
    %c0_56 = arith.constant 0 : index
    %72 = vector.load %arg7[%c5, %c0_55, %c0_56] : memref<9x32x32xbf16, #tpu.memory_space<vmem>>, vector<1x32x32xbf16>
    %73 = vector.shape_cast %72 : vector<1x32x32xbf16> to vector<32x32xbf16>
    %cst_57 = arith.constant dense<0.000000e+00> : vector<256x32xf32>
    %74 = tpu.matmul %71, %73, %cst_57 {dimension_numbers = #tpu.dot_dimension_numbers<[1], [0], [0], [1], [0, 0, 1, 1], [], []>} : vector<256x32xbf16>, vector<32x32xbf16>, vector<256x32xf32> -> vector<256x32xf32>
    %75 = arith.addf %70, %74 : vector<256x32xf32>
    %c39 = arith.constant 39 : index
    %c0_58 = arith.constant 0 : index
    %76 = vector.load %arg13[%c39, %c0_58] : memref<304x32xbf16, #tpu.memory_space<vmem>>, vector<256x32xbf16>
    %c6 = arith.constant 6 : index
    %c0_59 = arith.constant 0 : index
    %c0_60 = arith.constant 0 : index
    %77 = vector.load %arg7[%c6, %c0_59, %c0_60] : memref<9x32x32xbf16, #tpu.memory_space<vmem>>, vector<1x32x32xbf16>
    %78 = vector.shape_cast %77 : vector<1x32x32xbf16> to vector<32x32xbf16>
    %cst_61 = arith.constant dense<0.000000e+00> : vector<256x32xf32>
    %79 = tpu.matmul %76, %78, %cst_61 {dimension_numbers = #tpu.dot_dimension_numbers<[1], [0], [0], [1], [0, 0, 1, 1], [], []>} : vector<256x32xbf16>, vector<32x32xbf16>, vector<256x32xf32> -> vector<256x32xf32>
    %80 = arith.addf %75, %79 : vector<256x32xf32>
    %c40 = arith.constant 40 : index
    %c0_62 = arith.constant 0 : index
    %81 = vector.load %arg12[%c40, %c0_62] : memref<304x32xbf16, #tpu.memory_space<vmem>>, vector<256x32xbf16>
    %c7_63 = arith.constant 7 : index
    %c0_64 = arith.constant 0 : index
    %c0_65 = arith.constant 0 : index
    %82 = vector.load %arg7[%c7_63, %c0_64, %c0_65] : memref<9x32x32xbf16, #tpu.memory_space<vmem>>, vector<1x32x32xbf16>
    %83 = vector.shape_cast %82 : vector<1x32x32xbf16> to vector<32x32xbf16>
    %cst_66 = arith.constant dense<0.000000e+00> : vector<256x32xf32>
    %84 = tpu.matmul %81, %83, %cst_66 {dimension_numbers = #tpu.dot_dimension_numbers<[1], [0], [0], [1], [0, 0, 1, 1], [], []>} : vector<256x32xbf16>, vector<32x32xbf16>, vector<256x32xf32> -> vector<256x32xf32>
    %85 = arith.addf %80, %84 : vector<256x32xf32>
    %c41 = arith.constant 41 : index
    %c0_67 = arith.constant 0 : index
    %86 = vector.load %arg14[%c41, %c0_67] : memref<304x32xbf16, #tpu.memory_space<vmem>>, vector<256x32xbf16>
    %c8_68 = arith.constant 8 : index
    %c0_69 = arith.constant 0 : index
    %c0_70 = arith.constant 0 : index
    %87 = vector.load %arg7[%c8_68, %c0_69, %c0_70] : memref<9x32x32xbf16, #tpu.memory_space<vmem>>, vector<1x32x32xbf16>
    %88 = vector.shape_cast %87 : vector<1x32x32xbf16> to vector<32x32xbf16>
    %cst_71 = arith.constant dense<0.000000e+00> : vector<256x32xf32>
    %89 = tpu.matmul %86, %88, %cst_71 {dimension_numbers = #tpu.dot_dimension_numbers<[1], [0], [0], [1], [0, 0, 1, 1], [], []>} : vector<256x32xbf16>, vector<32x32xbf16>, vector<256x32xf32> -> vector<256x32xf32>
    %90 = arith.addf %85, %89 : vector<256x32xf32>
    %c0_72 = arith.constant 0 : index
    %c0_73 = arith.constant 0 : index
    %c0_74 = arith.constant 0 : index
    %91 = vector.load %arg9[%c0_72, %c0_73, %c0_74] : memref<1x256x32xf32, #tpu.memory_space<vmem>>, vector<1x256x32xf32>
    %92 = vector.shape_cast %91 : vector<1x256x32xf32> to vector<256x32xf32>
    %93 = vector.shape_cast %90 : vector<256x32xf32> to vector<1x256x32xf32>
    tpu.vector_store %arg9[%c0_72, %c0_73, %c0_74], %93 {strides = array<i32>} : memref<1x256x32xf32, #tpu.memory_space<vmem>>, vector<1x256x32xf32>,
    return
  }
  func.func @transform_0(%arg0: i32, %arg1: i32) -> (i32, i32, i32) {
    %c0_i32 = arith.constant 0 : i32
    %c0_i32_0 = arith.constant 0 : i32
    return %arg1, %arg0, %c0_i32 : i32, i32, i32
  }
  func.func @transform_1(%arg0: i32, %arg1: i32) -> (i32, i32) {
    %c0_i32 = arith.constant 0 : i32
    %c0_i32_0 = arith.constant 0 : i32
    %c0_i32_1 = arith.constant 0 : i32
    return %c0_i32, %c0_i32_0 : i32, i32
  }
  func.func @transform_2(%arg0: i32, %arg1: i32) -> (i32, i32) {
    %c0_i32 = arith.constant 0 : i32
    %c0_i32_0 = arith.constant 0 : i32
    %c0_i32_1 = arith.constant 0 : i32
    return %c0_i32, %c0_i32_0 : i32, i32
  }
  func.func @transform_3(%arg0: i32, %arg1: i32) -> (i32, i32) {
    %c0_i32 = arith.constant 0 : i32
    %c0_i32_0 = arith.constant 0 : i32
    %c0_i32_1 = arith.constant 0 : i32
    return %c0_i32, %c0_i32_0 : i32, i32
  }
  func.func @transform_4(%arg0: i32, %arg1: i32) -> (i32, i32) {
    %c0_i32 = arith.constant 0 : i32
    %c0_i32_0 = arith.constant 0 : i32
    %c0_i32_1 = arith.constant 0 : i32
    return %c0_i32, %c0_i32_0 : i32, i32
  }
  func.func @transform_5(%arg0: i32, %arg1: i32) -> (i32, i32, i32) {
    %c0_i32 = arith.constant 0 : i32
    %c0_i32_0 = arith.constant 0 : i32
    %c0_i32_1 = arith.constant 0 : i32
    %c0_i32_2 = arith.constant 0 : i32
    return %c0_i32, %c0_i32_0, %c0_i32_1 : i32, i32, i32
  }
  func.func @transform_6(%arg0: i32, %arg1: i32) -> (i32, i32) {
    %c0_i32 = arith.constant 0 : i32
    %c0_i32_0 = arith.constant 0 : i32
    %c0_i32_1 = arith.constant 0 : i32
    return %c0_i32, %c0_i32_0 : i32, i32
  }
  func.func @transform_7(%arg0: i32, %arg1: i32) -> (i32, i32, i32) {
    %c0_i32 = arith.constant 0 : i32
    %c0_i32_0 = arith.constant 0 : i32
    return %arg1, %arg0, %c0_i32 : i32, i32, i32
  }
}

module attributes {stable_mosaic.version = 11 : i64} {
  func.func @kernel(%arg0: i32, %arg1: i32, %arg2: memref<1x256x32xf32, #tpu.memory_space<vmem>>, %arg3: memref<1x256x32xf32, #tpu.memory_space<vmem>>, %arg4: memref<32x64xbf16, #tpu.memory_space<vmem>>, %arg5: memref<32x64xbf16, #tpu.memory_space<vmem>>, %arg6: memref<1x64xf32, #tpu.memory_space<vmem>>, %arg7: memref<1x256x64xf32, #tpu.memory_space<vmem>>, %arg8: memref<256x32xf32, #tpu.memory_space<vmem>>, %arg9: memref<256x32xf32, #tpu.memory_space<vmem>>) attributes {dimension_semantics = [#tpu.dimension_semantics<parallel>, #tpu.dimension_semantics<arbitrary>], iteration_bounds = array<i64: 2, 4>, scalar_prefetch = 0 : i64, scratch_operands = 2 : i64, tpu.core_type = #tpu.core_type<tc>, window_params = [{transform_indices = @transform_0, window_bounds = array<i64: 1, 256, 32>}, {transform_indices = @transform_1, window_bounds = array<i64: 1, 256, 32>}, {pipeline_mode = #tpu.pipeline_mode<synchronous>, transform_indices = @transform_2, window_bounds = array<i64: 32, 64>}, {pipeline_mode = #tpu.pipeline_mode<synchronous>, transform_indices = @transform_3, window_bounds = array<i64: 32, 64>}, {pipeline_mode = #tpu.pipeline_mode<synchronous>, transform_indices = @transform_4, window_bounds = array<i64: 1, 64>}, {transform_indices = @transform_5, window_bounds = array<i64: 1, 256, 64>}]} {
    %c0 = arith.constant 0 : index
    %c0_0 = arith.constant 0 : index
    %c0_1 = arith.constant 0 : index
    %0 = vector.load %arg2[%c0, %c0_0, %c0_1] : memref<1x256x32xf32, #tpu.memory_space<vmem>>, vector<1x256x32xf32>
    %1 = vector.shape_cast %0 : vector<1x256x32xf32> to vector<256x32xf32>
    %c0_i32 = arith.constant 0 : i32
    %2 = arith.cmpi eq, %arg1, %c0_i32 : i32
    %3 = arith.extui %2 : i1 to i32
    %c0_i32_2 = arith.constant 0 : i32
    %4 = arith.cmpi ne, %3, %c0_i32_2 : i32
    scf.if %4 {
      %c0_28 = arith.constant 0 : index
      %c0_29 = arith.constant 0 : index
      %39 = vector.load %arg8[%c0_28, %c0_29] : memref<256x32xf32, #tpu.memory_space<vmem>>, vector<256x32xf32>
      tpu.vector_store %arg8[%c0_28, %c0_29], %1 {strides = array<i32>} : memref<256x32xf32, #tpu.memory_space<vmem>>, vector<256x32xf32>,
    } else {
    }
    %c0_i32_3 = arith.constant 0 : i32
    %5 = arith.cmpi sgt, %arg1, %c0_i32_3 : i32
    %6 = arith.extui %5 : i1 to i32
    %c0_i32_4 = arith.constant 0 : i32
    %7 = arith.cmpi ne, %6, %c0_i32_4 : i32
    scf.if %7 {
      %c0_28 = arith.constant 0 : index
      %c0_29 = arith.constant 0 : index
      %39 = vector.load %arg8[%c0_28, %c0_29] : memref<256x32xf32, #tpu.memory_space<vmem>>, vector<256x32xf32>
      %cst_30 = arith.constant 5.000000e-01 : f32
      %40 = vector.broadcast %cst_30 : f32 to vector<256x32xf32>
      %41 = arith.cmpf ogt, %39, %40 : vector<256x32xf32>
      %cst_31 = arith.constant 2.500000e-01 : f32
      %42 = vector.broadcast %cst_31 : f32 to vector<256x32xf32>
      %43 = arith.mulf %39, %42 : vector<256x32xf32>
      %44 = arith.addf %43, %1 : vector<256x32xf32>
      %45 = arith.select %41, %1, %44 : vector<256x32xi1>, vector<256x32xf32>
      %c0_32 = arith.constant 0 : index
      %c0_33 = arith.constant 0 : index
      %46 = vector.load %arg8[%c0_32, %c0_33] : memref<256x32xf32, #tpu.memory_space<vmem>>, vector<256x32xf32>
      tpu.vector_store %arg8[%c0_32, %c0_33], %45 {strides = array<i32>} : memref<256x32xf32, #tpu.memory_space<vmem>>, vector<256x32xf32>,
    } else {
    }
    %c0_5 = arith.constant 0 : index
    %c0_6 = arith.constant 0 : index
    %8 = vector.load %arg8[%c0_5, %c0_6] : memref<256x32xf32, #tpu.memory_space<vmem>>, vector<256x32xf32>
    %cst = arith.constant 5.000000e-01 : f32
    %9 = vector.broadcast %cst : f32 to vector<256x32xf32>
    %10 = arith.cmpf ogt, %8, %9 : vector<256x32xf32>
    %11 = arith.extui %10 : vector<256x32xi1> to vector<256x32xi32>
    %12 = arith.sitofp %11 : vector<256x32xi32> to vector<256x32xf32>
    %13 = arith.truncf %12 : vector<256x32xf32> to vector<256x32xbf16>
    %c0_7 = arith.constant 0 : index
    %c0_8 = arith.constant 0 : index
    %14 = vector.load %arg4[%c0_7, %c0_8] : memref<32x64xbf16, #tpu.memory_space<vmem>>, vector<32x64xbf16>
    %cst_9 = arith.constant dense<0.000000e+00> : vector<256x64xf32>
    %15 = tpu.matmul %13, %14, %cst_9 {dimension_numbers = #tpu.dot_dimension_numbers<[1], [0], [0], [1], [0, 0, 1, 1], [], []>} : vector<256x32xbf16>, vector<32x64xbf16>, vector<256x64xf32> -> vector<256x64xf32>
    %c0_10 = arith.constant 0 : index
    %c0_11 = arith.constant 0 : index
    %c0_12 = arith.constant 0 : index
    %16 = vector.load %arg3[%c0_10, %c0_11, %c0_12] : memref<1x256x32xf32, #tpu.memory_space<vmem>>, vector<1x256x32xf32>
    %17 = vector.shape_cast %16 : vector<1x256x32xf32> to vector<256x32xf32>
    %c0_i32_13 = arith.constant 0 : i32
    %18 = arith.cmpi eq, %arg1, %c0_i32_13 : i32
    %19 = arith.extui %18 : i1 to i32
    %c0_i32_14 = arith.constant 0 : i32
    %20 = arith.cmpi ne, %19, %c0_i32_14 : i32
    scf.if %20 {
      %c0_28 = arith.constant 0 : index
      %c0_29 = arith.constant 0 : index
      %39 = vector.load %arg9[%c0_28, %c0_29] : memref<256x32xf32, #tpu.memory_space<vmem>>, vector<256x32xf32>
      tpu.vector_store %arg9[%c0_28, %c0_29], %17 {strides = array<i32>} : memref<256x32xf32, #tpu.memory_space<vmem>>, vector<256x32xf32>,
    } else {
    }
    %c0_i32_15 = arith.constant 0 : i32
    %21 = arith.cmpi sgt, %arg1, %c0_i32_15 : i32
    %22 = arith.extui %21 : i1 to i32
    %c0_i32_16 = arith.constant 0 : i32
    %23 = arith.cmpi ne, %22, %c0_i32_16 : i32
    scf.if %23 {
      %c0_28 = arith.constant 0 : index
      %c0_29 = arith.constant 0 : index
      %39 = vector.load %arg9[%c0_28, %c0_29] : memref<256x32xf32, #tpu.memory_space<vmem>>, vector<256x32xf32>
      %cst_30 = arith.constant 5.000000e-01 : f32
      %40 = vector.broadcast %cst_30 : f32 to vector<256x32xf32>
      %41 = arith.cmpf ogt, %39, %40 : vector<256x32xf32>
      %cst_31 = arith.constant 2.500000e-01 : f32
      %42 = vector.broadcast %cst_31 : f32 to vector<256x32xf32>
      %43 = arith.mulf %39, %42 : vector<256x32xf32>
      %44 = arith.addf %43, %17 : vector<256x32xf32>
      %45 = arith.select %41, %17, %44 : vector<256x32xi1>, vector<256x32xf32>
      %c0_32 = arith.constant 0 : index
      %c0_33 = arith.constant 0 : index
      %46 = vector.load %arg9[%c0_32, %c0_33] : memref<256x32xf32, #tpu.memory_space<vmem>>, vector<256x32xf32>
      tpu.vector_store %arg9[%c0_32, %c0_33], %45 {strides = array<i32>} : memref<256x32xf32, #tpu.memory_space<vmem>>, vector<256x32xf32>,
    } else {
    }
    %c0_17 = arith.constant 0 : index
    %c0_18 = arith.constant 0 : index
    %24 = vector.load %arg9[%c0_17, %c0_18] : memref<256x32xf32, #tpu.memory_space<vmem>>, vector<256x32xf32>
    %cst_19 = arith.constant 5.000000e-01 : f32
    %25 = vector.broadcast %cst_19 : f32 to vector<256x32xf32>
    %26 = arith.cmpf ogt, %24, %25 : vector<256x32xf32>
    %27 = arith.extui %26 : vector<256x32xi1> to vector<256x32xi32>
    %28 = arith.sitofp %27 : vector<256x32xi32> to vector<256x32xf32>
    %29 = arith.truncf %28 : vector<256x32xf32> to vector<256x32xbf16>
    %c0_20 = arith.constant 0 : index
    %c0_21 = arith.constant 0 : index
    %30 = vector.load %arg5[%c0_20, %c0_21] : memref<32x64xbf16, #tpu.memory_space<vmem>>, vector<32x64xbf16>
    %cst_22 = arith.constant dense<0.000000e+00> : vector<256x64xf32>
    %31 = tpu.matmul %29, %30, %cst_22 {dimension_numbers = #tpu.dot_dimension_numbers<[1], [0], [0], [1], [0, 0, 1, 1], [], []>} : vector<256x32xbf16>, vector<32x64xbf16>, vector<256x64xf32> -> vector<256x64xf32>
    %32 = arith.addf %15, %31 : vector<256x64xf32>
    %c0_23 = arith.constant 0 : index
    %c0_24 = arith.constant 0 : index
    %33 = vector.load %arg6[%c0_23, %c0_24] : memref<1x64xf32, #tpu.memory_space<vmem>>, vector<1x64xf32>
    %34 = vector.broadcast %33 : vector<1x64xf32> to vector<256x64xf32>
    %35 = arith.addf %32, %34 : vector<256x64xf32>
    %c0_25 = arith.constant 0 : index
    %c0_26 = arith.constant 0 : index
    %c0_27 = arith.constant 0 : index
    %36 = vector.load %arg7[%c0_25, %c0_26, %c0_27] : memref<1x256x64xf32, #tpu.memory_space<vmem>>, vector<1x256x64xf32>
    %37 = vector.shape_cast %36 : vector<1x256x64xf32> to vector<256x64xf32>
    %38 = vector.shape_cast %35 : vector<256x64xf32> to vector<1x256x64xf32>
    tpu.vector_store %arg7[%c0_25, %c0_26, %c0_27], %38 {strides = array<i32>} : memref<1x256x64xf32, #tpu.memory_space<vmem>>, vector<1x256x64xf32>,
    return
  }
  func.func @transform_0(%arg0: i32, %arg1: i32) -> (i32, i32, i32) {
    %c0_i32 = arith.constant 0 : i32
    %c0_i32_0 = arith.constant 0 : i32
    return %arg1, %arg0, %c0_i32 : i32, i32, i32
  }
  func.func @transform_1(%arg0: i32, %arg1: i32) -> (i32, i32, i32) {
    %c0_i32 = arith.constant 0 : i32
    %c0_i32_0 = arith.constant 0 : i32
    return %arg1, %arg0, %c0_i32 : i32, i32, i32
  }
  func.func @transform_2(%arg0: i32, %arg1: i32) -> (i32, i32) {
    %c0_i32 = arith.constant 0 : i32
    %c0_i32_0 = arith.constant 0 : i32
    %c0_i32_1 = arith.constant 0 : i32
    return %c0_i32, %c0_i32_0 : i32, i32
  }
  func.func @transform_3(%arg0: i32, %arg1: i32) -> (i32, i32) {
    %c0_i32 = arith.constant 0 : i32
    %c0_i32_0 = arith.constant 0 : i32
    %c0_i32_1 = arith.constant 0 : i32
    return %c0_i32, %c0_i32_0 : i32, i32
  }
  func.func @transform_4(%arg0: i32, %arg1: i32) -> (i32, i32) {
    %c0_i32 = arith.constant 0 : i32
    %c0_i32_0 = arith.constant 0 : i32
    %c0_i32_1 = arith.constant 0 : i32
    return %c0_i32, %c0_i32_0 : i32, i32
  }
  func.func @transform_5(%arg0: i32, %arg1: i32) -> (i32, i32, i32) {
    %c0_i32 = arith.constant 0 : i32
    %c0_i32_0 = arith.constant 0 : i32
    return %arg1, %arg0, %c0_i32 : i32, i32, i32
  }
}

</mosaic_0001>

<bundles_post_ra>
// kernel: snn_csplayer_forward.3
= control target key start
LH: loop header
LB: loop body
LE: loop exit
PB: predicated region body
PF: predicated region fallthrough
CT: control target
= control target key end

     0   :  { %10 = vsyncpa [#allocation4], 0  ;;  %s2294_s0 = inlined_call_operand.hbm [shape: f32[4,512,32], index: 0, kind: input, shape index: {}]   ;;  %s2295_s1 = inlined_call_operand.vmem [shape: bf16[32,64], index: 1, kind: input, shape index: {}]   ;;  %s2296_s2 = inlined_call_operand.vmem [shape: f32[1,64], index: 2, kind: input, shape index: {}]   ;;  %s2297_s3 = inlined_call_operand.vmem [shape: f32[4,512,32], index: 3, kind: output, shape index: {0}]   ;;  %s2298_s4 = inlined_call_operand.vmem [shape: f32[4,512,32], index: 4, kind: output, shape index: {1}]  }
   0x1   :  { %12 = vsyncpa [#allocation4 + $0x1], 0  ;;  %s1588_s15 = smov 0   ;;  %s1590_s16 = smov 0  }
   0x2   :  { %s1592_s17 = smov 0   ;;  %s1594_s18 = smov 0  }
   0x3   :  { %s1596_s19 = smov 0   ;;  %s1598_s20 = smov 0  }
   0x4   :  { %s1600_s21 = smov 0   ;;  %s1602_s22 = smov 0  }
   0x5 LB: > { %s1254_s23 = sadd.s32 4294967295, %s1556_s22   ;;  %s27_s24 = sadd.s32 1, %s1548_s20  ;;  %s1556_s22 = sphi %s1602_s22, %s18_s22   ;;  %s1552_s21 = sphi %s1600_s21, %s2312_s21   ;;  %s1548_s20 = sphi %s1598_s20, %s2311_s20   ;;  %s1544_s19 = sphi %s1596_s19, %s2310_s19   ;;  %s1540_s18 = sphi %s1594_s18, %s2309_s18   ;;  %s1536_s17 = sphi %s1592_s17, %s2308_s17   ;;  %s1532_s16 = sphi %s1590_s16, %s2307_s16   ;;  %s1528_s15 = sphi %s1588_s15, %s2306_s15  }
   0x6   : > { %p28_p0 = scmp.ge.s32.totalorder %s27_s24, 4  ;;  %s30_s25 = sadd.s32 1, %s1552_s21 }
   0x7   : > { %s39_s26 = sadd.s32 1, %s1536_s17  ;;  %p46_p1 = scmp.ne.s32.totalorder %s1536_s17, %s1532_s16 }
   0x8   : > { %s2314_s24 = smov (%p28_p0, %s27_s24), 0  ;;  %s2316_s25 = smov (!%p28_p0, %s30_s25), %s1552_s21 }
   0x9   : > { %s34_s27 = ssub.s32 %s1548_s20, %s2314_s24  ;;  %p47_p2 = scmp.eq.s32.totalorder %s1556_s22, 0 }
   0xa   : > { %p32_p3 = scmp.ge.s32.totalorder %s2316_s25, 2  ;;  %p52_p4 = scmp.ne.s32.totalorder %s1532_s16, %s1528_s15 }
   0xb   : > { %p1639_p5 = por %p47_p2, %p46_p1  ;;  %p53_p6 = scmp.eq.s32.totalorder %s1254_s23, 0 }
   0xc   : > { %s2318_s25 = smov (%p32_p3, %s2316_s25), 0  ;;  %p1389_p8 = scmp.lt.s32.totalorder %s1556_s22, 8 }
   0xd   : > { %2301 = sst [smem:[#allocation6_spill]] %s2318_s25  ;;  %p1645_p7 = por %p53_p6, %p52_p4 }
   0xe   : > { %s35_s30 = ssub.s32 %s1552_s21, %s2318_s25  ;;  %s180_s6 = sand.u32 1, %s1536_s17  }
   0xf   : > { %s36_s5 = sor.u32 %s35_s30, %s34_s27  ;;  %s1258_s7 = sshll.u32 %s180_s6, 8 }
  0x10   : > { %p37_p9 = scmp.eq.s32.totalorder %s36_s5, 0  ;;  %s1259_s8 = sshll.u32 %s1552_s21, 5 }
  0x11   : > { %s1260_s10 = sshll.u32 %s1548_s20, 6  ;;  %s184_s12 = scalar_lea.vmem [#allocation3], %s1258_s7 }
  0x12   : > { %s1655_s9 = scalar_select %p37_p9, %s1536_s17, %s39_s26  }
  0x13   : > { %s190_s11 = sadd.s32 %s1260_s10, %s1259_s8  ;;  %s193_s13 = sshll.u32 %s184_s12, 4  ;;  %s1658_s13 = int_to_ptr.vmem [resolvable:$true] %s193_s13 }
  0x14   : > { %s1261_s14 = sshll.u32 %s190_s11, 7  ;;  %p1669_p10 = pnand %p1389_p8, %p1639_p5 }
  0x15   : > { %s1663_s25 = scalar_lea.hbm %s2294_s0, %s1261_s14  ;;  %s1674_s27 = scalar_lea.sflag [#allocation4], %s180_s6 }
  0x16   : > { %s1460_s30 = scalar_lea.hbm %s1663_s25, 4096  ;;  %p1462_p13 = pneg %p1669_p10 }
  0x17   : > { %p1461_p12 = scmp.ne.s32.totalorder %s1663_s25, %s1460_s30  ;;  %s1465_s7 = scalar_lea.hbm %s2294_s0, 32768 }
  0x18   : > { %p1466_p2 = scmp.lt.u32.totalorder %s1663_s25, %s2294_s0  ;;  %p1467_p3 = scmp.lt.u32.totalorder %s1465_s7, %s1460_s30 }
  0x19   : > { %p1463_p0 = pnand %p1462_p13, %p1461_p12  ;;  %p1469_p5 = scmp.lt.u32.totalorder %s1460_s30, %s1663_s25 }
  0x1a   : > { %p1468_p4 = por %p1467_p3, %p1466_p2 }
  0x1b   : > { %p1464_p1 = pneg %p1463_p0 }
  0x1c   : > { %p1470_p6 = por %p1469_p5, %p1468_p4 }
  0x1e   : > { %p1471_p8 = pnand %p1470_p6, %p1464_p1 }
  0x20   : > { %1474 = shalt.err (!%p1471_p8)
}
  0x21   : > { %s1475_s6 = scalar_lea.vmem %s1658_s13, 4096  ;;  %s1558_s11 = smov [#allocation3]  }
  0x22   : > { %p1476_p9 = scmp.ne.s32.totalorder %s1658_s13, %s1475_s6  ;;  %s1480_s12 = sshll.u32 %s1558_s11, 4  ;;  %s1481_s12 = int_to_ptr.vmem [resolvable:$false] %s1480_s12 }
  0x23   : > { %s1482_s14 = scalar_lea.vmem %s1481_s12, 8192  ;;  %p1483_p11 = scmp.lt.s32.totalorder %s1658_s13, %s1481_s12 }
  0x24   : > { %p1478_p12 = pnand %p1476_p9, %p1462_p13  ;;  %p1484_p2 = scmp.lt.s32.totalorder %s1482_s14, %s1475_s6 }
  0x26   : > { %p1479_p0 = pneg %p1478_p12  ;;  %p1485_p3 = por %p1484_p2, %p1483_p11 }
  0x28   : > { %p1486_p4 = pnand %p1485_p3, %p1479_p0 }
  0x2a   : > { %1489 = shalt.err (!%p1486_p4)
}
  0x2b   : > { %s1559_s15 = smov 128   ;;  %s1560_s23 = smov 8  }
  0x2c   : > { %1388 = dma.hbm_to_vmem [thread:$0]  (!%p1669_p10), %s1663_s25, 4096, %s1658_s13, %s1674_s27, %s1559_s15, %s1559_s15, %s1560_s23  }
  0x2d   : > { %p201_p13 = scmp.lt.s32.totalorder %s1556_s22, 9  ;;  %p2304_p1 = scmp.ge.s32.totalorder %s1556_s22, 1 }
  0x2f   : > { %p202_p5 = pnand %p2304_p1, %p201_p13 }
  0x30   : > { %s207_s30 = sand.u32 (!%p202_p5), 1, %s1532_s16  }
  0x31   : > { %205 = sbr.rel (%p202_p5) target bundleno = 521 (0x209), region = 32  ;;  %s1263_s28 = sshll.u32 (!%p202_p5), %s207_s30, 8 }
  0x32   : > { %s208_s5 = scalar_lea.sflag (!%p202_p5), [#allocation4], %s207_s30  ;;  %s1706_s7 = scalar_lea.vmem (!%p202_p5), [#allocation3], %s1263_s28 }
  0x38   : > { %1523 = dma.done.wait (%p1645_p7), %s208_s5, 4096  }
  0x39   : > { %1525 = vsyncadd (%p1645_p7), %s208_s5, 4294963200  ;;  %s1264_s25 = sshll.u32 %s1544_s19, 5  ;;  %p251_p10 = scmp.lt.s32.totalorder %s1540_s18, 3  ;;  %v1716_v0 = vld [vmem:[%s1706_s7] sm:$0xff]  ;;  %v1719_v1 = vld [vmem:[%s1706_s7 + $0x8] sm:$0xff] }
  0x3a   : > { %p253_p11 = scmp.lt.s32.totalorder %s1264_s25, 63  ;;  %v1722_v2 = vld [vmem:[%s1706_s7 + $0x10] sm:$0xff]  ;;  %v1735_v3 = vld [vmem:[%s1706_s7 + $0x18] sm:$0xff]  ;;  %v1738_v4 = vld [vmem:[%s1706_s7 + $0x20] sm:$0xff]  ;;  %p1270_p7 = scmp.ne.s32.totalorder %s1540_s18, 0 }
  0x3b   : > { %s252_s13 = scalar_select %p251_p10, %s1540_s18, 3  ;;  %v1741_v5 = vld [vmem:[%s1706_s7 + $0x28] sm:$0xff]  ;;  %v1744_v6 = vld [vmem:[%s1706_s7 + $0x30] sm:$0xff]  ;;  %v1747_v7 = vld [vmem:[%s1706_s7 + $0x38] sm:$0xff] }
  0x3c   : > { %s2320_s25 = smov (!%p253_p11, %s1264_s25), 63  ;;  %v1750_v8 = vld [vmem:[%s1706_s7 + $0x40] sm:$0xff]  ;;  %v1753_v9 = vld [vmem:[%s1706_s7 + $0x48] sm:$0xff]  ;;  %v1756_v10 = vld [vmem:[%s1706_s7 + $0x50] sm:$0xff]  ;;  %vm307_vm0 = vcmask (!%p1270_p7), 261120  }
  0x3d   : > { %s1265_s29 = sshll.u32 %s252_s13, 6  ;;  %v1759_v11 = vld [vmem:[%s1706_s7 + $0x58] sm:$0xff]  ;;  %v1762_v12 = vld [vmem:[%s1706_s7 + $0x60] sm:$0xff]  ;;  %v1765_v13 = vld [vmem:[%s1706_s7 + $0x68] sm:$0xff]  ;;  %306 = sbr.rel (%p1270_p7) target bundleno = 81 (0x51), region = 40  ;;  %308 = vst.msk [vmem:[#allocation2] sm:$0xff] (!%p1270_p7), %vm307_vm0, %v1716_v0 }
  0x3e   : > { %s256_s26 = sadd.s32 %s1265_s29, %s2320_s25  ;;  %v1768_v14 = vld [vmem:[%s1706_s7 + $0x70] sm:$0xff]  ;;  %v1771_v15 = vld [vmem:[%s1706_s7 + $0x78] sm:$0xff]  ;;  %v1774_v16 = vld [vmem:[%s1706_s7 + $0x80] sm:$0xff]  ;;  %309 = vst.msk [vmem:[#allocation2 + $0x8] sm:$0xff] (!%p1270_p7), %vm307_vm0, %v1719_v1 }
  0x3f   : > { %s1266_s27 = sshll.u32 %s256_s26, 3  ;;  %v1777_v17 = vld [vmem:[%s1706_s7 + $0x88] sm:$0xff]  ;;  %v1780_v18 = vld [vmem:[%s1706_s7 + $0x90] sm:$0xff]  ;;  %v1783_v19 = vld [vmem:[%s1706_s7 + $0x98] sm:$0xff]  ;;  %310 = vst.msk [vmem:[#allocation2 + $0x10] sm:$0xff] (!%p1270_p7), %vm307_vm0, %v1722_v2 }
  0x40   : > { %s1727_s10 = scalar_lea.vmem %s2297_s3, %s1266_s27  ;;  %s1732_s12 = scalar_lea.vmem %s2298_s4, %s1266_s27  ;;  %v1786_v20 = vld [vmem:[%s1706_s7 + $0xa0] sm:$0xff]  ;;  %v1789_v21 = vld [vmem:[%s1706_s7 + $0xa8] sm:$0xff]  ;;  %v1792_v22 = vld [vmem:[%s1706_s7 + $0xb0] sm:$0xff]  ;;  %311 = vst.msk [vmem:[#allocation2 + $0x18] sm:$0xff] (!%p1270_p7), %vm307_vm0, %v1735_v3 }
  0x41   : > { %v1795_v23 = vld [vmem:[%s1706_s7 + $0xb8] sm:$0xff]  ;;  %v1798_v24 = vld [vmem:[%s1706_s7 + $0xc0] sm:$0xff]  ;;  %v1801_v25 = vld [vmem:[%s1706_s7 + $0xc8] sm:$0xff]  ;;  %312 = vst.msk [vmem:[#allocation2 + $0x20] sm:$0xff] (!%p1270_p7), %vm307_vm0, %v1738_v4 }
  0x42   : > { %v1804_v26 = vld [vmem:[%s1706_s7 + $0xd0] sm:$0xff]  ;;  %v1807_v27 = vld [vmem:[%s1706_s7 + $0xd8] sm:$0xff]  ;;  %v1810_v28 = vld [vmem:[%s1706_s7 + $0xe0] sm:$0xff]  ;;  %313 = vst.msk [vmem:[#allocation2 + $0x28] sm:$0xff] (!%p1270_p7), %vm307_vm0, %v1741_v5 }
  0x43   : > { %v1813_v29 = vld [vmem:[%s1706_s7 + $0xe8] sm:$0xff]  ;;  %v1816_v30 = vld [vmem:[%s1706_s7 + $0xf0] sm:$0xff]  ;;  %v1819_v31 = vld [vmem:[%s1706_s7 + $0xf8] sm:$0xff]  ;;  %314 = vst.msk [vmem:[#allocation2 + $0x30] sm:$0xff] (!%p1270_p7), %vm307_vm0, %v1744_v6 }
  0x44   : > { %315 = vst.msk [vmem:[#allocation2 + $0x38] sm:$0xff] %vm307_vm0, %v1747_v7  ;;  %316 = vst.msk [vmem:[#allocation2 + $0x40] sm:$0xff] %vm307_vm0, %v1750_v8 }
  0x45   : > { %317 = vst.msk [vmem:[#allocation2 + $0x48] sm:$0xff] %vm307_vm0, %v1753_v9  ;;  %318 = vst.msk [vmem:[#allocation2 + $0x50] sm:$0xff] %vm307_vm0, %v1756_v10 }
  0x46   : > { %319 = vst.msk [vmem:[#allocation2 + $0x58] sm:$0xff] %vm307_vm0, %v1759_v11  ;;  %320 = vst.msk [vmem:[#allocation2 + $0x60] sm:$0xff] %vm307_vm0, %v1762_v12 }
  0x47   : > { %321 = vst.msk [vmem:[#allocation2 + $0x68] sm:$0xff] %vm307_vm0, %v1765_v13  ;;  %322 = vst.msk [vmem:[#allocation2 + $0x70] sm:$0xff] %vm307_vm0, %v1768_v14 }
  0x48   : > { %323 = vst.msk [vmem:[#allocation2 + $0x78] sm:$0xff] %vm307_vm0, %v1771_v15  ;;  %324 = vst.msk [vmem:[#allocation2 + $0x80] sm:$0xff] %vm307_vm0, %v1774_v16 }
  0x49   : > { %325 = vst.msk [vmem:[#allocation2 + $0x88] sm:$0xff] %vm307_vm0, %v1777_v17  ;;  %326 = vst.msk [vmem:[#allocation2 + $0x90] sm:$0xff] %vm307_vm0, %v1780_v18 }
  0x4a   : > { %327 = vst.msk [vmem:[#allocation2 + $0x98] sm:$0xff] %vm307_vm0, %v1783_v19  ;;  %328 = vst.msk [vmem:[#allocation2 + $0xa0] sm:$0xff] %vm307_vm0, %v1786_v20 }
  0x4b   : > { %329 = vst.msk [vmem:[#allocation2 + $0xa8] sm:$0xff] %vm307_vm0, %v1789_v21  ;;  %330 = vst.msk [vmem:[#allocation2 + $0xb0] sm:$0xff] %vm307_vm0, %v1792_v22 }
  0x4c   : > { %331 = vst.msk [vmem:[#allocation2 + $0xb8] sm:$0xff] %vm307_vm0, %v1795_v23  ;;  %332 = vst.msk [vmem:[#allocation2 + $0xc0] sm:$0xff] %vm307_vm0, %v1798_v24 }
  0x4d   : > { %333 = vst.msk [vmem:[#allocation2 + $0xc8] sm:$0xff] %vm307_vm0, %v1801_v25  ;;  %334 = vst.msk [vmem:[#allocation2 + $0xd0] sm:$0xff] %vm307_vm0, %v1804_v26 }
  0x4e   : > { %335 = vst.msk [vmem:[#allocation2 + $0xd8] sm:$0xff] %vm307_vm0, %v1807_v27  ;;  %336 = vst.msk [vmem:[#allocation2 + $0xe0] sm:$0xff] %vm307_vm0, %v1810_v28 }
  0x4f   : > { %337 = vst.msk [vmem:[#allocation2 + $0xe8] sm:$0xff] %vm307_vm0, %v1813_v29  ;;  %338 = vst.msk [vmem:[#allocation2 + $0xf0] sm:$0xff] %vm307_vm0, %v1816_v30 }
  0x50   : > { %339 = vst.msk [vmem:[#allocation2 + $0xf8] sm:$0xff] %vm307_vm0, %v1819_v31 }
  0x51 PF: > { %p1271_p6 = scmp.le.s32.totalorder %s1540_s18, 0 }
  0x52   : > { %v344_v32 = vld [vmem:[#allocation2] sm:$0xff] (!%p1271_p6)  ;;  %v345_v33 = vld [vmem:[#allocation2 + $0x8] sm:$0xff] (!%p1271_p6)  ;;  %vm504_vm2 = vcmask (!%p1271_p6), 261120   ;;  %v354_v59 = vld [vmem:[#allocation2 + $0x50] sm:$0xff] (!%p1271_p6) }
  0x53   : > { %343 = sbr.rel (%p1271_p6) target bundleno = 119 (0x77), region = 44  ;;  %v346_v34 = vld [vmem:[#allocation2 + $0x10] sm:$0xff] (!%p1271_p6)  ;;  %vm376_vm1 = vcmp.gt.f32.partialorder (!%p1271_p6), %v344_v32, 0.5  ;;  %v408_v35 = vmul.f32 (!%p1271_p6), 0.25, %v344_v32  ;;  %v409_v36 = vmul.f32 (!%p1271_p6), 0.25, %v345_v33  ;;  %vm377_vm3 = vcmp.gt.f32.partialorder (!%p1271_p6), %v345_v33, 0.5 }
  0x54   : > { %v347_v37 = vld [vmem:[#allocation2 + $0x18] sm:$0xff] (!%p1271_p6)  ;;  %vm378_vm4 = vcmp.gt.f32.partialorder (!%p1271_p6), %v346_v34, 0.5  ;;  %v410_v39 = vmul.f32 (!%p1271_p6), 0.25, %v346_v34  ;;  %v353_v58 = vld [vmem:[#allocation2 + $0x48] sm:$0xff] (!%p1271_p6)  ;;  %v356_v32 = vld [vmem:[#allocation2 + $0x60] sm:$0xff] (!%p1271_p6)  ;;  %vm386_vm12 = vcmp.gt.f32.partialorder (!%p1271_p6), %v354_v59, 0.5 }
  0x55   : > { %v348_v38 = vld [vmem:[#allocation2 + $0x20] sm:$0xff] (!%p1271_p6)  ;;  %v411_v40 = vmul.f32 (!%p1271_p6), 0.25, %v347_v37  ;;  %v440_v42 = vadd.f32 (!%p1271_p6), %v408_v35, %v1716_v0  ;;  %v441_v43 = vadd.f32 (!%p1271_p6), %v409_v36, %v1719_v1  ;;  %vm379_vm5 = vcmp.gt.f32.partialorder (!%p1271_p6), %v347_v37, 0.5  ;;  %v355_v62 = vld [vmem:[#allocation2 + $0x58] sm:$0xff] (!%p1271_p6)  ;;  %v357_v36 = vld [vmem:[#allocation2 + $0x68] sm:$0xff] (!%p1271_p6) }
  0x56   : > { %v349_v41 = vld [vmem:[#allocation2 + $0x28] sm:$0xff] (!%p1271_p6)  ;;  %v412_v44 = vmul.f32 (!%p1271_p6), 0.25, %v348_v38  ;;  %v442_v46 = vadd.f32 (!%p1271_p6), %v410_v39, %v1722_v2  ;;  %vm380_vm6 = vcmp.gt.f32.partialorder (!%p1271_p6), %v348_v38, 0.5  ;;  %vm385_vm11 = vcmp.gt.f32.partialorder (!%p1271_p6), %v353_v58, 0.5  ;;  %v358_v39 = vld [vmem:[#allocation2 + $0x70] sm:$0xff] (!%p1271_p6) }
  0x57   : > { %v350_v45 = vld [vmem:[#allocation2 + $0x30] sm:$0xff] (!%p1271_p6)  ;;  %v443_v47 = vadd.f32 (!%p1271_p6), %v411_v40, %v1735_v3  ;;  %v413_v48 = vmul.f32 (!%p1271_p6), 0.25, %v349_v41  ;;  %v472_v50 = vsel (!%p1271_p6), %vm376_vm1, %v1716_v0, %v440_v42  ;;  %v473_v51 = vsel (!%p1271_p6), %vm377_vm3, %v1719_v1, %v441_v43  ;;  %v359_v42 = vld [vmem:[#allocation2 + $0x78] sm:$0xff] (!%p1271_p6)  ;;  %v360_v43 = vld [vmem:[#allocation2 + $0x80] sm:$0xff] (!%p1271_p6) }
  0x58   : > { %v351_v49 = vld [vmem:[#allocation2 + $0x38] sm:$0xff] (!%p1271_p6)  ;;  %v444_v52 = vadd.f32 (!%p1271_p6), %v412_v44, %v1738_v4  ;;  %vm381_vm7 = vcmp.gt.f32.partialorder (!%p1271_p6), %v349_v41, 0.5  ;;  %v352_v53 = vld [vmem:[#allocation2 + $0x40] sm:$0xff] (!%p1271_p6)  ;;  %505 = vst.msk [vmem:[#allocation2] sm:$0xff] (!%p1271_p6), %vm504_vm2, %v472_v50  ;;  %506 = vst.msk [vmem:[#allocation2 + $0x8] sm:$0xff] (!%p1271_p6), %vm504_vm2, %v473_v51  ;;  %v474_v54 = vsel (!%p1271_p6), %vm378_vm4, %v1722_v2, %v442_v46  ;;  %v414_v57 = vmul.f32 (!%p1271_p6), 0.25, %v350_v45 }
  0x59   : > { %v475_v55 = vsel (!%p1271_p6), %vm379_vm5, %v1735_v3, %v443_v47  ;;  %v445_v56 = vadd.f32 (!%p1271_p6), %v413_v48, %v1741_v5  ;;  %507 = vst.msk [vmem:[#allocation2 + $0x10] sm:$0xff] (!%p1271_p6), %vm504_vm2, %v474_v54  ;;  %vm382_vm8 = vcmp.gt.f32.partialorder (!%p1271_p6), %v350_v45, 0.5  ;;  %vm383_vm9 = vcmp.gt.f32.partialorder (!%p1271_p6), %v351_v49, 0.5  ;;  %v361_v46 = vld [vmem:[#allocation2 + $0x88] sm:$0xff] (!%p1271_p6)  ;;  %v362_v50 = vld [vmem:[#allocation2 + $0x90] sm:$0xff] (!%p1271_p6) }
  0x5a   : > { %508 = vst.msk [vmem:[#allocation2 + $0x18] sm:$0xff] %vm504_vm2, %v475_v55  ;;  %v476_v60 = vsel %vm380_vm6, %v1738_v4, %v444_v52  ;;  %v415_v61 = vmul.f32 0.25, %v351_v49  ;;  %v446_v0 = vadd.f32 %v414_v57, %v1744_v6  ;;  %vm384_vm10 = vcmp.gt.f32.partialorder %v352_v53, 0.5  ;;  %v364_v57 = vld [vmem:[#allocation2 + $0xa0] sm:$0xff] }
  0x5b   : > { %509 = vst.msk [vmem:[#allocation2 + $0x20] sm:$0xff] %vm504_vm2, %v476_v60  ;;  %v477_v63 = vsel %vm381_vm7, %v1741_v5, %v445_v56  ;;  %v416_v1 = vmul.f32 0.25, %v352_v53  ;;  %v417_v3 = vmul.f32 0.25, %v353_v58  ;;  %v418_v4 = vmul.f32 0.25, %v354_v59  ;;  %v365_v60 = vld [vmem:[#allocation2 + $0xa8] sm:$0xff] }
  0x5c   : > { %510 = vst.msk [vmem:[#allocation2 + $0x28] sm:$0xff] %vm504_vm2, %v477_v63  ;;  %v447_v2 = vadd.f32 %v415_v61, %v1747_v7  ;;  %v478_v33 = vsel %vm382_vm8, %v1744_v6, %v446_v0  ;;  %v419_v35 = vmul.f32 0.25, %v355_v62  ;;  %vm387_vm13 = vcmp.gt.f32.partialorder %v355_v62, 0.5  ;;  %v366_v61 = vld [vmem:[#allocation2 + $0xb0] sm:$0xff]  ;;  %v367_v0 = vld [vmem:[#allocation2 + $0xb8] sm:$0xff] }
  0x5d   : > { %v448_v34 = vadd.f32 %v416_v1, %v1750_v8  ;;  %511 = vst.msk [vmem:[#allocation2 + $0x30] sm:$0xff] %vm504_vm2, %v478_v33  ;;  %v449_v37 = vadd.f32 %v417_v3, %v1753_v9  ;;  %v450_v38 = vadd.f32 %v418_v4, %v1756_v10  ;;  %vm388_vm14 = vcmp.gt.f32.partialorder %v356_v32, 0.5  ;;  %v368_v4 = vld [vmem:[#allocation2 + $0xc0] sm:$0xff] }
  0x5e   : > { %v479_v5 = vsel %vm383_vm9, %v1747_v7, %v447_v2  ;;  %v451_v40 = vadd.f32 %v419_v35, %v1759_v11  ;;  %v420_v41 = vmul.f32 0.25, %v356_v32  ;;  %vm389_vm15 = vcmp.gt.f32.partialorder %v357_v36, 0.5 }
  0x5f   : > { %512 = vst.msk [vmem:[#allocation2 + $0x38] sm:$0xff] %vm504_vm2, %v479_v5  ;;  %v480_v6 = vsel %vm384_vm10, %v1750_v8, %v448_v34  ;;  %v481_v7 = vsel %vm385_vm11, %v1753_v9, %v449_v37  ;;  %v482_v44 = vsel %vm386_vm12, %v1756_v10, %v450_v38  ;;  %v421_v45 = vmul.f32 0.25, %v357_v36  ;;  %v370_v37 = vld [vmem:[#allocation2 + $0xd0] sm:$0xff] }
  0x60   : > { %513 = vst.msk [vmem:[#allocation2 + $0x40] sm:$0xff] %vm504_vm2, %v480_v6  ;;  %514 = vst.msk [vmem:[#allocation2 + $0x48] sm:$0xff] %vm504_vm2, %v481_v7  ;;  %v483_v8 = vsel %vm387_vm13, %v1759_v11, %v451_v40  ;;  %v452_v47 = vadd.f32 %v420_v41, %v1762_v12  ;;  %vm390_vm0 = vcmp.gt.f32.partialorder %v358_v39, 0.5  ;;  %v422_v48 = vmul.f32 0.25, %v358_v39  ;;  %v363_v11 = vld [vmem:[#allocation2 + $0x98] sm:$0xff]  ;;  %v372_v40 = vld [vmem:[#allocation2 + $0xe0] sm:$0xff] }
  0x61   : > { %515 = vst.msk [vmem:[#allocation2 + $0x50] sm:$0xff] %vm504_vm2, %v482_v44  ;;  %516 = vst.msk [vmem:[#allocation2 + $0x58] sm:$0xff] %vm504_vm2, %v483_v8  ;;  %v453_v9 = vadd.f32 %v421_v45, %v1765_v13  ;;  %vm391_vm1 = vcmp.gt.f32.partialorder %v359_v42, 0.5  ;;  %v423_v10 = vmul.f32 0.25, %v359_v42  ;;  %v424_v49 = vmul.f32 0.25, %v360_v43  ;;  %v371_v6 = vld [vmem:[#allocation2 + $0xd8] sm:$0xff] }
  0x62   : > { %v484_v51 = vsel %vm388_vm14, %v1762_v12, %v452_v47  ;;  %v454_v52 = vadd.f32 %v422_v48, %v1768_v14  ;;  %vm392_vm3 = vcmp.gt.f32.partialorder %v360_v43, 0.5  ;;  %v425_v53 = vmul.f32 0.25, %v361_v46  ;;  %v373_v43 = vld [vmem:[#allocation2 + $0xe8] sm:$0xff] }
  0x63   : > { %517 = vst.msk [vmem:[#allocation2 + $0x60] sm:$0xff] %vm504_vm2, %v484_v51  ;;  %v485_v54 = vsel %vm389_vm15, %v1765_v13, %v453_v9  ;;  %v455_v55 = vadd.f32 %v423_v10, %v1771_v15  ;;  %v456_v56 = vadd.f32 %v424_v49, %v1774_v16  ;;  %vm393_vm4 = vcmp.gt.f32.partialorder %v361_v46, 0.5  ;;  %v374_v46 = vld [vmem:[#allocation2 + $0xf0] sm:$0xff] }
  0x64   : > { %518 = vst.msk [vmem:[#allocation2 + $0x68] sm:$0xff] %vm504_vm2, %v485_v54  ;;  %v486_v12 = vsel %vm390_vm0, %v1768_v14, %v454_v52  ;;  %v457_v58 = vadd.f32 %v425_v53, %v1777_v17  ;;  %vm394_vm5 = vcmp.gt.f32.partialorder %v362_v50, 0.5  ;;  %v426_v59 = vmul.f32 0.25, %v362_v50 }
  0x65   : > { %519 = vst.msk [vmem:[#allocation2 + $0x70] sm:$0xff] %vm504_vm2, %v486_v12  ;;  %v487_v13 = vsel %vm391_vm1, %v1771_v15, %v455_v55  ;;  %v488_v62 = vsel %vm392_vm3, %v1774_v16, %v456_v56  ;;  %vm395_vm6 = vcmp.gt.f32.partialorder %v363_v11, 0.5  ;;  %v427_v63 = vmul.f32 0.25, %v363_v11 }
  0x66   : > { %520 = vst.msk [vmem:[#allocation2 + $0x78] sm:$0xff] %vm504_vm2, %v487_v13  ;;  %521 = vst.msk [vmem:[#allocation2 + $0x80] sm:$0xff] %vm504_vm2, %v488_v62  ;;  %v489_v14 = vsel %vm393_vm4, %v1777_v17, %v457_v58  ;;  %v458_v1 = vadd.f32 %v426_v59, %v1780_v18  ;;  %vm396_vm7 = vcmp.gt.f32.partialorder %v364_v57, 0.5  ;;  %v428_v2 = vmul.f32 0.25, %v364_v57  ;;  %v369_v17 = vld [vmem:[#allocation2 + $0xc8] sm:$0xff] }
  0x67   : > { %522 = vst.msk [vmem:[#allocation2 + $0x88] sm:$0xff] %vm504_vm2, %v489_v14  ;;  %v459_v15 = vadd.f32 %v427_v63, %v1783_v19  ;;  %vm397_vm8 = vcmp.gt.f32.partialorder %v365_v60, 0.5  ;;  %v429_v16 = vmul.f32 0.25, %v365_v60  ;;  %v430_v3 = vmul.f32 0.25, %v366_v61 }
  0x68   : > { %v490_v32 = vsel %vm394_vm5, %v1780_v18, %v458_v1  ;;  %v460_v33 = vadd.f32 %v428_v2, %v1786_v20  ;;  %vm398_vm9 = vcmp.gt.f32.partialorder %v366_v61, 0.5  ;;  %v431_v34 = vmul.f32 0.25, %v367_v0 }
  0x69   : > { %523 = vst.msk [vmem:[#allocation2 + $0x90] sm:$0xff] %vm504_vm2, %v490_v32  ;;  %v491_v35 = vsel %vm395_vm6, %v1783_v19, %v459_v15  ;;  %v461_v36 = vadd.f32 %v429_v16, %v1789_v21  ;;  %v462_v5 = vadd.f32 %v430_v3, %v1792_v22  ;;  %vm399_vm10 = vcmp.gt.f32.partialorder %v367_v0, 0.5 }
  0x6a   : > { %524 = vst.msk [vmem:[#allocation2 + $0x98] sm:$0xff] %vm504_vm2, %v491_v35  ;;  %v492_v18 = vsel %vm396_vm7, %v1786_v20, %v460_v33  ;;  %v463_v38 = vadd.f32 %v431_v34, %v1795_v23  ;;  %vm400_vm11 = vcmp.gt.f32.partialorder %v368_v4, 0.5  ;;  %v432_v39 = vmul.f32 0.25, %v368_v4 }
  0x6b   : > { %525 = vst.msk [vmem:[#allocation2 + $0xa0] sm:$0xff] %vm504_vm2, %v492_v18  ;;  %v493_v19 = vsel %vm397_vm8, %v1789_v21, %v461_v36  ;;  %v494_v41 = vsel %vm398_vm9, %v1792_v22, %v462_v5  ;;  %vm401_vm12 = vcmp.gt.f32.partialorder %v369_v17, 0.5  ;;  %v433_v42 = vmul.f32 0.25, %v369_v17 }
  0x6c   : > { %526 = vst.msk [vmem:[#allocation2 + $0xa8] sm:$0xff] %vm504_vm2, %v493_v19  ;;  %527 = vst.msk [vmem:[#allocation2 + $0xb0] sm:$0xff] %vm504_vm2, %v494_v41  ;;  %v495_v20 = vsel %vm399_vm10, %v1795_v23, %v463_v38  ;;  %v464_v7 = vadd.f32 %v432_v39, %v1798_v24  ;;  %vm402_vm13 = vcmp.gt.f32.partialorder %v370_v37, 0.5  ;;  %v434_v44 = vmul.f32 0.25, %v370_v37  ;;  %v375_v23 = vld [vmem:[#allocation2 + $0xf8] sm:$0xff] }
  0x6d   : > { %528 = vst.msk [vmem:[#allocation2 + $0xb8] sm:$0xff] %vm504_vm2, %v495_v20  ;;  %v465_v21 = vadd.f32 %v433_v42, %v1801_v25  ;;  %vm403_vm14 = vcmp.gt.f32.partialorder %v371_v6, 0.5  ;;  %v435_v22 = vmul.f32 0.25, %v371_v6  ;;  %v436_v45 = vmul.f32 0.25, %v372_v40 }
  0x6e   : > { %v496_v8 = vsel %vm400_vm11, %v1798_v24, %v464_v7  ;;  %v466_v47 = vadd.f32 %v434_v44, %v1804_v26  ;;  %vm404_vm15 = vcmp.gt.f32.partialorder %v372_v40, 0.5  ;;  %v437_v48 = vmul.f32 0.25, %v373_v43 }
  0x6f   : > { %529 = vst.msk [vmem:[#allocation2 + $0xc0] sm:$0xff] %vm504_vm2, %v496_v8  ;;  %v497_v9 = vsel %vm401_vm12, %v1801_v25, %v465_v21  ;;  %v467_v10 = vadd.f32 %v435_v22, %v1807_v27  ;;  %v468_v49 = vadd.f32 %v436_v45, %v1810_v28  ;;  %vm405_vm0 = vcmp.gt.f32.partialorder %v373_v43, 0.5 }
  0x70   : > { %530 = vst.msk [vmem:[#allocation2 + $0xc8] sm:$0xff] %vm504_vm2, %v497_v9  ;;  %v498_v24 = vsel %vm402_vm13, %v1804_v26, %v466_v47  ;;  %v469_v50 = vadd.f32 %v437_v48, %v1813_v29  ;;  %v438_v51 = vmul.f32 0.25, %v374_v46  ;;  %vm406_vm1 = vcmp.gt.f32.partialorder %v374_v46, 0.5 }
  0x71   : > { %531 = vst.msk [vmem:[#allocation2 + $0xd0] sm:$0xff] %vm504_vm2, %v498_v24  ;;  %v499_v52 = vsel %vm403_vm14, %v1807_v27, %v467_v10  ;;  %v500_v25 = vsel %vm404_vm15, %v1810_v28, %v468_v49  ;;  %v439_v53 = vmul.f32 0.25, %v375_v23  ;;  %vm407_vm3 = vcmp.gt.f32.partialorder %v375_v23, 0.5 }
  0x72   : > { %532 = vst.msk [vmem:[#allocation2 + $0xd8] sm:$0xff] %vm504_vm2, %v499_v52  ;;  %533 = vst.msk [vmem:[#allocation2 + $0xe0] sm:$0xff] %vm504_vm2, %v500_v25  ;;  %v501_v11 = vsel %vm405_vm0, %v1813_v29, %v469_v50  ;;  %v470_v26 = vadd.f32 %v438_v51, %v1816_v30 }
  0x73   : > { %534 = vst.msk [vmem:[#allocation2 + $0xe8] sm:$0xff] %vm504_vm2, %v501_v11  ;;  %v471_v54 = vadd.f32 %v439_v53, %v1819_v31 }
  0x74   : > { %v502_v55 = vsel %vm406_vm1, %v1816_v30, %v470_v26 }
  0x75   : > { %535 = vst.msk [vmem:[#allocation2 + $0xf0] sm:$0xff] %vm504_vm2, %v502_v55  ;;  %v503_v27 = vsel %vm407_vm3, %v1819_v31, %v471_v54 }
  0x76   : > { %536 = vst.msk [vmem:[#allocation2 + $0xf8] sm:$0xff] %vm504_vm2, %v503_v27 }
  0x77 PF: > { %v1458_v28 = vld [vmem:[%s2295_s1] sm:$0xff]   ;;  %v1459_v29 = vld [vmem:[%s2295_s1 + $0x8] sm:$0xff]   ;;  %vm704_vm4 = vcmask 261120   ;;  %v1561_v59 = vmov 0.0   ;;  %v555_v62 = vld [vmem:[#allocation2 + $0x90] sm:$0xff]  ;;  %s1562_s5 = smov 96  }
  0x78   : > { %1343 = vmatprep.subr.bf16.mxu0 %v1458_v28  ;;  %1379 = vmatprep.subr.bf16.mxu1 %v1458_v28  ;;  %v553_v30 = vld [vmem:[#allocation2 + $0x80] sm:$0xff]  ;;  %v554_v31 = vld [vmem:[#allocation2 + $0x88] sm:$0xff]  ;;  %v556_v63 = vld [vmem:[#allocation2 + $0x98] sm:$0xff]  ;;  %vm587_vm10 = vcmp.gt.f32.partialorder %v555_v62, 0.5 }
  0x79   : > { %1344 = vmatpush3.bf16.msra.mxu0 %v1458_v28  ;;  %1381 = vmatpush3.bf16.msra.mxu1 %v1458_v28  ;;  %vm585_vm2 = vcmp.gt.f32.partialorder %v553_v30, 0.5  ;;  %vm586_vm7 = vcmp.gt.f32.partialorder %v554_v31, 0.5  ;;  %v541_v1 = vld [vmem:[#allocation2 + $0x20] sm:$0xff]  ;;  %v542_v2 = vld [vmem:[#allocation2 + $0x28] sm:$0xff]  ;;  %v543_v15 = vld [vmem:[#allocation2 + $0x30] sm:$0xff]  ;;  %vm588_vm11 = vcmp.gt.f32.partialorder %v556_v63, 0.5 }
  0x7a   : > { %1345 = vmatprep.subr.bf16.mxu0 %v1459_v29  ;;  %1380 = vmatprep.subr.bf16.mxu1 %v1459_v29  ;;  %v1288_v13 = vsel %vm585_vm2, 1.0, %v1561_v59  ;;  %v1289_v14 = vsel %vm586_vm7, 1.0, %v1561_v59  ;;  %v544_v32 = vld [vmem:[#allocation2 + $0x38] sm:$0xff]  ;;  %v1290_v34 = vsel %vm587_vm10, 1.0, %v1561_v59  ;;  %vm573_vm12 = vcmp.gt.f32.partialorder %v541_v1, 0.5  ;;  %v557_v17 = vld [vmem:[#allocation2 + $0xa0] sm:$0xff] }
  0x7b   : > { %v673_v16 = vpack.c.bf16 %v1289_v14, %v1288_v13  ;;  %v558_v35 = vld [vmem:[#allocation2 + $0xa8] sm:$0xff]  ;;  %v1291_v36 = vsel %vm588_vm11, 1.0, %v1561_v59  ;;  %vm574_vm13 = vcmp.gt.f32.partialorder %v542_v2, 0.5  ;;  %v1276_v5 = vsel %vm573_vm12, 1.0, %v1561_v59  ;;  %v559_v37 = vld [vmem:[#allocation2 + $0xb0] sm:$0xff]  ;;  %v560_v39 = vld [vmem:[#allocation2 + $0xb8] sm:$0xff] }
  0x7c   : > { %v537_v56 = vld [vmem:[#allocation2] sm:$0xff]  ;;  %v538_v57 = vld [vmem:[#allocation2 + $0x8] sm:$0xff]  ;;  %vm575_vm14 = vcmp.gt.f32.partialorder %v543_v15, 0.5  ;;  %v674_v18 = vpack.c.bf16 %v1291_v36, %v1290_v34  ;;  %v1277_v38 = vsel %vm574_vm13, 1.0, %v1561_v59  ;;  %vm576_vm15 = vcmp.gt.f32.partialorder %v544_v32, 0.5  ;;  %v547_v7 = vld [vmem:[#allocation2 + $0x50] sm:$0xff] }
  0x7d   : > { %vm569_vm5 = vcmp.gt.f32.partialorder %v537_v56, 0.5  ;;  %vm570_vm6 = vcmp.gt.f32.partialorder %v538_v57, 0.5  ;;  %v539_v12 = vld [vmem:[#allocation2 + $0x10] sm:$0xff]  ;;  %1346 = vmatpush3.bf16.msra.mxu0 %v1459_v29  ;;  %1382 = vmatpush3.bf16.msra.mxu1 %v1459_v29  ;;  %v545_v6 = vld [vmem:[#allocation2 + $0x40] sm:$0xff]  ;;  %v667_v40 = vpack.c.bf16 %v1277_v38, %v1276_v5  ;;  %v1278_v19 = vsel %vm575_vm14, 1.0, %v1561_v59  ;;  %v546_v41 = vld [vmem:[#allocation2 + $0x48] sm:$0xff] }
  0x7e   : > { %v540_v58 = vld [vmem:[#allocation2 + $0x18] sm:$0xff]  ;;  %v1272_v60 = vsel %vm569_vm5, 1.0, %v1561_v59  ;;  %v1273_v61 = vsel %vm570_vm6, 1.0, %v1561_v59  ;;  %vm571_vm8 = vcmp.gt.f32.partialorder %v539_v12, 0.5  ;;  %1363 = vmatprep.mubr.msk.bf16.mxu1 %vm704_vm4, %v673_v16  ;;  %vm589_vm0 = vcmp.gt.f32.partialorder %v557_v17, 0.5  ;;  %v561_v22 = vld [vmem:[#allocation2 + $0xc0] sm:$0xff] }
  0x7f   : > { %v665_v0 = vpack.c.bf16 %v1273_v61, %v1272_v60  ;;  %vm572_vm9 = vcmp.gt.f32.partialorder %v540_v58, 0.5  ;;  %v1274_v3 = vsel %vm571_vm8, 1.0, %v1561_v59  ;;  %vm590_vm1 = vcmp.gt.f32.partialorder %v558_v35, 0.5  ;;  %v562_v45 = vld [vmem:[#allocation2 + $0xc8] sm:$0xff]  ;;  %v548_v47 = vld [vmem:[#allocation2 + $0x58] sm:$0xff]  ;;  %v563_v48 = vld [vmem:[#allocation2 + $0xd0] sm:$0xff] }
  0x80   : > { %v1275_v4 = vsel %vm572_vm9, 1.0, %v1561_v59  ;;  %1364 = vmatmul.mubr.msk.bf16.vlgmr.msra.gmra.mrb[0].mxu1 %vm704_vm4, %v674_v18  ;;  %v1279_v42 = vsel %vm576_vm15, 1.0, %v1561_v59  ;;  %v1292_v43 = vsel %vm589_vm0, 1.0, %v1561_v59  ;;  %v1293_v20 = vsel %vm590_vm1, 1.0, %v1561_v59  ;;  %v564_v10 = vld [vmem:[#allocation2 + $0xd8] sm:$0xff]  ;;  %v549_v49 = vld [vmem:[#allocation2 + $0x60] sm:$0xff] }
  0x81   : > { %v666_v33 = vpack.c.bf16 %v1275_v4, %v1274_v3  ;;  %1347 = vmatprep.mubr.msk.bf16.mxu0 %vm704_vm4, %v665_v0  ;;  %vm591_vm3 = vcmp.gt.f32.partialorder %v559_v37, 0.5  ;;  %v675_v44 = vpack.c.bf16 %v1293_v20, %v1292_v43  ;;  %vm592_vm5 = vcmp.gt.f32.partialorder %v560_v39, 0.5  ;;  %v550_v51 = vld [vmem:[#allocation2 + $0x68] sm:$0xff]  ;;  %v565_v11 = vld [vmem:[#allocation2 + $0xe0] sm:$0xff]  ;;  %v551_v57 = vld [vmem:[#allocation2 + $0x70] sm:$0xff] }
  0x82   : > { %v1294_v21 = vsel %vm591_vm3, 1.0, %v1561_v59  ;;  %vm577_vm6 = vcmp.gt.f32.partialorder %v545_v6, 0.5  ;;  %v1295_v46 = vsel %vm592_vm5, 1.0, %v1561_v59  ;;  %vm578_vm2 = vcmp.gt.f32.partialorder %v546_v41, 0.5  ;;  %v566_v26 = vld [vmem:[#allocation2 + $0xe8] sm:$0xff]  ;;  %v552_v30 = vld [vmem:[#allocation2 + $0x78] sm:$0xff] }
  0x83   : > { %1348 = vmatmul.mubr.msk.bf16.vlgmr.msra.gmra.mrb[0].mxu0 %vm704_vm4, %v666_v33  ;;  %v1280_v8 = vsel %vm577_vm6, 1.0, %v1561_v59  ;;  %v668_v23 = vpack.c.bf16 %v1279_v42, %v1278_v19  ;;  %1367 = vmatprep.mubr.msk.bf16.mxu1 %vm704_vm4, %v675_v44  ;;  %v1281_v9 = vsel %vm578_vm2, 1.0, %v1561_v59  ;;  %vm579_vm7 = vcmp.gt.f32.partialorder %v547_v7, 0.5  ;;  %v567_v60 = vld [vmem:[#allocation2 + $0xf0] sm:$0xff]  ;;  %v568_v61 = vld [vmem:[#allocation2 + $0xf8] sm:$0xff] }
  0x84   : > { %1351 = vmatprep.mubr.msk.bf16.mxu0 %vm704_vm4, %v667_v40  ;;  %v676_v24 = vpack.c.bf16 %v1295_v46, %v1294_v21  ;;  %v669_v50 = vpack.c.bf16 %v1281_v9, %v1280_v8  ;;  %vm593_vm8 = vcmp.gt.f32.partialorder %v561_v22, 0.5  ;;  %vm594_vm9 = vcmp.gt.f32.partialorder %v562_v45, 0.5  ;;  %v2068_v3 = vld [vmem:[%s2296_s2] ss:$0 sm:$0xff] }
  0x85   : > { %vm580_vm10 = vcmp.gt.f32.partialorder %v548_v47, 0.5  ;;  %v1296_v52 = vsel %vm593_vm8, 1.0, %v1561_v59  ;;  %v1297_v25 = vsel %vm594_vm9, 1.0, %v1561_v59  ;;  %vm595_vm11 = vcmp.gt.f32.partialorder %v563_v48, 0.5 }
  0x86   : > { %v677_v53 = vpack.c.bf16 %v1297_v25, %v1296_v52  ;;  %vm596_vm12 = vcmp.gt.f32.partialorder %v564_v10, 0.5  ;;  %vm581_vm13 = vcmp.gt.f32.partialorder %v549_v49, 0.5  ;;  %vm582_vm14 = vcmp.gt.f32.partialorder %v550_v51, 0.5 }
  0x87   : > { %v1282_v54 = vsel %vm579_vm7, 1.0, %v1561_v59  ;;  %v1283_v55 = vsel %vm580_vm10, 1.0, %v1561_v59  ;;  %v1298_v27 = vsel %vm595_vm11, 1.0, %v1561_v59  ;;  %v1299_v28 = vsel %vm596_vm12, 1.0, %v1561_v59 }
  0x88   : > { %1368 = vmatmul.mubr.msk.bf16.gmra.mrb[4].mxu1 %vm704_vm4, %v676_v24  ;;  %v1284_v29 = vsel %vm581_vm13, 1.0, %v1561_v59  ;;  %v1285_v56 = vsel %vm582_vm14, 1.0, %v1561_v59  ;;  %vm597_vm15 = vcmp.gt.f32.partialorder %v565_v11, 0.5  ;;  %vm598_vm0 = vcmp.gt.f32.partialorder %v566_v26, 0.5 }
  0x89   : > { %1371 = vmatprep.mubr.msk.bf16.mxu1 %vm704_vm4, %v677_v53  ;;  %v1300_v31 = vsel %vm597_vm15, 1.0, %v1561_v59  ;;  %v1301_v12 = vsel %vm598_vm0, 1.0, %v1561_v59  ;;  %v670_v58 = vpack.c.bf16 %v1283_v55, %v1282_v54  ;;  %v678_v13 = vpack.c.bf16 %v1299_v28, %v1298_v27 }
  0x8a   : > { %v671_v62 = vpack.c.bf16 %v1285_v56, %v1284_v29  ;;  %vm583_vm1 = vcmp.gt.f32.partialorder %v551_v57, 0.5  ;;  %vm584_vm3 = vcmp.gt.f32.partialorder %v552_v30, 0.5  ;;  %v679_v63 = vpack.c.bf16 %v1301_v12, %v1300_v31 }
  0x8b   : > { %1352 = vmatmul.mubr.msk.bf16.gmra.mrb[4].mxu0 %vm704_vm4, %v668_v23  ;;  %vm599_vm5 = vcmp.gt.f32.partialorder %v567_v60, 0.5  ;;  %vm600_vm6 = vcmp.gt.f32.partialorder %v568_v61, 0.5  ;;  %v1286_v0 = vsel %vm583_vm1, 1.0, %v1561_v59  ;;  %v1287_v14 = vsel %vm584_vm3, 1.0, %v1561_v59 }
  0x8c   : > { %1355 = vmatprep.mubr.msk.bf16.mxu0 %vm704_vm4, %v669_v50  ;;  %v1302_v1 = vsel %vm599_vm5, 1.0, %v1561_v59  ;;  %v1303_v2 = vsel %vm600_vm6, 1.0, %v1561_v59  ;;  %v672_v15 = vpack.c.bf16 %v1287_v14, %v1286_v0 }
  0x8d   : > { %v680_v16 = vpack.c.bf16 %v1303_v2, %v1302_v1 }
  0x90   : > { %1372 = vmatmul.mubr.msk.bf16.gmra.mrb[8].mxu1 %vm704_vm4, %v678_v13 }
  0x91   : > { %1375 = vmatprep.mubr.msk.bf16.mxu1 %vm704_vm4, %v679_v63 }
  0x93   : > { %1356 = vmatmul.mubr.msk.bf16.gmra.mrb[8].mxu0 %vm704_vm4, %v670_v58 }
  0x94   : > { %1359 = vmatprep.mubr.msk.bf16.mxu0 %vm704_vm4, %v671_v62 }
  0x98   : > { %1376 = vmatmul.mubr.msk.bf16.gmra.mrb[12].mxu1 %vm704_vm4, %v680_v16 }
  0x9b   : > { %1360 = vmatmul.mubr.msk.bf16.gmra.mrb[12].mxu0 %vm704_vm4, %v672_v15 }
 0x153   : > { %v1365_v33 = vpop.f32.mrb[0].mxu1 }
 0x154   : > { %v860_v59 = vadd.f32 %v1365_v33, %v2068_v3  ;;  %v851_v35 = vpop.f32.mrb[1].mxu1 }
 0x155   : > { %v852_v5 = vadd.f32 %v2068_v3, %v851_v35  ;;  %v1366_v18 = vpop.f32.mrb[2].mxu1 }
 0x156   : > { %v1349_v4 = vpop.f32.mrb[0].mxu0  ;;  %932 = vst.msk [vmem:[%s1727_s10 + $0x90] sm:$0xff] %vm704_vm4, %v860_v59  ;;  %v863_v39 = vadd.f32 %v1366_v18, %v2068_v3  ;;  %1014 = vrot.lane.b32.xlu0 %v860_v59, %s1562_s5  ;;  %v854_v6 = vpop.f32.mrb[3].mxu1 }
 0x157   : > { %v796_v32 = vadd.f32 %v1349_v4, %v2068_v3  ;;  %v787_v34 = vpop.f32.mrb[1].mxu0  ;;  %930 = vst.msk [vmem:[%s1727_s10 + $0x80] sm:$0xff] %vm704_vm4, %v852_v5  ;;  %v855_v19 = vadd.f32 %v2068_v3, %v854_v6 }
 0x158   : > { %v788_v17 = vadd.f32 %v2068_v3, %v787_v34  ;;  %v1350_v36 = vpop.f32.mrb[2].mxu0  ;;  %933 = vst.msk [vmem:[%s1727_s10 + $0x98] sm:$0xff] %vm704_vm4, %v863_v39 }
 0x159   : > { %916 = vst.msk [vmem:[%s1727_s10 + $0x10] sm:$0xff] %vm704_vm4, %v796_v32  ;;  %v799_v37 = vadd.f32 %v1350_v36, %v2068_v3  ;;  %982 = vrot.lane.b32.xlu1 %v796_v32, %s1562_s5  ;;  %v790_v38 = vpop.f32.mrb[3].mxu0  ;;  %931 = vst.msk [vmem:[%s1727_s10 + $0x88] sm:$0xff] %vm704_vm4, %v855_v19 }
 0x15a   : > { %914 = vst.msk [vmem:[%s1727_s10] sm:$0xff] %vm704_vm4, %v788_v17  ;;  %v791_v40 = vadd.f32 %v2068_v3, %v790_v38  ;;  %978 = vrot.lane.b32.xlu0 %v788_v17, %s1562_s5 }
 0x15b   : > { %917 = vst.msk [vmem:[%s1727_s10 + $0x18] sm:$0xff] %vm704_vm4, %v799_v37  ;;  %v1369_v20 = vpop.f32.mrb[4].mxu1 }
 0x15c   : > { %915 = vst.msk [vmem:[%s1727_s10 + $0x8] sm:$0xff] %vm704_vm4, %v791_v40  ;;  %v876_v21 = vadd.f32 %v1369_v20, %v2068_v3  ;;  %v867_v22 = vpop.f32.mrb[5].mxu1 }
 0x15d   : > { %984 = vrot.lane.b32.xlu1 %v799_v37, %s1562_s5  ;;  %v2108_v8 = vadd.f32 %v2068_v3, %v867_v22  ;;  %v1370_v47 = vpop.f32.mrb[6].mxu1 }
 0x15e   : > { %v1353_v41 = vpop.f32.mrb[4].mxu0  ;;  %1010 = vrot.lane.b32.xlu0 %v852_v5, %s1562_s5  ;;  %936 = vst.msk [vmem:[%s1727_s10 + $0xb0] sm:$0xff] %vm704_vm4, %v876_v21  ;;  %v879_v23 = vadd.f32 %v1370_v47, %v2068_v3  ;;  %v870_v9 = vpop.f32.mrb[7].mxu1 }
 0x15f   : > { %v812_v42 = vadd.f32 %v1353_v41, %v2068_v3  ;;  %v803_v43 = vpop.f32.mrb[5].mxu0  ;;  %934 = vst.msk [vmem:[%s1727_s10 + $0xa0] sm:$0xff] %vm704_vm4, %v2108_v8  ;;  %v871_v10 = vadd.f32 %v2068_v3, %v870_v9 }
 0x160   : > { %v2100_v7 = vadd.f32 %v2068_v3, %v803_v43  ;;  %v1354_v44 = vpop.f32.mrb[6].mxu0  ;;  %937 = vst.msk [vmem:[%s1727_s10 + $0xb8] sm:$0xff] %vm704_vm4, %v879_v23 }
 0x161   : > { %1016 = vrot.lane.b32.xlu1 %v863_v39, %s1562_s5  ;;  %920 = vst.msk [vmem:[%s1727_s10 + $0x30] sm:$0xff] %vm704_vm4, %v812_v42  ;;  %v815_v45 = vadd.f32 %v1354_v44, %v2068_v3  ;;  %v806_v46 = vpop.f32.mrb[7].mxu0  ;;  %935 = vst.msk [vmem:[%s1727_s10 + $0xa8] sm:$0xff] %vm704_vm4, %v871_v10 }
 0x162   : > { %918 = vst.msk [vmem:[%s1727_s10 + $0x20] sm:$0xff] %vm704_vm4, %v2100_v7  ;;  %v807_v48 = vadd.f32 %v2068_v3, %v806_v46  ;;  %980 = vrot.lane.b32.xlu0 %v791_v40, %s1562_s5 }
 0x163   : > { %921 = vst.msk [vmem:[%s1727_s10 + $0x38] sm:$0xff] %vm704_vm4, %v815_v45  ;;  %v1373_v51 = vpop.f32.mrb[8].mxu1 }
 0x164   : > { %919 = vst.msk [vmem:[%s1727_s10 + $0x28] sm:$0xff] %vm704_vm4, %v807_v48  ;;  %v892_v53 = vadd.f32 %v1373_v51, %v2068_v3  ;;  %v883_v11 = vpop.f32.mrb[9].mxu1 }
 0x165   : > { %1012 = vrot.lane.b32.xlu1 %v855_v19, %s1562_s5  ;;  %v884_v55 = vadd.f32 %v2068_v3, %v883_v11  ;;  %v1374_v27 = vpop.f32.mrb[10].mxu1 }
 0x166   : > { %v1357_v49 = vpop.f32.mrb[8].mxu0  ;;  %990 = vrot.lane.b32.xlu0 %v812_v42, %s1562_s5  ;;  %940 = vst.msk [vmem:[%s1727_s10 + $0xd0] sm:$0xff] %vm704_vm4, %v892_v53  ;;  %v895_v29 = vadd.f32 %v1374_v27, %v2068_v3  ;;  %v886_v56 = vpop.f32.mrb[11].mxu1 }
 0x167   : > { %v828_v24 = vadd.f32 %v1357_v49, %v2068_v3  ;;  %v819_v50 = vpop.f32.mrb[9].mxu0  ;;  %938 = vst.msk [vmem:[%s1727_s10 + $0xc0] sm:$0xff] %vm704_vm4, %v884_v55  ;;  %v887_v57 = vadd.f32 %v2068_v3, %v886_v56 }
 0x168   : > { %v820_v52 = vadd.f32 %v2068_v3, %v819_v50  ;;  %v1358_v25 = vpop.f32.mrb[10].mxu0  ;;  %941 = vst.msk [vmem:[%s1727_s10 + $0xd8] sm:$0xff] %vm704_vm4, %v895_v29 }
 0x169   : > { %992 = vrot.lane.b32.xlu1 %v815_v45, %s1562_s5  ;;  %924 = vst.msk [vmem:[%s1727_s10 + $0x50] sm:$0xff] %vm704_vm4, %v828_v24  ;;  %v831_v26 = vadd.f32 %v1358_v25, %v2068_v3  ;;  %v822_v54 = vpop.f32.mrb[11].mxu0  ;;  %939 = vst.msk [vmem:[%s1727_s10 + $0xc8] sm:$0xff] %vm704_vm4, %v887_v57 }
 0x16a   : > { %922 = vst.msk [vmem:[%s1727_s10 + $0x40] sm:$0xff] %vm704_vm4, %v820_v52  ;;  %v823_v28 = vadd.f32 %v2068_v3, %v822_v54  ;;  %1022 = vrot.lane.b32.xlu0 %v876_v21, %s1562_s5 }
 0x16b   : > { %925 = vst.msk [vmem:[%s1727_s10 + $0x58] sm:$0xff] %vm704_vm4, %v831_v26  ;;  %v1377_v58 = vpop.f32.mrb[12].mxu1 }
 0x16c   : > { %923 = vst.msk [vmem:[%s1727_s10 + $0x48] sm:$0xff] %vm704_vm4, %v823_v28  ;;  %v908_v13 = vadd.f32 %v1377_v58, %v2068_v3  ;;  %v899_v62 = vpop.f32.mrb[13].mxu1 }
 0x16d   : > { %1024 = vrot.lane.b32.xlu1 %v879_v23, %s1562_s5  ;;  %v900_v14 = vadd.f32 %v2068_v3, %v899_v62  ;;  %v1378_v1 = vpop.f32.mrb[14].mxu1 }
 0x16e   : > { %v1361_v30 = vpop.f32.mrb[12].mxu0  ;;  %986 = vrot.lane.b32.xlu0 %v2100_v7, %s1562_s5  ;;  %944 = vst.msk [vmem:[%s1727_s10 + $0xf0] sm:$0xff] %vm704_vm4, %v908_v13  ;;  %v911_v15 = vadd.f32 %v1378_v1, %v2068_v3  ;;  %v902_v16 = vpop.f32.mrb[15].mxu1 }
 0x16f   : > { %v844_v31 = vadd.f32 %v1361_v30, %v2068_v3  ;;  %v835_v12 = vpop.f32.mrb[13].mxu0  ;;  %942 = vst.msk [vmem:[%s1727_s10 + $0xe0] sm:$0xff] %vm704_vm4, %v900_v14  ;;  %v903_v4 = vadd.f32 %v2068_v3, %v902_v16 }
 0x170   : > { %v836_v60 = vadd.f32 %v2068_v3, %v835_v12  ;;  %v1362_v61 = vpop.f32.mrb[14].mxu0  ;;  %945 = vst.msk [vmem:[%s1727_s10 + $0xf8] sm:$0xff] %vm704_vm4, %v911_v15 }
 0x171   : > { %988 = vrot.lane.b32.xlu1 %v807_v48, %s1562_s5  ;;  %928 = vst.msk [vmem:[%s1727_s10 + $0x70] sm:$0xff] %vm704_vm4, %v844_v31  ;;  %v847_v63 = vadd.f32 %v1362_v61, %v2068_v3  ;;  %v838_v0 = vpop.f32.mrb[15].mxu0  ;;  %943 = vst.msk [vmem:[%s1727_s10 + $0xe8] sm:$0xff] %vm704_vm4, %v903_v4 }
 0x172   : > { %926 = vst.msk [vmem:[%s1727_s10 + $0x60] sm:$0xff] %vm704_vm4, %v836_v60  ;;  %v839_v2 = vadd.f32 %v2068_v3, %v838_v0  ;;  %1018 = vrot.lane.b32.xlu0 %v2108_v8, %s1562_s5 }
 0x173   : > { %929 = vst.msk [vmem:[%s1727_s10 + $0x78] sm:$0xff] %vm704_vm4, %v847_v63 }
 0x174   : > { %927 = vst.msk [vmem:[%s1727_s10 + $0x68] sm:$0xff] %vm704_vm4, %v839_v2 }
 0x175   : > { %1020 = vrot.lane.b32.xlu1 %v871_v10, %s1562_s5 }
 0x176   : > { %998 = vrot.lane.b32.xlu0 %v828_v24, %s1562_s5 }
 0x179   : > { %1000 = vrot.lane.b32.xlu1 %v831_v26, %s1562_s5 }
 0x17a   : > { %1030 = vrot.lane.b32.xlu0 %v892_v53, %s1562_s5 }
 0x17d   : > { %1032 = vrot.lane.b32.xlu1 %v895_v29, %s1562_s5 }
 0x17e   : > { %994 = vrot.lane.b32.xlu0 %v820_v52, %s1562_s5 }
 0x181   : > { %996 = vrot.lane.b32.xlu1 %v823_v28, %s1562_s5 }
 0x182   : > { %1026 = vrot.lane.b32.xlu0 %v884_v55, %s1562_s5 }
 0x185   : > { %1028 = vrot.lane.b32.xlu1 %v887_v57, %s1562_s5 }
 0x186   : > { %1006 = vrot.lane.b32.xlu0 %v844_v31, %s1562_s5 }
 0x189   : > { %1008 = vrot.lane.b32.xlu1 %v847_v63, %s1562_s5 }
 0x18a   : > { %1002 = vrot.lane.b32.xlu0 %v836_v60, %s1562_s5 }
 0x18d   : > { %1004 = vrot.lane.b32.xlu1 %v839_v2, %s1562_s5 }
 0x18e   : > { %1034 = vrot.lane.b32.xlu0 %v900_v14, %s1562_s5 }
 0x191   : > { %1036 = vrot.lane.b32.xlu1 %v903_v4, %s1562_s5 }
 0x192   : > { %1038 = vrot.lane.b32.xlu0 %v908_v13, %s1562_s5 }
 0x195   : > { %1040 = vrot.lane.b32.xlu1 %v911_v15, %s1562_s5 }
 0x1c8   : > { %v1015_v32 = vpop.permute.xlu0 %1014 }
 0x1c9   : > { %1092 = vst.msk [vmem:[%s1732_s12 + $0x90] sm:$0xff] %vm704_vm4, %v1015_v32 }
 0x1cb   : > { %v983_v3 = vpop.permute.xlu1 %982 }
 0x1cc   : > { %1076 = vst.msk [vmem:[%s1732_s12 + $0x10] sm:$0xff] %vm704_vm4, %v983_v3  ;;  %v979_v34 = vpop.permute.xlu0 %978 }
 0x1cd   : > { %1074 = vst.msk [vmem:[%s1732_s12] sm:$0xff] %vm704_vm4, %v979_v34 }
 0x1cf   : > { %v985_v33 = vpop.permute.xlu1 %984 }
 0x1d0   : > { %1077 = vst.msk [vmem:[%s1732_s12 + $0x18] sm:$0xff] %vm704_vm4, %v985_v33  ;;  %v1011_v17 = vpop.permute.xlu0 %1010 }
 0x1d1   : > { %1090 = vst.msk [vmem:[%s1732_s12 + $0x80] sm:$0xff] %vm704_vm4, %v1011_v17 }
 0x1d3   : > { %v1017_v59 = vpop.permute.xlu1 %1016 }
 0x1d4   : > { %1093 = vst.msk [vmem:[%s1732_s12 + $0x98] sm:$0xff] %vm704_vm4, %v1017_v59  ;;  %v981_v36 = vpop.permute.xlu0 %980 }
 0x1d5   : > { %1075 = vst.msk [vmem:[%s1732_s12 + $0x8] sm:$0xff] %vm704_vm4, %v981_v36 }
 0x1d7   : > { %v1013_v35 = vpop.permute.xlu1 %1012 }
 0x1d8   : > { %1091 = vst.msk [vmem:[%s1732_s12 + $0x88] sm:$0xff] %vm704_vm4, %v1013_v35  ;;  %v991_v37 = vpop.permute.xlu0 %990 }
 0x1d9   : > { %1080 = vst.msk [vmem:[%s1732_s12 + $0x30] sm:$0xff] %vm704_vm4, %v991_v37 }
 0x1db   : > { %v993_v5 = vpop.permute.xlu1 %992 }
 0x1dc   : > { %1081 = vst.msk [vmem:[%s1732_s12 + $0x38] sm:$0xff] %vm704_vm4, %v993_v5  ;;  %v1023_v38 = vpop.permute.xlu0 %1022 }
 0x1dd   : > { %1096 = vst.msk [vmem:[%s1732_s12 + $0xb0] sm:$0xff] %vm704_vm4, %v1023_v38 }
 0x1df   : > { %v1025_v18 = vpop.permute.xlu1 %1024 }
 0x1e0   : > { %1097 = vst.msk [vmem:[%s1732_s12 + $0xb8] sm:$0xff] %vm704_vm4, %v1025_v18  ;;  %v987_v6 = vpop.permute.xlu0 %986 }
 0x1e1   : > { %1078 = vst.msk [vmem:[%s1732_s12 + $0x20] sm:$0xff] %vm704_vm4, %v987_v6 }
 0x1e3   : > { %v989_v39 = vpop.permute.xlu1 %988 }
 0x1e4   : > { %1079 = vst.msk [vmem:[%s1732_s12 + $0x28] sm:$0xff] %vm704_vm4, %v989_v39  ;;  %v1019_v19 = vpop.permute.xlu0 %1018 }
 0x1e5   : > { %1094 = vst.msk [vmem:[%s1732_s12 + $0xa0] sm:$0xff] %vm704_vm4, %v1019_v19 }
 0x1e7   : > { %v1021_v40 = vpop.permute.xlu1 %1020 }
 0x1e8   : > { %1095 = vst.msk [vmem:[%s1732_s12 + $0xa8] sm:$0xff] %vm704_vm4, %v1021_v40  ;;  %v999_v42 = vpop.permute.xlu0 %998 }
 0x1e9   : > { %1084 = vst.msk [vmem:[%s1732_s12 + $0x50] sm:$0xff] %vm704_vm4, %v999_v42 }
 0x1eb   : > { %v1001_v41 = vpop.permute.xlu1 %1000 }
 0x1ec   : > { %1085 = vst.msk [vmem:[%s1732_s12 + $0x58] sm:$0xff] %vm704_vm4, %v1001_v41  ;;  %v1031_v20 = vpop.permute.xlu0 %1030 }
 0x1ed   : > { %1100 = vst.msk [vmem:[%s1732_s12 + $0xd0] sm:$0xff] %vm704_vm4, %v1031_v20 }
 0x1ef   : > { %v1033_v43 = vpop.permute.xlu1 %1032 }
 0x1f0   : > { %1101 = vst.msk [vmem:[%s1732_s12 + $0xd8] sm:$0xff] %vm704_vm4, %v1033_v43  ;;  %v995_v44 = vpop.permute.xlu0 %994 }
 0x1f1   : > { %1082 = vst.msk [vmem:[%s1732_s12 + $0x40] sm:$0xff] %vm704_vm4, %v995_v44 }
 0x1f3   : > { %v997_v7 = vpop.permute.xlu1 %996 }
 0x1f4   : > { %1083 = vst.msk [vmem:[%s1732_s12 + $0x48] sm:$0xff] %vm704_vm4, %v997_v7  ;;  %v1027_v22 = vpop.permute.xlu0 %1026 }
 0x1f5   : > { %1098 = vst.msk [vmem:[%s1732_s12 + $0xc0] sm:$0xff] %vm704_vm4, %v1027_v22 }
 0x1f7   : > { %v1029_v21 = vpop.permute.xlu1 %1028 }
 0x1f8   : > { %1099 = vst.msk [vmem:[%s1732_s12 + $0xc8] sm:$0xff] %vm704_vm4, %v1029_v21  ;;  %v1007_v46 = vpop.permute.xlu0 %1006 }
 0x1f9   : > { %1088 = vst.msk [vmem:[%s1732_s12 + $0x70] sm:$0xff] %vm704_vm4, %v1007_v46 }
 0x1fb   : > { %v1009_v45 = vpop.permute.xlu1 %1008 }
 0x1fc   : > { %1089 = vst.msk [vmem:[%s1732_s12 + $0x78] sm:$0xff] %vm704_vm4, %v1009_v45  ;;  %v1003_v47 = vpop.permute.xlu0 %1002 }
 0x1fd   : > { %1086 = vst.msk [vmem:[%s1732_s12 + $0x60] sm:$0xff] %vm704_vm4, %v1003_v47 }
 0x1ff   : > { %v1005_v8 = vpop.permute.xlu1 %1004 }
 0x200   : > { %1087 = vst.msk [vmem:[%s1732_s12 + $0x68] sm:$0xff] %vm704_vm4, %v1005_v8  ;;  %v1035_v23 = vpop.permute.xlu0 %1034 }
 0x201   : > { %1102 = vst.msk [vmem:[%s1732_s12 + $0xe0] sm:$0xff] %vm704_vm4, %v1035_v23 }
 0x203   : > { %v1037_v48 = vpop.permute.xlu1 %1036 }
 0x204   : > { %1103 = vst.msk [vmem:[%s1732_s12 + $0xe8] sm:$0xff] %vm704_vm4, %v1037_v48  ;;  %v1039_v10 = vpop.permute.xlu0 %1038 }
 0x205   : > { %1104 = vst.msk [vmem:[%s1732_s12 + $0xf0] sm:$0xff] %vm704_vm4, %v1039_v10 }
 0x207   : > { %v1041_v9 = vpop.permute.xlu1 %1040 }
 0x208   : > { %1105 = vst.msk [vmem:[%s1732_s12 + $0xf8] sm:$0xff] %vm704_vm4, %v1041_v9 }
 0x209 PF: > { %s18_s22 = sadd.s32 1, %s1556_s22   ;;  %s2305_s7 = sld [smem:[#allocation6_spill]] }
 0x20a   : > { %p15_p8 = scmp.ge.s32.totalorder %s18_s22, 10   ;;  %s2306_s15 = smov %s1532_s16 }
 0x20b   : > { %s2307_s16 = smov %s1536_s17  ;;  %s2308_s17 = smov %s1655_s9 }
 0x20c   : > { %s2309_s18 = smov %s1548_s20  ;;  %s2310_s19 = smov %s1552_s21 }
 0x20d   : > { %s2311_s20 = smov %s2314_s24  ;;  %17 = sbr.rel (!%p15_p8) target bundleno = 5 (0x5), region = 92 }
 0x20f   : > { %s2312_s21 = smov %s2305_s7 }
 0x214   :  { %1161 = vsyncpa [#allocation4], 1 }
 0x215   :  { %1163 = vsyncpa [#allocation4 + $0x1], 1 }

// kernel: snn_csplayer_forward.5
= control target key start
LH: loop header
LB: loop body
LE: loop exit
PB: predicated region body
PF: predicated region fallthrough
CT: control target
= control target key end

     0   :  { %10 = vsyncpa [#allocation5], 0  ;;  %s3396_s0 = inlined_call_operand.vmem [shape: f32[4,512,32], index: 0, kind: input, shape index: {}]   ;;  %s3397_s1 = inlined_call_operand.vmem [shape: f32[4,512,32], index: 1, kind: input, shape index: {}]   ;;  %s3398_s2 = inlined_call_operand.vmem [shape: bf16[32,64], index: 2, kind: input, shape index: {}]   ;;  %s3399_s3 = inlined_call_operand.vmem [shape: bf16[32,64], index: 3, kind: input, shape index: {}]   ;;  %s3400_s4 = inlined_call_operand.vmem [shape: f32[1,64], index: 4, kind: input, shape index: {}]   ;;  %s3401_s5 = inlined_call_operand.hbm [shape: f32[4,512,64], index: 5, kind: output, shape index: {}]  }
   0x1   :  { %12 = vsyncpa [#allocation5 + $0x1], 0  ;;  %s2217_s18 = smov 0   ;;  %s2219_s19 = smov 0  }
   0x2   :  { %s2221_s20 = smov 0   ;;  %s2223_s21 = smov 0  }
   0x3   :  { %s2225_s22 = smov 0   ;;  %s2227_s23 = smov 0  }
   0x4   :  { %s2229_s24 = smov 0   ;;  %s2231_s25 = smov 0  }
   0x5 LB: > { %s1748_s26 = sadd.s32 4294967295, %s2181_s25   ;;  %s1749_s27 = sadd.s32 4294967294, %s2181_s25   ;;  %s2181_s25 = sphi %s2231_s25, %s18_s25   ;;  %s2177_s24 = sphi %s2229_s24, %s3517_s24   ;;  %s2173_s23 = sphi %s2227_s23, %s3516_s23   ;;  %s2169_s22 = sphi %s2225_s22, %s3515_s22   ;;  %s2165_s21 = sphi %s2223_s21, %s3514_s21   ;;  %s2161_s20 = sphi %s2221_s20, %s3513_s20   ;;  %s2157_s19 = sphi %s2219_s19, %s3512_s19   ;;  %s2153_s18 = sphi %s2217_s18, %s3511_s18  }
   0x6   : > { %s27_s28 = sadd.s32 1, %s2173_s23  ;;  %s30_s29 = sadd.s32 1, %s2177_s24 }
   0x7   : > { %p28_p0 = scmp.ge.s32.totalorder %s27_s28, 4  ;;  %p168_p1 = scmp.ne.s32.totalorder %s2161_s20, %s2157_s19 }
   0x8   : > { %p169_p2 = scmp.eq.s32.totalorder %s1748_s26, 7  ;;  %p174_p5 = scmp.ne.s32.totalorder %s2157_s19, %s2153_s18 }
   0x9   : > { %s3519_s28 = smov (%p28_p0, %s27_s28), 0  ;;  %s3521_s29 = smov (!%p28_p0, %s30_s29), %s2177_s24 }
   0xa   : > { %s153_s30 = ssub.s32 %s2173_s23, %s3519_s28  ;;  %p2268_p3 = por %p169_p2, %p168_p1 }
   0xb   : > { %p32_p4 = scmp.ge.s32.totalorder %s3521_s29, 2  ;;  %p175_p6 = scmp.eq.s32.totalorder %s1749_s27, 7 }
   0xc   : > { %p1752_p7 = scmp.ge.s32.totalorder %s2181_s25, 1  ;;  %p228_p9 = scmp.lt.s32.totalorder %s2181_s25, 9 }
   0xd   : > { %s3523_s29 = smov (%p32_p4, %s3521_s29), 0  ;;  %p2277_p8 = por %p175_p6, %p174_p5 }
   0xe   : > { %s154_s8 = ssub.s32 %s2177_s24, %s3523_s29  ;;  %s158_s9 = sadd.s32 1, %s2161_s20 }
   0xf   : > { %s155_s10 = sor.u32 %s154_s8, %s153_s30  ;;  %p229_p10 = pnand %p1752_p7, %p228_p9 }
  0x10   : > { %p156_p11 = scmp.eq.s32.totalorder %s155_s10, 0 }
  0x11   : > { %232 = sbr.rel (%p229_p10) target bundleno = 480 (0x1e0), region = 40 }
  0x12   : > { %s2286_s11 = scalar_select %p156_p11, %s2161_s20, %s158_s9  }
  0x18   : > { %s266_s12 = sand.u32 1, %s2157_s19   ;;  %s2290_s13 = sshll.u32 %s2169_s22, 5 }
  0x19   : > { %s2294_s14 = sshll.u32 %s266_s12, 8  ;;  %p270_p12 = scmp.lt.s32.totalorder %s2165_s21, 3 }
  0x1a   : > { %p272_p13 = scmp.lt.s32.totalorder %s2290_s13, 63  ;;  %p1760_p0 = scmp.ne.s32.totalorder %s2165_s21, 0 }
  0x1b   : > { %s271_s15 = scalar_select %p270_p12, %s2165_s21, 3 }
  0x1c   : > { %s273_s16 = scalar_select %p272_p13, %s2290_s13, 63 }
  0x1d   : > { %s1755_s17 = sshll.u32 %s271_s15, 6  ;;  %vm327_vm0 = vcmask (!%p1760_p0), 261120  }
  0x1e   : > { %s275_s26 = sadd.s32 %s1755_s17, %s273_s16  ;;  %s2407_s16 = scalar_lea.vmem [#allocation4], %s2294_s14 }
  0x1f   : > { %s1756_s27 = sshll.u32 %s275_s26, 3 }
  0x20   : > { %s2303_s9 = scalar_lea.vmem %s3396_s0, %s1756_s27  ;;  %s2308_s15 = scalar_lea.vmem %s3397_s1, %s1756_s27 }
  0x21   : > { %v2311_v0 = vld [vmem:[%s2303_s9] sm:$0xff]  ;;  %v2314_v1 = vld [vmem:[%s2303_s9 + $0x8] sm:$0xff]  ;;  %v2317_v2 = vld [vmem:[%s2303_s9 + $0x10] sm:$0xff] }
  0x22   : > { %v2320_v3 = vld [vmem:[%s2303_s9 + $0x18] sm:$0xff]  ;;  %v2323_v4 = vld [vmem:[%s2303_s9 + $0x20] sm:$0xff]  ;;  %v2326_v5 = vld [vmem:[%s2303_s9 + $0x28] sm:$0xff]  ;;  %328 = vst.msk [vmem:[#allocation2] sm:$0xff] (!%p1760_p0), %vm327_vm0, %v2311_v0 }
  0x23   : > { %v2329_v6 = vld [vmem:[%s2303_s9 + $0x30] sm:$0xff]  ;;  %v2332_v7 = vld [vmem:[%s2303_s9 + $0x38] sm:$0xff]  ;;  %v2335_v8 = vld [vmem:[%s2303_s9 + $0x40] sm:$0xff]  ;;  %329 = vst.msk [vmem:[#allocation2 + $0x8] sm:$0xff] (!%p1760_p0), %vm327_vm0, %v2314_v1 }
  0x24   : > { %v2338_v9 = vld [vmem:[%s2303_s9 + $0x48] sm:$0xff]  ;;  %v2341_v10 = vld [vmem:[%s2303_s9 + $0x50] sm:$0xff]  ;;  %v2344_v11 = vld [vmem:[%s2303_s9 + $0x58] sm:$0xff]  ;;  %330 = vst.msk [vmem:[#allocation2 + $0x10] sm:$0xff] (!%p1760_p0), %vm327_vm0, %v2317_v2 }
  0x25   : > { %v2347_v12 = vld [vmem:[%s2303_s9 + $0x60] sm:$0xff]  ;;  %v2350_v13 = vld [vmem:[%s2303_s9 + $0x68] sm:$0xff]  ;;  %v2353_v14 = vld [vmem:[%s2303_s9 + $0x70] sm:$0xff]  ;;  %326 = sbr.rel (%p1760_p0) target bundleno = 55 (0x37), region = 44  ;;  %331 = vst.msk [vmem:[#allocation2 + $0x18] sm:$0xff] (!%p1760_p0), %vm327_vm0, %v2320_v3 }
  0x26   : > { %v2356_v15 = vld [vmem:[%s2303_s9 + $0x78] sm:$0xff]  ;;  %v2359_v16 = vld [vmem:[%s2303_s9 + $0x80] sm:$0xff]  ;;  %v2362_v17 = vld [vmem:[%s2303_s9 + $0x88] sm:$0xff]  ;;  %332 = vst.msk [vmem:[#allocation2 + $0x20] sm:$0xff] (!%p1760_p0), %vm327_vm0, %v2323_v4 }
  0x27   : > { %v2365_v18 = vld [vmem:[%s2303_s9 + $0x90] sm:$0xff]  ;;  %v2368_v19 = vld [vmem:[%s2303_s9 + $0x98] sm:$0xff]  ;;  %v2371_v20 = vld [vmem:[%s2303_s9 + $0xa0] sm:$0xff]  ;;  %333 = vst.msk [vmem:[#allocation2 + $0x28] sm:$0xff] (!%p1760_p0), %vm327_vm0, %v2326_v5 }
  0x28   : > { %v2374_v21 = vld [vmem:[%s2303_s9 + $0xa8] sm:$0xff]  ;;  %v2377_v22 = vld [vmem:[%s2303_s9 + $0xb0] sm:$0xff]  ;;  %v2380_v23 = vld [vmem:[%s2303_s9 + $0xb8] sm:$0xff]  ;;  %334 = vst.msk [vmem:[#allocation2 + $0x30] sm:$0xff] (!%p1760_p0), %vm327_vm0, %v2329_v6 }
  0x29   : > { %v2383_v24 = vld [vmem:[%s2303_s9 + $0xc0] sm:$0xff]  ;;  %v2386_v25 = vld [vmem:[%s2303_s9 + $0xc8] sm:$0xff]  ;;  %v2389_v26 = vld [vmem:[%s2303_s9 + $0xd0] sm:$0xff]  ;;  %335 = vst.msk [vmem:[#allocation2 + $0x38] sm:$0xff] (!%p1760_p0), %vm327_vm0, %v2332_v7 }
  0x2a   : > { %v2392_v27 = vld [vmem:[%s2303_s9 + $0xd8] sm:$0xff]  ;;  %v2395_v28 = vld [vmem:[%s2303_s9 + $0xe0] sm:$0xff]  ;;  %v2398_v29 = vld [vmem:[%s2303_s9 + $0xe8] sm:$0xff]  ;;  %336 = vst.msk [vmem:[#allocation2 + $0x40] sm:$0xff] (!%p1760_p0), %vm327_vm0, %v2335_v8 }
  0x2b   : > { %v2401_v30 = vld [vmem:[%s2303_s9 + $0xf0] sm:$0xff]  ;;  %v2404_v31 = vld [vmem:[%s2303_s9 + $0xf8] sm:$0xff]  ;;  %337 = vst.msk [vmem:[#allocation2 + $0x48] sm:$0xff] (!%p1760_p0), %vm327_vm0, %v2338_v9  ;;  %338 = vst.msk [vmem:[#allocation2 + $0x50] sm:$0xff] (!%p1760_p0), %vm327_vm0, %v2341_v10 }
  0x2c   : > { %339 = vst.msk [vmem:[#allocation2 + $0x58] sm:$0xff] %vm327_vm0, %v2344_v11  ;;  %340 = vst.msk [vmem:[#allocation2 + $0x60] sm:$0xff] %vm327_vm0, %v2347_v12 }
  0x2d   : > { %341 = vst.msk [vmem:[#allocation2 + $0x68] sm:$0xff] %vm327_vm0, %v2350_v13  ;;  %342 = vst.msk [vmem:[#allocation2 + $0x70] sm:$0xff] %vm327_vm0, %v2353_v14 }
  0x2e   : > { %343 = vst.msk [vmem:[#allocation2 + $0x78] sm:$0xff] %vm327_vm0, %v2356_v15  ;;  %344 = vst.msk [vmem:[#allocation2 + $0x80] sm:$0xff] %vm327_vm0, %v2359_v16 }
  0x2f   : > { %345 = vst.msk [vmem:[#allocation2 + $0x88] sm:$0xff] %vm327_vm0, %v2362_v17  ;;  %346 = vst.msk [vmem:[#allocation2 + $0x90] sm:$0xff] %vm327_vm0, %v2365_v18 }
  0x30   : > { %347 = vst.msk [vmem:[#allocation2 + $0x98] sm:$0xff] %vm327_vm0, %v2368_v19  ;;  %348 = vst.msk [vmem:[#allocation2 + $0xa0] sm:$0xff] %vm327_vm0, %v2371_v20 }
  0x31   : > { %349 = vst.msk [vmem:[#allocation2 + $0xa8] sm:$0xff] %vm327_vm0, %v2374_v21  ;;  %350 = vst.msk [vmem:[#allocation2 + $0xb0] sm:$0xff] %vm327_vm0, %v2377_v22 }
  0x32   : > { %351 = vst.msk [vmem:[#allocation2 + $0xb8] sm:$0xff] %vm327_vm0, %v2380_v23  ;;  %352 = vst.msk [vmem:[#allocation2 + $0xc0] sm:$0xff] %vm327_vm0, %v2383_v24 }
  0x33   : > { %353 = vst.msk [vmem:[#allocation2 + $0xc8] sm:$0xff] %vm327_vm0, %v2386_v25  ;;  %354 = vst.msk [vmem:[#allocation2 + $0xd0] sm:$0xff] %vm327_vm0, %v2389_v26 }
  0x34   : > { %355 = vst.msk [vmem:[#allocation2 + $0xd8] sm:$0xff] %vm327_vm0, %v2392_v27  ;;  %356 = vst.msk [vmem:[#allocation2 + $0xe0] sm:$0xff] %vm327_vm0, %v2395_v28 }
  0x35   : > { %357 = vst.msk [vmem:[#allocation2 + $0xe8] sm:$0xff] %vm327_vm0, %v2398_v29  ;;  %358 = vst.msk [vmem:[#allocation2 + $0xf0] sm:$0xff] %vm327_vm0, %v2401_v30 }
  0x36   : > { %359 = vst.msk [vmem:[#allocation2 + $0xf8] sm:$0xff] %vm327_vm0, %v2404_v31 }
  0x37 PF: > { %p1761_p1 = scmp.le.s32.totalorder %s2165_s21, 0 }
  0x38   : > { %v364_v32 = vld [vmem:[#allocation2] sm:$0xff] (!%p1761_p1)  ;;  %v365_v33 = vld [vmem:[#allocation2 + $0x8] sm:$0xff] (!%p1761_p1)  ;;  %v366_v34 = vld [vmem:[#allocation2 + $0x10] sm:$0xff] (!%p1761_p1)  ;;  %vm524_vm2 = vcmask (!%p1761_p1), 261120  }
  0x39   : > { %363 = sbr.rel (%p1761_p1) target bundleno = 93 (0x5d), region = 48  ;;  %vm396_vm1 = vcmp.gt.f32.partialorder (!%p1761_p1), %v364_v32, 0.5  ;;  %v428_v35 = vmul.f32 (!%p1761_p1), 0.25, %v364_v32  ;;  %v429_v36 = vmul.f32 (!%p1761_p1), 0.25, %v365_v33  ;;  %v367_v37 = vld [vmem:[#allocation2 + $0x18] sm:$0xff] (!%p1761_p1)  ;;  %v368_v38 = vld [vmem:[#allocation2 + $0x20] sm:$0xff] (!%p1761_p1) }
  0x3a   : > { %vm397_vm3 = vcmp.gt.f32.partialorder (!%p1761_p1), %v365_v33, 0.5  ;;  %vm398_vm4 = vcmp.gt.f32.partialorder (!%p1761_p1), %v366_v34, 0.5  ;;  %v430_v39 = vmul.f32 (!%p1761_p1), 0.25, %v366_v34  ;;  %v431_v40 = vmul.f32 (!%p1761_p1), 0.25, %v367_v37  ;;  %v369_v41 = vld [vmem:[#allocation2 + $0x28] sm:$0xff] (!%p1761_p1)  ;;  %v370_v45 = vld [vmem:[#allocation2 + $0x30] sm:$0xff] (!%p1761_p1) }
  0x3b   : > { %v460_v42 = vadd.f32 (!%p1761_p1), %v428_v35, %v2311_v0  ;;  %v461_v43 = vadd.f32 (!%p1761_p1), %v429_v36, %v2314_v1  ;;  %vm399_vm5 = vcmp.gt.f32.partialorder (!%p1761_p1), %v367_v37, 0.5  ;;  %v432_v44 = vmul.f32 (!%p1761_p1), 0.25, %v368_v38  ;;  %v371_v49 = vld [vmem:[#allocation2 + $0x38] sm:$0xff] (!%p1761_p1)  ;;  %v377_v36 = vld [vmem:[#allocation2 + $0x68] sm:$0xff] (!%p1761_p1) }
  0x3c   : > { %v462_v46 = vadd.f32 (!%p1761_p1), %v430_v39, %v2317_v2  ;;  %v463_v47 = vadd.f32 (!%p1761_p1), %v431_v40, %v2320_v3  ;;  %vm400_vm6 = vcmp.gt.f32.partialorder (!%p1761_p1), %v368_v38, 0.5  ;;  %v433_v48 = vmul.f32 (!%p1761_p1), 0.25, %v369_v41  ;;  %v372_v53 = vld [vmem:[#allocation2 + $0x40] sm:$0xff] (!%p1761_p1)  ;;  %v378_v39 = vld [vmem:[#allocation2 + $0x70] sm:$0xff] (!%p1761_p1) }
  0x3d   : > { %v492_v50 = vsel (!%p1761_p1), %vm396_vm1, %v2311_v0, %v460_v42  ;;  %v493_v51 = vsel (!%p1761_p1), %vm397_vm3, %v2314_v1, %v461_v43  ;;  %v464_v52 = vadd.f32 (!%p1761_p1), %v432_v44, %v2323_v4  ;;  %vm401_vm7 = vcmp.gt.f32.partialorder (!%p1761_p1), %v369_v41, 0.5  ;;  %v373_v58 = vld [vmem:[#allocation2 + $0x48] sm:$0xff] (!%p1761_p1)  ;;  %v374_v59 = vld [vmem:[#allocation2 + $0x50] sm:$0xff] (!%p1761_p1)  ;;  %v379_v42 = vld [vmem:[#allocation2 + $0x78] sm:$0xff] (!%p1761_p1) }
  0x3e   : > { %525 = vst.msk [vmem:[#allocation2] sm:$0xff] (!%p1761_p1), %vm524_vm2, %v492_v50  ;;  %526 = vst.msk [vmem:[#allocation2 + $0x8] sm:$0xff] (!%p1761_p1), %vm524_vm2, %v493_v51  ;;  %v494_v54 = vsel (!%p1761_p1), %vm398_vm4, %v2317_v2, %v462_v46  ;;  %v495_v55 = vsel (!%p1761_p1), %vm399_vm5, %v2320_v3, %v463_v47  ;;  %v465_v56 = vadd.f32 (!%p1761_p1), %v433_v48, %v2326_v5  ;;  %v434_v57 = vmul.f32 (!%p1761_p1), 0.25, %v370_v45  ;;  %v375_v62 = vld [vmem:[#allocation2 + $0x58] sm:$0xff] (!%p1761_p1)  ;;  %v376_v32 = vld [vmem:[#allocation2 + $0x60] sm:$0xff] (!%p1761_p1) }
  0x3f   : > { %527 = vst.msk [vmem:[#allocation2 + $0x10] sm:$0xff] (!%p1761_p1), %vm524_vm2, %v494_v54  ;;  %528 = vst.msk [vmem:[#allocation2 + $0x18] sm:$0xff] (!%p1761_p1), %vm524_vm2, %v495_v55  ;;  %v496_v60 = vsel (!%p1761_p1), %vm400_vm6, %v2323_v4, %v464_v52  ;;  %vm402_vm8 = vcmp.gt.f32.partialorder (!%p1761_p1), %v370_v45, 0.5  ;;  %vm403_vm9 = vcmp.gt.f32.partialorder (!%p1761_p1), %v371_v49, 0.5  ;;  %v435_v61 = vmul.f32 (!%p1761_p1), 0.25, %v371_v49  ;;  %v380_v43 = vld [vmem:[#allocation2 + $0x80] sm:$0xff] (!%p1761_p1) }
  0x40   : > { %529 = vst.msk [vmem:[#allocation2 + $0x20] sm:$0xff] %vm524_vm2, %v496_v60  ;;  %v497_v63 = vsel %vm401_vm7, %v2326_v5, %v465_v56  ;;  %v466_v0 = vadd.f32 %v434_v57, %v2329_v6  ;;  %vm404_vm10 = vcmp.gt.f32.partialorder %v372_v53, 0.5  ;;  %v436_v1 = vmul.f32 0.25, %v372_v53  ;;  %v381_v46 = vld [vmem:[#allocation2 + $0x88] sm:$0xff]  ;;  %v382_v50 = vld [vmem:[#allocation2 + $0x90] sm:$0xff]  ;;  %v384_v57 = vld [vmem:[#allocation2 + $0xa0] sm:$0xff] }
  0x41   : > { %530 = vst.msk [vmem:[#allocation2 + $0x28] sm:$0xff] %vm524_vm2, %v497_v63  ;;  %v467_v2 = vadd.f32 %v435_v61, %v2332_v7  ;;  %vm405_vm11 = vcmp.gt.f32.partialorder %v373_v58, 0.5  ;;  %v437_v3 = vmul.f32 0.25, %v373_v58  ;;  %v438_v4 = vmul.f32 0.25, %v374_v59  ;;  %v385_v60 = vld [vmem:[#allocation2 + $0xa8] sm:$0xff]  ;;  %v386_v61 = vld [vmem:[#allocation2 + $0xb0] sm:$0xff] }
  0x42   : > { %v498_v33 = vsel %vm402_vm8, %v2329_v6, %v466_v0  ;;  %v468_v34 = vadd.f32 %v436_v1, %v2335_v8  ;;  %vm406_vm12 = vcmp.gt.f32.partialorder %v374_v59, 0.5  ;;  %v439_v35 = vmul.f32 0.25, %v375_v62  ;;  %v387_v0 = vld [vmem:[#allocation2 + $0xb8] sm:$0xff] }
  0x43   : > { %531 = vst.msk [vmem:[#allocation2 + $0x30] sm:$0xff] %vm524_vm2, %v498_v33  ;;  %v499_v5 = vsel %vm403_vm9, %v2332_v7, %v467_v2  ;;  %v469_v37 = vadd.f32 %v437_v3, %v2338_v9  ;;  %v470_v38 = vadd.f32 %v438_v4, %v2341_v10  ;;  %vm407_vm13 = vcmp.gt.f32.partialorder %v375_v62, 0.5  ;;  %v388_v4 = vld [vmem:[#allocation2 + $0xc0] sm:$0xff] }
  0x44   : > { %532 = vst.msk [vmem:[#allocation2 + $0x38] sm:$0xff] %vm524_vm2, %v499_v5  ;;  %v500_v6 = vsel %vm404_vm10, %v2335_v8, %v468_v34  ;;  %v471_v40 = vadd.f32 %v439_v35, %v2344_v11  ;;  %vm408_vm14 = vcmp.gt.f32.partialorder %v376_v32, 0.5  ;;  %v440_v41 = vmul.f32 0.25, %v376_v32 }
  0x45   : > { %533 = vst.msk [vmem:[#allocation2 + $0x40] sm:$0xff] %vm524_vm2, %v500_v6  ;;  %v501_v7 = vsel %vm405_vm11, %v2338_v9, %v469_v37  ;;  %v502_v44 = vsel %vm406_vm12, %v2341_v10, %v470_v38  ;;  %vm409_vm15 = vcmp.gt.f32.partialorder %v377_v36, 0.5  ;;  %v441_v45 = vmul.f32 0.25, %v377_v36  ;;  %v390_v37 = vld [vmem:[#allocation2 + $0xd0] sm:$0xff]  ;;  %v391_v6 = vld [vmem:[#allocation2 + $0xd8] sm:$0xff] }
  0x46   : > { %534 = vst.msk [vmem:[#allocation2 + $0x48] sm:$0xff] %vm524_vm2, %v501_v7  ;;  %535 = vst.msk [vmem:[#allocation2 + $0x50] sm:$0xff] %vm524_vm2, %v502_v44  ;;  %v503_v8 = vsel %vm407_vm13, %v2344_v11, %v471_v40  ;;  %v472_v47 = vadd.f32 %v440_v41, %v2347_v12  ;;  %vm410_vm0 = vcmp.gt.f32.partialorder %v378_v39, 0.5  ;;  %v442_v48 = vmul.f32 0.25, %v378_v39  ;;  %v383_v11 = vld [vmem:[#allocation2 + $0x98] sm:$0xff]  ;;  %v392_v40 = vld [vmem:[#allocation2 + $0xe0] sm:$0xff] }
  0x47   : > { %536 = vst.msk [vmem:[#allocation2 + $0x58] sm:$0xff] %vm524_vm2, %v503_v8  ;;  %v473_v9 = vadd.f32 %v441_v45, %v2350_v13  ;;  %vm411_vm1 = vcmp.gt.f32.partialorder %v379_v42, 0.5  ;;  %v443_v10 = vmul.f32 0.25, %v379_v42  ;;  %v444_v49 = vmul.f32 0.25, %v380_v43 }
  0x48   : > { %v504_v51 = vsel %vm408_vm14, %v2347_v12, %v472_v47  ;;  %v474_v52 = vadd.f32 %v442_v48, %v2353_v14  ;;  %vm412_vm3 = vcmp.gt.f32.partialorder %v380_v43, 0.5  ;;  %v445_v53 = vmul.f32 0.25, %v381_v46  ;;  %v393_v43 = vld [vmem:[#allocation2 + $0xe8] sm:$0xff] }
  0x49   : > { %537 = vst.msk [vmem:[#allocation2 + $0x60] sm:$0xff] %vm524_vm2, %v504_v51  ;;  %v505_v54 = vsel %vm409_vm15, %v2350_v13, %v473_v9  ;;  %v475_v55 = vadd.f32 %v443_v10, %v2356_v15  ;;  %v476_v56 = vadd.f32 %v444_v49, %v2359_v16  ;;  %vm413_vm4 = vcmp.gt.f32.partialorder %v381_v46, 0.5  ;;  %v394_v46 = vld [vmem:[#allocation2 + $0xf0] sm:$0xff] }
  0x4a   : > { %538 = vst.msk [vmem:[#allocation2 + $0x68] sm:$0xff] %vm524_vm2, %v505_v54  ;;  %v506_v12 = vsel %vm410_vm0, %v2353_v14, %v474_v52  ;;  %v477_v58 = vadd.f32 %v445_v53, %v2362_v17  ;;  %vm414_vm5 = vcmp.gt.f32.partialorder %v382_v50, 0.5  ;;  %v446_v59 = vmul.f32 0.25, %v382_v50 }
  0x4b   : > { %539 = vst.msk [vmem:[#allocation2 + $0x70] sm:$0xff] %vm524_vm2, %v506_v12  ;;  %v507_v13 = vsel %vm411_vm1, %v2356_v15, %v475_v55  ;;  %v508_v62 = vsel %vm412_vm3, %v2359_v16, %v476_v56  ;;  %vm415_vm6 = vcmp.gt.f32.partialorder %v383_v11, 0.5  ;;  %v447_v63 = vmul.f32 0.25, %v383_v11 }
  0x4c   : > { %540 = vst.msk [vmem:[#allocation2 + $0x78] sm:$0xff] %vm524_vm2, %v507_v13  ;;  %541 = vst.msk [vmem:[#allocation2 + $0x80] sm:$0xff] %vm524_vm2, %v508_v62  ;;  %v509_v14 = vsel %vm413_vm4, %v2362_v17, %v477_v58  ;;  %v478_v1 = vadd.f32 %v446_v59, %v2365_v18  ;;  %vm416_vm7 = vcmp.gt.f32.partialorder %v384_v57, 0.5  ;;  %v448_v2 = vmul.f32 0.25, %v384_v57  ;;  %v389_v17 = vld [vmem:[#allocation2 + $0xc8] sm:$0xff] }
  0x4d   : > { %542 = vst.msk [vmem:[#allocation2 + $0x88] sm:$0xff] %vm524_vm2, %v509_v14  ;;  %v479_v15 = vadd.f32 %v447_v63, %v2368_v19  ;;  %vm417_vm8 = vcmp.gt.f32.partialorder %v385_v60, 0.5  ;;  %v449_v16 = vmul.f32 0.25, %v385_v60  ;;  %v450_v3 = vmul.f32 0.25, %v386_v61 }
  0x4e   : > { %v510_v32 = vsel %vm414_vm5, %v2365_v18, %v478_v1  ;;  %v480_v33 = vadd.f32 %v448_v2, %v2371_v20  ;;  %vm418_vm9 = vcmp.gt.f32.partialorder %v386_v61, 0.5  ;;  %v451_v34 = vmul.f32 0.25, %v387_v0 }
  0x4f   : > { %543 = vst.msk [vmem:[#allocation2 + $0x90] sm:$0xff] %vm524_vm2, %v510_v32  ;;  %v511_v35 = vsel %vm415_vm6, %v2368_v19, %v479_v15  ;;  %v481_v36 = vadd.f32 %v449_v16, %v2374_v21  ;;  %v482_v5 = vadd.f32 %v450_v3, %v2377_v22  ;;  %vm419_vm10 = vcmp.gt.f32.partialorder %v387_v0, 0.5 }
  0x50   : > { %544 = vst.msk [vmem:[#allocation2 + $0x98] sm:$0xff] %vm524_vm2, %v511_v35  ;;  %v512_v18 = vsel %vm416_vm7, %v2371_v20, %v480_v33  ;;  %v483_v38 = vadd.f32 %v451_v34, %v2380_v23  ;;  %vm420_vm11 = vcmp.gt.f32.partialorder %v388_v4, 0.5  ;;  %v452_v39 = vmul.f32 0.25, %v388_v4 }
  0x51   : > { %545 = vst.msk [vmem:[#allocation2 + $0xa0] sm:$0xff] %vm524_vm2, %v512_v18  ;;  %v513_v19 = vsel %vm417_vm8, %v2374_v21, %v481_v36  ;;  %v514_v41 = vsel %vm418_vm9, %v2377_v22, %v482_v5  ;;  %vm421_vm12 = vcmp.gt.f32.partialorder %v389_v17, 0.5  ;;  %v453_v42 = vmul.f32 0.25, %v389_v17 }
  0x52   : > { %546 = vst.msk [vmem:[#allocation2 + $0xa8] sm:$0xff] %vm524_vm2, %v513_v19  ;;  %547 = vst.msk [vmem:[#allocation2 + $0xb0] sm:$0xff] %vm524_vm2, %v514_v41  ;;  %v515_v20 = vsel %vm419_vm10, %v2380_v23, %v483_v38  ;;  %v484_v7 = vadd.f32 %v452_v39, %v2383_v24  ;;  %vm422_vm13 = vcmp.gt.f32.partialorder %v390_v37, 0.5  ;;  %v454_v44 = vmul.f32 0.25, %v390_v37  ;;  %v395_v23 = vld [vmem:[#allocation2 + $0xf8] sm:$0xff] }
  0x53   : > { %548 = vst.msk [vmem:[#allocation2 + $0xb8] sm:$0xff] %vm524_vm2, %v515_v20  ;;  %v485_v21 = vadd.f32 %v453_v42, %v2386_v25  ;;  %vm423_vm14 = vcmp.gt.f32.partialorder %v391_v6, 0.5  ;;  %v455_v22 = vmul.f32 0.25, %v391_v6  ;;  %v456_v45 = vmul.f32 0.25, %v392_v40 }
  0x54   : > { %v516_v8 = vsel %vm420_vm11, %v2383_v24, %v484_v7  ;;  %v486_v47 = vadd.f32 %v454_v44, %v2389_v26  ;;  %vm424_vm15 = vcmp.gt.f32.partialorder %v392_v40, 0.5  ;;  %v457_v48 = vmul.f32 0.25, %v393_v43 }
  0x55   : > { %549 = vst.msk [vmem:[#allocation2 + $0xc0] sm:$0xff] %vm524_vm2, %v516_v8  ;;  %v517_v9 = vsel %vm421_vm12, %v2386_v25, %v485_v21  ;;  %v487_v10 = vadd.f32 %v455_v22, %v2392_v27  ;;  %v488_v49 = vadd.f32 %v456_v45, %v2395_v28  ;;  %vm425_vm0 = vcmp.gt.f32.partialorder %v393_v43, 0.5 }
  0x56   : > { %550 = vst.msk [vmem:[#allocation2 + $0xc8] sm:$0xff] %vm524_vm2, %v517_v9  ;;  %v518_v24 = vsel %vm422_vm13, %v2389_v26, %v486_v47  ;;  %v489_v50 = vadd.f32 %v457_v48, %v2398_v29  ;;  %v458_v51 = vmul.f32 0.25, %v394_v46  ;;  %vm426_vm1 = vcmp.gt.f32.partialorder %v394_v46, 0.5 }
  0x57   : > { %551 = vst.msk [vmem:[#allocation2 + $0xd0] sm:$0xff] %vm524_vm2, %v518_v24  ;;  %v519_v52 = vsel %vm423_vm14, %v2392_v27, %v487_v10  ;;  %v520_v25 = vsel %vm424_vm15, %v2395_v28, %v488_v49  ;;  %v459_v53 = vmul.f32 0.25, %v395_v23  ;;  %vm427_vm3 = vcmp.gt.f32.partialorder %v395_v23, 0.5 }
  0x58   : > { %552 = vst.msk [vmem:[#allocation2 + $0xd8] sm:$0xff] %vm524_vm2, %v519_v52  ;;  %553 = vst.msk [vmem:[#allocation2 + $0xe0] sm:$0xff] %vm524_vm2, %v520_v25  ;;  %v521_v11 = vsel %vm425_vm0, %v2398_v29, %v489_v50  ;;  %v490_v26 = vadd.f32 %v458_v51, %v2401_v30 }
  0x59   : > { %554 = vst.msk [vmem:[#allocation2 + $0xe8] sm:$0xff] %vm524_vm2, %v521_v11  ;;  %v491_v54 = vadd.f32 %v459_v53, %v2404_v31 }
  0x5a   : > { %v522_v55 = vsel %vm426_vm1, %v2401_v30, %v490_v26 }
  0x5b   : > { %555 = vst.msk [vmem:[#allocation2 + $0xf0] sm:$0xff] %vm524_vm2, %v522_v55  ;;  %v523_v27 = vsel %vm427_vm3, %v2404_v31, %v491_v54 }
  0x5c   : > { %556 = vst.msk [vmem:[#allocation2 + $0xf8] sm:$0xff] %vm524_vm2, %v523_v27 }
  0x5d PF: > { %v2612_v58 = vld [vmem:[#allocation2 + $0x28] sm:$0xff]  ;;  %v2617_v30 = vld [vmem:[#allocation2 + $0x30] sm:$0xff]  ;;  %v2619_v31 = vld [vmem:[#allocation2 + $0x38] sm:$0xff]  ;;  %v3402_v39 = vmov 0.0  }
  0x5e   : > { %v2621_v59 = vld [vmem:[#allocation2 + $0x40] sm:$0xff]  ;;  %v566_v60 = vld [vmem:[#allocation2 + $0x48] sm:$0xff]  ;;  %v567_v61 = vld [vmem:[#allocation2 + $0x50] sm:$0xff] }
  0x5f   : > { %v2626_v13 = vld [vmem:[#allocation2 + $0x58] sm:$0xff]  ;;  %v569_v62 = vld [vmem:[#allocation2 + $0x60] sm:$0xff]  ;;  %v570_v63 = vld [vmem:[#allocation2 + $0x68] sm:$0xff] }
  0x60   : > { %v571_v0 = vld [vmem:[#allocation2 + $0x70] sm:$0xff]  ;;  %v572_v14 = vld [vmem:[#allocation2 + $0x78] sm:$0xff]  ;;  %v573_v1 = vld [vmem:[#allocation2 + $0x80] sm:$0xff] }
  0x61   : > { %v574_v2 = vld [vmem:[#allocation2 + $0x88] sm:$0xff]  ;;  %v575_v15 = vld [vmem:[#allocation2 + $0x90] sm:$0xff]  ;;  %v576_v16 = vld [vmem:[#allocation2 + $0x98] sm:$0xff] }
  0x62   : > { %v2602_v28 = vld [vmem:[#allocation2] sm:$0xff]  ;;  %v2604_v56 = vld [vmem:[#allocation2 + $0x8] sm:$0xff]  ;;  %v579_v32 = vld [vmem:[#allocation2 + $0xb0] sm:$0xff]  ;;  %vm607_vm11 = vcmp.gt.f32.partialorder %v575_v15, 0.5  ;;  %vm608_vm12 = vcmp.gt.f32.partialorder %v576_v16, 0.5 }
  0x63   : > { %v2606_v29 = vld [vmem:[#allocation2 + $0x10] sm:$0xff]  ;;  %v2608_v57 = vld [vmem:[#allocation2 + $0x18] sm:$0xff]  ;;  %vm589_vm4 = vcmp.gt.f32.partialorder %v2602_v28, 0.5  ;;  %vm590_vm5 = vcmp.gt.f32.partialorder %v2604_v56, 0.5  ;;  %v577_v3 = vld [vmem:[#allocation2 + $0xa0] sm:$0xff]  ;;  %v2736_v51 = vsel %vm607_vm11, 1.0, %v3402_v39 }
  0x64   : > { %v2610_v12 = vld [vmem:[#allocation2 + $0x20] sm:$0xff]  ;;  %vm591_vm6 = vcmp.gt.f32.partialorder %v2606_v29, 0.5  ;;  %vm592_vm2 = vcmp.gt.f32.partialorder %v2608_v57, 0.5  ;;  %v578_v4 = vld [vmem:[#allocation2 + $0xa8] sm:$0xff]  ;;  %v580_v33 = vld [vmem:[#allocation2 + $0xb8] sm:$0xff]  ;;  %vm609_vm13 = vcmp.gt.f32.partialorder %v577_v3, 0.5 }
  0x65   : > { %v581_v34 = vld [vmem:[#allocation2 + $0xc0] sm:$0xff]  ;;  %v582_v17 = vld [vmem:[#allocation2 + $0xc8] sm:$0xff]  ;;  %v583_v35 = vld [vmem:[#allocation2 + $0xd0] sm:$0xff]  ;;  %vm612_vm15 = vcmp.gt.f32.partialorder %v580_v33, 0.5  ;;  %v2635_v6 = vsel %vm589_vm4, 1.0, %v3402_v39  ;;  %v2640_v40 = vsel %vm590_vm5, 1.0, %v3402_v39 }
  0x66   : > { %v584_v36 = vld [vmem:[#allocation2 + $0xd8] sm:$0xff]  ;;  %v585_v5 = vld [vmem:[#allocation2 + $0xe0] sm:$0xff]  ;;  %v586_v37 = vld [vmem:[#allocation2 + $0xe8] sm:$0xff]  ;;  %vm613_vm1 = vcmp.gt.f32.partialorder %v581_v34, 0.5  ;;  %vm614_vm0 = vcmp.gt.f32.partialorder %v582_v17, 0.5  ;;  %vm615_vm3 = vcmp.gt.f32.partialorder %v583_v35, 0.5 }
  0x67   : > { %v587_v18 = vld [vmem:[#allocation2 + $0xf0] sm:$0xff]  ;;  %v588_v38 = vld [vmem:[#allocation2 + $0xf8] sm:$0xff]  ;;  %vm616_vm9 = vcmp.gt.f32.partialorder %v584_v36, 0.5  ;;  %vm617_vm10 = vcmp.gt.f32.partialorder %v585_v5, 0.5  ;;  %vm618_vm7 = vcmp.gt.f32.partialorder %v586_v37, 0.5  ;;  %v2645_v19 = vsel %vm591_vm6, 1.0, %v3402_v39 }
  0x68   : > { %vm619_vm14 = vcmp.gt.f32.partialorder %v587_v18, 0.5  ;;  %vm620_vm8 = vcmp.gt.f32.partialorder %v588_v38, 0.5  ;;  %v2650_v41 = vld [vmem:[%s3398_s2] sm:$0xf]  ;;  %v2655_v42 = vsel %vm592_vm2, 1.0, %v3402_v39  ;;  %vm3430_vm4 = vcmp.gt.f32.partialorder %v2610_v12, 0.5 }
  0x69   : > { %v2660_v43 = vsel %vm3430_vm4, 1.0, %v3402_v39  ;;  %vm3431_vm5 = vcmp.gt.f32.partialorder %v2612_v58, 0.5  ;;  %vm3432_vm6 = vcmp.gt.f32.partialorder %v2617_v30, 0.5  ;;  %v2675_v44 = vld [vmem:[%s3398_s2 + $0x4] sm:$0xf]  ;;  %vm3433_vm2 = vcmp.gt.f32.partialorder %v2619_v31, 0.5 }
  0x6a   : > { %v2665_v20 = vsel %vm3431_vm5, 1.0, %v3402_v39  ;;  %v2670_v7 = vsel %vm3432_vm6, 1.0, %v3402_v39  ;;  %v2680_v21 = vsel %vm3433_vm2, 1.0, %v3402_v39  ;;  %vm3434_vm4 = vcmp.gt.f32.partialorder %v2621_v59, 0.5  ;;  %v2698_v8 = vld [vmem:[%s3398_s2 + $0x8] sm:$0xf] }
  0x6b   : > { %v2685_v22 = vsel %vm3434_vm4, 1.0, %v3402_v39  ;;  %vm3436_vm5 = vcmp.gt.f32.partialorder %v566_v60, 0.5  ;;  %vm3438_vm6 = vcmp.gt.f32.partialorder %v567_v61, 0.5  ;;  %vm3440_vm2 = vcmp.gt.f32.partialorder %v2626_v13, 0.5  ;;  %v2720_v10 = vld [vmem:[%s3398_s2 + $0xc] sm:$0xf] }
  0x6c   : > { %3435 = vst [vmem:[#allocation7_spill] sm:$0xff] %v2685_v22  ;;  %v2689_v45 = vsel %vm3436_vm5, 1.0, %v3402_v39  ;;  %v2693_v46 = vsel %vm3438_vm6, 1.0, %v3402_v39  ;;  %v2703_v47 = vsel %vm3440_vm2, 1.0, %v3402_v39  ;;  %vm3442_vm4 = vcmp.gt.f32.partialorder %v569_v62, 0.5  ;;  %3454 = vst [vmem:[#allocation17_spill] sm:$0xff] %v2736_v51 }
  0x6d   : > { %3437 = vst [vmem:[#allocation8_spill] sm:$0xff] %v2689_v45  ;;  %3439 = vst [vmem:[#allocation9_spill] sm:$0xff] %v2693_v46  ;;  %v2707_v48 = vsel %vm3442_vm4, 1.0, %v3402_v39  ;;  %vm3444_vm5 = vcmp.gt.f32.partialorder %v570_v63, 0.5  ;;  %vm3446_vm6 = vcmp.gt.f32.partialorder %v571_v0, 0.5  ;;  %vm3448_vm2 = vcmp.gt.f32.partialorder %v572_v14, 0.5 }
  0x6e   : > { %3441 = vst [vmem:[#allocation10_spill] sm:$0xff] %v2703_v47  ;;  %3443 = vst [vmem:[#allocation11_spill] sm:$0xff] %v2707_v48  ;;  %v2711_v23 = vsel %vm3444_vm5, 1.0, %v3402_v39  ;;  %v2715_v9 = vsel %vm3446_vm6, 1.0, %v3402_v39  ;;  %v2724_v49 = vsel %vm3448_vm2, 1.0, %v3402_v39  ;;  %vm3450_vm4 = vcmp.gt.f32.partialorder %v573_v1, 0.5 }
  0x6f   : > { %3445 = vst [vmem:[#allocation12_spill] sm:$0xff] %v2711_v23  ;;  %3447 = vst [vmem:[#allocation13_spill] sm:$0xff] %v2715_v9  ;;  %v2728_v24 = vsel %vm3450_vm4, 1.0, %v3402_v39  ;;  %vm3452_vm5 = vcmp.gt.f32.partialorder %v574_v2, 0.5  ;;  %v2739_v52 = vld [vmem:[%s2308_s15] sm:$0xff]  ;;  %v2742_v25 = vld [vmem:[%s2308_s15 + $0x8] sm:$0xff] }
  0x70   : > { %3449 = vst [vmem:[#allocation14_spill] sm:$0xff] %v2724_v49  ;;  %3451 = vst [vmem:[#allocation15_spill] sm:$0xff] %v2728_v24  ;;  %v2732_v50 = vsel %vm3452_vm5, 1.0, %v3402_v39  ;;  %v2746_v53 = vsel %vm608_vm12, 1.0, %v3402_v39  ;;  %v2750_v11 = vsel %vm609_vm13, 1.0, %v3402_v39  ;;  %vm3457_vm6 = vcmp.gt.f32.partialorder %v578_v4, 0.5 }
  0x71   : > { %3453 = vst [vmem:[#allocation16_spill] sm:$0xff] %v2732_v50  ;;  %3455 = vst [vmem:[#allocation18_spill] sm:$0xff] %v2746_v53  ;;  %v2754_v26 = vsel %vm3457_vm6, 1.0, %v3402_v39  ;;  %vm3459_vm11 = vcmp.gt.f32.partialorder %v579_v32, 0.5  ;;  %v2761_v55 = vld [vmem:[%s2308_s15 + $0x10] sm:$0xff]  ;;  %v2764_v27 = vld [vmem:[%s2308_s15 + $0x18] sm:$0xff] }
  0x72   : > { %3456 = vst [vmem:[#allocation19_spill] sm:$0xff] %v2750_v11  ;;  %3458 = vst [vmem:[#allocation20_spill] sm:$0xff] %v2754_v26  ;;  %v2758_v54 = vsel %vm3459_vm11, 1.0, %v3402_v39  ;;  %v2768_v28 = vsel %vm612_vm15, 1.0, %v3402_v39  ;;  %v2772_v56 = vsel %vm613_vm1, 1.0, %v3402_v39  ;;  %v2776_v29 = vsel %vm614_vm0, 1.0, %v3402_v39 }
  0x73   : > { %3460 = vst [vmem:[#allocation21_spill] sm:$0xff] %v2758_v54  ;;  %3461 = vst [vmem:[#allocation22_spill] sm:$0xff] %v2768_v28  ;;  %v2780_v57 = vsel %vm615_vm3, 1.0, %v3402_v39  ;;  %v2783_v12 = vld [vmem:[%s2308_s15 + $0x20] sm:$0xff]  ;;  %v2786_v58 = vld [vmem:[%s2308_s15 + $0x28] sm:$0xff]  ;;  %v2790_v30 = vsel %vm616_vm9, 1.0, %v3402_v39 }
  0x74   : > { %3462 = vst [vmem:[#allocation23_spill] sm:$0xff] %v2772_v56  ;;  %3463 = vst [vmem:[#allocation24_spill] sm:$0xff] %v2776_v29  ;;  %v2794_v31 = vsel %vm617_vm10, 1.0, %v3402_v39  ;;  %v2798_v59 = vsel %vm618_vm7, 1.0, %v3402_v39  ;;  %v2802_v60 = vsel %vm619_vm14, 1.0, %v3402_v39  ;;  %v2805_v61 = vld [vmem:[%s2308_s15 + $0x30] sm:$0xff] }
  0x75   : > { %3464 = vst [vmem:[#allocation25_spill] sm:$0xff] %v2780_v57  ;;  %3465 = vst [vmem:[#allocation26_spill] sm:$0xff] %v2790_v30  ;;  %v2808_v13 = vld [vmem:[%s2308_s15 + $0x38] sm:$0xff]  ;;  %v2812_v62 = vsel %vm620_vm8, 1.0, %v3402_v39  ;;  %v2821_v1 = vld [vmem:[%s2308_s15 + $0x40] sm:$0xff]  ;;  %vm740_vm7 = vcmask (!%p1760_p0), 261120  }
  0x76   : > { %3466 = vst [vmem:[#allocation27_spill] sm:$0xff] %v2794_v31  ;;  %3467 = vst [vmem:[#allocation28_spill] sm:$0xff] %v2798_v59  ;;  %v2824_v2 = vld [vmem:[%s2308_s15 + $0x48] sm:$0xff]  ;;  %v2827_v15 = vld [vmem:[%s2308_s15 + $0x50] sm:$0xff] }
  0x77   : > { %3468 = vst [vmem:[#allocation29_spill] sm:$0xff] %v2802_v60  ;;  %3469 = vst [vmem:[#allocation30_spill] sm:$0xff] %v2812_v62  ;;  %v2838_v33 = vld [vmem:[%s2308_s15 + $0x58] sm:$0xff]  ;;  %v2841_v34 = vld [vmem:[%s2308_s15 + $0x60] sm:$0xff] }
  0x78   : > { %v2844_v17 = vld [vmem:[%s2308_s15 + $0x68] sm:$0xff]  ;;  %v2855_v18 = vld [vmem:[%s2308_s15 + $0x70] sm:$0xff]  ;;  %v2858_v38 = vld [vmem:[%s2308_s15 + $0x78] sm:$0xff]  ;;  %739 = sbr.rel (%p1760_p0) target bundleno = 139 (0x8b), region = 52  ;;  %741 = vst.msk [vmem:[#allocation3] sm:$0xff] (!%p1760_p0), %vm740_vm7, %v2739_v52 }
  0x79   : > { %v2861_v35 = vld [vmem:[%s2308_s15 + $0x80] sm:$0xff]  ;;  %v2872_v4 = vld [vmem:[%s2308_s15 + $0x88] sm:$0xff]  ;;  %v2875_v3 = vld [vmem:[%s2308_s15 + $0x90] sm:$0xff]  ;;  %742 = vst.msk [vmem:[#allocation3 + $0x8] sm:$0xff] (!%p1760_p0), %vm740_vm7, %v2742_v25 }
  0x7a   : > { %v2878_v16 = vld [vmem:[%s2308_s15 + $0x98] sm:$0xff]  ;;  %v2883_v14 = vld [vmem:[%s2308_s15 + $0xa0] sm:$0xff]  ;;  %v2886_v5 = vld [vmem:[%s2308_s15 + $0xa8] sm:$0xff]  ;;  %743 = vst.msk [vmem:[#allocation3 + $0x10] sm:$0xff] (!%p1760_p0), %vm740_vm7, %v2761_v55 }
  0x7b   : > { %v2889_v0 = vld [vmem:[%s2308_s15 + $0xb0] sm:$0xff]  ;;  %v2892_v37 = vld [vmem:[%s2308_s15 + $0xb8] sm:$0xff]  ;;  %v2895_v39 = vld [vmem:[%s2308_s15 + $0xc0] sm:$0xff]  ;;  %744 = vst.msk [vmem:[#allocation3 + $0x18] sm:$0xff] (!%p1760_p0), %vm740_vm7, %v2764_v27 }
  0x7c   : > { %v2898_v32 = vld [vmem:[%s2308_s15 + $0xc8] sm:$0xff]  ;;  %v2901_v63 = vld [vmem:[%s2308_s15 + $0xd0] sm:$0xff]  ;;  %v2904_v31 = vld [vmem:[%s2308_s15 + $0xd8] sm:$0xff]  ;;  %745 = vst.msk [vmem:[#allocation3 + $0x20] sm:$0xff] (!%p1760_p0), %vm740_vm7, %v2783_v12 }
  0x7d   : > { %v2907_v59 = vld [vmem:[%s2308_s15 + $0xe0] sm:$0xff]  ;;  %v2910_v57 = vld [vmem:[%s2308_s15 + $0xe8] sm:$0xff]  ;;  %v2913_v36 = vld [vmem:[%s2308_s15 + $0xf0] sm:$0xff]  ;;  %746 = vst.msk [vmem:[#allocation3 + $0x28] sm:$0xff] (!%p1760_p0), %vm740_vm7, %v2786_v58 }
  0x7e   : > { %v2916_v60 = vld [vmem:[%s2308_s15 + $0xf8] sm:$0xff]  ;;  %747 = vst.msk [vmem:[#allocation3 + $0x30] sm:$0xff] (!%p1760_p0), %vm740_vm7, %v2805_v61  ;;  %748 = vst.msk [vmem:[#allocation3 + $0x38] sm:$0xff] (!%p1760_p0), %vm740_vm7, %v2808_v13 }
  0x7f   : > { %749 = vst.msk [vmem:[#allocation3 + $0x40] sm:$0xff] %vm740_vm7, %v2821_v1  ;;  %750 = vst.msk [vmem:[#allocation3 + $0x48] sm:$0xff] %vm740_vm7, %v2824_v2 }
  0x80   : > { %751 = vst.msk [vmem:[#allocation3 + $0x50] sm:$0xff] %vm740_vm7, %v2827_v15  ;;  %752 = vst.msk [vmem:[#allocation3 + $0x58] sm:$0xff] %vm740_vm7, %v2838_v33 }
  0x81   : > { %753 = vst.msk [vmem:[#allocation3 + $0x60] sm:$0xff] %vm740_vm7, %v2841_v34  ;;  %754 = vst.msk [vmem:[#allocation3 + $0x68] sm:$0xff] %vm740_vm7, %v2844_v17 }
  0x82   : > { %755 = vst.msk [vmem:[#allocation3 + $0x70] sm:$0xff] %vm740_vm7, %v2855_v18  ;;  %756 = vst.msk [vmem:[#allocation3 + $0x78] sm:$0xff] %vm740_vm7, %v2858_v38 }
  0x83   : > { %757 = vst.msk [vmem:[#allocation3 + $0x80] sm:$0xff] %vm740_vm7, %v2861_v35  ;;  %758 = vst.msk [vmem:[#allocation3 + $0x88] sm:$0xff] %vm740_vm7, %v2872_v4 }
  0x84   : > { %759 = vst.msk [vmem:[#allocation3 + $0x90] sm:$0xff] %vm740_vm7, %v2875_v3  ;;  %760 = vst.msk [vmem:[#allocation3 + $0x98] sm:$0xff] %vm740_vm7, %v2878_v16 }
  0x85   : > { %761 = vst.msk [vmem:[#allocation3 + $0xa0] sm:$0xff] %vm740_vm7, %v2883_v14  ;;  %762 = vst.msk [vmem:[#allocation3 + $0xa8] sm:$0xff] %vm740_vm7, %v2886_v5 }
  0x86   : > { %763 = vst.msk [vmem:[#allocation3 + $0xb0] sm:$0xff] %vm740_vm7, %v2889_v0  ;;  %764 = vst.msk [vmem:[#allocation3 + $0xb8] sm:$0xff] %vm740_vm7, %v2892_v37 }
  0x87   : > { %765 = vst.msk [vmem:[#allocation3 + $0xc0] sm:$0xff] %vm740_vm7, %v2895_v39  ;;  %766 = vst.msk [vmem:[#allocation3 + $0xc8] sm:$0xff] %vm740_vm7, %v2898_v32 }
  0x88   : > { %767 = vst.msk [vmem:[#allocation3 + $0xd0] sm:$0xff] %vm740_vm7, %v2901_v63  ;;  %768 = vst.msk [vmem:[#allocation3 + $0xd8] sm:$0xff] %vm740_vm7, %v2904_v31 }
  0x89   : > { %769 = vst.msk [vmem:[#allocation3 + $0xe0] sm:$0xff] %vm740_vm7, %v2907_v59  ;;  %770 = vst.msk [vmem:[#allocation3 + $0xe8] sm:$0xff] %vm740_vm7, %v2910_v57 }
  0x8a   : > { %771 = vst.msk [vmem:[#allocation3 + $0xf0] sm:$0xff] %vm740_vm7, %v2913_v36  ;;  %772 = vst.msk [vmem:[#allocation3 + $0xf8] sm:$0xff] %vm740_vm7, %v2916_v60 }
  0x8b PF: > { %775 = sbr.rel (%p1761_p1) target bundleno = 177 (0xb1), region = 56  ;;  %v776_v62 = vld [vmem:[#allocation3] sm:$0xff] (!%p1761_p1)  ;;  %vm936_vm9 = vcmask (!%p1761_p1), 261120  }
  0x8c   : > { %v777_v30 = vld [vmem:[#allocation3 + $0x8] sm:$0xff] (!%p1761_p1)  ;;  %vm808_vm8 = vcmp.gt.f32.partialorder (!%p1761_p1), %v776_v62, 0.5  ;;  %v840_v29 = vmul.f32 (!%p1761_p1), 0.25, %v776_v62 }
  0x8d   : > { %v778_v56 = vld [vmem:[#allocation3 + $0x10] sm:$0xff] (!%p1761_p1)  ;;  %v841_v54 = vmul.f32 (!%p1761_p1), 0.25, %v777_v30  ;;  %vm809_vm10 = vcmp.gt.f32.partialorder (!%p1761_p1), %v777_v30, 0.5 }
  0x8e   : > { %v779_v28 = vld [vmem:[#allocation3 + $0x18] sm:$0xff] (!%p1761_p1)  ;;  %vm810_vm12 = vcmp.gt.f32.partialorder (!%p1761_p1), %v778_v56, 0.5  ;;  %v842_v26 = vmul.f32 (!%p1761_p1), 0.25, %v778_v56  ;;  %v872_v24 = vadd.f32 (!%p1761_p1), %v840_v29, %v2739_v52  ;;  %v786_v30 = vld [vmem:[#allocation3 + $0x50] sm:$0xff] (!%p1761_p1) }
  0x8f   : > { %v780_v11 = vld [vmem:[#allocation3 + $0x20] sm:$0xff] (!%p1761_p1)  ;;  %v843_v51 = vmul.f32 (!%p1761_p1), 0.25, %v779_v28  ;;  %v873_v50 = vadd.f32 (!%p1761_p1), %v841_v54, %v2742_v25  ;;  %vm811_vm13 = vcmp.gt.f32.partialorder (!%p1761_p1), %v779_v28, 0.5  ;;  %vm818_vm4 = vcmp.gt.f32.partialorder (!%p1761_p1), %v786_v30, 0.5 }
  0x90   : > { %v781_v53 = vld [vmem:[#allocation3 + $0x28] sm:$0xff] (!%p1761_p1)  ;;  %v844_v9 = vmul.f32 (!%p1761_p1), 0.25, %v780_v11  ;;  %v874_v48 = vadd.f32 (!%p1761_p1), %v842_v26, %v2761_v55  ;;  %vm812_vm14 = vcmp.gt.f32.partialorder (!%p1761_p1), %v780_v11, 0.5  ;;  %v904_v22 = vsel (!%p1761_p1), %vm808_vm8, %v2739_v52, %v872_v24 }
  0x91   : > { %v782_v49 = vld [vmem:[#allocation3 + $0x30] sm:$0xff] (!%p1761_p1)  ;;  %v875_v23 = vadd.f32 (!%p1761_p1), %v843_v51, %v2764_v27  ;;  %v845_v46 = vmul.f32 (!%p1761_p1), 0.25, %v781_v53  ;;  %v783_v47 = vld [vmem:[#allocation3 + $0x38] sm:$0xff] (!%p1761_p1)  ;;  %v905_v45 = vsel (!%p1761_p1), %vm809_vm10, %v2742_v25, %v873_v50  ;;  %vm813_vm15 = vcmp.gt.f32.partialorder (!%p1761_p1), %v781_v53, 0.5  ;;  %937 = vst.msk [vmem:[#allocation3] sm:$0xff] (!%p1761_p1), %vm936_vm9, %v904_v22  ;;  %v785_v52 = vld [vmem:[#allocation3 + $0x48] sm:$0xff] (!%p1761_p1) }
  0x92   : > { %v876_v29 = vadd.f32 %v844_v9, %v2783_v12  ;;  %v784_v54 = vld [vmem:[#allocation3 + $0x40] sm:$0xff]  ;;  %938 = vst.msk [vmem:[#allocation3 + $0x8] sm:$0xff] %vm936_vm9, %v905_v45  ;;  %v906_v51 = vsel %vm810_vm12, %v2761_v55, %v874_v48  ;;  %v846_v24 = vmul.f32 0.25, %v782_v49  ;;  %vm814_vm0 = vcmp.gt.f32.partialorder %v782_v49, 0.5  ;;  %v787_v9 = vld [vmem:[#allocation3 + $0x58] sm:$0xff]  ;;  %v789_v53 = vld [vmem:[#allocation3 + $0x68] sm:$0xff] }
  0x93   : > { %v907_v26 = vsel %vm811_vm13, %v2764_v27, %v875_v23  ;;  %v877_v62 = vadd.f32 %v845_v46, %v2786_v58  ;;  %939 = vst.msk [vmem:[#allocation3 + $0x10] sm:$0xff] %vm936_vm9, %v906_v51  ;;  %vm815_vm1 = vcmp.gt.f32.partialorder %v783_v47, 0.5  ;;  %v847_v45 = vmul.f32 0.25, %v783_v47  ;;  %v788_v49 = vld [vmem:[#allocation3 + $0x60] sm:$0xff] }
  0x94   : > { %940 = vst.msk [vmem:[#allocation3 + $0x18] sm:$0xff] %vm936_vm9, %v907_v26  ;;  %v908_v22 = vsel %vm812_vm14, %v2783_v12, %v876_v29  ;;  %v878_v46 = vadd.f32 %v846_v24, %v2805_v61  ;;  %vm816_vm3 = vcmp.gt.f32.partialorder %v784_v54, 0.5  ;;  %v848_v23 = vmul.f32 0.25, %v784_v54  ;;  %v790_v29 = vld [vmem:[#allocation3 + $0x70] sm:$0xff]  ;;  %v792_v24 = vld [vmem:[#allocation3 + $0x80] sm:$0xff] }
  0x95   : > { %941 = vst.msk [vmem:[#allocation3 + $0x20] sm:$0xff] %vm936_vm9, %v908_v22  ;;  %v909_v48 = vsel %vm813_vm15, %v2786_v58, %v877_v62  ;;  %v879_v50 = vadd.f32 %v847_v45, %v2808_v13  ;;  %vm817_vm2 = vcmp.gt.f32.partialorder %v785_v52, 0.5  ;;  %v849_v25 = vmul.f32 0.25, %v785_v52  ;;  %v791_v62 = vld [vmem:[#allocation3 + $0x78] sm:$0xff]  ;;  %v793_v45 = vld [vmem:[#allocation3 + $0x88] sm:$0xff] }
  0x96   : > { %942 = vst.msk [vmem:[#allocation3 + $0x28] sm:$0xff] %vm936_vm9, %v909_v48  ;;  %v850_v11 = vmul.f32 0.25, %v786_v30  ;;  %v910_v55 = vsel %vm814_vm0, %v2805_v61, %v878_v46  ;;  %v880_v27 = vadd.f32 %v848_v23, %v2821_v1  ;;  %v851_v28 = vmul.f32 0.25, %v787_v9  ;;  %v794_v30 = vld [vmem:[#allocation3 + $0x90] sm:$0xff] }
  0x97   : > { %943 = vst.msk [vmem:[#allocation3 + $0x30] sm:$0xff] %vm936_vm9, %v910_v55  ;;  %v911_v56 = vsel %vm815_vm1, %v2808_v13, %v879_v50  ;;  %v881_v12 = vadd.f32 %v849_v25, %v2824_v2  ;;  %vm819_vm5 = vcmp.gt.f32.partialorder %v787_v9, 0.5  ;;  %vm820_vm6 = vcmp.gt.f32.partialorder %v788_v49, 0.5  ;;  %v796_v55 = vld [vmem:[#allocation3 + $0xa0] sm:$0xff] }
  0x98   : > { %v882_v58 = vadd.f32 %v850_v11, %v2827_v15  ;;  %944 = vst.msk [vmem:[#allocation3 + $0x38] sm:$0xff] %vm936_vm9, %v911_v56  ;;  %v912_v61 = vsel %vm816_vm3, %v2821_v1, %v880_v27  ;;  %v883_v51 = vadd.f32 %v851_v28, %v2838_v33  ;;  %v852_v26 = vmul.f32 0.25, %v788_v49  ;;  %v797_v28 = vld [vmem:[#allocation3 + $0xa8] sm:$0xff]  ;;  %v798_v56 = vld [vmem:[#allocation3 + $0xb0] sm:$0xff] }
  0x99   : > { %945 = vst.msk [vmem:[#allocation3 + $0x40] sm:$0xff] %vm936_vm9, %v912_v61  ;;  %v913_v47 = vsel %vm817_vm2, %v2824_v2, %v881_v12  ;;  %vm821_vm11 = vcmp.gt.f32.partialorder %v789_v53, 0.5  ;;  %v853_v22 = vmul.f32 0.25, %v789_v53  ;;  %vm822_vm7 = vcmp.gt.f32.partialorder %v790_v29, 0.5 }
  0x9a   : > { %v914_v13 = vsel %vm818_vm4, %v2827_v15, %v882_v58  ;;  %946 = vst.msk [vmem:[#allocation3 + $0x48] sm:$0xff] %vm936_vm9, %v913_v47  ;;  %v915_v1 = vsel %vm819_vm5, %v2838_v33, %v883_v51  ;;  %v884_v54 = vadd.f32 %v852_v26, %v2841_v34  ;;  %v854_v48 = vmul.f32 0.25, %v790_v29  ;;  %v795_v33 = vld [vmem:[#allocation3 + $0x98] sm:$0xff]  ;;  %v800_v26 = vld [vmem:[#allocation3 + $0xc0] sm:$0xff] }
  0x9b   : > { %947 = vst.msk [vmem:[#allocation3 + $0x50] sm:$0xff] %vm936_vm9, %v914_v13  ;;  %948 = vst.msk [vmem:[#allocation3 + $0x58] sm:$0xff] %vm936_vm9, %v915_v1  ;;  %v885_v2 = vadd.f32 %v853_v22, %v2844_v17  ;;  %vm823_vm8 = vcmp.gt.f32.partialorder %v791_v62, 0.5  ;;  %v855_v15 = vmul.f32 0.25, %v791_v62  ;;  %v856_v52 = vmul.f32 0.25, %v792_v24  ;;  %v799_v58 = vld [vmem:[#allocation3 + $0xb8] sm:$0xff] }
  0x9c   : > { %v916_v46 = vsel %vm820_vm6, %v2841_v34, %v884_v54  ;;  %v886_v23 = vadd.f32 %v854_v48, %v2855_v18  ;;  %vm824_vm10 = vcmp.gt.f32.partialorder %v792_v24, 0.5  ;;  %v857_v9 = vmul.f32 0.25, %v793_v45  ;;  %v802_v1 = vld [vmem:[#allocation3 + $0xd0] sm:$0xff] }
  0x9d   : > { %949 = vst.msk [vmem:[#allocation3 + $0x60] sm:$0xff] %vm936_vm9, %v916_v46  ;;  %v917_v50 = vsel %vm821_vm11, %v2844_v17, %v885_v2  ;;  %v887_v25 = vadd.f32 %v855_v15, %v2858_v38  ;;  %v888_v11 = vadd.f32 %v856_v52, %v2861_v35  ;;  %vm825_vm12 = vcmp.gt.f32.partialorder %v793_v45, 0.5  ;;  %v803_v2 = vld [vmem:[#allocation3 + $0xd8] sm:$0xff]  ;;  %v804_v15 = vld [vmem:[#allocation3 + $0xe0] sm:$0xff]  ;;  %v805_v46 = vld [vmem:[#allocation3 + $0xe8] sm:$0xff] }
  0x9e   : > { %950 = vst.msk [vmem:[#allocation3 + $0x68] sm:$0xff] %vm936_vm9, %v917_v50  ;;  %v918_v34 = vsel %vm822_vm7, %v2855_v18, %v886_v23  ;;  %v889_v49 = vadd.f32 %v857_v9, %v2872_v4  ;;  %vm826_vm13 = vcmp.gt.f32.partialorder %v794_v30, 0.5  ;;  %v858_v27 = vmul.f32 0.25, %v794_v30  ;;  %v806_v50 = vld [vmem:[#allocation3 + $0xf0] sm:$0xff] }
  0x9f   : > { %951 = vst.msk [vmem:[#allocation3 + $0x70] sm:$0xff] %vm936_vm9, %v918_v34  ;;  %v919_v17 = vsel %vm823_vm8, %v2858_v38, %v887_v25  ;;  %v920_v53 = vsel %vm824_vm10, %v2861_v35, %v888_v11  ;;  %vm827_vm14 = vcmp.gt.f32.partialorder %v795_v33, 0.5  ;;  %v859_v12 = vmul.f32 0.25, %v795_v33 }
  0xa0   : > { %952 = vst.msk [vmem:[#allocation3 + $0x78] sm:$0xff] %vm936_vm9, %v919_v17  ;;  %953 = vst.msk [vmem:[#allocation3 + $0x80] sm:$0xff] %vm936_vm9, %v920_v53  ;;  %v921_v18 = vsel %vm825_vm12, %v2872_v4, %v889_v49  ;;  %v890_v29 = vadd.f32 %v858_v27, %v2875_v3  ;;  %vm828_vm15 = vcmp.gt.f32.partialorder %v796_v55, 0.5  ;;  %v860_v61 = vmul.f32 0.25, %v796_v55  ;;  %v801_v4 = vld [vmem:[#allocation3 + $0xc8] sm:$0xff] }
  0xa1   : > { %954 = vst.msk [vmem:[#allocation3 + $0x88] sm:$0xff] %vm936_vm9, %v921_v18  ;;  %v891_v38 = vadd.f32 %v859_v12, %v2878_v16  ;;  %vm829_vm0 = vcmp.gt.f32.partialorder %v797_v28, 0.5  ;;  %v861_v35 = vmul.f32 0.25, %v797_v28  ;;  %v862_v51 = vmul.f32 0.25, %v798_v56 }
  0xa2   : > { %v922_v62 = vsel %vm826_vm13, %v2875_v3, %v890_v29  ;;  %v892_v24 = vadd.f32 %v860_v61, %v2883_v14  ;;  %vm830_vm1 = vcmp.gt.f32.partialorder %v798_v56, 0.5  ;;  %v863_v47 = vmul.f32 0.25, %v799_v58 }
  0xa3   : > { %955 = vst.msk [vmem:[#allocation3 + $0x90] sm:$0xff] %vm936_vm9, %v922_v62  ;;  %v923_v13 = vsel %vm827_vm14, %v2878_v16, %v891_v38  ;;  %v893_v22 = vadd.f32 %v861_v35, %v2886_v5  ;;  %v894_v45 = vadd.f32 %v862_v51, %v2889_v0  ;;  %vm831_vm3 = vcmp.gt.f32.partialorder %v799_v58, 0.5 }
  0xa4   : > { %956 = vst.msk [vmem:[#allocation3 + $0x98] sm:$0xff] %vm936_vm9, %v923_v13  ;;  %v924_v3 = vsel %vm828_vm15, %v2883_v14, %v892_v24  ;;  %v895_v54 = vadd.f32 %v863_v47, %v2892_v37  ;;  %vm832_vm2 = vcmp.gt.f32.partialorder %v800_v26, 0.5  ;;  %v864_v48 = vmul.f32 0.25, %v800_v26 }
  0xa5   : > { %957 = vst.msk [vmem:[#allocation3 + $0xa0] sm:$0xff] %vm936_vm9, %v924_v3  ;;  %v925_v16 = vsel %vm829_vm0, %v2886_v5, %v893_v22  ;;  %v926_v52 = vsel %vm830_vm1, %v2889_v0, %v894_v45  ;;  %vm833_vm4 = vcmp.gt.f32.partialorder %v801_v4, 0.5  ;;  %v865_v30 = vmul.f32 0.25, %v801_v4 }
  0xa6   : > { %958 = vst.msk [vmem:[#allocation3 + $0xa8] sm:$0xff] %vm936_vm9, %v925_v16  ;;  %959 = vst.msk [vmem:[#allocation3 + $0xb0] sm:$0xff] %vm936_vm9, %v926_v52  ;;  %v927_v14 = vsel %vm831_vm3, %v2892_v37, %v895_v54  ;;  %v896_v23 = vadd.f32 %v864_v48, %v2895_v39  ;;  %vm834_vm5 = vcmp.gt.f32.partialorder %v802_v1, 0.5  ;;  %v866_v9 = vmul.f32 0.25, %v802_v1  ;;  %v807_v37 = vld [vmem:[#allocation3 + $0xf8] sm:$0xff] }
  0xa7   : > { %960 = vst.msk [vmem:[#allocation3 + $0xb8] sm:$0xff] %vm936_vm9, %v927_v14  ;;  %v897_v5 = vadd.f32 %v865_v30, %v2898_v32  ;;  %vm835_vm6 = vcmp.gt.f32.partialorder %v803_v2, 0.5  ;;  %v867_v0 = vmul.f32 0.25, %v803_v2  ;;  %v868_v33 = vmul.f32 0.25, %v804_v15 }
  0xa8   : > { %v928_v25 = vsel %vm832_vm2, %v2895_v39, %v896_v23  ;;  %v898_v11 = vadd.f32 %v866_v9, %v2901_v63  ;;  %vm836_vm11 = vcmp.gt.f32.partialorder %v804_v15, 0.5  ;;  %v869_v55 = vmul.f32 0.25, %v805_v46 }
  0xa9   : > { %961 = vst.msk [vmem:[#allocation3 + $0xc0] sm:$0xff] %vm936_vm9, %v928_v25  ;;  %v929_v34 = vsel %vm833_vm4, %v2898_v32, %v897_v5  ;;  %v899_v49 = vadd.f32 %v867_v0, %v2904_v31  ;;  %v900_v27 = vadd.f32 %v868_v33, %v2907_v59  ;;  %vm837_vm7 = vcmp.gt.f32.partialorder %v805_v46, 0.5 }
  0xaa   : > { %962 = vst.msk [vmem:[#allocation3 + $0xc8] sm:$0xff] %vm936_vm9, %v929_v34  ;;  %v930_v39 = vsel %vm834_vm5, %v2901_v63, %v898_v11  ;;  %v901_v28 = vadd.f32 %v869_v55, %v2910_v57  ;;  %v870_v56 = vmul.f32 0.25, %v806_v50  ;;  %vm838_vm8 = vcmp.gt.f32.partialorder %v806_v50, 0.5 }
  0xab   : > { %963 = vst.msk [vmem:[#allocation3 + $0xd0] sm:$0xff] %vm936_vm9, %v930_v39  ;;  %v931_v17 = vsel %vm835_vm6, %v2904_v31, %v899_v49  ;;  %v932_v32 = vsel %vm836_vm11, %v2907_v59, %v900_v27  ;;  %v871_v53 = vmul.f32 0.25, %v807_v37  ;;  %vm839_vm10 = vcmp.gt.f32.partialorder %v807_v37, 0.5 }
  0xac   : > { %964 = vst.msk [vmem:[#allocation3 + $0xd8] sm:$0xff] %vm936_vm9, %v931_v17  ;;  %965 = vst.msk [vmem:[#allocation3 + $0xe0] sm:$0xff] %vm936_vm9, %v932_v32  ;;  %v933_v12 = vsel %vm837_vm7, %v2910_v57, %v901_v28  ;;  %v902_v63 = vadd.f32 %v870_v56, %v2913_v36 }
  0xad   : > { %966 = vst.msk [vmem:[#allocation3 + $0xe8] sm:$0xff] %vm936_vm9, %v933_v12  ;;  %v903_v58 = vadd.f32 %v871_v53, %v2916_v60 }
  0xae   : > { %v934_v18 = vsel %vm838_vm8, %v2913_v36, %v902_v63 }
  0xaf   : > { %967 = vst.msk [vmem:[#allocation3 + $0xf0] sm:$0xff] %vm936_vm9, %v934_v18  ;;  %v935_v31 = vsel %vm839_vm10, %v2916_v60, %v903_v58 }
  0xb0   : > { %968 = vst.msk [vmem:[#allocation3 + $0xf8] sm:$0xff] %vm936_vm9, %v935_v31 }
  0xb1 PF: > { %v1846_v59 = vcombine.low %v2650_v41, %v2675_v44  ;;  %v2085_v57 = vld [vmem:[%s3399_s3] sm:$0xff]   ;;  %v1847_v29 = vcombine.low %v2698_v8, %v2720_v10  ;;  %vm1129_vm12 = vcmask 261120   ;;  %v2086_v36 = vld [vmem:[%s3399_s3 + $0x8] sm:$0xff]   ;;  %v3470_v60 = vpack.c.bf16 %v2640_v40, %v2635_v6  ;;  %v971_v61 = vld [vmem:[#allocation3 + $0x10] sm:$0xff]  ;;  %s1867_s30 = sshll.u32 %s2165_s21, 6  ;;  %s1648_s9 = sshll.u32 %s2407_s16, 4  ;;  %s3333_s9 = int_to_ptr.vmem [resolvable:$true] %s1648_s9 }
  0xb2   : > { %1907 = vmatprep.subr.bf16.mxu1 %v2085_v57  ;;  %v972_v8 = vld [vmem:[#allocation3 + $0x18] sm:$0xff]  ;;  %vm1003_vm14 = vcmp.gt.f32.partialorder %v971_v61, 0.5  ;;  %v973_v10 = vld [vmem:[#allocation3 + $0x20] sm:$0xff]  ;;  %v974_v38 = vld [vmem:[#allocation3 + $0x28] sm:$0xff]  ;;  %v3471_v35 = vmov 0.0   ;;  %v3472_v54 = vpack.c.bf16 %v2655_v42, %v2645_v19  ;;  %v3473_v48 = vpack.c.bf16 %v2665_v20, %v2660_v43  ;;  %s1645_s8 = sadd.s32 %s1867_s30, %s2290_s13  ;;  %s3344_s15 = scalar_lea.sflag [#allocation5], %s266_s12 }
  0xb3   : > { %1947 = vmatprep.mubr.msk.bf16.mxu0 %vm1129_vm12, %v3470_v60  ;;  %1943 = vmatprep.subr.bf16.mxu0 %v1846_v59  ;;  %vm1004_vm15 = vcmp.gt.f32.partialorder %v972_v8, 0.5  ;;  %v1798_v40 = vsel %vm1003_vm14, 1.0, %v3471_v35  ;;  %vm1005_vm0 = vcmp.gt.f32.partialorder %v973_v10, 0.5  ;;  %vm1006_vm1 = vcmp.gt.f32.partialorder %v974_v38, 0.5  ;;  %v975_v24 = vld [vmem:[#allocation3 + $0x30] sm:$0xff]  ;;  %v976_v47 = vld [vmem:[#allocation3 + $0x38] sm:$0xff] }
  0xb4   : > { %1944 = vmatpush3.bf16.msra.mxu0 %v1846_v59  ;;  %1908 = vmatpush3.bf16.msra.mxu1 %v2085_v57  ;;  %v1799_v62 = vsel %vm1004_vm15, 1.0, %v3471_v35  ;;  %v1800_v13 = vsel %vm1005_vm0, 1.0, %v3471_v35  ;;  %v1801_v22 = vsel %vm1006_vm1, 1.0, %v3471_v35  ;;  %v977_v45 = vld [vmem:[#allocation3 + $0x40] sm:$0xff]  ;;  %v978_v1 = vld [vmem:[#allocation3 + $0x48] sm:$0xff]  ;;  %vm1007_vm3 = vcmp.gt.f32.partialorder %v975_v24, 0.5 }
  0xb5   : > { %1945 = vmatprep.subr.bf16.mxu0 %v1847_v29  ;;  %1909 = vmatprep.subr.bf16.mxu1 %v2086_v36  ;;  %v1098_v4 = vpack.c.bf16 %v1799_v62, %v1798_v40  ;;  %v1099_v3 = vpack.c.bf16 %v1801_v22, %v1800_v13  ;;  %vm1008_vm2 = vcmp.gt.f32.partialorder %v976_v47, 0.5  ;;  %vm1009_vm4 = vcmp.gt.f32.partialorder %v977_v45, 0.5  ;;  %v979_v19 = vld [vmem:[#allocation3 + $0x50] sm:$0xff]  ;;  %v980_v42 = vld [vmem:[#allocation3 + $0x58] sm:$0xff]  ;;  %v981_v46 = vld [vmem:[#allocation3 + $0x60] sm:$0xff]  ;;  %s1868_s21 = sshll.u32 %s1645_s8, 7 }
  0xb6   : > { %vm1010_vm5 = vcmp.gt.f32.partialorder %v978_v1, 0.5  ;;  %v1802_v2 = vsel %vm1007_vm3, 1.0, %v3471_v35  ;;  %v1803_v15 = vsel %vm1008_vm2, 1.0, %v3471_v35  ;;  %v1804_v16 = vsel %vm1009_vm4, 1.0, %v3471_v35  ;;  %v982_v14 = vld [vmem:[#allocation3 + $0x68] sm:$0xff]  ;;  %v3476_v9 = vld [vmem:[#allocation7_spill] sm:$0xff]  ;;  %s3331_s22 = scalar_lea.hbm %s3401_s5, %s1868_s21 }
  0xb7   : > { %v969_v41 = vld [vmem:[#allocation3] sm:$0xff]  ;;  %v1805_v52 = vsel %vm1010_vm5, 1.0, %v3471_v35  ;;  %v1100_v30 = vpack.c.bf16 %v1803_v15, %v1802_v2  ;;  %vm1011_vm6 = vcmp.gt.f32.partialorder %v979_v19, 0.5  ;;  %vm1012_vm11 = vcmp.gt.f32.partialorder %v980_v42, 0.5  ;;  %v3475_v20 = vld [vmem:[#allocation8_spill] sm:$0xff]  ;;  %v3478_v49 = vld [vmem:[#allocation10_spill] sm:$0xff] }
  0xb8   : > { %v970_v44 = vld [vmem:[#allocation3 + $0x8] sm:$0xff]  ;;  %vm1001_vm9 = vcmp.gt.f32.partialorder %v969_v41, 0.5  ;;  %1946 = vmatpush3.bf16.msra.mxu0 %v1847_v29  ;;  %1910 = vmatpush3.bf16.msra.mxu1 %v2086_v36  ;;  %v1101_v23 = vpack.c.bf16 %v1805_v52, %v1804_v16  ;;  %vm1013_vm7 = vcmp.gt.f32.partialorder %v981_v46, 0.5  ;;  %vm1014_vm8 = vcmp.gt.f32.partialorder %v982_v14, 0.5  ;;  %v985_v55 = vld [vmem:[#allocation3 + $0x80] sm:$0xff]  ;;  %v3479_v27 = vld [vmem:[#allocation9_spill] sm:$0xff] }
  0xb9   : > { %vm1002_vm13 = vcmp.gt.f32.partialorder %v970_v44, 0.5  ;;  %v1796_v51 = vsel %vm1001_vm9, 1.0, %v3471_v35  ;;  %v3474_v43 = vpack.c.bf16 %v2680_v21, %v2670_v7  ;;  %v3477_v5 = vpack.c.bf16 %v3475_v20, %v3476_v9  ;;  %v983_v7 = vld [vmem:[#allocation3 + $0x70] sm:$0xff]  ;;  %v984_v21 = vld [vmem:[#allocation3 + $0x78] sm:$0xff]  ;;  %v986_v37 = vld [vmem:[#allocation3 + $0x88] sm:$0xff]  ;;  %s2087_s14 = scalar_lea.vmem %s3333_s9, 4096 }
  0xba   : > { %v1797_v6 = vsel %vm1002_vm13, 1.0, %v3471_v35  ;;  %v1806_v0 = vsel %vm1011_vm6, 1.0, %v3471_v35  ;;  %v1807_v33 = vsel %vm1012_vm11, 1.0, %v3471_v35  ;;  %v1808_v50 = vsel %vm1013_vm7, 1.0, %v3471_v35  ;;  %v3481_v28 = vld [vmem:[#allocation12_spill] sm:$0xff]  ;;  %v3482_v56 = vld [vmem:[#allocation11_spill] sm:$0xff]  ;;  %p2088_p2 = scmp.ne.s32.totalorder %s3333_s9, %s2087_s14 }
  0xbb   : > { %v1097_v26 = vpack.c.bf16 %v1797_v6, %v1796_v51  ;;  %1948 = vmatmul.mubr.msk.bf16.vlgmr.msra.gmra.mrb[0].mxu0 %vm1129_vm12, %v3472_v54  ;;  %v1809_v25 = vsel %vm1014_vm8, 1.0, %v3471_v35  ;;  %v1102_v11 = vpack.c.bf16 %v1807_v33, %v1806_v0  ;;  %vm1015_vm10 = vcmp.gt.f32.partialorder %v983_v7, 0.5  ;;  %v987_v58 = vld [vmem:[#allocation3 + $0x90] sm:$0xff]  ;;  %v988_v18 = vld [vmem:[#allocation3 + $0x98] sm:$0xff]  ;;  %v989_v59 = vld [vmem:[#allocation3 + $0xa0] sm:$0xff]  ;;  %s2184_s17 = smov [#allocation4]  }
  0xbc   : > { %1951 = vmatprep.mubr.msk.bf16.mxu0 %vm1129_vm12, %v3473_v48  ;;  %v1103_v34 = vpack.c.bf16 %v1809_v25, %v1808_v50  ;;  %vm1016_vm9 = vcmp.gt.f32.partialorder %v984_v21, 0.5  ;;  %vm1017_vm13 = vcmp.gt.f32.partialorder %v985_v55, 0.5  ;;  %vm1018_vm14 = vcmp.gt.f32.partialorder %v986_v37, 0.5  ;;  %v990_v57 = vld [vmem:[#allocation3 + $0xa8] sm:$0xff]  ;;  %v3484_v36 = vld [vmem:[#allocation14_spill] sm:$0xff]  ;;  %v3485_v60 = vld [vmem:[#allocation13_spill] sm:$0xff]  ;;  %p2089_p4 = pnand %p2088_p2, %p2268_p3 }
  0xbd   : > { %1911 = vmatprep.mubr.msk.bf16.mxu1 %vm1129_vm12, %v1097_v26  ;;  %v3480_v39 = vpack.c.bf16 %v3478_v49, %v3479_v27  ;;  %v3483_v17 = vpack.c.bf16 %v3481_v28, %v3482_v56  ;;  %v1810_v32 = vsel %vm1015_vm10, 1.0, %v3471_v35  ;;  %v1811_v53 = vsel %vm1016_vm9, 1.0, %v3471_v35  ;;  %v3487_v44 = vld [vmem:[#allocation16_spill] sm:$0xff]  ;;  %v3488_v61 = vld [vmem:[#allocation15_spill] sm:$0xff]  ;;  %v991_v40 = vld [vmem:[#allocation3 + $0xb0] sm:$0xff]  ;;  %s2091_s26 = sshll.u32 %s2184_s17, 4  ;;  %s2092_s26 = int_to_ptr.vmem [resolvable:$false] %s2091_s26 }
  0xbe   : > { %1912 = vmatmul.mubr.msk.bf16.vlgmr.msra.gmra.mrb[0].mxu1 %vm1129_vm12, %v1098_v4  ;;  %v1812_v12 = vsel %vm1017_vm13, 1.0, %v3471_v35  ;;  %v1813_v63 = vsel %vm1018_vm14, 1.0, %v3471_v35  ;;  %v1104_v31 = vpack.c.bf16 %v1811_v53, %v1810_v32  ;;  %vm1019_vm15 = vcmp.gt.f32.partialorder %v987_v58, 0.5  ;;  %v992_v26 = vld [vmem:[#allocation3 + $0xb8] sm:$0xff]  ;;  %v993_v24 = vld [vmem:[#allocation3 + $0xc0] sm:$0xff]  ;;  %v994_v47 = vld [vmem:[#allocation3 + $0xc8] sm:$0xff]  ;;  %p2090_p5 = pneg %p2089_p4  ;;  %p2094_p6 = scmp.lt.s32.totalorder %s3333_s9, %s2092_s26 }
  0xbf   : > { %1915 = vmatprep.mubr.msk.bf16.mxu1 %vm1129_vm12, %v1099_v3  ;;  %v1105_v29 = vpack.c.bf16 %v1813_v63, %v1812_v12  ;;  %vm1020_vm0 = vcmp.gt.f32.partialorder %v988_v18, 0.5  ;;  %vm1021_vm1 = vcmp.gt.f32.partialorder %v989_v59, 0.5  ;;  %vm1022_vm3 = vcmp.gt.f32.partialorder %v990_v57, 0.5  ;;  %v3490_v13 = vld [vmem:[#allocation18_spill] sm:$0xff]  ;;  %v3491_v22 = vld [vmem:[#allocation17_spill] sm:$0xff]  ;;  %v3493_v1 = vld [vmem:[#allocation20_spill] sm:$0xff] }
  0xc0   : > { %v3486_v41 = vpack.c.bf16 %v3484_v36, %v3485_v60  ;;  %v3489_v8 = vpack.c.bf16 %v3487_v44, %v3488_v61  ;;  %v1814_v10 = vsel %vm1019_vm15, 1.0, %v3471_v35  ;;  %v1815_v38 = vsel %vm1020_vm0, 1.0, %v3471_v35  ;;  %v3494_v3 = vld [vmem:[#allocation19_spill] sm:$0xff]  ;;  %v995_v52 = vld [vmem:[#allocation3 + $0xd0] sm:$0xff]  ;;  %v996_v19 = vld [vmem:[#allocation3 + $0xd8] sm:$0xff]  ;;  %s2093_s27 = scalar_lea.vmem %s2092_s26, 8192 }
  0xc1   : > { %v1816_v51 = vsel %vm1021_vm1, 1.0, %v3471_v35  ;;  %v1817_v6 = vsel %vm1022_vm3, 1.0, %v3471_v35  ;;  %v1106_v62 = vpack.c.bf16 %v1815_v38, %v1814_v10  ;;  %vm1023_vm2 = vcmp.gt.f32.partialorder %v991_v40, 0.5  ;;  %v998_v46 = vld [vmem:[#allocation3 + $0xe8] sm:$0xff]  ;;  %v999_v21 = vld [vmem:[#allocation3 + $0xf0] sm:$0xff]  ;;  %v3506_v28 = vld [vmem:[#allocation27_spill] sm:$0xff]  ;;  %p2095_p7 = scmp.lt.s32.totalorder %s2093_s27, %s2087_s14 }
  0xc2   : > { %v1107_v4 = vpack.c.bf16 %v1817_v6, %v1816_v51  ;;  %vm1024_vm4 = vcmp.gt.f32.partialorder %v992_v26, 0.5  ;;  %vm1025_vm5 = vcmp.gt.f32.partialorder %v993_v24, 0.5  ;;  %vm1026_vm6 = vcmp.gt.f32.partialorder %v994_v47, 0.5  ;;  %v3499_v9 = vld [vmem:[#allocation24_spill] sm:$0xff]  ;;  %v3503_v49 = vld [vmem:[#allocation25_spill] sm:$0xff]  ;;  %v3508_v12 = vld [vmem:[#allocation30_spill] sm:$0xff] }
  0xc3   : > { %1952 = vmatmul.mubr.msk.bf16.gmra.mrb[4].mxu0 %vm1129_vm12, %v3474_v43  ;;  %v3492_v45 = vpack.c.bf16 %v3490_v13, %v3491_v22  ;;  %v3495_v54 = vpack.c.bf16 %v3493_v1, %v3494_v3  ;;  %v1818_v48 = vsel %vm1023_vm2, 1.0, %v3471_v35  ;;  %v1819_v2 = vsel %vm1024_vm4, 1.0, %v3471_v35  ;;  %v3497_v43 = vld [vmem:[#allocation21_spill] sm:$0xff]  ;;  %v3234_v59 = vld [vmem:[%s3400_s4] ss:$0 sm:$0xff]  ;;  %p2096_p9 = por %p2095_p7, %p2094_p6 }
  0xc4   : > { %1955 = vmatprep.mubr.msk.bf16.mxu0 %vm1129_vm12, %v3477_v5  ;;  %v1820_v15 = vsel %vm1025_vm5, 1.0, %v3471_v35  ;;  %v1821_v16 = vsel %vm1026_vm6, 1.0, %v3471_v35  ;;  %v1108_v42 = vpack.c.bf16 %v1819_v2, %v1818_v48  ;;  %vm1027_vm11 = vcmp.gt.f32.partialorder %v995_v52, 0.5  ;;  %v3500_v5 = vld [vmem:[#allocation23_spill] sm:$0xff]  ;;  %v3509_v63 = vld [vmem:[#allocation29_spill] sm:$0xff] }
  0xc5   : > { %v1109_v14 = vpack.c.bf16 %v1821_v16, %v1820_v15  ;;  %vm1028_vm7 = vcmp.gt.f32.partialorder %v996_v19, 0.5  ;;  %vm1030_vm10 = vcmp.gt.f32.partialorder %v998_v46, 0.5  ;;  %v3501_v0 = vpack.c.bf16 %v3499_v9, %v3500_v5  ;;  %p2097_p10 = pnand %p2096_p9, %p2090_p5 }
  0xc6   : > { %1916 = vmatmul.mubr.msk.bf16.gmra.mrb[4].mxu1 %vm1129_vm12, %v1100_v30  ;;  %v997_v30 = vld [vmem:[#allocation3 + $0xe0] sm:$0xff]  ;;  %v1822_v33 = vsel %vm1027_vm11, 1.0, %v3471_v35  ;;  %v1823_v50 = vsel %vm1028_vm7, 1.0, %v3471_v35  ;;  %v1825_v7 = vsel %vm1030_vm10, 1.0, %v3471_v35  ;;  %vm1031_vm9 = vcmp.gt.f32.partialorder %v999_v21, 0.5 }
  0xc7   : > { %1919 = vmatprep.mubr.msk.bf16.mxu1 %vm1129_vm12, %v1101_v23  ;;  %vm1029_vm8 = vcmp.gt.f32.partialorder %v997_v30, 0.5  ;;  %v3496_v23 = vld [vmem:[#allocation22_spill] sm:$0xff]  ;;  %v1110_v55 = vpack.c.bf16 %v1823_v50, %v1822_v33  ;;  %v3510_v58 = vpack.c.bf16 %v3508_v12, %v3509_v63  ;;  %vm1599_vm14 = vcmask 523264  }
  0xc8   : > { %v3498_v20 = vpack.c.bf16 %v3496_v23, %v3497_v43  ;;  %v1824_v25 = vsel %vm1029_vm8, 1.0, %v3471_v35 }
  0xc9   : > { %v1111_v37 = vpack.c.bf16 %v1825_v7, %v1824_v25 }
  0xcb   : > { %1956 = vmatmul.mubr.msk.bf16.gmra.mrb[8].mxu0 %vm1129_vm12, %v3480_v39  ;;  %v3505_v39 = vld [vmem:[#allocation28_spill] sm:$0xff] }
  0xcc   : > { %1959 = vmatprep.mubr.msk.bf16.mxu0 %vm1129_vm12, %v3483_v17  ;;  %v3507_v56 = vpack.c.bf16 %v3505_v39, %v3506_v28  ;;  %v1826_v17 = vsel %vm1031_vm9, 1.0, %v3471_v35 }
  0xce   : > { %1920 = vmatmul.mubr.msk.bf16.gmra.mrb[8].mxu1 %vm1129_vm12, %v1102_v11  ;;  %v1000_v11 = vld [vmem:[#allocation3 + $0xf8] sm:$0xff] }
  0xcf   : > { %1923 = vmatprep.mubr.msk.bf16.mxu1 %vm1129_vm12, %v1103_v34  ;;  %vm1032_vm13 = vcmp.gt.f32.partialorder %v1000_v11, 0.5  ;;  %v3502_v34 = vld [vmem:[#allocation26_spill] sm:$0xff] }
  0xd0   : > { %v3504_v27 = vpack.c.bf16 %v3502_v34, %v3503_v49  ;;  %v1827_v32 = vsel %vm1032_vm13, 1.0, %v3471_v35 }
  0xd1   : > { %v1112_v53 = vpack.c.bf16 %v1827_v32, %v1826_v17 }
  0xd3   : > { %1960 = vmatmul.mubr.msk.bf16.gmra.mrb[12].mxu0 %vm1129_vm12, %v3486_v41 }
  0xd4   : > { %1963 = vmatprep.mubr.msk.bf16.mxu0 %vm1129_vm12, %v3489_v8 }
  0xd6   : > { %1924 = vmatmul.mubr.msk.bf16.gmra.mrb[12].mxu1 %vm1129_vm12, %v1104_v31 }
  0xd7   : > { %1927 = vmatprep.mubr.msk.bf16.mxu1 %vm1129_vm12, %v1105_v29 }
  0xdb   : > { %1964 = vmatmul.mubr.msk.bf16.gmra.mrb[16].mxu0 %vm1129_vm12, %v3492_v45 }
  0xdc   : > { %1967 = vmatprep.mubr.msk.bf16.mxu0 %vm1129_vm12, %v3495_v54 }
  0xde   : > { %1928 = vmatmul.mubr.msk.bf16.gmra.mrb[16].mxu1 %vm1129_vm12, %v1106_v62 }
  0xdf   : > { %1931 = vmatprep.mubr.msk.bf16.mxu1 %vm1129_vm12, %v1107_v4 }
  0xe3   : > { %1968 = vmatmul.mubr.msk.bf16.gmra.mrb[20].mxu0 %vm1129_vm12, %v3498_v20 }
  0xe4   : > { %1971 = vmatprep.mubr.msk.bf16.mxu0 %vm1129_vm12, %v3501_v0 }
  0xe6   : > { %1932 = vmatmul.mubr.msk.bf16.gmra.mrb[20].mxu1 %vm1129_vm12, %v1108_v42 }
  0xe7   : > { %1935 = vmatprep.mubr.msk.bf16.mxu1 %vm1129_vm12, %v1109_v14 }
  0xeb   : > { %1972 = vmatmul.mubr.msk.bf16.gmra.mrb[24].mxu0 %vm1129_vm12, %v3504_v27 }
  0xec   : > { %1975 = vmatprep.mubr.msk.bf16.mxu0 %vm1129_vm12, %v3507_v56 }
  0xee   : > { %1936 = vmatmul.mubr.msk.bf16.gmra.mrb[24].mxu1 %vm1129_vm12, %v1110_v55 }
  0xef   : > { %1939 = vmatprep.mubr.msk.bf16.mxu1 %vm1129_vm12, %v1111_v37 }
  0xf3   : > { %1976 = vmatmul.mubr.msk.bf16.gmra.mrb[28].mxu0 %vm1129_vm12, %v3510_v58 }
  0xf6   : > { %1940 = vmatmul.mubr.msk.bf16.gmra.mrb[28].mxu1 %vm1129_vm12, %v1112_v53 }
 0x18e   : > { %v1949_v18 = vpop.f32.mrb[0].mxu0 }
 0x18f   : > { %v1433_v29 = vpop.f32.mrb[1].mxu0 }
 0x190   : > { %v1950_v60 = vpop.f32.mrb[2].mxu0 }
 0x191   : > { %v1913_v31 = vpop.f32.mrb[0].mxu1  ;;  %v1436_v8 = vpop.f32.mrb[3].mxu0 }
 0x192   : > { %v1442_v57 = vadd.f32 %v1949_v18, %v1913_v31  ;;  %v1212_v35 = vpop.f32.mrb[1].mxu1 }
 0x193   : > { %v1434_v36 = vadd.f32 %v1433_v29, %v1212_v35  ;;  %v1914_v41 = vpop.f32.mrb[2].mxu1 }
 0x194   : > { %v1569_v44 = vadd.f32 %v3234_v59, %v1442_v57  ;;  %v1445_v61 = vadd.f32 %v1950_v60, %v1914_v41  ;;  %v1215_v10 = vpop.f32.mrb[3].mxu1 }
 0x195   : > { %v1567_v38 = vadd.f32 %v3234_v59, %v1434_v36  ;;  %v1437_v51 = vadd.f32 %v1436_v8, %v1215_v10 }
 0x196   : > { %1602 = vst.msk [vmem:[%s2407_s16 + $0x10] sm:$0xff] %vm1599_vm14, %v1569_v44  ;;  %v1570_v6 = vadd.f32 %v3234_v59, %v1445_v61  ;;  %v1953_v26 = vpop.f32.mrb[4].mxu0 }
 0x197   : > { %1600 = vst.msk [vmem:[%s2407_s16] sm:$0xff] %vm1599_vm14, %v1567_v38  ;;  %v1568_v40 = vadd.f32 %v3234_v59, %v1437_v51  ;;  %v1449_v47 = vpop.f32.mrb[5].mxu0 }
 0x198   : > { %1603 = vst.msk [vmem:[%s2407_s16 + $0x18] sm:$0xff] %vm1599_vm14, %v1570_v6  ;;  %v1954_v22 = vpop.f32.mrb[6].mxu0 }
 0x199   : > { %1601 = vst.msk [vmem:[%s2407_s16 + $0x8] sm:$0xff] %vm1599_vm14, %v1568_v40  ;;  %v1917_v62 = vpop.f32.mrb[4].mxu1  ;;  %v1452_v54 = vpop.f32.mrb[7].mxu0 }
 0x19a   : > { %v1458_v24 = vadd.f32 %v1953_v26, %v1917_v62  ;;  %v1228_v4 = vpop.f32.mrb[5].mxu1 }
 0x19b   : > { %v1450_v13 = vadd.f32 %v1449_v47, %v1228_v4  ;;  %v1918_v45 = vpop.f32.mrb[6].mxu1 }
 0x19c   : > { %v1573_v1 = vadd.f32 %v3234_v59, %v1458_v24  ;;  %v1461_v3 = vadd.f32 %v1954_v22, %v1918_v45  ;;  %v1231_v48 = vpop.f32.mrb[7].mxu1 }
 0x19d   : > { %v1571_v2 = vadd.f32 %v3234_v59, %v1450_v13  ;;  %v1453_v15 = vadd.f32 %v1452_v54, %v1231_v48 }
 0x19e   : > { %1606 = vst.msk [vmem:[%s2407_s16 + $0x30] sm:$0xff] %vm1599_vm14, %v1573_v1  ;;  %v1574_v16 = vadd.f32 %v3234_v59, %v1461_v3  ;;  %v1957_v19 = vpop.f32.mrb[8].mxu0 }
 0x19f   : > { %1604 = vst.msk [vmem:[%s2407_s16 + $0x20] sm:$0xff] %vm1599_vm14, %v1571_v2  ;;  %v1572_v52 = vadd.f32 %v3234_v59, %v1453_v15  ;;  %v1465_v46 = vpop.f32.mrb[9].mxu0 }
 0x1a0   : > { %1607 = vst.msk [vmem:[%s2407_s16 + $0x38] sm:$0xff] %vm1599_vm14, %v1574_v16  ;;  %v1958_v43 = vpop.f32.mrb[10].mxu0 }
 0x1a1   : > { %1605 = vst.msk [vmem:[%s2407_s16 + $0x28] sm:$0xff] %vm1599_vm14, %v1572_v52  ;;  %v1921_v42 = vpop.f32.mrb[8].mxu1  ;;  %v1468_v0 = vpop.f32.mrb[11].mxu0 }
 0x1a2   : > { %v1474_v30 = vadd.f32 %v1957_v19, %v1921_v42  ;;  %v1244_v14 = vpop.f32.mrb[9].mxu1 }
 0x1a3   : > { %v1466_v23 = vadd.f32 %v1465_v46, %v1244_v14  ;;  %v1922_v20 = vpop.f32.mrb[10].mxu1 }
 0x1a4   : > { %v1577_v9 = vadd.f32 %v3234_v59, %v1474_v30  ;;  %v1477_v5 = vadd.f32 %v1958_v43, %v1922_v20  ;;  %v1247_v33 = vpop.f32.mrb[11].mxu1 }
 0x1a5   : > { %v1575_v50 = vadd.f32 %v3234_v59, %v1466_v23  ;;  %v1469_v25 = vadd.f32 %v1468_v0, %v1247_v33 }
 0x1a6   : > { %1610 = vst.msk [vmem:[%s2407_s16 + $0x50] sm:$0xff] %vm1599_vm14, %v1577_v9  ;;  %v1578_v7 = vadd.f32 %v3234_v59, %v1477_v5  ;;  %v1961_v11 = vpop.f32.mrb[12].mxu0 }
 0x1a7   : > { %1608 = vst.msk [vmem:[%s2407_s16 + $0x40] sm:$0xff] %vm1599_vm14, %v1575_v50  ;;  %v1576_v21 = vadd.f32 %v3234_v59, %v1469_v25  ;;  %v1481_v34 = vpop.f32.mrb[13].mxu0 }
 0x1a8   : > { %1611 = vst.msk [vmem:[%s2407_s16 + $0x58] sm:$0xff] %vm1599_vm14, %v1578_v7  ;;  %v1962_v39 = vpop.f32.mrb[14].mxu0 }
 0x1a9   : > { %1609 = vst.msk [vmem:[%s2407_s16 + $0x48] sm:$0xff] %vm1599_vm14, %v1576_v21  ;;  %v1925_v55 = vpop.f32.mrb[12].mxu1  ;;  %v1484_v32 = vpop.f32.mrb[15].mxu0 }
 0x1aa   : > { %v1490_v37 = vadd.f32 %v1961_v11, %v1925_v55  ;;  %v1260_v49 = vpop.f32.mrb[13].mxu1 }
 0x1ab   : > { %v1482_v27 = vadd.f32 %v1481_v34, %v1260_v49  ;;  %v1926_v28 = vpop.f32.mrb[14].mxu1 }
 0x1ac   : > { %v1581_v56 = vadd.f32 %v3234_v59, %v1490_v37  ;;  %v1493_v17 = vadd.f32 %v1962_v39, %v1926_v28  ;;  %v1263_v53 = vpop.f32.mrb[15].mxu1 }
 0x1ad   : > { %v1579_v12 = vadd.f32 %v3234_v59, %v1482_v27  ;;  %v1485_v63 = vadd.f32 %v1484_v32, %v1263_v53 }
 0x1ae   : > { %1614 = vst.msk [vmem:[%s2407_s16 + $0x70] sm:$0xff] %vm1599_vm14, %v1581_v56  ;;  %v1582_v58 = vadd.f32 %v3234_v59, %v1493_v17  ;;  %v1965_v31 = vpop.f32.mrb[16].mxu0 }
 0x1af   : > { %1612 = vst.msk [vmem:[%s2407_s16 + $0x60] sm:$0xff] %vm1599_vm14, %v1579_v12  ;;  %v1580_v18 = vadd.f32 %v3234_v59, %v1485_v63  ;;  %v1497_v35 = vpop.f32.mrb[17].mxu0 }
 0x1b0   : > { %1615 = vst.msk [vmem:[%s2407_s16 + $0x78] sm:$0xff] %vm1599_vm14, %v1582_v58  ;;  %v1966_v41 = vpop.f32.mrb[18].mxu0 }
 0x1b1   : > { %1613 = vst.msk [vmem:[%s2407_s16 + $0x68] sm:$0xff] %vm1599_vm14, %v1580_v18  ;;  %v1929_v57 = vpop.f32.mrb[16].mxu1  ;;  %v1500_v10 = vpop.f32.mrb[19].mxu0 }
 0x1b2   : > { %v1506_v29 = vadd.f32 %v1965_v31, %v1929_v57  ;;  %v1276_v36 = vpop.f32.mrb[17].mxu1 }
 0x1b3   : > { %v1498_v60 = vadd.f32 %v1497_v35, %v1276_v36  ;;  %v1930_v44 = vpop.f32.mrb[18].mxu1 }
 0x1b4   : > { %v1585_v61 = vadd.f32 %v3234_v59, %v1506_v29  ;;  %v1509_v8 = vadd.f32 %v1966_v41, %v1930_v44  ;;  %v1279_v38 = vpop.f32.mrb[19].mxu1 }
 0x1b5   : > { %v1583_v51 = vadd.f32 %v3234_v59, %v1498_v60  ;;  %v1501_v6 = vadd.f32 %v1500_v10, %v1279_v38 }
 0x1b6   : > { %1618 = vst.msk [vmem:[%s2407_s16 + $0x90] sm:$0xff] %vm1599_vm14, %v1585_v61  ;;  %v1586_v40 = vadd.f32 %v3234_v59, %v1509_v8  ;;  %v1969_v62 = vpop.f32.mrb[20].mxu0 }
 0x1b7   : > { %1616 = vst.msk [vmem:[%s2407_s16 + $0x80] sm:$0xff] %vm1599_vm14, %v1583_v51  ;;  %v1584_v26 = vadd.f32 %v3234_v59, %v1501_v6  ;;  %v1513_v4 = vpop.f32.mrb[21].mxu0 }
 0x1b8   : > { %1619 = vst.msk [vmem:[%s2407_s16 + $0x98] sm:$0xff] %vm1599_vm14, %v1586_v40  ;;  %v1970_v45 = vpop.f32.mrb[22].mxu0 }
 0x1b9   : > { %1617 = vst.msk [vmem:[%s2407_s16 + $0x88] sm:$0xff] %vm1599_vm14, %v1584_v26  ;;  %v1933_v24 = vpop.f32.mrb[20].mxu1  ;;  %v1516_v48 = vpop.f32.mrb[23].mxu0 }
 0x1ba   : > { %v1522_v47 = vadd.f32 %v1969_v62, %v1933_v24  ;;  %v1292_v13 = vpop.f32.mrb[21].mxu1 }
 0x1bb   : > { %v1514_v22 = vadd.f32 %v1513_v4, %v1292_v13  ;;  %v1934_v1 = vpop.f32.mrb[22].mxu1 }
 0x1bc   : > { %v1589_v3 = vadd.f32 %v3234_v59, %v1522_v47  ;;  %v1525_v54 = vadd.f32 %v1970_v45, %v1934_v1  ;;  %v1295_v2 = vpop.f32.mrb[23].mxu1 }
 0x1bd   : > { %v1587_v15 = vadd.f32 %v3234_v59, %v1514_v22  ;;  %v1517_v16 = vadd.f32 %v1516_v48, %v1295_v2 }
 0x1be   : > { %1622 = vst.msk [vmem:[%s2407_s16 + $0xb0] sm:$0xff] %vm1599_vm14, %v1589_v3  ;;  %v1590_v52 = vadd.f32 %v3234_v59, %v1525_v54  ;;  %v1973_v42 = vpop.f32.mrb[24].mxu0 }
 0x1bf   : > { %1620 = vst.msk [vmem:[%s2407_s16 + $0xa0] sm:$0xff] %vm1599_vm14, %v1587_v15  ;;  %v1588_v19 = vadd.f32 %v3234_v59, %v1517_v16  ;;  %v1529_v14 = vpop.f32.mrb[25].mxu0 }
 0x1c0   : > { %1623 = vst.msk [vmem:[%s2407_s16 + $0xb8] sm:$0xff] %vm1599_vm14, %v1590_v52  ;;  %v1974_v20 = vpop.f32.mrb[26].mxu0 }
 0x1c1   : > { %1621 = vst.msk [vmem:[%s2407_s16 + $0xa8] sm:$0xff] %vm1599_vm14, %v1588_v19  ;;  %v1937_v30 = vpop.f32.mrb[24].mxu1  ;;  %v1532_v33 = vpop.f32.mrb[27].mxu0 }
 0x1c2   : > { %v1538_v46 = vadd.f32 %v1973_v42, %v1937_v30  ;;  %v1308_v23 = vpop.f32.mrb[25].mxu1 }
 0x1c3   : > { %v1530_v43 = vadd.f32 %v1529_v14, %v1308_v23  ;;  %v1938_v9 = vpop.f32.mrb[26].mxu1 }
 0x1c4   : > { %v1593_v5 = vadd.f32 %v3234_v59, %v1538_v46  ;;  %v1541_v0 = vadd.f32 %v1974_v20, %v1938_v9  ;;  %v1311_v50 = vpop.f32.mrb[27].mxu1 }
 0x1c5   : > { %v1591_v25 = vadd.f32 %v3234_v59, %v1530_v43  ;;  %v1533_v7 = vadd.f32 %v1532_v33, %v1311_v50 }
 0x1c6   : > { %1626 = vst.msk [vmem:[%s2407_s16 + $0xd0] sm:$0xff] %vm1599_vm14, %v1593_v5  ;;  %v1594_v21 = vadd.f32 %v3234_v59, %v1541_v0  ;;  %v1977_v55 = vpop.f32.mrb[28].mxu0 }
 0x1c7   : > { %1624 = vst.msk [vmem:[%s2407_s16 + $0xc0] sm:$0xff] %vm1599_vm14, %v1591_v25  ;;  %v1592_v11 = vadd.f32 %v3234_v59, %v1533_v7  ;;  %v1545_v49 = vpop.f32.mrb[29].mxu0 }
 0x1c8   : > { %1627 = vst.msk [vmem:[%s2407_s16 + $0xd8] sm:$0xff] %vm1599_vm14, %v1594_v21  ;;  %v1978_v28 = vpop.f32.mrb[30].mxu0 }
 0x1c9   : > { %1625 = vst.msk [vmem:[%s2407_s16 + $0xc8] sm:$0xff] %vm1599_vm14, %v1592_v11  ;;  %v1941_v37 = vpop.f32.mrb[28].mxu1  ;;  %v1548_v53 = vpop.f32.mrb[31].mxu0 }
 0x1ca   : > { %v1554_v34 = vadd.f32 %v1977_v55, %v1941_v37  ;;  %v1324_v27 = vpop.f32.mrb[29].mxu1 }
 0x1cb   : > { %v1546_v39 = vadd.f32 %v1545_v49, %v1324_v27  ;;  %v1942_v56 = vpop.f32.mrb[30].mxu1 }
 0x1cc   : > { %v1597_v17 = vadd.f32 %v3234_v59, %v1554_v34  ;;  %v1557_v32 = vadd.f32 %v1978_v28, %v1942_v56  ;;  %v1327_v12 = vpop.f32.mrb[31].mxu1 }
 0x1cd   : > { %v1595_v63 = vadd.f32 %v3234_v59, %v1546_v39  ;;  %v1549_v58 = vadd.f32 %v1548_v53, %v1327_v12 }
 0x1ce   : > { %1630 = vst.msk [vmem:[%s2407_s16 + $0xf0] sm:$0xff] %vm1599_vm14, %v1597_v17  ;;  %v1598_v18 = vadd.f32 %v3234_v59, %v1557_v32 }
 0x1cf   : > { %1628 = vst.msk [vmem:[%s2407_s16 + $0xe0] sm:$0xff] %vm1599_vm14, %v1595_v63  ;;  %v1596_v31 = vadd.f32 %v3234_v59, %v1549_v58 }
 0x1d0   : > { %1631 = vst.msk [vmem:[%s2407_s16 + $0xf8] sm:$0xff] %vm1599_vm14, %v1598_v18 }
 0x1d1   : > { %1629 = vst.msk [vmem:[%s2407_s16 + $0xe8] sm:$0xff] %vm1599_vm14, %v1596_v31 }
 0x1d2   : > { %2100 = shalt.err (!%p2097_p10)
}
 0x1d3   : > { %s2101_s12 = scalar_lea.hbm %s3331_s22, 4096  ;;  %s2105_s8 = scalar_lea.hbm %s3401_s5, 32768 }
 0x1d4   : > { %p2102_p11 = scmp.ne.s32.totalorder %s3331_s22, %s2101_s12  ;;  %p2106_p0 = scmp.lt.u32.totalorder %s3331_s22, %s3401_s5 }
 0x1d5   : > { %p2107_p1 = scmp.lt.u32.totalorder %s2105_s8, %s2101_s12  ;;  %p2109_p4 = scmp.lt.u32.totalorder %s2101_s12, %s3331_s22 }
 0x1d6   : > { %p2103_p12 = pnand %p2102_p11, %p2268_p3 }
 0x1d7   : > { %p2108_p2 = por %p2107_p1, %p2106_p0 }
 0x1d8   : > { %p2104_p13 = pneg %p2103_p12 }
 0x1d9   : > { %p2110_p5 = por %p2109_p4, %p2108_p2 }
 0x1db   : > { %p2111_p6 = pnand %p2110_p5, %p2104_p13 }
 0x1dd   : > { %2114 = shalt.err (!%p2111_p6)
}
 0x1de   : > { %s2185_s10 = smov 128   ;;  %s2186_s14 = smov 8  }
 0x1df   : > { %2011 = dma.vmem_to_hbm [thread:$0]  (%p2268_p3), %s3333_s9, 4096, %s3331_s22, %s3344_s15, %s2185_s10, %s2185_s10, %s2186_s14  }
 0x1e0 PF: > { %p2017_p7 = scmp.ge.s32.totalorder %s2181_s25, 2  ;;  %s1663_s17 = sand.u32 1, %s2153_s18  }
 0x1e1   : > { %s1664_s26 = scalar_lea.sflag [#allocation5], %s1663_s17 }
 0x1e2   : > { %p2014_p9 = pnand %p2017_p7, %p2277_p8 }
 0x1e4   : > { %2148 = dma.done.wait (!%p2014_p9), %s1664_s26, 4096  }
 0x1e5   : > { %2150 = vsyncadd (!%p2014_p9), %s1664_s26, 4294963200  ;;  %s18_s25 = sadd.s32 1, %s2181_s25   ;;  %s3511_s18 = smov %s2157_s19 }
 0x1e6   : > { %p15_p10 = scmp.ge.s32.totalorder %s18_s25, 10   ;;  %s3512_s19 = smov %s2161_s20 }
 0x1e7   : > { %s3513_s20 = smov %s2286_s11  ;;  %s3514_s21 = smov %s2173_s23 }
 0x1e8   : > { %s3515_s22 = smov %s2177_s24  ;;  %s3516_s23 = smov %s3519_s28 }
 0x1e9   : > { %s3517_s24 = smov %s3523_s29  ;;  %17 = sbr.rel (!%p15_p10) target bundleno = 5 (0x5), region = 94 }
 0x1f0   :  { %1669 = vsyncpa [#allocation5], 1 }
 0x1f1   :  { %1671 = vsyncpa [#allocation5 + $0x1], 1 }

// kernel: snn_csplayer_forward.4
= control target key start
LH: loop header
LB: loop body
LE: loop exit
PB: predicated region body
PF: predicated region fallthrough
CT: control target
= control target key end

     0   :  { %s7660_s24 = smov 0   ;;  %s7662_s25 = smov 0   ;;  %s9558_s0 = inlined_call_operand.vmem [shape: f32[4,512,32], index: 0, kind: input, shape index: {}]   ;;  %s9559_s1 = inlined_call_operand.vmem [shape: bf16[256,1], index: 1, kind: input, shape index: {}]   ;;  %s9560_s2 = inlined_call_operand.vmem [shape: bf16[256,1], index: 2, kind: input, shape index: {}]   ;;  %s9561_s3 = inlined_call_operand.vmem [shape: bf16[32,32], index: 3, kind: input, shape index: {}]   ;;  %s9562_s4 = inlined_call_operand.vmem [shape: f32[1,32], index: 4, kind: input, shape index: {}]   ;;  %s9563_s5 = inlined_call_operand.vmem [shape: bf16[9,32,32], index: 5, kind: input, shape index: {}]   ;;  %s9564_s6 = inlined_call_operand.vmem [shape: f32[1,32], index: 6, kind: input, shape index: {}]   ;;  %s9565_s7 = inlined_call_operand.vmem [shape: f32[4,512,32], index: 7, kind: output, shape index: {}]  }
   0x1   :  { %s7664_s26 = smov 0   ;;  %s7666_s27 = smov 0  }
   0x2   :  { %s7668_s28 = smov 0  }
   0x3 LB: > { %s26_s29 = sadd.s32 1, %s7606_s26  ;;  %s29_s30 = sadd.s32 1, %s7610_s27  ;;  %s7614_s28 = sphi %s7668_s28, %s17_s28   ;;  %s7610_s27 = sphi %s7666_s27, %s9863_s27   ;;  %s7606_s26 = sphi %s7664_s26, %s9862_s26   ;;  %s7602_s25 = sphi %s7662_s25, %s9861_s25   ;;  %s7598_s24 = sphi %s7660_s24, %s9860_s24  }
   0x4   : > { %p27_p0 = scmp.ge.s32.totalorder %s26_s29, 4  ;;  %p6358_p1 = scmp.ge.s32.totalorder %s7614_s28, 1 }
   0x5   : > { %p258_p2 = scmp.lt.s32.totalorder %s7614_s28, 9 }
   0x6   : > { %s9865_s29 = smov (%p27_p0, %s26_s29), 0  ;;  %s9867_s30 = smov (!%p27_p0, %s29_s30), %s7610_s27 }
   0x7   : > { %p259_p3 = pnand %p6358_p1, %p258_p2  ;;  %p31_p4 = scmp.ge.s32.totalorder %s9867_s30, 2 }
   0x9   : > { %s9869_s30 = smov (%p31_p4, %s9867_s30), 0  ;;  %262 = sbr.rel (%p259_p3) target bundleno = 1135 (0x46f), region = 48 }
  0x10   : > { %s6359_s8 = sshll.u32 %s7602_s25, 5  ;;  %p299_p5 = scmp.lt.s32.totalorder %s7598_s24, 3 }
  0x11   : > { %p301_p6 = scmp.lt.s32.totalorder %s6359_s8, 63  ;;  %p6365_p7 = scmp.ne.s32.totalorder %s7598_s24, 0 }
  0x12   : > { %s300_s9 = scalar_select %p299_p5, %s7598_s24, 3 }
  0x13   : > { %s9871_s8 = smov (!%p301_p6, %s6359_s8), 63  ;;  %vm355_vm0 = vcmask (!%p6365_p7), 261120  }
  0x14   : > { %s6360_s10 = sshll.u32 %s300_s9, 6 }
  0x15   : > { %s304_s11 = sadd.s32 %s6360_s10, %s9871_s8 }
  0x16   : > { %s6361_s12 = sshll.u32 %s304_s11, 3 }
  0x17   : > { %s7697_s15 = scalar_lea.vmem %s9558_s0, %s6361_s12  ;;  %s7702_s18 = scalar_lea.vmem %s9565_s7, %s6361_s12 }
  0x18   : > { %v7705_v0 = vld [vmem:[%s7697_s15] sm:$0xff]  ;;  %v7708_v1 = vld [vmem:[%s7697_s15 + $0x8] sm:$0xff]  ;;  %v7711_v2 = vld [vmem:[%s7697_s15 + $0x10] sm:$0xff] }
  0x19   : > { %v7714_v3 = vld [vmem:[%s7697_s15 + $0x18] sm:$0xff]  ;;  %v7717_v4 = vld [vmem:[%s7697_s15 + $0x20] sm:$0xff]  ;;  %v7720_v5 = vld [vmem:[%s7697_s15 + $0x28] sm:$0xff]  ;;  %356 = vst.msk [vmem:[#allocation2] sm:$0xff] (!%p6365_p7), %vm355_vm0, %v7705_v0 }
  0x1a   : > { %v7723_v6 = vld [vmem:[%s7697_s15 + $0x30] sm:$0xff]  ;;  %v7726_v7 = vld [vmem:[%s7697_s15 + $0x38] sm:$0xff]  ;;  %v7729_v8 = vld [vmem:[%s7697_s15 + $0x40] sm:$0xff]  ;;  %357 = vst.msk [vmem:[#allocation2 + $0x8] sm:$0xff] (!%p6365_p7), %vm355_vm0, %v7708_v1 }
  0x1b   : > { %v7732_v9 = vld [vmem:[%s7697_s15 + $0x48] sm:$0xff]  ;;  %v7735_v10 = vld [vmem:[%s7697_s15 + $0x50] sm:$0xff]  ;;  %v7738_v11 = vld [vmem:[%s7697_s15 + $0x58] sm:$0xff]  ;;  %358 = vst.msk [vmem:[#allocation2 + $0x10] sm:$0xff] (!%p6365_p7), %vm355_vm0, %v7711_v2 }
  0x1c   : > { %v7741_v12 = vld [vmem:[%s7697_s15 + $0x60] sm:$0xff]  ;;  %v7744_v13 = vld [vmem:[%s7697_s15 + $0x68] sm:$0xff]  ;;  %v7747_v14 = vld [vmem:[%s7697_s15 + $0x70] sm:$0xff]  ;;  %359 = vst.msk [vmem:[#allocation2 + $0x18] sm:$0xff] (!%p6365_p7), %vm355_vm0, %v7714_v3 }
  0x1d   : > { %9589 = vst [vmem:[#allocation7_spill] sm:$0xff] %v7741_v12  ;;  %9590 = vst [vmem:[#allocation8_spill] sm:$0xff] %v7744_v13  ;;  %v7750_v15 = vld [vmem:[%s7697_s15 + $0x78] sm:$0xff]  ;;  %v7753_v16 = vld [vmem:[%s7697_s15 + $0x80] sm:$0xff] }
  0x1e   : > { %9591 = vst [vmem:[#allocation9_spill] sm:$0xff] %v7747_v14  ;;  %9592 = vst [vmem:[#allocation10_spill] sm:$0xff] %v7750_v15  ;;  %v7756_v17 = vld [vmem:[%s7697_s15 + $0x88] sm:$0xff]  ;;  %v7759_v18 = vld [vmem:[%s7697_s15 + $0x90] sm:$0xff] }
  0x1f   : > { %9593 = vst [vmem:[#allocation11_spill] sm:$0xff] %v7753_v16  ;;  %9594 = vst [vmem:[#allocation12_spill] sm:$0xff] %v7756_v17  ;;  %v7762_v19 = vld [vmem:[%s7697_s15 + $0x98] sm:$0xff]  ;;  %v7765_v20 = vld [vmem:[%s7697_s15 + $0xa0] sm:$0xff] }
  0x20   : > { %9595 = vst [vmem:[#allocation13_spill] sm:$0xff] %v7759_v18  ;;  %9596 = vst [vmem:[#allocation14_spill] sm:$0xff] %v7762_v19  ;;  %v7768_v21 = vld [vmem:[%s7697_s15 + $0xa8] sm:$0xff]  ;;  %v7771_v22 = vld [vmem:[%s7697_s15 + $0xb0] sm:$0xff]  ;;  %354 = sbr.rel (%p6365_p7) target bundleno = 53 (0x35), region = 52 }
  0x21   : > { %9597 = vst [vmem:[#allocation15_spill] sm:$0xff] %v7765_v20  ;;  %9598 = vst [vmem:[#allocation16_spill] sm:$0xff] %v7768_v21  ;;  %v7774_v23 = vld [vmem:[%s7697_s15 + $0xb8] sm:$0xff]  ;;  %v7777_v24 = vld [vmem:[%s7697_s15 + $0xc0] sm:$0xff] }
  0x22   : > { %9599 = vst [vmem:[#allocation17_spill] sm:$0xff] %v7771_v22  ;;  %9600 = vst [vmem:[#allocation18_spill] sm:$0xff] %v7774_v23  ;;  %v7780_v25 = vld [vmem:[%s7697_s15 + $0xc8] sm:$0xff]  ;;  %v7783_v26 = vld [vmem:[%s7697_s15 + $0xd0] sm:$0xff] }
  0x23   : > { %9601 = vst [vmem:[#allocation19_spill] sm:$0xff] %v7777_v24  ;;  %9602 = vst [vmem:[#allocation20_spill] sm:$0xff] %v7780_v25  ;;  %v7786_v27 = vld [vmem:[%s7697_s15 + $0xd8] sm:$0xff]  ;;  %v7789_v28 = vld [vmem:[%s7697_s15 + $0xe0] sm:$0xff] }
  0x24   : > { %9603 = vst [vmem:[#allocation21_spill] sm:$0xff] %v7783_v26  ;;  %9604 = vst [vmem:[#allocation22_spill] sm:$0xff] %v7786_v27  ;;  %v7792_v29 = vld [vmem:[%s7697_s15 + $0xe8] sm:$0xff]  ;;  %v7795_v30 = vld [vmem:[%s7697_s15 + $0xf0] sm:$0xff] }
  0x25   : > { %9605 = vst [vmem:[#allocation23_spill] sm:$0xff] %v7789_v28  ;;  %9606 = vst [vmem:[#allocation24_spill] sm:$0xff] %v7792_v29  ;;  %v7798_v31 = vld [vmem:[%s7697_s15 + $0xf8] sm:$0xff] }
  0x26   : > { %9607 = vst [vmem:[#allocation25_spill] sm:$0xff] %v7795_v30  ;;  %9608 = vst [vmem:[#allocation26_spill] sm:$0xff] %v7798_v31 }
  0x27   : > { %360 = vst.msk [vmem:[#allocation2 + $0x20] sm:$0xff] %vm355_vm0, %v7717_v4  ;;  %361 = vst.msk [vmem:[#allocation2 + $0x28] sm:$0xff] %vm355_vm0, %v7720_v5 }
  0x28   : > { %362 = vst.msk [vmem:[#allocation2 + $0x30] sm:$0xff] %vm355_vm0, %v7723_v6  ;;  %363 = vst.msk [vmem:[#allocation2 + $0x38] sm:$0xff] %vm355_vm0, %v7726_v7 }
  0x29   : > { %364 = vst.msk [vmem:[#allocation2 + $0x40] sm:$0xff] %vm355_vm0, %v7729_v8  ;;  %365 = vst.msk [vmem:[#allocation2 + $0x48] sm:$0xff] %vm355_vm0, %v7732_v9 }
  0x2a   : > { %366 = vst.msk [vmem:[#allocation2 + $0x50] sm:$0xff] %vm355_vm0, %v7735_v10  ;;  %367 = vst.msk [vmem:[#allocation2 + $0x58] sm:$0xff] %vm355_vm0, %v7738_v11 }
  0x2b   : > { %368 = vst.msk [vmem:[#allocation2 + $0x60] sm:$0xff] %vm355_vm0, %v7741_v12  ;;  %369 = vst.msk [vmem:[#allocation2 + $0x68] sm:$0xff] %vm355_vm0, %v7744_v13 }
  0x2c   : > { %370 = vst.msk [vmem:[#allocation2 + $0x70] sm:$0xff] %vm355_vm0, %v7747_v14  ;;  %371 = vst.msk [vmem:[#allocation2 + $0x78] sm:$0xff] %vm355_vm0, %v7750_v15 }
  0x2d   : > { %372 = vst.msk [vmem:[#allocation2 + $0x80] sm:$0xff] %vm355_vm0, %v7753_v16  ;;  %373 = vst.msk [vmem:[#allocation2 + $0x88] sm:$0xff] %vm355_vm0, %v7756_v17 }
  0x2e   : > { %374 = vst.msk [vmem:[#allocation2 + $0x90] sm:$0xff] %vm355_vm0, %v7759_v18  ;;  %375 = vst.msk [vmem:[#allocation2 + $0x98] sm:$0xff] %vm355_vm0, %v7762_v19 }
  0x2f   : > { %376 = vst.msk [vmem:[#allocation2 + $0xa0] sm:$0xff] %vm355_vm0, %v7765_v20  ;;  %377 = vst.msk [vmem:[#allocation2 + $0xa8] sm:$0xff] %vm355_vm0, %v7768_v21 }
  0x30   : > { %378 = vst.msk [vmem:[#allocation2 + $0xb0] sm:$0xff] %vm355_vm0, %v7771_v22  ;;  %379 = vst.msk [vmem:[#allocation2 + $0xb8] sm:$0xff] %vm355_vm0, %v7774_v23 }
  0x31   : > { %380 = vst.msk [vmem:[#allocation2 + $0xc0] sm:$0xff] %vm355_vm0, %v7777_v24  ;;  %381 = vst.msk [vmem:[#allocation2 + $0xc8] sm:$0xff] %vm355_vm0, %v7780_v25 }
  0x32   : > { %382 = vst.msk [vmem:[#allocation2 + $0xd0] sm:$0xff] %vm355_vm0, %v7783_v26  ;;  %383 = vst.msk [vmem:[#allocation2 + $0xd8] sm:$0xff] %vm355_vm0, %v7786_v27 }
  0x33   : > { %384 = vst.msk [vmem:[#allocation2 + $0xe0] sm:$0xff] %vm355_vm0, %v7789_v28  ;;  %385 = vst.msk [vmem:[#allocation2 + $0xe8] sm:$0xff] %vm355_vm0, %v7792_v29 }
  0x34   : > { %386 = vst.msk [vmem:[#allocation2 + $0xf0] sm:$0xff] %vm355_vm0, %v7795_v30  ;;  %387 = vst.msk [vmem:[#allocation2 + $0xf8] sm:$0xff] %vm355_vm0, %v7798_v31 }
  0x35 PF: > { %p6366_p8 = scmp.le.s32.totalorder %s7598_s24, 0 }
  0x36   : > { %v392_v32 = vld [vmem:[#allocation2] sm:$0xff] (!%p6366_p8)  ;;  %v393_v33 = vld [vmem:[#allocation2 + $0x8] sm:$0xff] (!%p6366_p8)  ;;  %v394_v34 = vld [vmem:[#allocation2 + $0x10] sm:$0xff] (!%p6366_p8)  ;;  %vm552_vm2 = vcmask (!%p6366_p8), 261120  }
  0x37   : > { %391 = sbr.rel (%p6366_p8) target bundleno = 90 (0x5a), region = 56  ;;  %vm424_vm1 = vcmp.gt.f32.partialorder (!%p6366_p8), %v392_v32, 0.5  ;;  %v456_v35 = vmul.f32 (!%p6366_p8), 0.25, %v392_v32  ;;  %v457_v36 = vmul.f32 (!%p6366_p8), 0.25, %v393_v33  ;;  %v395_v37 = vld [vmem:[#allocation2 + $0x18] sm:$0xff] (!%p6366_p8)  ;;  %vm425_vm3 = vcmp.gt.f32.partialorder (!%p6366_p8), %v393_v33, 0.5 }
  0x38   : > { %vm426_vm4 = vcmp.gt.f32.partialorder (!%p6366_p8), %v394_v34, 0.5  ;;  %v458_v39 = vmul.f32 (!%p6366_p8), 0.25, %v394_v34  ;;  %v459_v40 = vmul.f32 (!%p6366_p8), 0.25, %v395_v37  ;;  %vm427_vm5 = vcmp.gt.f32.partialorder (!%p6366_p8), %v395_v37, 0.5  ;;  %v398_v45 = vld [vmem:[#allocation2 + $0x30] sm:$0xff] (!%p6366_p8)  ;;  %v399_v49 = vld [vmem:[#allocation2 + $0x38] sm:$0xff] (!%p6366_p8) }
  0x39   : > { %v488_v42 = vadd.f32 (!%p6366_p8), %v456_v35, %v7705_v0  ;;  %v489_v43 = vadd.f32 (!%p6366_p8), %v457_v36, %v7708_v1  ;;  %v400_v53 = vld [vmem:[#allocation2 + $0x40] sm:$0xff] (!%p6366_p8)  ;;  %v462_v57 = vmul.f32 (!%p6366_p8), 0.25, %v398_v45  ;;  %v401_v58 = vld [vmem:[#allocation2 + $0x48] sm:$0xff] (!%p6366_p8)  ;;  %v402_v59 = vld [vmem:[#allocation2 + $0x50] sm:$0xff] (!%p6366_p8)  ;;  %vm430_vm8 = vcmp.gt.f32.partialorder (!%p6366_p8), %v398_v45, 0.5 }
  0x3a   : > { %v490_v46 = vadd.f32 (!%p6366_p8), %v458_v39, %v7711_v2  ;;  %v491_v47 = vadd.f32 (!%p6366_p8), %v459_v40, %v7714_v3  ;;  %vm431_vm9 = vcmp.gt.f32.partialorder (!%p6366_p8), %v399_v49, 0.5  ;;  %v463_v61 = vmul.f32 (!%p6366_p8), 0.25, %v399_v49  ;;  %v403_v62 = vld [vmem:[#allocation2 + $0x58] sm:$0xff] (!%p6366_p8)  ;;  %v404_v37 = vld [vmem:[#allocation2 + $0x60] sm:$0xff] (!%p6366_p8)  ;;  %v406_v45 = vld [vmem:[#allocation2 + $0x70] sm:$0xff] (!%p6366_p8) }
  0x3b   : > { %v520_v50 = vsel (!%p6366_p8), %vm424_vm1, %v7705_v0, %v488_v42  ;;  %v521_v51 = vsel (!%p6366_p8), %vm425_vm3, %v7708_v1, %v489_v43  ;;  %v494_v32 = vadd.f32 (!%p6366_p8), %v462_v57, %v7723_v6  ;;  %vm432_vm10 = vcmp.gt.f32.partialorder (!%p6366_p8), %v400_v53, 0.5 }
  0x3c   : > { %v396_v38 = vld [vmem:[#allocation2 + $0x20] sm:$0xff] (!%p6366_p8)  ;;  %v397_v41 = vld [vmem:[#allocation2 + $0x28] sm:$0xff] (!%p6366_p8)  ;;  %553 = vst.msk [vmem:[#allocation2] sm:$0xff] (!%p6366_p8), %vm552_vm2, %v520_v50  ;;  %554 = vst.msk [vmem:[#allocation2 + $0x8] sm:$0xff] (!%p6366_p8), %vm552_vm2, %v521_v51  ;;  %v522_v54 = vsel (!%p6366_p8), %vm426_vm4, %v7711_v2, %v490_v46  ;;  %v523_v55 = vsel (!%p6366_p8), %vm427_vm5, %v7714_v3, %v491_v47  ;;  %v464_v33 = vmul.f32 (!%p6366_p8), 0.25, %v400_v53  ;;  %v495_v34 = vadd.f32 (!%p6366_p8), %v463_v61, %v7726_v7 }
  0x3d   : > { %v460_v44 = vmul.f32 (!%p6366_p8), 0.25, %v396_v38  ;;  %vm428_vm6 = vcmp.gt.f32.partialorder (!%p6366_p8), %v396_v38, 0.5  ;;  %v461_v48 = vmul.f32 (!%p6366_p8), 0.25, %v397_v41  ;;  %vm429_vm7 = vcmp.gt.f32.partialorder (!%p6366_p8), %v397_v41, 0.5  ;;  %555 = vst.msk [vmem:[#allocation2 + $0x10] sm:$0xff] (!%p6366_p8), %vm552_vm2, %v522_v54  ;;  %556 = vst.msk [vmem:[#allocation2 + $0x18] sm:$0xff] (!%p6366_p8), %vm552_vm2, %v523_v55 }
  0x3e   : > { %vm433_vm11 = vcmp.gt.f32.partialorder %v401_v58, 0.5  ;;  %v465_v35 = vmul.f32 0.25, %v401_v58  ;;  %v466_v36 = vmul.f32 0.25, %v402_v59  ;;  %v526_v38 = vsel %vm430_vm8, %v7723_v6, %v494_v32  ;;  %v405_v41 = vld [vmem:[#allocation2 + $0x68] sm:$0xff]  ;;  %v407_v50 = vld [vmem:[#allocation2 + $0x78] sm:$0xff]  ;;  %v408_v51 = vld [vmem:[#allocation2 + $0x80] sm:$0xff] }
  0x3f   : > { %v492_v52 = vadd.f32 %v460_v44, %v7717_v4  ;;  %v493_v56 = vadd.f32 %v461_v48, %v7720_v5  ;;  %v496_v39 = vadd.f32 %v464_v33, %v7729_v8  ;;  %vm434_vm12 = vcmp.gt.f32.partialorder %v402_v59, 0.5  ;;  %559 = vst.msk [vmem:[#allocation2 + $0x30] sm:$0xff] %vm552_vm2, %v526_v38  ;;  %v409_v55 = vld [vmem:[#allocation2 + $0x88] sm:$0xff]  ;;  %v410_v61 = vld [vmem:[#allocation2 + $0x90] sm:$0xff]  ;;  %v411_v33 = vld [vmem:[#allocation2 + $0x98] sm:$0xff] }
  0x40   : > { %v467_v40 = vmul.f32 0.25, %v403_v62  ;;  %v527_v42 = vsel %vm431_vm9, %v7726_v7, %v495_v34  ;;  %v497_v43 = vadd.f32 %v465_v35, %v7732_v9  ;;  %v498_v44 = vadd.f32 %v466_v36, %v7735_v10  ;;  %v412_v38 = vld [vmem:[#allocation2 + $0xa0] sm:$0xff] }
  0x41   : > { %v524_v60 = vsel %vm428_vm6, %v7717_v4, %v492_v52  ;;  %v525_v63 = vsel %vm429_vm7, %v7720_v5, %v493_v56  ;;  %vm435_vm13 = vcmp.gt.f32.partialorder %v403_v62, 0.5  ;;  %560 = vst.msk [vmem:[#allocation2 + $0x38] sm:$0xff] %vm552_vm2, %v527_v42  ;;  %v528_v46 = vsel %vm432_vm10, %v7729_v8, %v496_v39  ;;  %v413_v42 = vld [vmem:[#allocation2 + $0xa8] sm:$0xff] }
  0x42   : > { %557 = vst.msk [vmem:[#allocation2 + $0x20] sm:$0xff] %vm552_vm2, %v524_v60  ;;  %558 = vst.msk [vmem:[#allocation2 + $0x28] sm:$0xff] %vm552_vm2, %v525_v63  ;;  %v499_v47 = vadd.f32 %v467_v40, %v7738_v11  ;;  %vm436_vm14 = vcmp.gt.f32.partialorder %v404_v37, 0.5  ;;  %v468_v48 = vmul.f32 0.25, %v404_v37  ;;  %v529_v49 = vsel %vm433_vm11, %v7732_v9, %v497_v43  ;;  %v414_v43 = vld [vmem:[#allocation2 + $0xb0] sm:$0xff] }
  0x43   : > { %561 = vst.msk [vmem:[#allocation2 + $0x40] sm:$0xff] %vm552_vm2, %v528_v46  ;;  %v530_v52 = vsel %vm434_vm12, %v7735_v10, %v498_v44  ;;  %vm437_vm15 = vcmp.gt.f32.partialorder %v405_v41, 0.5  ;;  %v469_v54 = vmul.f32 0.25, %v405_v41  ;;  %562 = vst.msk [vmem:[#allocation2 + $0x48] sm:$0xff] %vm552_vm2, %v529_v49  ;;  %vm438_vm0 = vcmp.gt.f32.partialorder %v406_v45, 0.5 }
  0x44   : > { %563 = vst.msk [vmem:[#allocation2 + $0x50] sm:$0xff] %vm552_vm2, %v530_v52  ;;  %v531_v53 = vsel %vm435_vm13, %v7738_v11, %v499_v47  ;;  %v500_v56 = vadd.f32 %v468_v48, %v7741_v12  ;;  %v470_v57 = vmul.f32 0.25, %v406_v45  ;;  %vm439_vm1 = vcmp.gt.f32.partialorder %v407_v50, 0.5  ;;  %v415_v47 = vld [vmem:[#allocation2 + $0xb8] sm:$0xff] }
  0x45   : > { %564 = vst.msk [vmem:[#allocation2 + $0x58] sm:$0xff] %vm552_vm2, %v531_v53  ;;  %v501_v58 = vadd.f32 %v469_v54, %v7744_v13  ;;  %v471_v59 = vmul.f32 0.25, %v407_v50  ;;  %v472_v60 = vmul.f32 0.25, %v408_v51  ;;  %vm440_vm3 = vcmp.gt.f32.partialorder %v408_v51, 0.5  ;;  %v416_v54 = vld [vmem:[#allocation2 + $0xc0] sm:$0xff] }
  0x46   : > { %v532_v63 = vsel %vm436_vm14, %v7741_v12, %v500_v56  ;;  %v502_v32 = vadd.f32 %v470_v57, %v7747_v14  ;;  %v473_v62 = vmul.f32 0.25, %v409_v55  ;;  %vm441_vm4 = vcmp.gt.f32.partialorder %v409_v55, 0.5  ;;  %v417_v57 = vld [vmem:[#allocation2 + $0xc8] sm:$0xff] }
  0x47   : > { %565 = vst.msk [vmem:[#allocation2 + $0x60] sm:$0xff] %vm552_vm2, %v532_v63  ;;  %v533_v34 = vsel %vm437_vm15, %v7744_v13, %v501_v58  ;;  %v503_v35 = vadd.f32 %v471_v59, %v7750_v15  ;;  %v504_v36 = vadd.f32 %v472_v60, %v7753_v16  ;;  %vm442_vm5 = vcmp.gt.f32.partialorder %v410_v61, 0.5  ;;  %v418_v63 = vld [vmem:[#allocation2 + $0xd0] sm:$0xff] }
  0x48   : > { %566 = vst.msk [vmem:[#allocation2 + $0x68] sm:$0xff] %vm552_vm2, %v533_v34  ;;  %v534_v37 = vsel %vm438_vm0, %v7747_v14, %v502_v32  ;;  %v505_v39 = vadd.f32 %v473_v62, %v7756_v17  ;;  %v474_v40 = vmul.f32 0.25, %v410_v61  ;;  %vm443_vm6 = vcmp.gt.f32.partialorder %v411_v33, 0.5  ;;  %v419_v34 = vld [vmem:[#allocation2 + $0xd8] sm:$0xff] }
  0x49   : > { %567 = vst.msk [vmem:[#allocation2 + $0x70] sm:$0xff] %vm552_vm2, %v534_v37  ;;  %v535_v41 = vsel %vm439_vm1, %v7750_v15, %v503_v35  ;;  %v536_v44 = vsel %vm440_vm3, %v7753_v16, %v504_v36  ;;  %v475_v46 = vmul.f32 0.25, %v411_v33  ;;  %vm444_vm7 = vcmp.gt.f32.partialorder %v412_v38, 0.5  ;;  %v420_v35 = vld [vmem:[#allocation2 + $0xe0] sm:$0xff] }
  0x4a   : > { %568 = vst.msk [vmem:[#allocation2 + $0x78] sm:$0xff] %vm552_vm2, %v535_v41  ;;  %569 = vst.msk [vmem:[#allocation2 + $0x80] sm:$0xff] %vm552_vm2, %v536_v44  ;;  %v537_v45 = vsel %vm441_vm4, %v7756_v17, %v505_v39  ;;  %v506_v48 = vadd.f32 %v474_v40, %v7759_v18  ;;  %v476_v49 = vmul.f32 0.25, %v412_v38  ;;  %vm445_vm8 = vcmp.gt.f32.partialorder %v413_v42, 0.5  ;;  %v421_v39 = vld [vmem:[#allocation2 + $0xe8] sm:$0xff] }
  0x4b   : > { %570 = vst.msk [vmem:[#allocation2 + $0x88] sm:$0xff] %vm552_vm2, %v537_v45  ;;  %v507_v50 = vadd.f32 %v475_v46, %v7762_v19  ;;  %v477_v51 = vmul.f32 0.25, %v413_v42  ;;  %v478_v52 = vmul.f32 0.25, %v414_v43  ;;  %vm446_vm9 = vcmp.gt.f32.partialorder %v414_v43, 0.5  ;;  %v422_v46 = vld [vmem:[#allocation2 + $0xf0] sm:$0xff] }
  0x4c   : > { %v538_v53 = vsel %vm442_vm5, %v7759_v18, %v506_v48  ;;  %v508_v56 = vadd.f32 %v476_v49, %v7765_v20  ;;  %v479_v55 = vmul.f32 0.25, %v415_v47  ;;  %vm447_vm10 = vcmp.gt.f32.partialorder %v415_v47, 0.5  ;;  %v423_v49 = vld [vmem:[#allocation2 + $0xf8] sm:$0xff] }
  0x4d   : > { %571 = vst.msk [vmem:[#allocation2 + $0x90] sm:$0xff] %vm552_vm2, %v538_v53  ;;  %v539_v58 = vsel %vm443_vm6, %v7762_v19, %v507_v50  ;;  %v509_v59 = vadd.f32 %v477_v51, %v7768_v21  ;;  %v510_v60 = vadd.f32 %v478_v52, %v7771_v22  ;;  %vm448_vm11 = vcmp.gt.f32.partialorder %v416_v54, 0.5 }
  0x4e   : > { %572 = vst.msk [vmem:[#allocation2 + $0x98] sm:$0xff] %vm552_vm2, %v539_v58  ;;  %v540_v61 = vsel %vm444_vm7, %v7765_v20, %v508_v56  ;;  %v511_v32 = vadd.f32 %v479_v55, %v7774_v23  ;;  %v480_v62 = vmul.f32 0.25, %v416_v54  ;;  %vm449_vm12 = vcmp.gt.f32.partialorder %v417_v57, 0.5 }
  0x4f   : > { %573 = vst.msk [vmem:[#allocation2 + $0xa0] sm:$0xff] %vm552_vm2, %v540_v61  ;;  %v541_v33 = vsel %vm445_vm8, %v7768_v21, %v509_v59  ;;  %v542_v36 = vsel %vm446_vm9, %v7771_v22, %v510_v60  ;;  %v481_v37 = vmul.f32 0.25, %v417_v57  ;;  %vm450_vm13 = vcmp.gt.f32.partialorder %v418_v63, 0.5 }
  0x50   : > { %574 = vst.msk [vmem:[#allocation2 + $0xa8] sm:$0xff] %vm552_vm2, %v541_v33  ;;  %575 = vst.msk [vmem:[#allocation2 + $0xb0] sm:$0xff] %vm552_vm2, %v542_v36  ;;  %v543_v38 = vsel %vm447_vm10, %v7774_v23, %v511_v32  ;;  %v512_v40 = vadd.f32 %v480_v62, %v7777_v24  ;;  %v482_v41 = vmul.f32 0.25, %v418_v63  ;;  %vm451_vm14 = vcmp.gt.f32.partialorder %v419_v34, 0.5 }
  0x51   : > { %576 = vst.msk [vmem:[#allocation2 + $0xb8] sm:$0xff] %vm552_vm2, %v543_v38  ;;  %v513_v42 = vadd.f32 %v481_v37, %v7780_v25  ;;  %v483_v43 = vmul.f32 0.25, %v419_v34  ;;  %v484_v44 = vmul.f32 0.25, %v420_v35  ;;  %vm452_vm15 = vcmp.gt.f32.partialorder %v420_v35, 0.5 }
  0x52   : > { %v544_v45 = vsel %vm448_vm11, %v7777_v24, %v512_v40  ;;  %v514_v48 = vadd.f32 %v482_v41, %v7783_v26  ;;  %v485_v47 = vmul.f32 0.25, %v421_v39  ;;  %vm453_vm0 = vcmp.gt.f32.partialorder %v421_v39, 0.5 }
  0x53   : > { %577 = vst.msk [vmem:[#allocation2 + $0xc0] sm:$0xff] %vm552_vm2, %v544_v45  ;;  %v545_v50 = vsel %vm449_vm12, %v7780_v25, %v513_v42  ;;  %v515_v51 = vadd.f32 %v483_v43, %v7786_v27  ;;  %v516_v52 = vadd.f32 %v484_v44, %v7789_v28  ;;  %v486_v56 = vmul.f32 0.25, %v422_v46 }
  0x54   : > { %578 = vst.msk [vmem:[#allocation2 + $0xc8] sm:$0xff] %vm552_vm2, %v545_v50  ;;  %v546_v54 = vsel %vm450_vm13, %v7783_v26, %v514_v48  ;;  %v517_v53 = vadd.f32 %v485_v47, %v7792_v29  ;;  %vm454_vm1 = vcmp.gt.f32.partialorder %v422_v46, 0.5  ;;  %v487_v58 = vmul.f32 0.25, %v423_v49 }
  0x55   : > { %579 = vst.msk [vmem:[#allocation2 + $0xd0] sm:$0xff] %vm552_vm2, %v546_v54  ;;  %v547_v55 = vsel %vm451_vm14, %v7786_v27, %v515_v51  ;;  %v548_v57 = vsel %vm452_vm15, %v7789_v28, %v516_v52  ;;  %v518_v60 = vadd.f32 %v486_v56, %v7795_v30  ;;  %vm455_vm3 = vcmp.gt.f32.partialorder %v423_v49, 0.5 }
  0x56   : > { %580 = vst.msk [vmem:[#allocation2 + $0xd8] sm:$0xff] %vm552_vm2, %v547_v55  ;;  %581 = vst.msk [vmem:[#allocation2 + $0xe0] sm:$0xff] %vm552_vm2, %v548_v57  ;;  %v549_v59 = vsel %vm453_vm0, %v7792_v29, %v517_v53  ;;  %v519_v63 = vadd.f32 %v487_v58, %v7798_v31 }
  0x57   : > { %582 = vst.msk [vmem:[#allocation2 + $0xe8] sm:$0xff] %vm552_vm2, %v549_v59  ;;  %v550_v61 = vsel %vm454_vm1, %v7795_v30, %v518_v60 }
  0x58   : > { %583 = vst.msk [vmem:[#allocation2 + $0xf0] sm:$0xff] %vm552_vm2, %v550_v61  ;;  %v551_v32 = vsel %vm455_vm3, %v7798_v31, %v519_v63 }
  0x59   : > { %584 = vst.msk [vmem:[#allocation2 + $0xf8] sm:$0xff] %vm552_vm2, %v551_v32 }
  0x5a PF: > { %v7554_v62 = vld [vmem:[%s9561_s3] sm:$0xff]   ;;  %v7555_v34 = vld [vmem:[%s9561_s3 + $0x8] sm:$0xff]   ;;  %vm9588_vm4 = vcmask 261120   ;;  %v9566_v40 = vmov 0.0   ;;  %v591_v45 = vld [vmem:[#allocation2 + $0x30] sm:$0xff] }
  0x5b   : > { %6862 = vmatprep.subr.bf16.mxu0 %v7554_v62  ;;  %v589_v39 = vld [vmem:[#allocation2 + $0x20] sm:$0xff]  ;;  %v590_v38 = vld [vmem:[#allocation2 + $0x28] sm:$0xff]  ;;  %v592_v48 = vld [vmem:[#allocation2 + $0x38] sm:$0xff]  ;;  %vm623_vm10 = vcmp.gt.f32.partialorder %v591_v45, 0.5 }
  0x5c   : > { %6863 = vmatpush3.bf16.msra.mxu0 %v7554_v62  ;;  %vm621_vm8 = vcmp.gt.f32.partialorder %v589_v39, 0.5  ;;  %vm622_vm9 = vcmp.gt.f32.partialorder %v590_v38, 0.5  ;;  %v593_v51 = vld [vmem:[#allocation2 + $0x40] sm:$0xff]  ;;  %v594_v52 = vld [vmem:[#allocation2 + $0x48] sm:$0xff]  ;;  %vm624_vm11 = vcmp.gt.f32.partialorder %v592_v48, 0.5  ;;  %v6373_v53 = vsel %vm623_vm10, 1.0, %v9566_v40 }
  0x5d   : > { %6864 = vmatprep.subr.bf16.mxu0 %v7555_v34  ;;  %v6371_v49 = vsel %vm621_vm8, 1.0, %v9566_v40  ;;  %v6372_v50 = vsel %vm622_vm9, 1.0, %v9566_v40  ;;  %vm625_vm12 = vcmp.gt.f32.partialorder %v593_v51, 0.5  ;;  %vm626_vm13 = vcmp.gt.f32.partialorder %v594_v52, 0.5  ;;  %v595_v58 = vld [vmem:[#allocation2 + $0x50] sm:$0xff]  ;;  %v596_v59 = vld [vmem:[#allocation2 + $0x58] sm:$0xff] }
  0x5e   : > { %v715_v54 = vpack.c.bf16 %v6372_v50, %v6371_v49  ;;  %v6374_v56 = vsel %vm624_vm11, 1.0, %v9566_v40  ;;  %v6375_v55 = vsel %vm625_vm12, 1.0, %v9566_v40  ;;  %v6376_v57 = vsel %vm626_vm13, 1.0, %v9566_v40  ;;  %v597_v63 = vld [vmem:[#allocation2 + $0x60] sm:$0xff]  ;;  %v598_v61 = vld [vmem:[#allocation2 + $0x68] sm:$0xff]  ;;  %v603_v48 = vld [vmem:[#allocation2 + $0x90] sm:$0xff] }
  0x5f   : > { %v585_v35 = vld [vmem:[#allocation2] sm:$0xff]  ;;  %v586_v33 = vld [vmem:[#allocation2 + $0x8] sm:$0xff]  ;;  %v716_v60 = vpack.c.bf16 %v6374_v56, %v6373_v53  ;;  %v717_v32 = vpack.c.bf16 %v6376_v57, %v6375_v55  ;;  %vm627_vm14 = vcmp.gt.f32.partialorder %v595_v58, 0.5  ;;  %vm628_vm15 = vcmp.gt.f32.partialorder %v596_v59, 0.5  ;;  %v607_v57 = vld [vmem:[#allocation2 + $0xb0] sm:$0xff] }
  0x60   : > { %v587_v36 = vld [vmem:[#allocation2 + $0x10] sm:$0xff]  ;;  %vm617_vm5 = vcmp.gt.f32.partialorder %v585_v35, 0.5  ;;  %vm618_vm6 = vcmp.gt.f32.partialorder %v586_v33, 0.5  ;;  %v588_v37 = vld [vmem:[#allocation2 + $0x18] sm:$0xff]  ;;  %6865 = vmatpush3.bf16.msra.mxu0 %v7555_v34  ;;  %vm629_vm0 = vcmp.gt.f32.partialorder %v597_v63, 0.5  ;;  %vm630_vm1 = vcmp.gt.f32.partialorder %v598_v61, 0.5 }
  0x61   : > { %vm619_vm7 = vcmp.gt.f32.partialorder %v587_v36, 0.5  ;;  %v6367_v41 = vsel %vm617_vm5, 1.0, %v9566_v40  ;;  %v6368_v42 = vsel %vm618_vm6, 1.0, %v9566_v40  ;;  %vm620_vm2 = vcmp.gt.f32.partialorder %v588_v37, 0.5  ;;  %v599_v36 = vld [vmem:[#allocation2 + $0x70] sm:$0xff]  ;;  %v600_v37 = vld [vmem:[#allocation2 + $0x78] sm:$0xff] }
  0x62   : > { %v6369_v43 = vsel %vm619_vm7, 1.0, %v9566_v40  ;;  %v713_v44 = vpack.c.bf16 %v6368_v42, %v6367_v41  ;;  %v6370_v46 = vsel %vm620_vm2, 1.0, %v9566_v40  ;;  %v6377_v62 = vsel %vm627_vm14, 1.0, %v9566_v40  ;;  %v601_v38 = vld [vmem:[#allocation2 + $0x80] sm:$0xff]  ;;  %v602_v41 = vld [vmem:[#allocation2 + $0x88] sm:$0xff]  ;;  %v608_v58 = vld [vmem:[#allocation2 + $0xb8] sm:$0xff] }
  0x63   : > { %v714_v47 = vpack.c.bf16 %v6370_v46, %v6369_v43  ;;  %v6378_v34 = vsel %vm628_vm15, 1.0, %v9566_v40  ;;  %v6379_v35 = vsel %vm629_vm0, 1.0, %v9566_v40  ;;  %v6380_v33 = vsel %vm630_vm1, 1.0, %v9566_v40  ;;  %v605_v50 = vld [vmem:[#allocation2 + $0xa0] sm:$0xff]  ;;  %v606_v51 = vld [vmem:[#allocation2 + $0xa8] sm:$0xff] }
  0x64   : > { %6866 = vmatprep.mubr.msk.bf16.mxu0 %vm9588_vm4, %v713_v44  ;;  %v718_v39 = vpack.c.bf16 %v6378_v34, %v6377_v62  ;;  %v719_v42 = vpack.c.bf16 %v6380_v33, %v6379_v35  ;;  %vm631_vm3 = vcmp.gt.f32.partialorder %v599_v36, 0.5  ;;  %vm632_vm5 = vcmp.gt.f32.partialorder %v600_v37, 0.5  ;;  %v610_v63 = vld [vmem:[#allocation2 + $0xc8] sm:$0xff]  ;;  %v611_v33 = vld [vmem:[#allocation2 + $0xd0] sm:$0xff]  ;;  %v612_v36 = vld [vmem:[#allocation2 + $0xd8] sm:$0xff] }
  0x65   : > { %6867 = vmatmul.mubr.msk.bf16.vlgmr.msra.gmra.mrb[0].mxu0 %vm9588_vm4, %v714_v47  ;;  %vm633_vm6 = vcmp.gt.f32.partialorder %v601_v38, 0.5  ;;  %vm634_vm7 = vcmp.gt.f32.partialorder %v602_v41, 0.5  ;;  %v6381_v43 = vsel %vm631_vm3, 1.0, %v9566_v40  ;;  %v6382_v44 = vsel %vm632_vm5, 1.0, %v9566_v40  ;;  %v604_v47 = vld [vmem:[#allocation2 + $0x98] sm:$0xff]  ;;  %v614_v38 = vld [vmem:[#allocation2 + $0xe8] sm:$0xff] }
  0x66   : > { %6870 = vmatprep.mubr.msk.bf16.mxu0 %vm9588_vm4, %v715_v54  ;;  %v6383_v46 = vsel %vm633_vm6, 1.0, %v9566_v40  ;;  %v6384_v45 = vsel %vm634_vm7, 1.0, %v9566_v40  ;;  %v720_v49 = vpack.c.bf16 %v6382_v44, %v6381_v43  ;;  %vm635_vm2 = vcmp.gt.f32.partialorder %v603_v48, 0.5  ;;  %v616_v48 = vld [vmem:[#allocation2 + $0xf8] sm:$0xff] }
  0x67   : > { %v721_v52 = vpack.c.bf16 %v6384_v45, %v6383_v46  ;;  %vm636_vm8 = vcmp.gt.f32.partialorder %v604_v47, 0.5  ;;  %vm637_vm9 = vcmp.gt.f32.partialorder %v605_v50, 0.5  ;;  %vm638_vm10 = vcmp.gt.f32.partialorder %v606_v51, 0.5  ;;  %v615_v45 = vld [vmem:[#allocation2 + $0xf0] sm:$0xff] }
  0x68   : > { %v6385_v54 = vsel %vm635_vm2, 1.0, %v9566_v40  ;;  %v6386_v53 = vsel %vm636_vm8, 1.0, %v9566_v40  ;;  %v6387_v56 = vsel %vm637_vm9, 1.0, %v9566_v40  ;;  %v6388_v55 = vsel %vm638_vm10, 1.0, %v9566_v40 }
  0x69   : > { %v722_v59 = vpack.c.bf16 %v6386_v53, %v6385_v54  ;;  %v723_v61 = vpack.c.bf16 %v6388_v55, %v6387_v56  ;;  %vm639_vm11 = vcmp.gt.f32.partialorder %v607_v57, 0.5  ;;  %vm640_vm12 = vcmp.gt.f32.partialorder %v608_v58, 0.5  ;;  %v8050_v54 = vld [vmem:[%s9562_s4] ss:$0 sm:$0xff] }
  0x6a   : > { %vm642_vm14 = vcmp.gt.f32.partialorder %v610_v63, 0.5  ;;  %v6390_v62 = vsel %vm640_vm12, 1.0, %v9566_v40  ;;  %vm643_vm15 = vcmp.gt.f32.partialorder %v611_v33, 0.5  ;;  %vm644_vm0 = vcmp.gt.f32.partialorder %v612_v36, 0.5 }
  0x6b   : > { %v6392_v35 = vsel %vm642_vm14, 1.0, %v9566_v40  ;;  %vm646_vm3 = vcmp.gt.f32.partialorder %v614_v38, 0.5  ;;  %v6394_v43 = vsel %vm644_vm0, 1.0, %v9566_v40  ;;  %vm647_vm5 = vcmp.gt.f32.partialorder %v615_v45, 0.5 }
  0x6c   : > { %v6396_v46 = vsel %vm646_vm3, 1.0, %v9566_v40  ;;  %vm648_vm6 = vcmp.gt.f32.partialorder %v616_v48, 0.5  ;;  %v6397_v50 = vsel %vm647_vm5, 1.0, %v9566_v40 }
  0x6d   : > { %6871 = vmatmul.mubr.msk.bf16.gmra.mrb[4].mxu0 %vm9588_vm4, %v716_v60  ;;  %v609_v60 = vld [vmem:[#allocation2 + $0xc0] sm:$0xff]  ;;  %v6398_v51 = vsel %vm648_vm6, 1.0, %v9566_v40 }
  0x6e   : > { %6874 = vmatprep.mubr.msk.bf16.mxu0 %vm9588_vm4, %v717_v32  ;;  %vm641_vm13 = vcmp.gt.f32.partialorder %v609_v60, 0.5  ;;  %v6389_v32 = vsel %vm639_vm11, 1.0, %v9566_v40 }
  0x6f   : > { %v6391_v34 = vsel %vm641_vm13, 1.0, %v9566_v40  ;;  %v724_v37 = vpack.c.bf16 %v6390_v62, %v6389_v32 }
  0x70   : > { %v725_v41 = vpack.c.bf16 %v6392_v35, %v6391_v34 }
  0x75   : > { %6875 = vmatmul.mubr.msk.bf16.gmra.mrb[8].mxu0 %vm9588_vm4, %v718_v39  ;;  %v613_v39 = vld [vmem:[#allocation2 + $0xe0] sm:$0xff] }
  0x76   : > { %6878 = vmatprep.mubr.msk.bf16.mxu0 %vm9588_vm4, %v719_v42  ;;  %vm645_vm1 = vcmp.gt.f32.partialorder %v613_v39, 0.5  ;;  %v6393_v42 = vsel %vm643_vm15, 1.0, %v9566_v40 }
  0x77   : > { %v6395_v44 = vsel %vm645_vm1, 1.0, %v9566_v40  ;;  %v726_v47 = vpack.c.bf16 %v6394_v43, %v6393_v42 }
  0x7d   : > { %6879 = vmatmul.mubr.msk.bf16.gmra.mrb[12].mxu0 %vm9588_vm4, %v720_v49  ;;  %v727_v49 = vpack.c.bf16 %v6396_v46, %v6395_v44 }
  0x7e   : > { %6882 = vmatprep.mubr.msk.bf16.mxu0 %vm9588_vm4, %v721_v52  ;;  %v728_v52 = vpack.c.bf16 %v6398_v51, %v6397_v50 }
  0x85   : > { %6883 = vmatmul.mubr.msk.bf16.gmra.mrb[16].mxu0 %vm9588_vm4, %v722_v59 }
  0x86   : > { %6886 = vmatprep.mubr.msk.bf16.mxu0 %vm9588_vm4, %v723_v61 }
  0x8d   : > { %6887 = vmatmul.mubr.msk.bf16.gmra.mrb[20].mxu0 %vm9588_vm4, %v724_v37 }
  0x8e   : > { %6890 = vmatprep.mubr.msk.bf16.mxu0 %vm9588_vm4, %v725_v41 }
  0x95   : > { %6891 = vmatmul.mubr.msk.bf16.gmra.mrb[24].mxu0 %vm9588_vm4, %v726_v47 }
  0x96   : > { %6894 = vmatprep.mubr.msk.bf16.mxu0 %vm9588_vm4, %v727_v49 }
  0x9d   : > { %6895 = vmatmul.mubr.msk.bf16.gmra.mrb[28].mxu0 %vm9588_vm4, %v728_v52 }
 0x138   : > { %v6868_v53 = vpop.f32.mrb[0].mxu0 }
 0x139   : > { %v8053_v56 = vadd.f32 %v6868_v53, %v8050_v54  ;;  %v835_v55 = vpop.f32.mrb[1].mxu0 }
 0x13a   : > { %v8056_v57 = vadd.f32 %v8050_v54, %v835_v55  ;;  %v6869_v58 = vpop.f32.mrb[2].mxu0 }
 0x13b   : > { %v8059_v59 = vadd.f32 %v6869_v58, %v8050_v54  ;;  %v838_v60 = vpop.f32.mrb[3].mxu0  ;;  %967 = vst.msk [vmem:[#allocation3 + $0x10] sm:$0xff] (!%p6365_p7), %vm9588_vm4, %v8053_v56 }
 0x13c   : > { %v8062_v63 = vadd.f32 %v8050_v54, %v838_v60  ;;  %965 = vst.msk [vmem:[#allocation3] sm:$0xff] (!%p6365_p7), %vm9588_vm4, %v8056_v57 }
 0x13d   : > { %968 = vst.msk [vmem:[#allocation3 + $0x18] sm:$0xff] (!%p6365_p7), %vm9588_vm4, %v8059_v59 }
 0x13e   : > { %966 = vst.msk [vmem:[#allocation3 + $0x8] sm:$0xff] (!%p6365_p7), %vm9588_vm4, %v8062_v63 }
 0x140   : > { %v6872_v61 = vpop.f32.mrb[4].mxu0 }
 0x141   : > { %v8065_v32 = vadd.f32 %v6872_v61, %v8050_v54  ;;  %v851_v62 = vpop.f32.mrb[5].mxu0 }
 0x142   : > { %v8068_v34 = vadd.f32 %v8050_v54, %v851_v62  ;;  %v6873_v35 = vpop.f32.mrb[6].mxu0 }
 0x143   : > { %v8071_v33 = vadd.f32 %v6873_v35, %v8050_v54  ;;  %v854_v36 = vpop.f32.mrb[7].mxu0  ;;  %971 = vst.msk [vmem:[#allocation3 + $0x30] sm:$0xff] (!%p6365_p7), %vm9588_vm4, %v8065_v32 }
 0x144   : > { %v8074_v37 = vadd.f32 %v8050_v54, %v854_v36  ;;  %969 = vst.msk [vmem:[#allocation3 + $0x20] sm:$0xff] (!%p6365_p7), %vm9588_vm4, %v8068_v34 }
 0x145   : > { %972 = vst.msk [vmem:[#allocation3 + $0x38] sm:$0xff] (!%p6365_p7), %vm9588_vm4, %v8071_v33 }
 0x146   : > { %970 = vst.msk [vmem:[#allocation3 + $0x28] sm:$0xff] (!%p6365_p7), %vm9588_vm4, %v8074_v37 }
 0x148   : > { %v6876_v39 = vpop.f32.mrb[8].mxu0 }
 0x149   : > { %v8077_v38 = vadd.f32 %v6876_v39, %v8050_v54  ;;  %v867_v41 = vpop.f32.mrb[9].mxu0 }
 0x14a   : > { %v8080_v42 = vadd.f32 %v8050_v54, %v867_v41  ;;  %v6877_v43 = vpop.f32.mrb[10].mxu0 }
 0x14b   : > { %v8083_v44 = vadd.f32 %v6877_v43, %v8050_v54  ;;  %v870_v46 = vpop.f32.mrb[11].mxu0  ;;  %975 = vst.msk [vmem:[#allocation3 + $0x50] sm:$0xff] (!%p6365_p7), %vm9588_vm4, %v8077_v38 }
 0x14c   : > { %v8086_v45 = vadd.f32 %v8050_v54, %v870_v46  ;;  %973 = vst.msk [vmem:[#allocation3 + $0x40] sm:$0xff] (!%p6365_p7), %vm9588_vm4, %v8080_v42 }
 0x14d   : > { %976 = vst.msk [vmem:[#allocation3 + $0x58] sm:$0xff] (!%p6365_p7), %vm9588_vm4, %v8083_v44 }
 0x14e   : > { %974 = vst.msk [vmem:[#allocation3 + $0x48] sm:$0xff] (!%p6365_p7), %vm9588_vm4, %v8086_v45 }
 0x150   : > { %v6880_v48 = vpop.f32.mrb[12].mxu0 }
 0x151   : > { %v8089_v47 = vadd.f32 %v6880_v48, %v8050_v54  ;;  %v883_v49 = vpop.f32.mrb[13].mxu0 }
 0x152   : > { %v8092_v50 = vadd.f32 %v8050_v54, %v883_v49  ;;  %v6881_v51 = vpop.f32.mrb[14].mxu0 }
 0x153   : > { %v8095_v52 = vadd.f32 %v6881_v51, %v8050_v54  ;;  %v886_v53 = vpop.f32.mrb[15].mxu0  ;;  %979 = vst.msk [vmem:[#allocation3 + $0x70] sm:$0xff] (!%p6365_p7), %vm9588_vm4, %v8089_v47 }
 0x154   : > { %v8098_v55 = vadd.f32 %v8050_v54, %v886_v53  ;;  %977 = vst.msk [vmem:[#allocation3 + $0x60] sm:$0xff] (!%p6365_p7), %vm9588_vm4, %v8092_v50 }
 0x155   : > { %980 = vst.msk [vmem:[#allocation3 + $0x78] sm:$0xff] (!%p6365_p7), %vm9588_vm4, %v8095_v52 }
 0x156   : > { %978 = vst.msk [vmem:[#allocation3 + $0x68] sm:$0xff] (!%p6365_p7), %vm9588_vm4, %v8098_v55 }
 0x158   : > { %v6884_v58 = vpop.f32.mrb[16].mxu0 }
 0x159   : > { %v8101_v60 = vadd.f32 %v6884_v58, %v8050_v54  ;;  %v899_v61 = vpop.f32.mrb[17].mxu0 }
 0x15a   : > { %v8104_v62 = vadd.f32 %v8050_v54, %v899_v61  ;;  %v6885_v35 = vpop.f32.mrb[18].mxu0 }
 0x15b   : > { %v8107_v36 = vadd.f32 %v6885_v35, %v8050_v54  ;;  %v902_v39 = vpop.f32.mrb[19].mxu0  ;;  %983 = vst.msk [vmem:[#allocation3 + $0x90] sm:$0xff] (!%p6365_p7), %vm9588_vm4, %v8101_v60 }
 0x15c   : > { %v8110_v41 = vadd.f32 %v8050_v54, %v902_v39  ;;  %981 = vst.msk [vmem:[#allocation3 + $0x80] sm:$0xff] (!%p6365_p7), %vm9588_vm4, %v8104_v62 }
 0x15d   : > { %984 = vst.msk [vmem:[#allocation3 + $0x98] sm:$0xff] (!%p6365_p7), %vm9588_vm4, %v8107_v36 }
 0x15e   : > { %982 = vst.msk [vmem:[#allocation3 + $0x88] sm:$0xff] (!%p6365_p7), %vm9588_vm4, %v8110_v41 }
 0x160   : > { %v6888_v43 = vpop.f32.mrb[20].mxu0 }
 0x161   : > { %v8113_v46 = vadd.f32 %v6888_v43, %v8050_v54  ;;  %v915_v48 = vpop.f32.mrb[21].mxu0 }
 0x162   : > { %v8116_v49 = vadd.f32 %v8050_v54, %v915_v48  ;;  %v6889_v51 = vpop.f32.mrb[22].mxu0 }
 0x163   : > { %v8119_v53 = vadd.f32 %v6889_v51, %v8050_v54  ;;  %v918_v58 = vpop.f32.mrb[23].mxu0  ;;  %987 = vst.msk [vmem:[#allocation3 + $0xb0] sm:$0xff] (!%p6365_p7), %vm9588_vm4, %v8113_v46 }
 0x164   : > { %v8122_v61 = vadd.f32 %v8050_v54, %v918_v58  ;;  %985 = vst.msk [vmem:[#allocation3 + $0xa0] sm:$0xff] (!%p6365_p7), %vm9588_vm4, %v8116_v49 }
 0x165   : > { %988 = vst.msk [vmem:[#allocation3 + $0xb8] sm:$0xff] (!%p6365_p7), %vm9588_vm4, %v8119_v53 }
 0x166   : > { %986 = vst.msk [vmem:[#allocation3 + $0xa8] sm:$0xff] (!%p6365_p7), %vm9588_vm4, %v8122_v61 }
 0x168   : > { %v6892_v35 = vpop.f32.mrb[24].mxu0 }
 0x169   : > { %v8125_v39 = vadd.f32 %v6892_v35, %v8050_v54  ;;  %v931_v40 = vpop.f32.mrb[25].mxu0 }
 0x16a   : > { %v8128_v43 = vadd.f32 %v8050_v54, %v931_v40  ;;  %v6893_v29 = vpop.f32.mrb[26].mxu0 }
 0x16b   : > { %v8131_v48 = vadd.f32 %v6893_v29, %v8050_v54  ;;  %v934_v31 = vpop.f32.mrb[27].mxu0  ;;  %991 = vst.msk [vmem:[#allocation3 + $0xd0] sm:$0xff] (!%p6365_p7), %vm9588_vm4, %v8125_v39 }
 0x16c   : > { %v8134_v51 = vadd.f32 %v8050_v54, %v934_v31  ;;  %989 = vst.msk [vmem:[#allocation3 + $0xc0] sm:$0xff] (!%p6365_p7), %vm9588_vm4, %v8128_v43 }
 0x16d   : > { %992 = vst.msk [vmem:[#allocation3 + $0xd8] sm:$0xff] (!%p6365_p7), %vm9588_vm4, %v8131_v48 }
 0x16e   : > { %964 = sbr.rel (%p6365_p7) target bundleno = 375 (0x177), region = 60  ;;  %990 = vst.msk [vmem:[#allocation3 + $0xc8] sm:$0xff] (!%p6365_p7), %vm9588_vm4, %v8134_v51 }
 0x170   : > { %v6896_v28 = vpop.f32.mrb[28].mxu0 }
 0x171   : > { %v8137_v58 = vadd.f32 %v6896_v28, %v8050_v54  ;;  %v947_v30 = vpop.f32.mrb[29].mxu0 }
 0x172   : > { %v8140_v35 = vadd.f32 %v8050_v54, %v947_v30  ;;  %v6897_v25 = vpop.f32.mrb[30].mxu0 }
 0x173   : > { %v8143_v40 = vadd.f32 %v6897_v25, %v8050_v54  ;;  %v950_v27 = vpop.f32.mrb[31].mxu0  ;;  %995 = vst.msk [vmem:[#allocation3 + $0xf0] sm:$0xff] (!%p6365_p7), %vm9588_vm4, %v8137_v58 }
 0x174   : > { %v8146_v29 = vadd.f32 %v8050_v54, %v950_v27  ;;  %993 = vst.msk [vmem:[#allocation3 + $0xe0] sm:$0xff] (!%p6365_p7), %vm9588_vm4, %v8140_v35 }
 0x175   : > { %996 = vst.msk [vmem:[#allocation3 + $0xf8] sm:$0xff] %vm9588_vm4, %v8143_v40 }
 0x176   : > { %994 = vst.msk [vmem:[#allocation3 + $0xe8] sm:$0xff] %vm9588_vm4, %v8146_v29 }
 0x177 PF: > { %999 = sbr.rel (%p6366_p8) target bundleno = 411 (0x19b), region = 64  ;;  %v1000_v25 = vld [vmem:[#allocation3] sm:$0xff] (!%p6366_p8)  ;;  %v1001_v27 = vld [vmem:[#allocation3 + $0x8] sm:$0xff] (!%p6366_p8)  ;;  %v1002_v28 = vld [vmem:[#allocation3 + $0x10] sm:$0xff] (!%p6366_p8) }
 0x178   : > { %vm1032_vm7 = vcmp.gt.f32.partialorder (!%p6366_p8), %v1000_v25, 0.5  ;;  %v1064_v30 = vmul.f32 (!%p6366_p8), 0.25, %v1000_v25  ;;  %v1065_v31 = vmul.f32 (!%p6366_p8), 0.25, %v1001_v27  ;;  %v1003_v54 = vld [vmem:[#allocation3 + $0x18] sm:$0xff] (!%p6366_p8)  ;;  %v1004_v24 = vld [vmem:[#allocation3 + $0x20] sm:$0xff] (!%p6366_p8)  ;;  %vm1033_vm2 = vcmp.gt.f32.partialorder (!%p6366_p8), %v1001_v27, 0.5 }
 0x179   : > { %vm1034_vm8 = vcmp.gt.f32.partialorder (!%p6366_p8), %v1002_v28, 0.5  ;;  %v1066_v26 = vmul.f32 (!%p6366_p8), 0.25, %v1002_v28  ;;  %v1067_v21 = vmul.f32 (!%p6366_p8), 0.25, %v1003_v54  ;;  %v1005_v23 = vld [vmem:[#allocation3 + $0x28] sm:$0xff] (!%p6366_p8)  ;;  %vm1035_vm9 = vcmp.gt.f32.partialorder (!%p6366_p8), %v1003_v54, 0.5  ;;  %v1006_v19 = vld [vmem:[#allocation3 + $0x30] sm:$0xff] (!%p6366_p8) }
 0x17a   : > { %v1096_v20 = vadd.f32 (!%p6366_p8), %v1064_v30, %v8056_v57  ;;  %v1097_v22 = vadd.f32 (!%p6366_p8), %v1065_v31, %v8062_v63  ;;  %v1068_v17 = vmul.f32 (!%p6366_p8), 0.25, %v1004_v24  ;;  %vm1036_vm10 = vcmp.gt.f32.partialorder (!%p6366_p8), %v1004_v24, 0.5  ;;  %v1007_v15 = vld [vmem:[#allocation3 + $0x38] sm:$0xff] (!%p6366_p8)  ;;  %v1008_v31 = vld [vmem:[#allocation3 + $0x40] sm:$0xff] (!%p6366_p8)  ;;  %v1010_v27 = vld [vmem:[#allocation3 + $0x50] sm:$0xff] (!%p6366_p8) }
 0x17b   : > { %v1098_v16 = vadd.f32 (!%p6366_p8), %v1066_v26, %v8053_v56  ;;  %v1099_v18 = vadd.f32 (!%p6366_p8), %v1067_v21, %v8059_v59  ;;  %v1069_v13 = vmul.f32 (!%p6366_p8), 0.25, %v1005_v23  ;;  %vm1037_vm11 = vcmp.gt.f32.partialorder (!%p6366_p8), %v1005_v23, 0.5  ;;  %v1013_v23 = vld [vmem:[#allocation3 + $0x68] sm:$0xff] (!%p6366_p8) }
 0x17c   : > { %v1128_v12 = vsel (!%p6366_p8), %vm1032_vm7, %v8056_v57, %v1096_v20  ;;  %v1129_v14 = vsel (!%p6366_p8), %vm1033_vm2, %v8062_v63, %v1097_v22  ;;  %v1100_v30 = vadd.f32 (!%p6366_p8), %v1068_v17, %v8068_v34  ;;  %v1070_v20 = vmul.f32 (!%p6366_p8), 0.25, %v1006_v19  ;;  %v1009_v57 = vld [vmem:[#allocation3 + $0x48] sm:$0xff] (!%p6366_p8)  ;;  %v1011_v17 = vld [vmem:[#allocation3 + $0x58] sm:$0xff] (!%p6366_p8) }
 0x17d   : > { %1160 = vst.msk [vmem:[#allocation3] sm:$0xff] (!%p6366_p8), %vm9588_vm4, %v1128_v12  ;;  %1161 = vst.msk [vmem:[#allocation3 + $0x8] sm:$0xff] (!%p6366_p8), %vm9588_vm4, %v1129_v14  ;;  %v1130_v21 = vsel (!%p6366_p8), %vm1034_vm8, %v8053_v56, %v1098_v16  ;;  %v1131_v26 = vsel (!%p6366_p8), %vm1035_vm9, %v8059_v59, %v1099_v18  ;;  %v1101_v25 = vadd.f32 (!%p6366_p8), %v1069_v13, %v8074_v37  ;;  %vm1038_vm12 = vcmp.gt.f32.partialorder (!%p6366_p8), %v1006_v19, 0.5  ;;  %v1012_v19 = vld [vmem:[#allocation3 + $0x60] sm:$0xff] (!%p6366_p8) }
 0x17e   : > { %1162 = vst.msk [vmem:[#allocation3 + $0x10] sm:$0xff] %vm9588_vm4, %v1130_v21  ;;  %1163 = vst.msk [vmem:[#allocation3 + $0x18] sm:$0xff] %vm9588_vm4, %v1131_v26  ;;  %v1132_v12 = vsel %vm1036_vm10, %v8068_v34, %v1100_v30  ;;  %vm1039_vm13 = vcmp.gt.f32.partialorder %v1007_v15, 0.5  ;;  %v1071_v14 = vmul.f32 0.25, %v1007_v15  ;;  %v1102_v13 = vadd.f32 %v1070_v20, %v8065_v32  ;;  %v1014_v30 = vld [vmem:[#allocation3 + $0x70] sm:$0xff]  ;;  %v1016_v20 = vld [vmem:[#allocation3 + $0x80] sm:$0xff] }
 0x17f   : > { %1164 = vst.msk [vmem:[#allocation3 + $0x20] sm:$0xff] %vm9588_vm4, %v1132_v12  ;;  %v1133_v16 = vsel %vm1037_vm11, %v8074_v37, %v1101_v25  ;;  %vm1040_vm14 = vcmp.gt.f32.partialorder %v1008_v31, 0.5  ;;  %v1072_v18 = vmul.f32 0.25, %v1008_v31  ;;  %vm1041_vm15 = vcmp.gt.f32.partialorder %v1009_v57, 0.5  ;;  %v1015_v25 = vld [vmem:[#allocation3 + $0x78] sm:$0xff] }
 0x180   : > { %1165 = vst.msk [vmem:[#allocation3 + $0x28] sm:$0xff] %vm9588_vm4, %v1133_v16  ;;  %v1103_v22 = vadd.f32 %v1071_v14, %v8071_v33  ;;  %v1073_v24 = vmul.f32 0.25, %v1009_v57  ;;  %v1074_v56 = vmul.f32 0.25, %v1010_v27  ;;  %v1134_v59 = vsel %vm1038_vm12, %v8065_v32, %v1102_v13  ;;  %v1017_v14 = vld [vmem:[#allocation3 + $0x88] sm:$0xff] }
 0x181   : > { %v1104_v63 = vadd.f32 %v1072_v18, %v8080_v42  ;;  %vm1042_vm0 = vcmp.gt.f32.partialorder %v1010_v27, 0.5  ;;  %v1075_v34 = vmul.f32 0.25, %v1011_v17  ;;  %1166 = vst.msk [vmem:[#allocation3 + $0x30] sm:$0xff] %vm9588_vm4, %v1134_v59  ;;  %vm1043_vm1 = vcmp.gt.f32.partialorder %v1011_v17, 0.5  ;;  %v1018_v27 = vld [vmem:[#allocation3 + $0x90] sm:$0xff]  ;;  %v1020_v59 = vld [vmem:[#allocation3 + $0xa0] sm:$0xff] }
 0x182   : > { %v1135_v37 = vsel %vm1039_vm13, %v8071_v33, %v1103_v22  ;;  %v1105_v28 = vadd.f32 %v1073_v24, %v8086_v45  ;;  %v1106_v54 = vadd.f32 %v1074_v56, %v8077_v38  ;;  %vm1044_vm3 = vcmp.gt.f32.partialorder %v1012_v19, 0.5 }
 0x183   : > { %1167 = vst.msk [vmem:[#allocation3 + $0x38] sm:$0xff] %vm9588_vm4, %v1135_v37  ;;  %v1136_v32 = vsel %vm1040_vm14, %v8080_v42, %v1104_v63  ;;  %v1107_v21 = vadd.f32 %v1075_v34, %v8083_v44  ;;  %v1076_v26 = vmul.f32 0.25, %v1012_v19  ;;  %vm1045_vm5 = vcmp.gt.f32.partialorder %v1013_v23, 0.5  ;;  %v1021_v34 = vld [vmem:[#allocation3 + $0xa8] sm:$0xff]  ;;  %v1022_v37 = vld [vmem:[#allocation3 + $0xb0] sm:$0xff] }
 0x184   : > { %1168 = vst.msk [vmem:[#allocation3 + $0x40] sm:$0xff] %vm9588_vm4, %v1136_v32  ;;  %v1137_v15 = vsel %vm1041_vm15, %v8086_v45, %v1105_v28  ;;  %v1138_v33 = vsel %vm1042_vm0, %v8077_v38, %v1106_v54  ;;  %v1077_v12 = vmul.f32 0.25, %v1013_v23  ;;  %vm1046_vm6 = vcmp.gt.f32.partialorder %v1014_v30, 0.5  ;;  %v1023_v54 = vld [vmem:[#allocation3 + $0xb8] sm:$0xff] }
 0x185   : > { %1169 = vst.msk [vmem:[#allocation3 + $0x48] sm:$0xff] %vm9588_vm4, %v1137_v15  ;;  %1170 = vst.msk [vmem:[#allocation3 + $0x50] sm:$0xff] %vm9588_vm4, %v1138_v33  ;;  %v1139_v42 = vsel %vm1043_vm1, %v8083_v44, %v1107_v21  ;;  %v1108_v31 = vadd.f32 %v1076_v26, %v8092_v50  ;;  %v1078_v16 = vmul.f32 0.25, %v1014_v30  ;;  %vm1047_vm7 = vcmp.gt.f32.partialorder %v1015_v25, 0.5  ;;  %v1019_v44 = vld [vmem:[#allocation3 + $0x98] sm:$0xff]  ;;  %v1024_v26 = vld [vmem:[#allocation3 + $0xc0] sm:$0xff] }
 0x186   : > { %1171 = vst.msk [vmem:[#allocation3 + $0x58] sm:$0xff] %vm9588_vm4, %v1139_v42  ;;  %v1109_v45 = vadd.f32 %v1077_v12, %v8098_v55  ;;  %v1079_v38 = vmul.f32 0.25, %v1015_v25  ;;  %v1080_v57 = vmul.f32 0.25, %v1016_v20  ;;  %vm1048_vm2 = vcmp.gt.f32.partialorder %v1016_v20, 0.5  ;;  %v1026_v42 = vld [vmem:[#allocation3 + $0xd0] sm:$0xff] }
 0x187   : > { %v1140_v13 = vsel %vm1044_vm3, %v8092_v50, %v1108_v31  ;;  %v1110_v18 = vadd.f32 %v1078_v16, %v8089_v47  ;;  %v1081_v17 = vmul.f32 0.25, %v1017_v14  ;;  %vm1049_vm8 = vcmp.gt.f32.partialorder %v1017_v14, 0.5 }
 0x188   : > { %1172 = vst.msk [vmem:[#allocation3 + $0x60] sm:$0xff] %vm9588_vm4, %v1140_v13  ;;  %v1141_v22 = vsel %vm1045_vm5, %v8098_v55, %v1109_v45  ;;  %v1111_v24 = vadd.f32 %v1079_v38, %v8095_v52  ;;  %v1112_v56 = vadd.f32 %v1080_v57, %v8104_v62  ;;  %vm1050_vm9 = vcmp.gt.f32.partialorder %v1018_v27, 0.5  ;;  %v1027_v45 = vld [vmem:[#allocation3 + $0xd8] sm:$0xff]  ;;  %v1028_v38 = vld [vmem:[#allocation3 + $0xe0] sm:$0xff]  ;;  %v1029_v13 = vld [vmem:[#allocation3 + $0xe8] sm:$0xff] }
 0x189   : > { %1173 = vst.msk [vmem:[#allocation3 + $0x68] sm:$0xff] %vm9588_vm4, %v1141_v22  ;;  %v1142_v50 = vsel %vm1046_vm6, %v8089_v47, %v1110_v18  ;;  %v1113_v19 = vadd.f32 %v1081_v17, %v8110_v41  ;;  %v1082_v63 = vmul.f32 0.25, %v1018_v27  ;;  %vm1051_vm10 = vcmp.gt.f32.partialorder %v1019_v44, 0.5  ;;  %v1030_v22 = vld [vmem:[#allocation3 + $0xf0] sm:$0xff] }
 0x18a   : > { %1174 = vst.msk [vmem:[#allocation3 + $0x70] sm:$0xff] %vm9588_vm4, %v1142_v50  ;;  %v1143_v55 = vsel %vm1047_vm7, %v8095_v52, %v1111_v24  ;;  %v1144_v23 = vsel %vm1048_vm2, %v8104_v62, %v1112_v56  ;;  %v1083_v28 = vmul.f32 0.25, %v1019_v44  ;;  %vm1052_vm11 = vcmp.gt.f32.partialorder %v1020_v59, 0.5 }
 0x18b   : > { %1175 = vst.msk [vmem:[#allocation3 + $0x78] sm:$0xff] %vm9588_vm4, %v1143_v55  ;;  %1176 = vst.msk [vmem:[#allocation3 + $0x80] sm:$0xff] %vm9588_vm4, %v1144_v23  ;;  %v1145_v47 = vsel %vm1049_vm8, %v8110_v41, %v1113_v19  ;;  %v1114_v30 = vadd.f32 %v1082_v63, %v8101_v60  ;;  %v1084_v32 = vmul.f32 0.25, %v1020_v59  ;;  %vm1053_vm12 = vcmp.gt.f32.partialorder %v1021_v34, 0.5  ;;  %v1025_v41 = vld [vmem:[#allocation3 + $0xc8] sm:$0xff] }
 0x18c   : > { %1177 = vst.msk [vmem:[#allocation3 + $0x88] sm:$0xff] %vm9588_vm4, %v1145_v47  ;;  %v1115_v52 = vadd.f32 %v1083_v28, %v8107_v36  ;;  %v1085_v62 = vmul.f32 0.25, %v1021_v34  ;;  %v1086_v21 = vmul.f32 0.25, %v1022_v37  ;;  %vm1054_vm13 = vcmp.gt.f32.partialorder %v1022_v37, 0.5 }
 0x18d   : > { %v1146_v25 = vsel %vm1050_vm9, %v8101_v60, %v1114_v30  ;;  %v1116_v20 = vadd.f32 %v1084_v32, %v8116_v49  ;;  %v1087_v15 = vmul.f32 0.25, %v1023_v54  ;;  %vm1055_vm14 = vcmp.gt.f32.partialorder %v1023_v54, 0.5 }
 0x18e   : > { %1178 = vst.msk [vmem:[#allocation3 + $0x90] sm:$0xff] %vm9588_vm4, %v1146_v25  ;;  %v1147_v33 = vsel %vm1051_vm10, %v8107_v36, %v1115_v52  ;;  %v1117_v12 = vadd.f32 %v1085_v62, %v8122_v61  ;;  %v1118_v14 = vadd.f32 %v1086_v21, %v8113_v46  ;;  %vm1056_vm15 = vcmp.gt.f32.partialorder %v1024_v26, 0.5 }
 0x18f   : > { %1179 = vst.msk [vmem:[#allocation3 + $0x98] sm:$0xff] %vm9588_vm4, %v1147_v33  ;;  %v1148_v60 = vsel %vm1052_vm11, %v8116_v49, %v1116_v20  ;;  %v1119_v31 = vadd.f32 %v1087_v15, %v8119_v53  ;;  %v1088_v16 = vmul.f32 0.25, %v1024_v26  ;;  %vm1057_vm0 = vcmp.gt.f32.partialorder %v1025_v41, 0.5 }
 0x190   : > { %1180 = vst.msk [vmem:[#allocation3 + $0xa0] sm:$0xff] %vm9588_vm4, %v1148_v60  ;;  %v1149_v36 = vsel %vm1053_vm12, %v8122_v61, %v1117_v12  ;;  %v1150_v57 = vsel %vm1054_vm13, %v8113_v46, %v1118_v14  ;;  %v1089_v27 = vmul.f32 0.25, %v1025_v41  ;;  %vm1058_vm1 = vcmp.gt.f32.partialorder %v1026_v42, 0.5 }
 0x191   : > { %1181 = vst.msk [vmem:[#allocation3 + $0xa8] sm:$0xff] %vm9588_vm4, %v1149_v36  ;;  %1182 = vst.msk [vmem:[#allocation3 + $0xb0] sm:$0xff] %vm9588_vm4, %v1150_v57  ;;  %v1151_v49 = vsel %vm1055_vm14, %v8119_v53, %v1119_v31  ;;  %v1120_v18 = vadd.f32 %v1088_v16, %v8128_v43  ;;  %v1090_v17 = vmul.f32 0.25, %v1026_v42  ;;  %vm1059_vm3 = vcmp.gt.f32.partialorder %v1027_v45, 0.5  ;;  %v1031_v53 = vld [vmem:[#allocation3 + $0xf8] sm:$0xff] }
 0x192   : > { %1183 = vst.msk [vmem:[#allocation3 + $0xb8] sm:$0xff] %vm9588_vm4, %v1151_v49  ;;  %v1121_v61 = vadd.f32 %v1089_v27, %v8134_v51  ;;  %v1091_v46 = vmul.f32 0.25, %v1027_v45  ;;  %v1092_v44 = vmul.f32 0.25, %v1028_v38  ;;  %vm1060_vm5 = vcmp.gt.f32.partialorder %v1028_v38, 0.5 }
 0x193   : > { %v1152_v24 = vsel %vm1056_vm15, %v8128_v43, %v1120_v18  ;;  %v1122_v56 = vadd.f32 %v1090_v17, %v8125_v39  ;;  %v1093_v59 = vmul.f32 0.25, %v1029_v13  ;;  %vm1061_vm6 = vcmp.gt.f32.partialorder %v1029_v13, 0.5 }
 0x194   : > { %1184 = vst.msk [vmem:[#allocation3 + $0xc0] sm:$0xff] %vm9588_vm4, %v1152_v24  ;;  %v1153_v50 = vsel %vm1057_vm0, %v8134_v51, %v1121_v61  ;;  %v1123_v19 = vadd.f32 %v1091_v46, %v8131_v48  ;;  %v1124_v63 = vadd.f32 %v1092_v44, %v8140_v35  ;;  %v1094_v37 = vmul.f32 0.25, %v1030_v22 }
 0x195   : > { %1185 = vst.msk [vmem:[#allocation3 + $0xc8] sm:$0xff] %vm9588_vm4, %v1153_v50  ;;  %v1154_v43 = vsel %vm1058_vm1, %v8125_v39, %v1122_v56  ;;  %v1125_v34 = vadd.f32 %v1093_v59, %v8146_v29  ;;  %vm1062_vm7 = vcmp.gt.f32.partialorder %v1030_v22, 0.5  ;;  %v1095_v23 = vmul.f32 0.25, %v1031_v53 }
 0x196   : > { %1186 = vst.msk [vmem:[#allocation3 + $0xd0] sm:$0xff] %vm9588_vm4, %v1154_v43  ;;  %v1155_v55 = vsel %vm1059_vm3, %v8131_v48, %v1123_v19  ;;  %v1156_v51 = vsel %vm1060_vm5, %v8140_v35, %v1124_v63  ;;  %v1126_v39 = vadd.f32 %v1094_v37, %v8137_v58  ;;  %vm1063_vm2 = vcmp.gt.f32.partialorder %v1031_v53, 0.5 }
 0x197   : > { %1187 = vst.msk [vmem:[#allocation3 + $0xd8] sm:$0xff] %vm9588_vm4, %v1155_v55  ;;  %1188 = vst.msk [vmem:[#allocation3 + $0xe0] sm:$0xff] %vm9588_vm4, %v1156_v51  ;;  %v1157_v28 = vsel %vm1061_vm6, %v8146_v29, %v1125_v34  ;;  %v1127_v54 = vadd.f32 %v1095_v23, %v8143_v40 }
 0x198   : > { %1189 = vst.msk [vmem:[#allocation3 + $0xe8] sm:$0xff] %vm9588_vm4, %v1157_v28  ;;  %v1158_v47 = vsel %vm1062_vm7, %v8137_v58, %v1126_v39 }
 0x199   : > { %1190 = vst.msk [vmem:[#allocation3 + $0xf0] sm:$0xff] %vm9588_vm4, %v1158_v47  ;;  %v1159_v48 = vsel %vm1063_vm2, %v8143_v40, %v1127_v54 }
 0x19a   : > { %1191 = vst.msk [vmem:[#allocation3 + $0xf8] sm:$0xff] %vm9588_vm4, %v1159_v48 }
 0x19b PF: > { %v8347_v52 = vld [vmem:[#allocation3 + $0x20] sm:$0xff]  ;;  %v8349_v62 = vld [vmem:[#allocation3 + $0x28] sm:$0xff]  ;;  %v1198_v58 = vld [vmem:[#allocation3 + $0x30] sm:$0xff]  ;;  %v9609_v44 = vmov 0.0  }
 0x19c   : > { %v1199_v40 = vld [vmem:[#allocation3 + $0x38] sm:$0xff]  ;;  %v1200_v21 = vld [vmem:[#allocation3 + $0x40] sm:$0xff]  ;;  %v1201_v26 = vld [vmem:[#allocation3 + $0x48] sm:$0xff]  ;;  %vm9610_vm12 = vcmp.gt.f32.partialorder %v8347_v52, 0.5  ;;  %vm9612_vm15 = vcmp.gt.f32.partialorder %v1198_v58, 0.5 }
 0x19d   : > { %v1202_v25 = vld [vmem:[#allocation3 + $0x50] sm:$0xff]  ;;  %v1203_v20 = vld [vmem:[#allocation3 + $0x58] sm:$0xff]  ;;  %v1204_v15 = vld [vmem:[#allocation3 + $0x60] sm:$0xff]  ;;  %v6424_v53 = vsel %vm9610_vm12, 1.0, %v9609_v44  ;;  %v6426_v19 = vsel %vm9612_vm15, 1.0, %v9609_v44  ;;  %vm9615_vm1 = vcmp.gt.f32.partialorder %v1201_v26, 0.5 }
 0x19e   : > { %v1205_v41 = vld [vmem:[#allocation3 + $0x68] sm:$0xff]  ;;  %v1206_v33 = vld [vmem:[#allocation3 + $0x70] sm:$0xff]  ;;  %v1207_v12 = vld [vmem:[#allocation3 + $0x78] sm:$0xff]  ;;  %v6429_v34 = vsel %vm9615_vm1, 1.0, %v9609_v44  ;;  %vm9617_vm12 = vcmp.gt.f32.partialorder %v1203_v20, 0.5 }
 0x19f   : > { %v1208_v14 = vld [vmem:[#allocation3 + $0x80] sm:$0xff]  ;;  %v1209_v42 = vld [vmem:[#allocation3 + $0x88] sm:$0xff]  ;;  %v1210_v60 = vld [vmem:[#allocation3 + $0x90] sm:$0xff]  ;;  %v6431_v55 = vsel %vm9617_vm12, 1.0, %v9609_v44  ;;  %vm9619_vm15 = vcmp.gt.f32.partialorder %v1205_v41, 0.5 }
 0x1a0   : > { %v1211_v31 = vld [vmem:[#allocation3 + $0x98] sm:$0xff]  ;;  %v1212_v16 = vld [vmem:[#allocation3 + $0xa0] sm:$0xff]  ;;  %v1213_v45 = vld [vmem:[#allocation3 + $0xa8] sm:$0xff]  ;;  %vm1242_vm0 = vcmp.gt.f32.partialorder %v1210_v60, 0.5  ;;  %v6433_v23 = vsel %vm9619_vm15, 1.0, %v9609_v44  ;;  %vm9622_vm1 = vcmp.gt.f32.partialorder %v1208_v14, 0.5 }
 0x1a1   : > { %v8339_v35 = vld [vmem:[#allocation3] sm:$0xff]  ;;  %v8341_v30 = vld [vmem:[#allocation3 + $0x8] sm:$0xff]  ;;  %v1214_v38 = vld [vmem:[#allocation3 + $0xb0] sm:$0xff]  ;;  %vm1245_vm5 = vcmp.gt.f32.partialorder %v1213_v45, 0.5  ;;  %v6436_v54 = vsel %vm9622_vm1, 1.0, %v9609_v44  ;;  %v6438_v48 = vsel %vm1242_vm0, 1.0, %v9609_v44 }
 0x1a2   : > { %v8343_v29 = vld [vmem:[#allocation3 + $0x10] sm:$0xff]  ;;  %v8345_v32 = vld [vmem:[#allocation3 + $0x18] sm:$0xff]  ;;  %vm1224_vm8 = vcmp.gt.f32.partialorder %v8339_v35, 0.5  ;;  %vm1225_vm9 = vcmp.gt.f32.partialorder %v8341_v30, 0.5  ;;  %v1216_v57 = vld [vmem:[#allocation3 + $0xc0] sm:$0xff]  ;;  %vm1246_vm3 = vcmp.gt.f32.partialorder %v1214_v38, 0.5 }
 0x1a3   : > { %vm1226_vm10 = vcmp.gt.f32.partialorder %v8343_v29, 0.5  ;;  %vm1227_vm11 = vcmp.gt.f32.partialorder %v8345_v32, 0.5  ;;  %v1215_v36 = vld [vmem:[#allocation3 + $0xb8] sm:$0xff]  ;;  %v1217_v27 = vld [vmem:[#allocation3 + $0xc8] sm:$0xff]  ;;  %v1218_v13 = vld [vmem:[#allocation3 + $0xd0] sm:$0xff]  ;;  %vm1248_vm2 = vcmp.gt.f32.partialorder %v1216_v57, 0.5 }
 0x1a4   : > { %vm1247_vm6 = vcmp.gt.f32.partialorder %v1215_v36, 0.5  ;;  %v1219_v49 = vld [vmem:[#allocation3 + $0xd8] sm:$0xff]  ;;  %v1220_v18 = vld [vmem:[#allocation3 + $0xe0] sm:$0xff]  ;;  %v1221_v17 = vld [vmem:[#allocation3 + $0xe8] sm:$0xff]  ;;  %vm1249_vm7 = vcmp.gt.f32.partialorder %v1217_v27, 0.5  ;;  %vm1250_vm4 = vcmp.gt.f32.partialorder %v1218_v13, 0.5 }
 0x1a5   : > { %v1222_v61 = vld [vmem:[#allocation3 + $0xf0] sm:$0xff]  ;;  %v1223_v46 = vld [vmem:[#allocation3 + $0xf8] sm:$0xff]  ;;  %vm1251_vm14 = vcmp.gt.f32.partialorder %v1219_v49, 0.5  ;;  %vm1252_vm13 = vcmp.gt.f32.partialorder %v1220_v18, 0.5  ;;  %v6420_v22 = vsel %vm1224_vm8, 1.0, %v9609_v44  ;;  %v6421_v24 = vsel %vm1225_vm9, 1.0, %v9609_v44 }
 0x1a6   : > { %v6422_v56 = vsel %vm1226_vm10, 1.0, %v9609_v44  ;;  %v6423_v59 = vsel %vm1227_vm11, 1.0, %v9609_v44  ;;  %vm9611_vm8 = vcmp.gt.f32.partialorder %v8349_v62, 0.5  ;;  %vm9613_vm9 = vcmp.gt.f32.partialorder %v1199_v40, 0.5 }
 0x1a7   : > { %v6425_v50 = vsel %vm9611_vm8, 1.0, %v9609_v44  ;;  %v6427_v63 = vsel %vm9613_vm9, 1.0, %v9609_v44  ;;  %vm9614_vm10 = vcmp.gt.f32.partialorder %v1200_v21, 0.5  ;;  %vm9616_vm11 = vcmp.gt.f32.partialorder %v1202_v25, 0.5 }
 0x1a8   : > { %v6428_v43 = vsel %vm9614_vm10, 1.0, %v9609_v44  ;;  %v6430_v37 = vsel %vm9616_vm11, 1.0, %v9609_v44  ;;  %vm9618_vm8 = vcmp.gt.f32.partialorder %v1204_v15, 0.5  ;;  %vm9620_vm9 = vcmp.gt.f32.partialorder %v1206_v33, 0.5 }
 0x1a9   : > { %v6432_v51 = vsel %vm9618_vm8, 1.0, %v9609_v44  ;;  %v6434_v28 = vsel %vm9620_vm9, 1.0, %v9609_v44  ;;  %vm9621_vm10 = vcmp.gt.f32.partialorder %v1207_v12, 0.5  ;;  %vm9623_vm11 = vcmp.gt.f32.partialorder %v1209_v42, 0.5 }
 0x1aa   : > { %v6435_v39 = vsel %vm9621_vm10, 1.0, %v9609_v44  ;;  %v6437_v47 = vsel %vm9623_vm11, 1.0, %v9609_v44  ;;  %vm9624_vm12 = vcmp.gt.f32.partialorder %v1211_v31, 0.5  ;;  %vm9625_vm8 = vcmp.gt.f32.partialorder %v1212_v16, 0.5 }
 0x1ab   : > { %v6439_v35 = vsel %vm9624_vm12, 1.0, %v9609_v44  ;;  %v6440_v30 = vsel %vm9625_vm8, 1.0, %v9609_v44  ;;  %v6441_v29 = vsel %vm1245_vm5, 1.0, %v9609_v44  ;;  %v6442_v32 = vsel %vm1246_vm3, 1.0, %v9609_v44 }
 0x1ac   : > { %v6443_v52 = vsel %vm1247_vm6, 1.0, %v9609_v44  ;;  %v6444_v62 = vsel %vm1248_vm2, 1.0, %v9609_v44  ;;  %v6445_v58 = vsel %vm1249_vm7, 1.0, %v9609_v44  ;;  %v6446_v40 = vsel %vm1250_vm4, 1.0, %v9609_v44  ;;  %1338 = sbr.rel (%p6365_p7) target bundleno = 446 (0x1be), region = 68 }
 0x1ad   : > { %v6447_v21 = vsel %vm1251_vm14, 1.0, %v9609_v44  ;;  %v6448_v26 = vsel %vm1252_vm13, 1.0, %v9609_v44  ;;  %vm9626_vm0 = vcmp.gt.f32.partialorder %v1221_v17, 0.5  ;;  %vm9627_vm3 = vcmp.gt.f32.partialorder %v1222_v61, 0.5 }
 0x1ae   : > { %v6449_v25 = vsel %vm9626_vm0, 1.0, %v9609_v44  ;;  %v6450_v20 = vsel %vm9627_vm3, 1.0, %v9609_v44  ;;  %vm9628_vm5 = vcmp.gt.f32.partialorder %v1223_v46, 0.5  ;;  %v8427_v41 = vpack.c.bf16 %v6421_v24, %v6420_v22 }
 0x1af   : > { %v6451_v15 = vsel %vm9628_vm5, 1.0, %v9609_v44  ;;  %v8429_v33 = vpack.c.bf16 %v6423_v59, %v6422_v56  ;;  %v8431_v12 = vpack.c.bf16 %v6425_v50, %v6424_v53  ;;  %v8433_v14 = vpack.c.bf16 %v6427_v63, %v6426_v19 }
 0x1b0   : > { %v8435_v42 = vpack.c.bf16 %v6429_v34, %v6428_v43  ;;  %v8437_v60 = vpack.c.bf16 %v6431_v55, %v6430_v37  ;;  %v8439_v31 = vpack.c.bf16 %v6433_v23, %v6432_v51  ;;  %v8441_v16 = vpack.c.bf16 %v6435_v39, %v6434_v28 }
 0x1b1   : > { %v8443_v45 = vpack.c.bf16 %v6437_v47, %v6436_v54  ;;  %v8445_v38 = vpack.c.bf16 %v6439_v35, %v6438_v48  ;;  %v8447_v36 = vpack.c.bf16 %v6441_v29, %v6440_v30  ;;  %v8449_v57 = vpack.c.bf16 %v6443_v52, %v6442_v32 }
 0x1b2   : > { %v8451_v27 = vpack.c.bf16 %v6445_v58, %v6444_v62  ;;  %v8453_v13 = vpack.c.bf16 %v6447_v21, %v6446_v40  ;;  %v8455_v49 = vpack.c.bf16 %v6449_v25, %v6448_v26  ;;  %v8457_v18 = vpack.c.bf16 %v6451_v15, %v6450_v20 }
 0x1b3   : > { %vm1340_vm4 = vcmask 257024   ;;  %vm1342_vm13 = vcmask 261124   ;;  %v7617_v17 = vmov 0   ;;  %vm9629_vm14 = vcmask 261120  }
 0x1b4   : > { %1339 = vst.msk [vmem:[#allocation4] sm:$0xff] %vm9629_vm14, %v7617_v17  ;;  %vm9630_vm6 = vmmov %vm9629_vm14 }
 0x1b5   : > { %1344 = vst.msk [vmem:[#allocation4 + $0x90] sm:$0xff] %vm9630_vm6, %v7617_v17  ;;  %vm9631_vm7 = vmmov %vm9630_vm6 }
 0x1b6   : > { %1345 = vst.msk [vmem:[#allocation5] sm:$0xff] %vm9631_vm7, %v7617_v17  ;;  %vm9632_vm2 = vmmov %vm9630_vm6 }
 0x1b7   : > { %1348 = vst.msk [vmem:[#allocation5 + $0x90] sm:$0xff] %vm9632_vm2, %v7617_v17  ;;  %vm9633_vm15 = vmmov %vm9632_vm2 }
 0x1b8   : > { %1349 = vst.msk [vmem:[#allocation6] sm:$0xff] %vm9633_vm15, %v7617_v17  ;;  %vm9634_vm9 = vmmov %vm9632_vm2 }
 0x1b9   : > { %1352 = vst.msk [vmem:[#allocation6 + $0x90] sm:$0xff] %vm9634_vm9, %v7617_v17 }
 0x1ba   : > { %1341 = vst.msk [vmem:[#allocation4 + $0x8] sm:$0xf] %vm1340_vm4, %v7617_v17  ;;  %1346 = vst.msk [vmem:[#allocation5 + $0x8] sm:$0xf] %vm1340_vm4, %v7617_v17 }
 0x1bb   : > { %1350 = vst.msk [vmem:[#allocation6 + $0x8] sm:$0xf] %vm1340_vm4, %v7617_v17 }
 0x1bc   : > { %1343 = vst.msk [vmem:[#allocation4 + $0x88] sm:$0xf0] %vm1342_vm13, %v7617_v17  ;;  %1347 = vst.msk [vmem:[#allocation5 + $0x88] sm:$0xf0] %vm1342_vm13, %v7617_v17 }
 0x1bd   : > { %1351 = vst.msk [vmem:[#allocation6 + $0x88] sm:$0xf0] %vm1342_vm13, %v7617_v17 }
 0x1be PF: > { %v1439_v61 = vld [vmem:[%s9559_s1 + $0x8] sm:$0xf]  ;;  %v1437_v46 = vld [vmem:[%s9559_s1] sm:$0xf]  ;;  %v7618_v22 = vmov 0   ;;  %vm1369_vm10 = vcmask 1043456  }
 0x1bf   : > { %v7558_v44 = vld [vmem:[%s9563_s5 + $0x40] sm:$0xff]   ;;  %7557 = vset.pattern.permute.xlu1 %v7618_v22  ;;  %7556 = vset.pattern.permute.xlu0 %v7618_v22  ;;  %v1440_v24 = vld [vmem:[%s9559_s1 + $0xc] sm:$0xf]  ;;  %v2048_v19 = vld [vmem:[%s9560_s2 + $0x8] sm:$0xf]  ;;  %v1370_v51 = vrot.slane %v8427_v41, 4 }
 0x1c0   : > { %1495 = vperm.xlu1 %7557, %v1439_v61   ;;  %1471 = vperm.xlu0 %7556, %v1437_v46   ;;  %v1438_v56 = vld [vmem:[%s9559_s1 + $0x4] sm:$0xf]  ;;  %v2046_v53 = vld [vmem:[%s9560_s2] sm:$0xf]  ;;  %v2049_v50 = vld [vmem:[%s9560_s2 + $0xc] sm:$0xf] }
 0x1c1   : > { %7042 = vmatprep.subr.bf16.mxu1 %v7558_v44  ;;  %v2047_v59 = vld [vmem:[%s9560_s2 + $0x4] sm:$0xf]  ;;  %v2051_v63 = vld [vmem:[%s9560_s2 + $0x14] sm:$0xf]  ;;  %v2050_v43 = vld [vmem:[%s9560_s2 + $0x10] sm:$0xf] }
 0x1c2   : > { %7043 = vmatpush3.bf16.msra.mxu1 %v7558_v44  ;;  %v1442_v34 = vld [vmem:[%s9559_s1 + $0x14] sm:$0xf]  ;;  %v7559_v37 = vld [vmem:[%s9563_s5 + $0x48] sm:$0xff]   ;;  %v1441_v55 = vld [vmem:[%s9559_s1 + $0x10] sm:$0xf]  ;;  %v1371_v23 = vrot.slane %v8429_v33, 4 }
 0x1c3   : > { %vm1418_vm1 = vcmask 261124   ;;  %v1373_v28 = vrot.slane %v8431_v12, 4  ;;  %7044 = vmatprep.subr.bf16.mxu1 %v7559_v37  ;;  %v1375_v47 = vrot.slane %v8433_v14, 4  ;;  %v1377_v48 = vrot.slane %v8435_v42, 4  ;;  %v1444_v35 = vld [vmem:[%s9559_s1 + $0x1c] sm:$0xf] }
 0x1c4   : > { %1507 = vperm.xlu1 %7557, %v1440_v24   ;;  %1483 = vperm.xlu0 %7556, %v1438_v56   ;;  %v1372_v39 = vsel %vm1369_vm10, %v1370_v51, %v1371_v23  ;;  %1419 = vst.msk [vmem:[#allocation4 + $0x8] sm:$0xf0] %vm1418_vm1, %v1370_v51  ;;  %vm9635_vm11 = vcmask 261120   ;;  %v1443_v30 = vld [vmem:[%s9559_s1 + $0x18] sm:$0xf]  ;;  %v1379_v52 = vrot.slane %v8437_v60, 4 }
 0x1c5   : > { %v1374_v54 = vsel %vm1369_vm10, %v1371_v23, %v1373_v28  ;;  %1420 = vst.msk [vmem:[#allocation4 + $0x10] sm:$0xff] %vm9635_vm11, %v1372_v39  ;;  %vm9636_vm12 = vmmov %vm9635_vm11  ;;  %v1376_v29 = vsel %vm1369_vm10, %v1373_v28, %v1375_v47  ;;  %v1378_v32 = vsel %vm1369_vm10, %v1375_v47, %v1377_v48  ;;  %v1381_v62 = vrot.slane %v8439_v31, 4  ;;  %v2053_v58 = vld [vmem:[%s9560_s2 + $0x1c] sm:$0xf]  ;;  %v2052_v40 = vld [vmem:[%s9560_s2 + $0x18] sm:$0xf] }
 0x1c6   : > { %7045 = vmatpush3.bf16.msra.mxu1 %v7559_v37  ;;  %1421 = vst.msk [vmem:[#allocation4 + $0x18] sm:$0xff] %vm9636_vm12, %v1374_v54  ;;  %vm9637_vm8 = vmmov %vm9635_vm11  ;;  %v1380_v21 = vsel %vm1369_vm10, %v1377_v48, %v1379_v52  ;;  %v7560_v25 = vld [vmem:[%s9563_s5] sm:$0xff]   ;;  %v1383_v20 = vrot.slane %v8441_v16, 4  ;;  %v1385_v15 = vrot.slane %v8443_v45, 4  ;;  %v1387_v17 = vrot.slane %v8445_v38, 4  ;;  %v7561_v24 = vld [vmem:[%s9563_s5 + $0x8] sm:$0xff]  }
 0x1c7   : > { %1422 = vst.msk [vmem:[#allocation4 + $0x20] sm:$0xff] %vm9637_vm8, %v1376_v29  ;;  %vm9638_vm0 = vmmov %vm9637_vm8  ;;  %v1382_v26 = vsel %vm1369_vm10, %v1379_v52, %v1381_v62  ;;  %v1389_v61 = vrot.slane %v8447_v36, 4  ;;  %v1391_v46 = vrot.slane %v8449_v57, 4  ;;  %v1393_v44 = vrot.slane %v8451_v27, 4  ;;  %6898 = vmatprep.subr.bf16.mxu0 %v7560_v25  ;;  %v2055_v54 = vld [vmem:[%s9560_s2 + $0x24] sm:$0xf] }
 0x1c8   : > { %2092 = vperm.xlu1 %7557, %v2047_v59   ;;  %2080 = vperm.xlu0 %7556, %v2046_v53   ;;  %1423 = vst.msk [vmem:[#allocation4 + $0x28] sm:$0xff] %vm9638_vm0, %v1378_v32  ;;  %vm9639_vm3 = vmmov %vm9638_vm0  ;;  %v1395_v22 = vrot.slane %v8453_v13, 4  ;;  %v1384_v59 = vsel %vm1369_vm10, %v1381_v62, %v1383_v20  ;;  %v1386_v53 = vsel %vm1369_vm10, %v1383_v20, %v1385_v15  ;;  %v1397_v39 = vrot.slane %v8455_v49, 4  ;;  %v2054_v47 = vld [vmem:[%s9560_s2 + $0x20] sm:$0xf] }
 0x1c9   : > { %1424 = vst.msk [vmem:[#allocation4 + $0x30] sm:$0xff] %vm9639_vm3, %v1380_v21  ;;  %vm9640_vm5 = vmmov %vm9638_vm0  ;;  %6899 = vmatpush3.bf16.msra.mxu0 %v7560_v25  ;;  %v1392_v37 = vsel %vm1369_vm10, %v1389_v61, %v1391_v46  ;;  %v1446_v32 = vld [vmem:[%s9559_s1 + $0x24] sm:$0xf]  ;;  %v1445_v25 = vld [vmem:[%s9559_s1 + $0x20] sm:$0xf]  ;;  %vm1435_vm8 = vcmask 257024  }
 0x1ca   : > { %1425 = vst.msk [vmem:[#allocation4 + $0x38] sm:$0xff] %vm9640_vm5, %v1382_v26  ;;  %vm9641_vm4 = vmmov %vm9638_vm0  ;;  %6900 = vmatprep.subr.bf16.mxu0 %v7561_v24  ;;  %v1396_v28 = vsel %vm1369_vm10, %v1393_v44, %v1395_v22  ;;  %v1398_v62 = vsel %vm1369_vm10, %v1395_v22, %v1397_v39 }
 0x1cb   : > { %v4301_v56 = vld [vmem:[#allocation4 + $0x8] sm:$0xf0]  ;;  %1426 = vst.msk [vmem:[#allocation4 + $0x40] sm:$0xff] %vm9641_vm4, %v1384_v59  ;;  %vm9642_vm13 = vmmov %vm9638_vm0 }
 0x1cc   : > { %2116 = vperm.xlu1 %7557, %v2049_v50   ;;  %2104 = vperm.xlu0 %7556, %v2048_v19   ;;  %v1388_v50 = vsel %vm1369_vm10, %v1385_v15, %v1387_v17  ;;  %v1390_v19 = vsel %vm1369_vm10, %v1387_v17, %v1389_v61  ;;  %1427 = vst.msk [vmem:[#allocation4 + $0x48] sm:$0xff] %vm9642_vm13, %v1386_v53  ;;  %vm9643_vm14 = vmmov %vm9638_vm0  ;;  %v1448_v61 = vld [vmem:[%s9559_s1 + $0x2c] sm:$0xf] }
 0x1cd   : > { %1428 = vst.msk [vmem:[#allocation4 + $0x50] sm:$0xff] %vm9643_vm14, %v1388_v50  ;;  %vm9644_vm6 = vmmov %vm9638_vm0  ;;  %6901 = vmatpush3.bf16.msra.mxu0 %v7561_v24  ;;  %v2057_v53 = vld [vmem:[%s9560_s2 + $0x2c] sm:$0xf]  ;;  %v2056_v50 = vld [vmem:[%s9560_s2 + $0x28] sm:$0xf] }
 0x1ce   : > { %1429 = vst.msk [vmem:[#allocation4 + $0x58] sm:$0xff] %vm9644_vm6, %v1390_v19  ;;  %vm9645_vm7 = vmmov %vm9638_vm0  ;;  %v4304_v48 = vld [vmem:[#allocation4 + $0x20] sm:$0xff] }
 0x1cf   : > { %1430 = vst.msk [vmem:[#allocation4 + $0x60] sm:$0xff] %vm9645_vm7, %v1392_v37  ;;  %vm9646_vm2 = vmmov %vm9638_vm0  ;;  %v4345_v29 = vrot.slane %v4304_v48, 4  ;;  %v4305_v52 = vld [vmem:[#allocation4 + $0x28] sm:$0xff]  ;;  %v1452_v48 = vld [vmem:[%s9559_s1 + $0x3c] sm:$0xf] }
 0x1d0   : > { %2140 = vperm.xlu1 %7557, %v2051_v63   ;;  %2128 = vperm.xlu0 %7556, %v2050_v43   ;;  %v4302_v63 = vld [vmem:[#allocation4 + $0x10] sm:$0xff]  ;;  %v4340_v43 = vrot.slane %v4301_v56, 4  ;;  %vm9647_vm15 = vmmov %vm9638_vm0  ;;  %v4347_v15 = vrot.slane %v4305_v52, 4 }
 0x1d1   : > { %v4341_v51 = vrot.slane %v4302_v63, 4  ;;  %1432 = vst.msk [vmem:[#allocation4 + $0x70] sm:$0xff] %vm9647_vm15, %v1396_v28  ;;  %vm9648_vm9 = vmmov %vm9638_vm0  ;;  %v4306_v26 = vld [vmem:[#allocation4 + $0x30] sm:$0xff]  ;;  %v4307_v56 = vld [vmem:[#allocation4 + $0x38] sm:$0xff] }
 0x1d2   : > { %vm9649_vm11 = vmmov %vm9638_vm0  ;;  %v4349_v17 = vrot.slane %v4306_v26, 4  ;;  %v4348_v22 = vsel %vm1369_vm10, %v4345_v29, %v4347_v15  ;;  %v4308_v59 = vld [vmem:[#allocation4 + $0x40] sm:$0xff]  ;;  %v4351_v19 = vrot.slane %v4307_v56, 4  ;;  %v2059_v63 = vld [vmem:[%s9560_s2 + $0x34] sm:$0xf] }
 0x1d3   : > { %1433 = vst.msk [vmem:[#allocation4 + $0x78] sm:$0xff] %vm9649_vm11, %v1398_v62  ;;  %vm9650_vm12 = vmmov %vm9638_vm0  ;;  %v1450_v28 = vld [vmem:[%s9559_s1 + $0x34] sm:$0xf]  ;;  %v2061_v62 = vld [vmem:[%s9560_s2 + $0x3c] sm:$0xf] }
 0x1d4   : > { %1531 = vperm.xlu1 %7557, %v1442_v34   ;;  %1519 = vperm.xlu0 %7556, %v1441_v55   ;;  %v4303_v34 = vld [vmem:[#allocation4 + $0x18] sm:$0xff]  ;;  %v1394_v55 = vsel %vm1369_vm10, %v1391_v46, %v1393_v44  ;;  %vm9651_vm3 = vmmov %vm9638_vm0  ;;  %v1447_v44 = vld [vmem:[%s9559_s1 + $0x28] sm:$0xf]  ;;  %v4350_v24 = vsel %vm1369_vm10, %v4347_v15, %v4349_v17  ;;  %v4352_v37 = vsel %vm1369_vm10, %v4349_v17, %v4351_v19 }
 0x1d5   : > { %v4343_v23 = vrot.slane %v4303_v34, 4  ;;  %1431 = vst.msk [vmem:[#allocation4 + $0x68] sm:$0xff] %vm9646_vm2, %v1394_v55  ;;  %v7563_v46 = vld [vmem:[%s9563_s5 + $0x58] sm:$0xff]   ;;  %vm9652_vm5 = vmmov %vm9638_vm0  ;;  %v2058_v34 = vld [vmem:[%s9560_s2 + $0x30] sm:$0xf] }
 0x1d6   : > { %vm9653_vm4 = vmmov %vm9638_vm0  ;;  %v4312_v52 = vld [vmem:[#allocation4 + $0x60] sm:$0xff]  ;;  %v1456_v56 = vld [vmem:[%s9559_s1 + $0x4c] sm:$0xf] }
 0x1d7   : > { %v4346_v21 = vsel %vm1369_vm10, %v4343_v23, %v4345_v29  ;;  %vm9654_vm13 = vmmov %vm9638_vm0  ;;  %v2063_v26 = vld [vmem:[%s9560_s2 + $0x44] sm:$0xf] }
 0x1d8   : > { %1555 = vperm.xlu1 %7557, %v1444_v35   ;;  %1543 = vperm.xlu0 %7556, %v1443_v30   ;;  %v4342_v35 = vsel %vm1369_vm10, %v4340_v43, %v4341_v51  ;;  %v4344_v30 = vsel %vm1369_vm10, %v4341_v51, %v4343_v23  ;;  %v4353_v43 = vrot.slane %v4308_v59, 4  ;;  %v4309_v51 = vld [vmem:[#allocation4 + $0x48] sm:$0xff]  ;;  %v4310_v23 = vld [vmem:[#allocation4 + $0x50] sm:$0xff]  ;;  %vm9655_vm14 = vmmov %vm9638_vm0 }
 0x1d9   : > { %7046 = vmatprep.mubr.msk.bf16.mxu1 %vm9648_vm9, %v4342_v35  ;;  %v1451_v35 = vld [vmem:[%s9559_s1 + $0x38] sm:$0xf]  ;;  %vm9656_vm6 = vmmov %vm9638_vm0  ;;  %v1455_v59 = vld [vmem:[%s9559_s1 + $0x48] sm:$0xf] }
 0x1da   : > { %7047 = vmatmul.mubr.msk.bf16.vlgmr.msra.gmra.mrb[0].mxu1 %vm9650_vm12, %v4344_v30  ;;  %v4354_v55 = vsel %vm1369_vm10, %v4351_v19, %v4353_v43  ;;  %vm9657_vm7 = vmmov %vm9638_vm0  ;;  %v4315_v19 = vld [vmem:[#allocation4 + $0x78] sm:$0xff] }
 0x1db   : > { %7050 = vmatprep.mubr.msk.bf16.mxu1 %vm9638_vm0, %v4346_v21  ;;  %v4361_v21 = vrot.slane %v4312_v52, 4  ;;  %vm9658_vm2 = vmmov %vm9638_vm0  ;;  %v2069_v52 = vld [vmem:[%s9560_s2 + $0x5c] sm:$0xf] }
 0x1dc   : > { %2164 = vperm.xlu1 %7557, %v2053_v58   ;;  %2152 = vperm.xlu0 %7556, %v2052_v40   ;;  %v7562_v58 = vld [vmem:[%s9563_s5 + $0x50] sm:$0xff]   ;;  %v1399_v40 = vrot.slane %v8457_v18, 4  ;;  %v4313_v17 = vld [vmem:[#allocation4 + $0x68] sm:$0xff]  ;;  %vm9659_vm15 = vmmov %vm9638_vm0 }
 0x1dd   : > { %7078 = vmatprep.subr.bf16.mxu1 %v7562_v58  ;;  %vm9660_vm9 = vmmov %vm9638_vm0 }
 0x1de   : > { %v1400_v20 = vsel %vm1369_vm10, %v1397_v39, %v1399_v40  ;;  %7079 = vmatpush3.bf16.msra.mxu1 %v7562_v58  ;;  %1436 = vst.msk [vmem:[#allocation4 + $0x88] sm:$0xf] %vm1435_vm8, %v1399_v40  ;;  %v1449_v39 = vld [vmem:[%s9559_s1 + $0x30] sm:$0xf]  ;;  %v2060_v58 = vld [vmem:[%s9560_s2 + $0x38] sm:$0xf]  ;;  %vm9661_vm11 = vmmov %vm9638_vm0 }
 0x1df   : > { %1434 = vst.msk [vmem:[#allocation4 + $0x80] sm:$0xff] %vm9651_vm3, %v1400_v20  ;;  %7080 = vmatprep.subr.bf16.mxu1 %v7563_v46  ;;  %vm9662_vm12 = vmmov %vm9638_vm0 }
 0x1e0   : > { %2188 = vperm.xlu1 %7557, %v2055_v54   ;;  %2176 = vperm.xlu0 %7556, %v2054_v47   ;;  %v4355_v54 = vrot.slane %v4309_v51, 4  ;;  %v4357_v47 = vrot.slane %v4310_v23, 4  ;;  %v2067_v51 = vld [vmem:[%s9560_s2 + $0x54] sm:$0xf]  ;;  %v2066_v23 = vld [vmem:[%s9560_s2 + $0x50] sm:$0xf]  ;;  %vm9663_vm3 = vmmov %vm9638_vm0 }
 0x1e2   : > { %7081 = vmatpush3.bf16.msra.mxu1 %v7563_v46  ;;  %v4356_v30 = vsel %vm1369_vm10, %v4353_v43, %v4355_v54  ;;  %v4358_v29 = vsel %vm1369_vm10, %v4355_v54, %v4357_v47  ;;  %v1454_v46 = vld [vmem:[%s9559_s1 + $0x44] sm:$0xf]  ;;  %v2065_v43 = vld [vmem:[%s9560_s2 + $0x4c] sm:$0xf] }
 0x1e3   : > { %7051 = vmatmul.mubr.msk.bf16.gmra.mrb[4].mxu1 %vm9652_vm5, %v4348_v22  ;;  %v4363_v22 = vrot.slane %v4313_v17, 4  ;;  %v8736_v17 = vld [vmem:[%s9563_s5 + $0x60] sm:$0xff]   ;;  %vm9664_vm5 = vmmov %vm9638_vm0 }
 0x1e4   : > { %1579 = vperm.xlu1 %7557, %v1446_v32   ;;  %1567 = vperm.xlu0 %7556, %v1445_v25   ;;  %v4311_v32 = vld [vmem:[#allocation4 + $0x58] sm:$0xff]  ;;  %v2062_v25 = vld [vmem:[%s9560_s2 + $0x40] sm:$0xf] }
 0x1e5   : > { %7054 = vmatprep.mubr.msk.bf16.mxu1 %vm9653_vm4, %v4350_v24  ;;  %v4359_v40 = vrot.slane %v4311_v32, 4  ;;  %v4317_v54 = vld [vmem:[#allocation4 + $0x88] sm:$0xf]  ;;  %7114 = vmatprep.subr.bf16.mxu1 %v8736_v17  ;;  %vm2715_vm4 = vsmask.f32 4352 }
 0x1e7   : > { %v4360_v20 = vsel %vm1369_vm10, %v4357_v47, %v4359_v40  ;;  %v4362_v15 = vsel %vm1369_vm10, %v4359_v40, %v4361_v21  ;;  %v1458_v47 = vld [vmem:[%s9559_s1 + $0x54] sm:$0xf]  ;;  %v2070_v40 = vld [vmem:[%s9560_s2 + $0x60] sm:$0xf] }
 0x1e8   : > { %1603 = vperm.xlu1 %7557, %v1448_v61   ;;  %1591 = vperm.xlu0 %7556, %v1447_v44   ;;  %v4314_v61 = vld [vmem:[#allocation4 + $0x70] sm:$0xff]  ;;  %v1453_v44 = vld [vmem:[%s9559_s1 + $0x40] sm:$0xf] }
 0x1e9   : > { %v4365_v24 = vrot.slane %v4314_v61, 4  ;;  %v2073_v61 = vld [vmem:[%s9560_s2 + $0x6c] sm:$0xf] }
 0x1eb   : > { %7055 = vmatmul.mubr.msk.bf16.gmra.mrb[8].mxu1 %vm9654_vm13, %v4352_v37  ;;  %v4367_v37 = vrot.slane %v4315_v19, 4  ;;  %vm9666_vm13 = vmmov %vm9638_vm0 }
 0x1ec   : > { %2212 = vperm.xlu1 %7557, %v2057_v53   ;;  %2200 = vperm.xlu0 %7556, %v2056_v50   ;;  %v4364_v53 = vsel %vm1369_vm10, %v4361_v21, %v4363_v22  ;;  %v4366_v50 = vsel %vm1369_vm10, %v4363_v22, %v4365_v24  ;;  %v1462_v21 = vld [vmem:[%s9559_s1 + $0x64] sm:$0xf]  ;;  %v2074_v22 = vld [vmem:[%s9560_s2 + $0x70] sm:$0xf] }
 0x1ed   : > { %7058 = vmatprep.mubr.msk.bf16.mxu1 %vm9655_vm14, %v4354_v55  ;;  %vm9667_vm14 = vmmov %vm9638_vm0 }
 0x1f0   : > { %2236 = vperm.xlu1 %7557, %v2059_v63   ;;  %2224 = vperm.xlu0 %7556, %v2058_v34   ;;  %v4316_v63 = vld [vmem:[#allocation4 + $0x80] sm:$0xff]  ;;  %v2064_v34 = vld [vmem:[%s9560_s2 + $0x48] sm:$0xf] }
 0x1f1   : > { %v4369_v55 = vrot.slane %v4316_v63, 4  ;;  %v1477_v63 = vlaneseq }
 0x1f3   : > { %7059 = vmatmul.mubr.msk.bf16.gmra.mrb[12].mxu1 %vm9656_vm6, %v4356_v30  ;;  %v1460_v30 = vld [vmem:[%s9559_s1 + $0x5c] sm:$0xf]  ;;  %vm9668_vm6 = vmmov %vm9638_vm0 }
 0x1f4   : > { %1627 = vperm.xlu1 %7557, %v1450_v28   ;;  %1615 = vperm.xlu0 %7556, %v1449_v39   ;;  %v4368_v28 = vsel %vm1369_vm10, %v4365_v24, %v4367_v37  ;;  %v4370_v39 = vsel %vm1369_vm10, %v4367_v37, %v4369_v55  ;;  %v1466_v24 = vld [vmem:[%s9559_s1 + $0x74] sm:$0xf] }
 0x1f5   : > { %7062 = vmatprep.mubr.msk.bf16.mxu1 %vm9657_vm7, %v4358_v29  ;;  %v1459_v29 = vld [vmem:[%s9559_s1 + $0x58] sm:$0xf]  ;;  %vm9669_vm7 = vmmov %vm9638_vm0 }
 0x1f8   : > { %1651 = vperm.xlu1 %7557, %v1452_v48   ;;  %1639 = vperm.xlu0 %7556, %v1451_v35   ;;  %v1457_v48 = vld [vmem:[%s9559_s1 + $0x50] sm:$0xf]  ;;  %v4371_v35 = vrot.slane %v4317_v54, 4 }
 0x1fa   : > { %v4372_v32 = vsel %vm1369_vm10, %v4369_v55, %v4371_v35  ;;  %v1478_v55 = vshrl.u32 %v1477_v63, 7 }
 0x1fb   : > { %7063 = vmatmul.mubr.msk.bf16.gmra.mrb[16].mxu1 %vm9658_vm2, %v4360_v20  ;;  %v1464_v20 = vld [vmem:[%s9559_s1 + $0x6c] sm:$0xf]  ;;  %vm9670_vm2 = vmmov %vm9638_vm0 }
 0x1fc   : > { %2260 = vperm.xlu1 %7557, %v2061_v62   ;;  %2248 = vperm.xlu0 %7556, %v2060_v58   ;;  %v2068_v62 = vld [vmem:[%s9560_s2 + $0x58] sm:$0xf]  ;;  %v2071_v58 = vld [vmem:[%s9560_s2 + $0x64] sm:$0xf] }
 0x1fd   : > { %7066 = vmatprep.mubr.msk.bf16.mxu1 %vm9659_vm15, %v4362_v15  ;;  %v1463_v15 = vld [vmem:[%s9559_s1 + $0x68] sm:$0xf]  ;;  %vm3468_vm15 = vsmask.f32 3328 }
 0x200   : > { %2284 = vperm.xlu1 %7557, %v2063_v26   ;;  %2272 = vperm.xlu0 %7556, %v2062_v25   ;;  %v1461_v26 = vld [vmem:[%s9559_s1 + $0x60] sm:$0xf]  ;;  %v8724_v25 = vld [vmem:[%s9563_s5 + $0x10] sm:$0xff]  }
 0x201   : > { %6934 = vmatprep.subr.bf16.mxu0 %v8724_v25 }
 0x203   : > { %7067 = vmatmul.mubr.msk.bf16.gmra.mrb[20].mxu1 %vm9660_vm9, %v4364_v53  ;;  %v1467_v53 = vld [vmem:[%s9559_s1 + $0x78] sm:$0xf]  ;;  %vm9671_vm9 = vmmov %vm9638_vm0 }
 0x204   : > { %1675 = vperm.xlu1 %7557, %v1454_v46   ;;  %1663 = vperm.xlu0 %7556, %v1453_v44   ;;  %v2072_v46 = vld [vmem:[%s9560_s2 + $0x68] sm:$0xf]  ;;  %v2075_v44 = vld [vmem:[%s9560_s2 + $0x74] sm:$0xf] }
 0x205   : > { %7070 = vmatprep.mubr.msk.bf16.mxu1 %vm9661_vm11, %v4366_v50  ;;  %v7619_v50 = vmov 839922192   ;;  %vm9672_vm11 = vmmov %vm9638_vm0 }
 0x206   : > { %v1475_v19 = vunpack.c.l.s4 %v7619_v50 }
 0x208   : > { %1699 = vperm.xlu1 %7557, %v1456_v56   ;;  %1687 = vperm.xlu0 %7556, %v1455_v59   ;;  %v1465_v56 = vld [vmem:[%s9559_s1 + $0x70] sm:$0xf]  ;;  %v1468_v59 = vld [vmem:[%s9559_s1 + $0x7c] sm:$0xf]  ;;  %v1476_v37 = vunpack.c.0.s8 %v1475_v19 }
 0x20b   : > { %7071 = vmatmul.mubr.msk.bf16.gmra.mrb[24].mxu1 %vm9662_vm12, %v4368_v28  ;;  %v8769_v28 = vsub.s32 %v1476_v37, %v1478_v55  ;;  %vm9673_vm12 = vmmov %vm9638_vm0 }
 0x20c   : > { %2308 = vperm.xlu1 %7557, %v2065_v43   ;;  %2296 = vperm.xlu0 %7556, %v2064_v34   ;;  %v2077_v43 = vld [vmem:[%s9560_s2 + $0x7c] sm:$0xf]  ;;  %v2076_v34 = vld [vmem:[%s9560_s2 + $0x78] sm:$0xf] }
 0x20d   : > { %7074 = vmatprep.mubr.msk.bf16.mxu1 %vm9638_vm0, %v4370_v39 }
 0x210   : > { %2332 = vperm.xlu1 %7557, %v2067_v51   ;;  %2320 = vperm.xlu0 %7556, %v2066_v23  }
 0x213   : > { %7075 = vmatmul.mubr.msk.bf16.gmra.mrb[28].mxu1 %vm9663_vm3, %v4372_v32  ;;  %vm9674_vm3 = vmmov %vm9638_vm0 }
 0x214   : > { %1723 = vperm.xlu1 %7557, %v1458_v47   ;;  %1711 = vperm.xlu0 %7556, %v1457_v48  }
 0x218   : > { %1747 = vperm.xlu1 %7557, %v1460_v30   ;;  %1735 = vperm.xlu0 %7556, %v1459_v29  }
 0x21c   : > { %2356 = vperm.xlu1 %7557, %v2069_v52   ;;  %2344 = vperm.xlu0 %7556, %v2068_v62  }
 0x220   : > { %2380 = vperm.xlu1 %7557, %v2071_v58   ;;  %2368 = vperm.xlu0 %7556, %v2070_v40  }
 0x224   : > { %1771 = vperm.xlu1 %7557, %v1462_v21   ;;  %1759 = vperm.xlu0 %7556, %v1461_v26  }
 0x228   : > { %1795 = vperm.xlu1 %7557, %v1464_v20   ;;  %1783 = vperm.xlu0 %7556, %v1463_v15  }
 0x22c   : > { %2404 = vperm.xlu1 %7557, %v2073_v61   ;;  %2392 = vperm.xlu0 %7556, %v2072_v46  }
 0x230   : > { %2428 = vperm.xlu1 %7557, %v2075_v44   ;;  %2416 = vperm.xlu0 %7556, %v2074_v22   ;;  %v2694_v22 = vld [vmem:[#allocation5] sm:$0xf8] }
 0x231   : > { %v2717_v63 = vshrl.u32 %v2694_v22, 16 }
 0x234   : > { %1819 = vperm.xlu1 %7557, %v1466_v24   ;;  %1807 = vperm.xlu0 %7556, %v1465_v56  }
 0x238   : > { %1843 = vperm.xlu1 %7557, %v1468_v59   ;;  %1831 = vperm.xlu0 %7556, %v1467_v53  }
 0x23c   : > { %2452 = vperm.xlu1 %7557, %v2077_v43   ;;  %2440 = vperm.xlu0 %7556, %v2076_v34   ;;  %v2720_v43 = vshll.u32 %v2694_v22, 16 }
 0x23f   : > { %v1496_v51 = vpop.permute.xlu1 %1495  ;;  %v1472_v23 = vpop.permute.xlu0 %1471 }
 0x240   : > { %v1504_v47 = vrot.slane %v1496_v51, %v8769_v28  ;;  %v1480_v48 = vrot.slane %v1472_v23, %v8769_v28 }
 0x243   : > { %v1508_v39 = vpop.permute.xlu1 %1507  ;;  %v1484_v54 = vpop.permute.xlu0 %1483 }
 0x244   : > { %v1516_v35 = vrot.slane %v1508_v39, %v8769_v28  ;;  %v1492_v30 = vrot.slane %v1484_v54, %v8769_v28  ;;  %v2719_v54 = vrot.slane %v2717_v63, 3 }
 0x246   : > { %v6454_v29 = vcombine.low %v1504_v47, %v1516_v35  ;;  %v6453_v32 = vcombine.low %v1480_v48, %v1492_v30  ;;  %v2722_v47 = vrot.slane %v2720_v43, 4 }
 0x247   : > { %v2093_v52 = vpop.permute.xlu1 %2092  ;;  %v2081_v62 = vpop.permute.xlu0 %2080 }
 0x248   : > { %v1950_v58 = vmul.bf16 %v6454_v29, %v8429_v33  ;;  %v1949_v40 = vmul.bf16 %v6453_v32, %v8427_v41  ;;  %v2101_v21 = vrot.slane %v2093_v52, %v8769_v28  ;;  %v2089_v26 = vrot.slane %v2081_v62, %v8769_v28 }
 0x24a   : > { %v8779_v20 = vrot.slane %v1950_v58, 4  ;;  %v1981_v15 = vrot.slane %v1949_v40, 4  ;;  %v6469_v61 = vcombine.low %v2089_v26, %v2101_v21 }
 0x24b   : > { %v2117_v46 = vpop.permute.xlu1 %2116  ;;  %v2105_v44 = vpop.permute.xlu0 %2104 }
 0x24c   : > { %v1983_v24 = vsel %vm1369_vm10, %v1981_v15, %v8779_v20  ;;  %2029 = vst.msk [vmem:[#allocation5 + $0x8] sm:$0xf0] %vm1418_vm1, %v1981_v15  ;;  %v2558_v56 = vmul.bf16 %v6469_v61, %v8427_v41  ;;  %v2125_v59 = vrot.slane %v2117_v46, %v8769_v28  ;;  %v2113_v53 = vrot.slane %v2105_v44, %v8769_v28 }
 0x24d   : > { %2030 = vst.msk [vmem:[#allocation5 + $0x10] sm:$0xff] %vm9664_vm5, %v1983_v24  ;;  %v2723_v46 = vor.u32 %v2722_v47, %v2719_v54  ;;  %vm9675_vm5 = vmmov %vm9638_vm0 }
 0x24e   : > { %v2590_v50 = vrot.slane %v2558_v56, 4  ;;  %v6470_v19 = vcombine.low %v2113_v53, %v2125_v59 }
 0x24f   : > { %v2141_v34 = vpop.permute.xlu1 %2140  ;;  %v2129_v37 = vpop.permute.xlu0 %2128 }
 0x250   : > { %2638 = vst.msk [vmem:[#allocation6 + $0x8] sm:$0xf0] %vm1418_vm1, %v2590_v50  ;;  %v2559_v55 = vmul.bf16 %v6470_v19, %v8429_v33  ;;  %v2149_v51 = vrot.slane %v2141_v34, %v8769_v28  ;;  %v2137_v41 = vrot.slane %v2129_v37, %v8769_v28  ;;  %vm9665_vm1 = vmmov %vm9638_vm0 }
 0x252   : > { %v2591_v23 = vrot.slane %v2559_v55, 4  ;;  %v6471_v39 = vcombine.low %v2137_v41, %v2149_v51 }
 0x253   : > { %v1532_v48 = vpop.permute.xlu1 %1531  ;;  %v1520_v35 = vpop.permute.xlu0 %1519  ;;  %v2695_v30 = vld [vmem:[#allocation5 + $0x8] sm:$0xff] }
 0x254   : > { %v2592_v29 = vsel %vm1369_vm10, %v2590_v50, %v2591_v23  ;;  %v2560_v32 = vmul.bf16 %v6471_v39, %v8431_v12  ;;  %v1540_v52 = vrot.slane %v1532_v48, %v8769_v28  ;;  %v1528_v62 = vrot.slane %v1520_v35, %v8769_v28  ;;  %v2696_v33 = vld [vmem:[#allocation5 + $0x10] sm:$0xff] }
 0x255   : > { %2639 = vst.msk [vmem:[#allocation6 + $0x10] sm:$0xff] %vm9665_vm1, %v2592_v29  ;;  %v2725_v58 = vshrl.u32 %v2695_v30, 16  ;;  %v2728_v40 = vshll.u32 %v2695_v30, 16  ;;  %v2734_v21 = vshrl.u32 %v2696_v33, 16  ;;  %v2737_v26 = vshll.u32 %v2696_v33, 16  ;;  %vm9676_vm1 = vmmov %vm9638_vm0 }
 0x256   : > { %v8797_v15 = vrot.slane %v2560_v32, 4  ;;  %v6455_v61 = vcombine.low %v1528_v62, %v1540_v52 }
 0x257   : > { %v1556_v44 = vpop.permute.xlu1 %1555  ;;  %v1544_v22 = vpop.permute.xlu0 %1543  ;;  %v2727_v24 = vrot.slane %v2725_v58, 3  ;;  %v2730_v56 = vrot.slane %v2728_v40, 4  ;;  %v2736_v59 = vrot.slane %v2734_v21, 3  ;;  %v2739_v53 = vrot.slane %v2737_v26, 4  ;;  %v4626_v50 = vld [vmem:[#allocation6 + $0x8] sm:$0xf0] }
 0x258   : > { %v2594_v19 = vsel %vm1369_vm10, %v2591_v23, %v8797_v15  ;;  %v1951_v63 = vmul.bf16 %v6455_v61, %v8431_v12  ;;  %v1564_v43 = vrot.slane %v1556_v44, %v8769_v28  ;;  %v1552_v34 = vrot.slane %v1544_v22, %v8769_v28  ;;  %v7566_v23 = vld [vmem:[%s9563_s5 + $0x18] sm:$0xff]  }
 0x259   : > { %2640 = vst.msk [vmem:[#allocation6 + $0x18] sm:$0xff] %vm9666_vm13, %v2594_v19  ;;  %v2731_v37 = vor.u32 %v2730_v56, %v2727_v24  ;;  %v8805_v55 = vor.u32 %v2739_v53, %v2736_v59  ;;  %v4649_v51 = vshrl.u32 %v4626_v50, 16  ;;  %v4652_v41 = vshll.u32 %v4626_v50, 16  ;;  %v8827_v24 = vld [vmem:[%s9563_s5 + $0x20] sm:$0xff]   ;;  %vm9677_vm13 = vmmov %vm9638_vm0 }
 0x25a   : > { %v1984_v39 = vrot.slane %v1951_v63, 4  ;;  %v6456_v54 = vcombine.low %v1552_v34, %v1564_v43 }
 0x25b   : > { %v2165_v47 = vpop.permute.xlu1 %2164  ;;  %v2153_v48 = vpop.permute.xlu0 %2152  ;;  %v2732_v35 = vsel %vm2715_vm4, %v2723_v46, %v2731_v37  ;;  %v2741_v12 = vsel %vm2715_vm4, %v2731_v37, %v8805_v55  ;;  %v4651_v33 = vrot.slane %v4649_v51, 4  ;;  %v4654_v58 = vrot.slane %v4652_v41, 5 }
 0x25c   : > { %v1985_v30 = vsel %vm1369_vm10, %v8779_v20, %v1984_v39  ;;  %v1952_v29 = vmul.bf16 %v6456_v54, %v8433_v14  ;;  %v2173_v32 = vrot.slane %v2165_v47, %v8769_v28  ;;  %v2161_v52 = vrot.slane %v2153_v48, %v8769_v28  ;;  %6902 = vmatprep.mubr.msk.bf16.mxu0 %vm9667_vm14, %v2732_v35  ;;  %v4627_v62 = vld [vmem:[#allocation6 + $0x10] sm:$0xff]  ;;  %vm9678_vm14 = vmmov %vm9638_vm0 }
 0x25d   : > { %2031 = vst.msk [vmem:[#allocation5 + $0x18] sm:$0xff] %vm9668_vm6, %v1985_v30  ;;  %6903 = vmatmul.mubr.msk.bf16.vlgmr.msra.gmra.mrb[32].mxu0 %vm9669_vm7, %v2741_v12  ;;  %v4657_v40 = vshrl.u32 %v4627_v62, 16  ;;  %v4660_v21 = vshll.u32 %v4627_v62, 16  ;;  %v4655_v19 = vor.u32 %v4654_v58, %v4651_v33  ;;  %vm9679_vm6 = vmmov %vm9638_vm0 }
 0x25e   : > { %v8821_v26 = vrot.slane %v1952_v29, 4  ;;  %v6472_v20 = vcombine.low %v2161_v52, %v2173_v32  ;;  %6935 = vmatpush3.bf16.msra.mxu0 %v8724_v25  ;;  %vm9680_vm7 = vmmov %vm9638_vm0 }
 0x25f   : > { %v2189_v61 = vpop.permute.xlu1 %2188  ;;  %v2177_v46 = vpop.permute.xlu0 %2176  ;;  %v4659_v44 = vrot.slane %v4657_v40, 4  ;;  %v4662_v22 = vrot.slane %v4660_v21, 5  ;;  %6936 = vmatprep.subr.bf16.mxu0 %v7566_v23 }
 0x260   : > { %v1987_v56 = vsel %vm1369_vm10, %v1984_v39, %v8821_v26  ;;  %v2561_v59 = vmul.bf16 %v6472_v20, %v8433_v14  ;;  %v2197_v53 = vrot.slane %v2189_v61, %v8769_v28  ;;  %v2185_v50 = vrot.slane %v2177_v46, %v8769_v28  ;;  %v4628_v25 = vld [vmem:[#allocation6 + $0x18] sm:$0xff] }
 0x261   : > { %2032 = vst.msk [vmem:[#allocation5 + $0x20] sm:$0xff] %vm9670_vm2, %v1987_v56  ;;  %v4663_v63 = vor.u32 %v4662_v22, %v4659_v44  ;;  %v4666_v43 = vshrl.u32 %v4628_v25, 16  ;;  %v4669_v34 = vshll.u32 %v4628_v25, 16  ;;  %vm9681_vm2 = vmmov %vm9638_vm0 }
 0x262   : > { %v2595_v37 = vrot.slane %v2561_v59, 4  ;;  %v6473_v51 = vcombine.low %v2185_v50, %v2197_v53  ;;  %6937 = vmatpush3.bf16.msra.mxu0 %v7566_v23 }
 0x263   : > { %v1580_v41 = vpop.permute.xlu1 %1579  ;;  %v1568_v54 = vpop.permute.xlu0 %1567  ;;  %v4664_v39 = vsel %vm3468_vm15, %v4655_v19, %v4663_v63  ;;  %v4668_v14 = vrot.slane %v4666_v43, 4  ;;  %v4671_v47 = vrot.slane %v4669_v34, 5  ;;  %6970 = vmatprep.subr.bf16.mxu0 %v8827_v24 }
 0x264   : > { %v2596_v48 = vsel %vm1369_vm10, %v8797_v15, %v2595_v37  ;;  %v2562_v35 = vmul.bf16 %v6473_v51, %v8435_v42  ;;  %v1588_v12 = vrot.slane %v1580_v41, %v8769_v28  ;;  %v1576_v30 = vrot.slane %v1568_v54, %v8769_v28  ;;  %7082 = vmatprep.mubr.msk.bf16.mxu1 %vm9671_vm9, %v4664_v39  ;;  %v2697_v23 = vld [vmem:[#allocation5 + $0x18] sm:$0xff]  ;;  %v7567_v15 = vld [vmem:[%s9563_s5 + $0x68] sm:$0xff]   ;;  %vm9682_vm9 = vmmov %vm9638_vm0 }
 0x265   : > { %2641 = vst.msk [vmem:[#allocation6 + $0x20] sm:$0xff] %vm9672_vm11, %v2596_v48  ;;  %v8844_v29 = vor.u32 %v4671_v47, %v4668_v14  ;;  %v2743_v32 = vshrl.u32 %v2697_v23, 16  ;;  %v2746_v52 = vshll.u32 %v2697_v23, 16  ;;  %vm9683_vm11 = vmmov %vm9638_vm0 }
 0x266   : > { %v8846_v62 = vrot.slane %v2562_v35, 4  ;;  %v6457_v33 = vcombine.low %v1576_v30, %v1588_v12 }
 0x267   : > { %v1604_v58 = vpop.permute.xlu1 %1603  ;;  %v1592_v40 = vpop.permute.xlu0 %1591  ;;  %v4673_v21 = vsel %vm3468_vm15, %v4663_v63, %v8844_v29  ;;  %v2745_v20 = vrot.slane %v2743_v32, 3  ;;  %v2748_v61 = vrot.slane %v2746_v52, 4 }
 0x268   : > { %v2598_v46 = vsel %vm1369_vm10, %v2595_v37, %v8846_v62  ;;  %v1953_v44 = vmul.bf16 %v6457_v33, %v8435_v42  ;;  %v1612_v22 = vrot.slane %v1604_v58, %v8769_v28  ;;  %v1600_v56 = vrot.slane %v1592_v40, %v8769_v28  ;;  %7083 = vmatmul.mubr.msk.bf16.vlgmr.msra.gmra.mrb[0].mxu1 %vm9673_vm12, %v4673_v21  ;;  %v2698_v59 = vld [vmem:[#allocation5 + $0x20] sm:$0xff]  ;;  %v8866_v42 = vld [vmem:[%s9563_s5 + $0x70] sm:$0xff]   ;;  %vm9684_vm12 = vmmov %vm9638_vm0 }
 0x269   : > { %2642 = vst.msk [vmem:[#allocation6 + $0x28] sm:$0xff] %vm9638_vm0, %v2598_v46  ;;  %v8860_v53 = vor.u32 %v2748_v61, %v2745_v20  ;;  %v2752_v50 = vshrl.u32 %v2698_v59, 16  ;;  %v2755_v25 = vshll.u32 %v2698_v59, 16  ;;  %7115 = vmatpush3.bf16.msra.mxu1 %v8736_v17 }
 0x26a   : > { %v1988_v19 = vrot.slane %v1953_v44, 4  ;;  %v6458_v63 = vcombine.low %v1600_v56, %v1612_v22  ;;  %7116 = vmatprep.subr.bf16.mxu1 %v7567_v15 }
 0x26b   : > { %v2213_v43 = vpop.permute.xlu1 %2212  ;;  %v2201_v34 = vpop.permute.xlu0 %2200  ;;  %v2750_v37 = vsel %vm2715_vm4, %v8805_v55, %v8860_v53  ;;  %v2754_v51 = vrot.slane %v2752_v50, 3  ;;  %v2757_v41 = vrot.slane %v2755_v25, 4 }
 0x26c   : > { %v1989_v54 = vsel %vm1369_vm10, %v8821_v26, %v1988_v19  ;;  %v1954_v17 = vmul.bf16 %v6458_v63, %v8437_v60  ;;  %v2221_v39 = vrot.slane %v2213_v43, %v8769_v28  ;;  %v2209_v14 = vrot.slane %v2201_v34, %v8769_v28  ;;  %6906 = vmatprep.mubr.msk.bf16.mxu0 %vm9674_vm3, %v2750_v37  ;;  %v4629_v47 = vld [vmem:[#allocation6 + $0x20] sm:$0xff]  ;;  %vm9685_vm3 = vmmov %vm9638_vm0 }
 0x26d   : > { %2033 = vst.msk [vmem:[#allocation5 + $0x28] sm:$0xff] %vm9675_vm5, %v1989_v54  ;;  %v2758_v48 = vor.u32 %v2757_v41, %v2754_v51  ;;  %v4675_v35 = vshrl.u32 %v4629_v47, 16  ;;  %v4678_v12 = vshll.u32 %v4629_v47, 16  ;;  %7117 = vmatpush3.bf16.msra.mxu1 %v7567_v15  ;;  %vm9686_vm5 = vmmov %vm9638_vm0 }
 0x26e   : > { %v1990_v55 = vrot.slane %v1954_v17, 4  ;;  %v6474_v30 = vcombine.low %v2209_v14, %v2221_v39  ;;  %7150 = vmatprep.subr.bf16.mxu1 %v8866_v42 }
 0x26f   : > { %v2237_v26 = vpop.permute.xlu1 %2236  ;;  %v2225_v23 = vpop.permute.xlu0 %2224  ;;  %v8881_v32 = vsel %vm2715_vm4, %v8860_v53, %v2758_v48  ;;  %v4677_v52 = vrot.slane %v4675_v35, 4  ;;  %v4680_v33 = vrot.slane %v4678_v12, 5 }
 0x270   : > { %v1991_v58 = vsel %vm1369_vm10, %v1988_v19, %v1990_v55  ;;  %v2563_v40 = vmul.bf16 %v6474_v30, %v8437_v60  ;;  %v2245_v21 = vrot.slane %v2237_v26, %v8769_v28  ;;  %v2233_v15 = vrot.slane %v2225_v23, %v8769_v28  ;;  %6907 = vmatmul.mubr.msk.bf16.gmra.mrb[36].mxu0 %vm9676_vm1, %v8881_v32  ;;  %v4630_v20 = vld [vmem:[#allocation6 + $0x28] sm:$0xff]  ;;  %vm9687_vm1 = vmmov %vm9638_vm0 }
 0x271   : > { %2034 = vst.msk [vmem:[#allocation5 + $0x30] sm:$0xff] %vm9677_vm13, %v1991_v58  ;;  %v4681_v61 = vor.u32 %v4680_v33, %v4677_v52  ;;  %v4684_v46 = vshrl.u32 %v4630_v20, 16  ;;  %v4687_v44 = vshll.u32 %v4630_v20, 16  ;;  %vm9688_vm13 = vmmov %vm9638_vm0 }
 0x272   : > { %v2599_v22 = vrot.slane %v2563_v40, 4  ;;  %v6475_v56 = vcombine.low %v2233_v15, %v2245_v21 }
 0x273   : > { %v1628_v59 = vpop.permute.xlu1 %1627  ;;  %v1616_v50 = vpop.permute.xlu0 %1615  ;;  %v4682_v60 = vsel %vm3468_vm15, %v8844_v29, %v4681_v61  ;;  %v4686_v25 = vrot.slane %v4684_v46, 4  ;;  %v4689_v19 = vrot.slane %v4687_v44, 5 }
 0x274   : > { %v2600_v63 = vsel %vm1369_vm10, %v8846_v62, %v2599_v22  ;;  %v2564_v43 = vmul.bf16 %v6475_v56, %v8439_v31  ;;  %v1636_v34 = vrot.slane %v1628_v59, %v8769_v28  ;;  %v1624_v37 = vrot.slane %v1616_v50, %v8769_v28  ;;  %7086 = vmatprep.mubr.msk.bf16.mxu1 %vm9678_vm14, %v4682_v60  ;;  %v2699_v51 = vld [vmem:[#allocation5 + $0x28] sm:$0xff]  ;;  %vm9689_vm14 = vmmov %vm9638_vm0 }
 0x275   : > { %2643 = vst.msk [vmem:[#allocation6 + $0x30] sm:$0xff] %vm9679_vm6, %v2600_v63  ;;  %v4690_v41 = vor.u32 %v4689_v19, %v4686_v25  ;;  %v2761_v54 = vshrl.u32 %v2699_v51, 16  ;;  %v2764_v17 = vshll.u32 %v2699_v51, 16  ;;  %vm9690_vm6 = vmmov %vm9638_vm0 }
 0x276   : > { %v2601_v29 = vrot.slane %v2564_v43, 4  ;;  %v6459_v39 = vcombine.low %v1624_v37, %v1636_v34 }
 0x277   : > { %v1652_v14 = vpop.permute.xlu1 %1651  ;;  %v1640_v47 = vpop.permute.xlu0 %1639  ;;  %v4691_v62 = vsel %vm3468_vm15, %v4681_v61, %v4690_v41  ;;  %v2763_v35 = vrot.slane %v2761_v54, 3  ;;  %v2766_v12 = vrot.slane %v2764_v17, 4 }
 0x278   : > { %v2602_v30 = vsel %vm1369_vm10, %v2599_v22, %v2601_v29  ;;  %v1955_v26 = vmul.bf16 %v6459_v39, %v8439_v31  ;;  %v1660_v23 = vrot.slane %v1652_v14, %v8769_v28  ;;  %v1648_v52 = vrot.slane %v1640_v47, %v8769_v28  ;;  %7087 = vmatmul.mubr.msk.bf16.gmra.mrb[4].mxu1 %vm9680_vm7, %v4691_v62  ;;  %v2700_v33 = vld [vmem:[#allocation5 + $0x30] sm:$0xff]  ;;  %vm9691_vm7 = vmmov %vm9638_vm0 }
 0x279   : > { %2644 = vst.msk [vmem:[#allocation6 + $0x38] sm:$0xff] %vm9681_vm2, %v2602_v30  ;;  %v2767_v58 = vor.u32 %v2766_v12, %v2763_v35  ;;  %v2770_v40 = vshrl.u32 %v2700_v33, 16  ;;  %v2773_v21 = vshll.u32 %v2700_v33, 16  ;;  %vm9692_vm2 = vmmov %vm9638_vm0 }
 0x27a   : > { %v1992_v15 = vrot.slane %v1955_v26, 4  ;;  %v6460_v20 = vcombine.low %v1648_v52, %v1660_v23 }
 0x27b   : > { %v2261_v61 = vpop.permute.xlu1 %2260  ;;  %v2249_v46 = vpop.permute.xlu0 %2248  ;;  %v8907_v44 = vsel %vm2715_vm4, %v2758_v48, %v2767_v58  ;;  %v2772_v31 = vrot.slane %v2770_v40, 3  ;;  %v2775_v22 = vrot.slane %v2773_v21, 4 }
 0x27c   : > { %v1993_v56 = vsel %vm1369_vm10, %v1990_v55, %v1992_v15  ;;  %v1956_v59 = vmul.bf16 %v6460_v20, %v8441_v16  ;;  %v2269_v50 = vrot.slane %v2261_v61, %v8769_v28  ;;  %v2257_v60 = vrot.slane %v2249_v46, %v8769_v28  ;;  %6910 = vmatprep.mubr.msk.bf16.mxu0 %vm9682_vm9, %v8907_v44  ;;  %v4631_v25 = vld [vmem:[#allocation6 + $0x30] sm:$0xff]  ;;  %vm9693_vm9 = vmmov %vm9638_vm0 }
 0x27d   : > { %2035 = vst.msk [vmem:[#allocation5 + $0x38] sm:$0xff] %vm9683_vm11, %v1993_v56  ;;  %v2776_v19 = vor.u32 %v2775_v22, %v2772_v31  ;;  %v4693_v63 = vshrl.u32 %v4631_v25, 16  ;;  %v4696_v48 = vshll.u32 %v4631_v25, 16  ;;  %vm9694_vm11 = vmmov %vm9638_vm0 }
 0x27e   : > { %v1994_v43 = vrot.slane %v1956_v59, 4  ;;  %v6476_v34 = vcombine.low %v2257_v60, %v2269_v50 }
 0x27f   : > { %v2285_v37 = vpop.permute.xlu1 %2284  ;;  %v2273_v51 = vpop.permute.xlu0 %2272  ;;  %v8917_v55 = vsel %vm2715_vm4, %v2767_v58, %v2776_v19  ;;  %v4695_v54 = vrot.slane %v4693_v63, 4  ;;  %v4698_v17 = vrot.slane %v4696_v48, 5 }
 0x280   : > { %v1995_v39 = vsel %vm1369_vm10, %v1992_v15, %v1994_v43  ;;  %v2565_v14 = vmul.bf16 %v6476_v34, %v8441_v16  ;;  %v2293_v47 = vrot.slane %v2285_v37, %v8769_v28  ;;  %v2281_v62 = vrot.slane %v2273_v51, %v8769_v28  ;;  %6911 = vmatmul.mubr.msk.bf16.gmra.mrb[40].mxu0 %vm9684_vm12, %v8917_v55  ;;  %v4632_v35 = vld [vmem:[#allocation6 + $0x38] sm:$0xff]  ;;  %vm9695_vm12 = vmmov %vm9638_vm0 }
 0x281   : > { %2036 = vst.msk [vmem:[#allocation5 + $0x40] sm:$0xff] %vm9638_vm0, %v1995_v39  ;;  %v4699_v12 = vor.u32 %v4698_v17, %v4695_v54  ;;  %v4702_v30 = vshrl.u32 %v4632_v35, 16  ;;  %v4705_v26 = vshll.u32 %v4632_v35, 16 }
 0x282   : > { %v2603_v23 = vrot.slane %v2565_v14, 4  ;;  %v6477_v52 = vcombine.low %v2281_v62, %v2293_v47 }
 0x283   : > { %v1676_v33 = vpop.permute.xlu1 %1675  ;;  %v1664_v58 = vpop.permute.xlu0 %1663  ;;  %v4700_v40 = vsel %vm3468_vm15, %v4690_v41, %v4699_v12  ;;  %v4704_v16 = vrot.slane %v4702_v30, 4  ;;  %v4707_v21 = vrot.slane %v4705_v26, 5 }
 0x284   : > { %v2604_v15 = vsel %vm1369_vm10, %v2601_v29, %v2603_v23  ;;  %v2566_v20 = vmul.bf16 %v6477_v52, %v8443_v45  ;;  %v1684_v61 = vrot.slane %v1676_v33, %v8769_v28  ;;  %v1672_v46 = vrot.slane %v1664_v58, %v8769_v28  ;;  %7090 = vmatprep.mubr.msk.bf16.mxu1 %vm9685_vm3, %v4700_v40  ;;  %v2701_v31 = vld [vmem:[#allocation5 + $0x38] sm:$0xff]  ;;  %vm9696_vm3 = vmmov %vm9638_vm0 }
 0x285   : > { %2645 = vst.msk [vmem:[#allocation6 + $0x40] sm:$0xff] %vm9686_vm5, %v2604_v15  ;;  %v4708_v22 = vor.u32 %v4707_v21, %v4704_v16  ;;  %v2779_v56 = vshrl.u32 %v2701_v31, 16  ;;  %v2782_v59 = vshll.u32 %v2701_v31, 16  ;;  %vm9697_vm5 = vmmov %vm9638_vm0 }
 0x286   : > { %v2605_v50 = vrot.slane %v2566_v20, 4  ;;  %v6461_v41 = vcombine.low %v1672_v46, %v1684_v61 }
 0x287   : > { %v1700_v60 = vpop.permute.xlu1 %1699  ;;  %v1688_v25 = vpop.permute.xlu0 %1687  ;;  %v4709_v29 = vsel %vm3468_vm15, %v4699_v12, %v4708_v22  ;;  %v2781_v63 = vrot.slane %v2779_v56, 3  ;;  %v2784_v48 = vrot.slane %v2782_v59, 4 }
 0x288   : > { %v2606_v34 = vsel %vm1369_vm10, %v2603_v23, %v2605_v50  ;;  %v1957_v37 = vmul.bf16 %v6461_v41, %v8443_v45  ;;  %v1708_v51 = vrot.slane %v1700_v60, %v8769_v28  ;;  %v1696_v54 = vrot.slane %v1688_v25, %v8769_v28  ;;  %7091 = vmatmul.mubr.msk.bf16.gmra.mrb[8].mxu1 %vm9687_vm1, %v4709_v29  ;;  %v2702_v17 = vld [vmem:[#allocation5 + $0x40] sm:$0xff]  ;;  %vm9698_vm1 = vmmov %vm9638_vm0 }
 0x289   : > { %2646 = vst.msk [vmem:[#allocation6 + $0x48] sm:$0xff] %vm9688_vm13, %v2606_v34  ;;  %v2785_v39 = vor.u32 %v2784_v48, %v2781_v63  ;;  %v2788_v14 = vshrl.u32 %v2702_v17, 16  ;;  %v2791_v47 = vshll.u32 %v2702_v17, 16  ;;  %vm9699_vm13 = vmmov %vm9638_vm0 }
 0x28a   : > { %v1996_v62 = vrot.slane %v1957_v37, 4  ;;  %v6462_v35 = vcombine.low %v1696_v54, %v1708_v51 }
 0x28b   : > { %v2309_v12 = vpop.permute.xlu1 %2308  ;;  %v2297_v30 = vpop.permute.xlu0 %2296  ;;  %v8941_v26 = vsel %vm2715_vm4, %v2776_v19, %v2785_v39  ;;  %v2790_v45 = vrot.slane %v2788_v14, 3  ;;  %v2793_v23 = vrot.slane %v2791_v47, 4 }
 0x28c   : > { %v1997_v52 = vsel %vm1369_vm10, %v1994_v43, %v1996_v62  ;;  %v1958_v33 = vmul.bf16 %v6462_v35, %v8445_v38  ;;  %v2317_v58 = vrot.slane %v2309_v12, %v8769_v28  ;;  %v2305_v40 = vrot.slane %v2297_v30, %v8769_v28  ;;  %6914 = vmatprep.mubr.msk.bf16.mxu0 %vm9689_vm14, %v8941_v26  ;;  %v4633_v16 = vld [vmem:[#allocation6 + $0x40] sm:$0xff]  ;;  %vm9700_vm14 = vmmov %vm9638_vm0 }
 0x28d   : > { %2037 = vst.msk [vmem:[#allocation5 + $0x48] sm:$0xff] %vm9690_vm6, %v1997_v52  ;;  %v2794_v21 = vor.u32 %v2793_v23, %v2790_v45  ;;  %v4711_v15 = vshrl.u32 %v4633_v16, 16  ;;  %v4714_v19 = vshll.u32 %v4633_v16, 16  ;;  %vm9701_vm6 = vmmov %vm9638_vm0 }
 0x28e   : > { %v1998_v20 = vrot.slane %v1958_v33, 4  ;;  %v6478_v61 = vcombine.low %v2305_v40, %v2317_v58 }
 0x28f   : > { %v2333_v46 = vpop.permute.xlu1 %2332  ;;  %v2321_v31 = vpop.permute.xlu0 %2320  ;;  %v8951_v43 = vsel %vm2715_vm4, %v2785_v39, %v2794_v21  ;;  %v4713_v56 = vrot.slane %v4711_v15, 4  ;;  %v4716_v59 = vrot.slane %v4714_v19, 5 }
 0x290   : > { %v1999_v41 = vsel %vm1369_vm10, %v1996_v62, %v1998_v20  ;;  %v2567_v60 = vmul.bf16 %v6478_v61, %v8445_v38  ;;  %v2341_v25 = vrot.slane %v2333_v46, %v8769_v28  ;;  %v2329_v29 = vrot.slane %v2321_v31, %v8769_v28  ;;  %6915 = vmatmul.mubr.msk.bf16.gmra.mrb[44].mxu0 %vm9691_vm7, %v8951_v43  ;;  %v4634_v63 = vld [vmem:[#allocation6 + $0x48] sm:$0xff]  ;;  %vm9702_vm7 = vmmov %vm9638_vm0 }
 0x291   : > { %2038 = vst.msk [vmem:[#allocation5 + $0x50] sm:$0xff] %vm9692_vm2, %v1999_v41  ;;  %v4717_v48 = vor.u32 %v4716_v59, %v4713_v56  ;;  %v4720_v34 = vshrl.u32 %v4634_v63, 16  ;;  %v4723_v37 = vshll.u32 %v4634_v63, 16  ;;  %vm9703_vm2 = vmmov %vm9638_vm0 }
 0x292   : > { %v2607_v51 = vrot.slane %v2567_v60, 4  ;;  %v6479_v54 = vcombine.low %v2329_v29, %v2341_v25 }
 0x293   : > { %v1724_v17 = vpop.permute.xlu1 %1723  ;;  %v1712_v39 = vpop.permute.xlu0 %1711  ;;  %v4718_v14 = vsel %vm3468_vm15, %v4708_v22, %v4717_v48  ;;  %v4722_v38 = vrot.slane %v4720_v34, 4  ;;  %v4725_v47 = vrot.slane %v4723_v37, 5 }
 0x294   : > { %v2608_v62 = vsel %vm1369_vm10, %v2605_v50, %v2607_v51  ;;  %v2568_v35 = vmul.bf16 %v6479_v54, %v8447_v36  ;;  %v1732_v12 = vrot.slane %v1724_v17, %v8769_v28  ;;  %v1720_v30 = vrot.slane %v1712_v39, %v8769_v28  ;;  %7094 = vmatprep.mubr.msk.bf16.mxu1 %vm9693_vm9, %v4718_v14  ;;  %v2703_v45 = vld [vmem:[#allocation5 + $0x48] sm:$0xff]  ;;  %vm9704_vm9 = vmmov %vm9638_vm0 }
 0x295   : > { %2647 = vst.msk [vmem:[#allocation6 + $0x50] sm:$0xff] %vm9694_vm11, %v2608_v62  ;;  %v4726_v23 = vor.u32 %v4725_v47, %v4722_v38  ;;  %v2797_v52 = vshrl.u32 %v2703_v45, 16  ;;  %v2800_v33 = vshll.u32 %v2703_v45, 16  ;;  %vm9705_vm11 = vmmov %vm9638_vm0 }
 0x296   : > { %v2609_v58 = vrot.slane %v2568_v35, 4  ;;  %v6463_v22 = vcombine.low %v1720_v30, %v1732_v12 }
 0x297   : > { %v1748_v40 = vpop.permute.xlu1 %1747  ;;  %v1736_v16 = vpop.permute.xlu0 %1735  ;;  %v4727_v50 = vsel %vm3468_vm15, %v4717_v48, %v4726_v23  ;;  %v2799_v15 = vrot.slane %v2797_v52, 3  ;;  %v2802_v19 = vrot.slane %v2800_v33, 4 }
 0x298   : > { %v2610_v61 = vsel %vm1369_vm10, %v2607_v51, %v2609_v58  ;;  %v1959_v46 = vmul.bf16 %v6463_v22, %v8447_v36  ;;  %v1756_v31 = vrot.slane %v1748_v40, %v8769_v28  ;;  %v1744_v56 = vrot.slane %v1736_v16, %v8769_v28  ;;  %7095 = vmatmul.mubr.msk.bf16.gmra.mrb[12].mxu1 %vm9695_vm12, %v4727_v50  ;;  %v2704_v59 = vld [vmem:[#allocation5 + $0x50] sm:$0xff]  ;;  %vm9706_vm12 = vmmov %vm9638_vm0 }
 0x299   : > { %2648 = vst.msk [vmem:[#allocation6 + $0x58] sm:$0xff] %vm9638_vm0, %v2610_v61  ;;  %v2803_v41 = vor.u32 %v2802_v19, %v2799_v15  ;;  %v2806_v60 = vshrl.u32 %v2704_v59, 16  ;;  %v2809_v25 = vshll.u32 %v2704_v59, 16 }
 0x29a   : > { %v2000_v29 = vrot.slane %v1959_v46, 4  ;;  %v6464_v63 = vcombine.low %v1744_v56, %v1756_v31 }
 0x29b   : > { %v2357_v48 = vpop.permute.xlu1 %2356  ;;  %v2345_v34 = vpop.permute.xlu0 %2344  ;;  %v8975_v37 = vsel %vm2715_vm4, %v2794_v21, %v2803_v41  ;;  %v2808_v36 = vrot.slane %v2806_v60, 3  ;;  %v2811_v51 = vrot.slane %v2809_v25, 4 }
 0x29c   : > { %v2001_v54 = vsel %vm1369_vm10, %v1998_v20, %v2000_v29  ;;  %v1960_v17 = vmul.bf16 %v6464_v63, %v8449_v57  ;;  %v2365_v39 = vrot.slane %v2357_v48, %v8769_v28  ;;  %v2353_v14 = vrot.slane %v2345_v34, %v8769_v28  ;;  %6918 = vmatprep.mubr.msk.bf16.mxu0 %vm9696_vm3, %v8975_v37  ;;  %v4635_v38 = vld [vmem:[#allocation6 + $0x50] sm:$0xff]  ;;  %vm9707_vm3 = vmmov %vm9638_vm0 }
 0x29d   : > { %2039 = vst.msk [vmem:[#allocation5 + $0x58] sm:$0xff] %vm9697_vm5, %v2001_v54  ;;  %v2812_v47 = vor.u32 %v2811_v51, %v2808_v36  ;;  %v4729_v62 = vshrl.u32 %v4635_v38, 16  ;;  %v4732_v21 = vshll.u32 %v4635_v38, 16  ;;  %vm9708_vm5 = vmmov %vm9638_vm0 }
 0x29e   : > { %v2002_v35 = vrot.slane %v1960_v17, 4  ;;  %v6480_v12 = vcombine.low %v2353_v14, %v2365_v39 }
 0x29f   : > { %v2381_v30 = vpop.permute.xlu1 %2380  ;;  %v2369_v45 = vpop.permute.xlu0 %2368  ;;  %v8985_v20 = vsel %vm2715_vm4, %v2803_v41, %v2812_v47  ;;  %v4731_v52 = vrot.slane %v4729_v62, 4  ;;  %v4734_v33 = vrot.slane %v4732_v21, 5 }
 0x2a0   : > { %v2003_v22 = vsel %vm1369_vm10, %v2000_v29, %v2002_v35  ;;  %v2569_v40 = vmul.bf16 %v6480_v12, %v8449_v57  ;;  %v2389_v16 = vrot.slane %v2381_v30, %v8769_v28  ;;  %v2377_v50 = vrot.slane %v2369_v45, %v8769_v28  ;;  %6919 = vmatmul.mubr.msk.bf16.gmra.mrb[48].mxu0 %vm9698_vm1, %v8985_v20  ;;  %v4636_v15 = vld [vmem:[#allocation6 + $0x58] sm:$0xff]  ;;  %vm9709_vm1 = vmmov %vm9638_vm0 }
 0x2a1   : > { %2040 = vst.msk [vmem:[#allocation5 + $0x60] sm:$0xff] %vm9699_vm13, %v2003_v22  ;;  %v4735_v19 = vor.u32 %v4734_v33, %v4731_v52  ;;  %v4738_v61 = vshrl.u32 %v4636_v15, 16  ;;  %v4741_v46 = vshll.u32 %v4636_v15, 16  ;;  %vm9710_vm13 = vmmov %vm9638_vm0 }
 0x2a2   : > { %v2611_v31 = vrot.slane %v2569_v40, 4  ;;  %v6481_v56 = vcombine.low %v2377_v50, %v2389_v16 }
 0x2a3   : > { %v1772_v59 = vpop.permute.xlu1 %1771  ;;  %v1760_v41 = vpop.permute.xlu0 %1759  ;;  %v4736_v60 = vsel %vm3468_vm15, %v4726_v23, %v4735_v19  ;;  %v4740_v57 = vrot.slane %v4738_v61, 4  ;;  %v4743_v25 = vrot.slane %v4741_v46, 5 }
 0x2a4   : > { %v2612_v29 = vsel %vm1369_vm10, %v2609_v58, %v2611_v31  ;;  %v2570_v63 = vmul.bf16 %v6481_v56, %v8451_v27  ;;  %v1780_v48 = vrot.slane %v1772_v59, %v8769_v28  ;;  %v1768_v34 = vrot.slane %v1760_v41, %v8769_v28  ;;  %7098 = vmatprep.mubr.msk.bf16.mxu1 %vm9700_vm14, %v4736_v60  ;;  %v2705_v36 = vld [vmem:[#allocation5 + $0x58] sm:$0xff]  ;;  %vm9711_vm14 = vmmov %vm9638_vm0 }
 0x2a5   : > { %2649 = vst.msk [vmem:[#allocation6 + $0x60] sm:$0xff] %vm9701_vm6, %v2612_v29  ;;  %v9001_v51 = vor.u32 %v4743_v25, %v4740_v57  ;;  %v2815_v54 = vshrl.u32 %v2705_v36, 16  ;;  %v2818_v17 = vshll.u32 %v2705_v36, 16  ;;  %vm9712_vm6 = vmmov %vm9638_vm0 }
 0x2a6   : > { %v2613_v23 = vrot.slane %v2570_v63, 4  ;;  %v6465_v39 = vcombine.low %v1768_v34, %v1780_v48 }
 0x2a7   : > { %v1796_v14 = vpop.permute.xlu1 %1795  ;;  %v1784_v38 = vpop.permute.xlu0 %1783  ;;  %v4745_v58 = vsel %vm3468_vm15, %v4735_v19, %v9001_v51  ;;  %v2817_v62 = vrot.slane %v2815_v54, 3  ;;  %v2820_v21 = vrot.slane %v2818_v17, 4 }
 0x2a8   : > { %v2614_v12 = vsel %vm1369_vm10, %v2611_v31, %v2613_v23  ;;  %v1961_v30 = vmul.bf16 %v6465_v39, %v8451_v27  ;;  %v1804_v45 = vrot.slane %v1796_v14, %v8769_v28  ;;  %v1792_v52 = vrot.slane %v1784_v38, %v8769_v28  ;;  %7099 = vmatmul.mubr.msk.bf16.gmra.mrb[16].mxu1 %vm9702_vm7, %v4745_v58  ;;  %v2706_v33 = vld [vmem:[#allocation5 + $0x60] sm:$0xff]  ;;  %vm9713_vm7 = vmmov %vm9638_vm0 }
 0x2a9   : > { %2650 = vst.msk [vmem:[#allocation6 + $0x68] sm:$0xff] %vm9703_vm2, %v2614_v12  ;;  %v2821_v22 = vor.u32 %v2820_v21, %v2817_v62  ;;  %v2824_v40 = vshrl.u32 %v2706_v33, 16  ;;  %v2827_v16 = vshll.u32 %v2706_v33, 16  ;;  %vm9714_vm2 = vmmov %vm9638_vm0 }
 0x2aa   : > { %v2004_v50 = vrot.slane %v1961_v30, 4  ;;  %v6466_v15 = vcombine.low %v1792_v52, %v1804_v45 }
 0x2ab   : > { %v2405_v19 = vpop.permute.xlu1 %2404  ;;  %v2393_v61 = vpop.permute.xlu0 %2392  ;;  %v9012_v46 = vsel %vm2715_vm4, %v2812_v47, %v2821_v22  ;;  %v2826_v27 = vrot.slane %v2824_v40, 3  ;;  %v2829_v31 = vrot.slane %v2827_v16, 4 }
 0x2ac   : > { %v2005_v56 = vsel %vm1369_vm10, %v2002_v35, %v2004_v50  ;;  %v1962_v59 = vmul.bf16 %v6466_v15, %v8453_v13  ;;  %v2413_v41 = vrot.slane %v2405_v19, %v8769_v28  ;;  %v2401_v60 = vrot.slane %v2393_v61, %v8769_v28  ;;  %6922 = vmatprep.mubr.msk.bf16.mxu0 %vm9704_vm9, %v9012_v46  ;;  %v4637_v57 = vld [vmem:[#allocation6 + $0x60] sm:$0xff]  ;;  %vm9715_vm9 = vmmov %vm9638_vm0 }
 0x2ad   : > { %2041 = vst.msk [vmem:[#allocation5 + $0x68] sm:$0xff] %vm9705_vm11, %v2005_v56  ;;  %v2830_v25 = vor.u32 %v2829_v31, %v2826_v27  ;;  %v4747_v29 = vshrl.u32 %v4637_v57, 16  ;;  %v4750_v47 = vshll.u32 %v4637_v57, 16  ;;  %vm9716_vm11 = vmmov %vm9638_vm0 }
 0x2ae   : > { %v2006_v63 = vrot.slane %v1962_v59, 4  ;;  %v6482_v48 = vcombine.low %v2401_v60, %v2413_v41 }
 0x2af   : > { %v2429_v34 = vpop.permute.xlu1 %2428  ;;  %v2417_v36 = vpop.permute.xlu0 %2416  ;;  %v9022_v35 = vsel %vm2715_vm4, %v2821_v22, %v2830_v25  ;;  %v4749_v54 = vrot.slane %v4747_v29, 4  ;;  %v4752_v17 = vrot.slane %v4750_v47, 5 }
 0x2b0   : > { %v2007_v39 = vsel %vm1369_vm10, %v2004_v50, %v2006_v63  ;;  %v2571_v14 = vmul.bf16 %v6482_v48, %v8453_v13  ;;  %v2437_v38 = vrot.slane %v2429_v34, %v8769_v28  ;;  %v2425_v58 = vrot.slane %v2417_v36, %v8769_v28  ;;  %6923 = vmatmul.mubr.msk.bf16.gmra.mrb[52].mxu0 %vm9706_vm12, %v9022_v35  ;;  %v4638_v62 = vld [vmem:[#allocation6 + $0x68] sm:$0xff]  ;;  %vm9718_vm12 = vmmov %vm9638_vm0 }
 0x2b1   : > { %2042 = vst.msk [vmem:[#allocation5 + $0x70] sm:$0xff] %vm9638_vm0, %v2007_v39  ;;  %v4753_v21 = vor.u32 %v4752_v17, %v4749_v54  ;;  %v4756_v12 = vshrl.u32 %v4638_v62, 16  ;;  %v4759_v30 = vshll.u32 %v4638_v62, 16 }
 0x2b2   : > { %v2615_v45 = vrot.slane %v2571_v14, 4  ;;  %v6483_v52 = vcombine.low %v2425_v58, %v2437_v38 }
 0x2b3   : > { %v1820_v33 = vpop.permute.xlu1 %1819  ;;  %v1808_v22 = vpop.permute.xlu0 %1807  ;;  %v9033_v13 = vsel %vm3468_vm15, %v9001_v51, %v4753_v21  ;;  %v4758_v40 = vrot.slane %v4756_v12, 4  ;;  %v4761_v16 = vrot.slane %v4759_v30, 5 }
 0x2b4   : > { %v2616_v50 = vsel %vm1369_vm10, %v2613_v23, %v2615_v45  ;;  %v2572_v15 = vmul.bf16 %v6483_v52, %v8455_v49  ;;  %v1828_v19 = vrot.slane %v1820_v33, %v8769_v28  ;;  %v1816_v61 = vrot.slane %v1808_v22, %v8769_v28  ;;  %7102 = vmatprep.mubr.msk.bf16.mxu1 %vm9707_vm3, %v9033_v13  ;;  %v2707_v27 = vld [vmem:[#allocation5 + $0x68] sm:$0xff]  ;;  %vm9719_vm3 = vmmov %vm9638_vm0 }
 0x2b5   : > { %2651 = vst.msk [vmem:[#allocation6 + $0x70] sm:$0xff] %vm9708_vm5, %v2616_v50  ;;  %v4762_v31 = vor.u32 %v4761_v16, %v4758_v40  ;;  %v2833_v56 = vshrl.u32 %v2707_v27, 16  ;;  %v2836_v59 = vshll.u32 %v2707_v27, 16  ;;  %vm9720_vm5 = vmmov %vm9638_vm0 }
 0x2b6   : > { %v2617_v41 = vrot.slane %v2572_v15, 4  ;;  %v6467_v60 = vcombine.low %v1816_v61, %v1828_v19 }
 0x2b7   : > { %v1844_v57 = vpop.permute.xlu1 %1843  ;;  %v1832_v29 = vpop.permute.xlu0 %1831  ;;  %v9043_v23 = vsel %vm3468_vm15, %v4753_v21, %v4762_v31  ;;  %v2835_v47 = vrot.slane %v2833_v56, 3  ;;  %v2838_v48 = vrot.slane %v2836_v59, 4 }
 0x2b8   : > { %v2618_v34 = vsel %vm1369_vm10, %v2615_v45, %v2617_v41  ;;  %v1963_v36 = vmul.bf16 %v6467_v60, %v8455_v49  ;;  %v1852_v54 = vrot.slane %v1844_v57, %v8769_v28  ;;  %v1840_v17 = vrot.slane %v1832_v29, %v8769_v28  ;;  %7103 = vmatmul.mubr.msk.bf16.gmra.mrb[20].mxu1 %vm9709_vm1, %v9043_v23  ;;  %v2708_v39 = vld [vmem:[#allocation5 + $0x70] sm:$0xff]  ;;  %vm9721_vm1 = vmmov %vm9638_vm0 }
 0x2b9   : > { %2652 = vst.msk [vmem:[#allocation6 + $0x78] sm:$0xff] %vm9710_vm13, %v2618_v34  ;;  %v2839_v14 = vor.u32 %v2838_v48, %v2835_v47  ;;  %v2842_v38 = vshrl.u32 %v2708_v39, 16  ;;  %v2845_v58 = vshll.u32 %v2708_v39, 16  ;;  %vm9722_vm13 = vmmov %vm9638_vm0 }
 0x2ba   : > { %v2008_v62 = vrot.slane %v1963_v36, 4  ;;  %v6468_v21 = vcombine.low %v1840_v17, %v1852_v54 }
 0x2bb   : > { %v2453_v12 = vpop.permute.xlu1 %2452  ;;  %v2441_v30 = vpop.permute.xlu0 %2440  ;;  %v9053_v45 = vsel %vm2715_vm4, %v2830_v25, %v2839_v14  ;;  %v2844_v49 = vrot.slane %v2842_v38, 3  ;;  %v2847_v52 = vrot.slane %v2845_v58, 4 }
 0x2bc   : > { %v2009_v33 = vsel %vm1369_vm10, %v2006_v63, %v2008_v62  ;;  %v1964_v22 = vmul.bf16 %v6468_v21, %v8457_v18  ;;  %v2461_v40 = vrot.slane %v2453_v12, %v8769_v28  ;;  %v2449_v16 = vrot.slane %v2441_v30, %v8769_v28  ;;  %6926 = vmatprep.mubr.msk.bf16.mxu0 %vm9711_vm14, %v9053_v45  ;;  %v4639_v50 = vld [vmem:[#allocation6 + $0x70] sm:$0xff]  ;;  %v3122_v30 = vld [vmem:[#allocation4 + $0x8] sm:$0xff]  ;;  %vm9723_vm14 = vmmov %vm9638_vm0 }
 0x2bd   : > { %2043 = vst.msk [vmem:[#allocation5 + $0x78] sm:$0xff] %vm9712_vm6, %v2009_v33  ;;  %v2848_v15 = vor.u32 %v2847_v52, %v2844_v49  ;;  %v4765_v19 = vshrl.u32 %v4639_v50, 16  ;;  %v4768_v25 = vshll.u32 %v4639_v50, 16  ;;  %v3161_v50 = vrot.slane %v3122_v30, 4  ;;  %vm9724_vm6 = vmmov %vm9638_vm0 }
 0x2be   : > { %v2010_v61 = vrot.slane %v1964_v22, 4  ;;  %v6484_v27 = vcombine.low %v2449_v16, %v2461_v40 }
 0x2bf   : > { %v9063_v56 = vsel %vm2715_vm4, %v2839_v14, %v2848_v15  ;;  %v4767_v63 = vrot.slane %v4765_v19, 4  ;;  %v4770_v59 = vrot.slane %v4768_v25, 5 }
 0x2c0   : > { %v2011_v60 = vsel %vm1369_vm10, %v2008_v62, %v2010_v61  ;;  %2045 = vst.msk [vmem:[#allocation5 + $0x88] sm:$0xf] %vm1435_vm8, %v2010_v61  ;;  %v2573_v28 = vmul.bf16 %v6484_v27, %v8457_v18  ;;  %6927 = vmatmul.mubr.msk.bf16.gmra.mrb[56].mxu0 %vm9713_vm7, %v9063_v56  ;;  %v4640_v57 = vld [vmem:[#allocation6 + $0x78] sm:$0xff]  ;;  %vm9725_vm7 = vmmov %vm9638_vm0 }
 0x2c1   : > { %2044 = vst.msk [vmem:[#allocation5 + $0x80] sm:$0xff] %vm9714_vm2, %v2011_v60  ;;  %v4771_v29 = vor.u32 %v4770_v59, %v4767_v63  ;;  %v4774_v47 = vshrl.u32 %v4640_v57, 16  ;;  %v4777_v48 = vshll.u32 %v4640_v57, 16  ;;  %v5053_v62 = vld [vmem:[#allocation5 + $0x10] sm:$0xf8]  ;;  %vm9726_vm2 = vmmov %vm9638_vm0 }
 0x2c2   : > { %v2619_v34 = vrot.slane %v2573_v28, 4  ;;  %v5076_v40 = vshrl.u32 %v5053_v62, 16  ;;  %v5079_v63 = vshll.u32 %v5053_v62, 16  ;;  %v3124_v62 = vld [vmem:[#allocation4 + $0x18] sm:$0xff] }
 0x2c3   : > { %v9072_v36 = vsel %vm3468_vm15, %v4762_v31, %v4771_v29  ;;  %v4776_v54 = vrot.slane %v4774_v47, 4  ;;  %v4779_v17 = vrot.slane %v4777_v48, 5  ;;  %v9100_v30 = vrot.slane %v3124_v62, 4  ;;  %v3133_v62 = vld [vmem:[#allocation4 + $0x60] sm:$0xff] }
 0x2c4   : > { %v2620_v39 = vsel %vm1369_vm10, %v2617_v41, %v2619_v34  ;;  %2654 = vst.msk [vmem:[#allocation6 + $0x88] sm:$0xf] %vm1435_vm8, %v2619_v34  ;;  %7106 = vmatprep.mubr.msk.bf16.mxu1 %vm9715_vm9, %v9072_v36  ;;  %v2709_v18 = vld [vmem:[#allocation5 + $0x78] sm:$0xff]  ;;  %v3121_v41 = vld [vmem:[#allocation4] sm:$0xf0]  ;;  %vm9717_vm8 = vmmov %vm9638_vm0 }
 0x2c5   : > { %2653 = vst.msk [vmem:[#allocation6 + $0x80] sm:$0xff] %vm9716_vm11, %v2620_v39  ;;  %v9079_v14 = vor.u32 %v4779_v17, %v4776_v54  ;;  %v2851_v38 = vshrl.u32 %v2709_v18, 16  ;;  %v2854_v58 = vshll.u32 %v2709_v18, 16  ;;  %v3160_v16 = vrot.slane %v3121_v41, 4  ;;  %vm9727_vm9 = vmmov %vm9638_vm0 }
 0x2c6   : > { %v5078_v54 = vrot.slane %v5076_v40, 3  ;;  %vm9728_vm11 = vmmov %vm9638_vm0 }
 0x2c7   : > { %v9083_v31 = vsel %vm3468_vm15, %v4771_v29, %v9079_v14  ;;  %v2853_v21 = vrot.slane %v2851_v38, 3  ;;  %v2856_v12 = vrot.slane %v2854_v58, 4  ;;  %v3162_v17 = vsel %vm1369_vm10, %v3160_v16, %v3161_v50 }
 0x2c8   : > { %7107 = vmatmul.mubr.msk.bf16.gmra.mrb[24].mxu1 %vm9717_vm8, %v9083_v31  ;;  %v2710_v49 = vld [vmem:[#allocation5 + $0x80] sm:$0xf]  ;;  %v5081_v58 = vrot.slane %v5079_v63, 4  ;;  %v3126_v63 = vld [vmem:[#allocation4 + $0x28] sm:$0xff]  ;;  %vm9729_vm8 = vmmov %vm9638_vm0 }
 0x2c9   : > { %v9087_v52 = vor.u32 %v2856_v12, %v2853_v21  ;;  %v2860_v33 = vshrl.u32 %v2710_v49, 16  ;;  %v2863_v22 = vshll.u32 %v2710_v49, 16 }
 0x2cb   : > { %v9091_v19 = vsel %vm2715_vm4, %v2848_v15, %v9087_v52  ;;  %v2862_v25 = vrot.slane %v2860_v33, 3  ;;  %v2865_v61 = vrot.slane %v2863_v22, 4  ;;  %v4642_v27 = vld [vmem:[#allocation6 + $0x88] sm:$0x1f]  ;;  %v3123_v15 = vld [vmem:[#allocation4 + $0x10] sm:$0xff]  ;;  %v5082_v22 = vor.u32 %v5081_v58, %v5078_v54  ;;  %v3130_v54 = vld [vmem:[#allocation4 + $0x48] sm:$0xff] }
 0x2cc   : > { %6930 = vmatprep.mubr.msk.bf16.mxu0 %vm9718_vm12, %v9091_v19  ;;  %v4641_v59 = vld [vmem:[#allocation6 + $0x80] sm:$0xff]  ;;  %v4792_v60 = vshrl.u32 %v4642_v27, 16  ;;  %v4795_v28 = vshll.u32 %v4642_v27, 16  ;;  %v3163_v41 = vrot.slane %v3123_v15, 4  ;;  %v7570_v27 = vld [vmem:[%s9563_s5 + $0x28] sm:$0xff]   ;;  %vm9730_vm12 = vmmov %vm9638_vm0  ;;  %v3177_v15 = vrot.slane %v3130_v54, 4 }
 0x2cd   : > { %v2866_v57 = vor.u32 %v2865_v61, %v2862_v25  ;;  %v4783_v29 = vshrl.u32 %v4641_v59, 16  ;;  %v4786_v47 = vshll.u32 %v4641_v59, 16  ;;  %v5091_v40 = vsel %vm2715_vm4, %v5082_v22, %v8860_v53  ;;  %v3125_v61 = vld [vmem:[#allocation4 + $0x20] sm:$0xff] }
 0x2ce   : > { %v4794_v48 = vrot.slane %v4792_v60, 4  ;;  %v4797_v34 = vrot.slane %v4795_v28, 5  ;;  %v3164_v16 = vsel %vm1369_vm10, %v3161_v50, %v3163_v41  ;;  %v3166_v25 = vsel %vm1369_vm10, %v3163_v41, %v9100_v30  ;;  %v7571_v50 = vld [vmem:[%s9563_s5 + $0x78] sm:$0xff]   ;;  %v9125_v60 = vld [vmem:[%s9563_s5 + $0x30] sm:$0xff]   ;;  %v5068_v22 = vld [vmem:[#allocation5 + $0x88] sm:$0xff] }
 0x2cf   : > { %v2867_v39 = vsel %vm2715_vm4, %v9087_v52, %v2866_v57  ;;  %v4785_v18 = vrot.slane %v4783_v29, 4  ;;  %v4788_v38 = vrot.slane %v4786_v47, 5  ;;  %v3167_v53 = vrot.slane %v3125_v61, 4  ;;  %v3127_v57 = vld [vmem:[#allocation4 + $0x30] sm:$0xff]  ;;  %v3128_v29 = vld [vmem:[#allocation4 + $0x38] sm:$0xff] }
 0x2d0   : > { %6931 = vmatmul.mubr.msk.bf16.gmra.mrb[60].mxu0 %vm9638_vm0, %v2867_v39  ;;  %v4798_v21 = vor.u32 %v4797_v34, %v4794_v48  ;;  %v3169_v59 = vrot.slane %v3126_v63, 4  ;;  %v3129_v34 = vld [vmem:[#allocation4 + $0x40] sm:$0xff]  ;;  %v3131_v39 = vld [vmem:[#allocation4 + $0x50] sm:$0xff]  ;;  %v5210_v63 = vshrl.u32 %v5068_v22, 16 }
 0x2d1   : > { %v4789_v12 = vor.u32 %v4788_v38, %v4785_v18  ;;  %6938 = vmatprep.mubr.msk.bf16.mxu0 %vm9719_vm3, %v3162_v17  ;;  %vm9731_vm3 = vmmov %vm9638_vm0  ;;  %v3175_v17 = vrot.slane %v3129_v34, 4  ;;  %v3132_v18 = vld [vmem:[#allocation4 + $0x58] sm:$0xff]  ;;  %v3179_v38 = vrot.slane %v3131_v39, 4  ;;  %v5069_v34 = vld [vmem:[#allocation5 + $0x90] sm:$0xf] }
 0x2d2   : > { %v9137_v28 = vsel %vm1369_vm10, %v3167_v53, %v3169_v59  ;;  %v3181_v58 = vrot.slane %v3132_v18, 4  ;;  %v3137_v18 = vld [vmem:[#allocation4 + $0x80] sm:$0xf] }
 0x2d3   : > { %v4790_v49 = vsel %vm3468_vm15, %v9079_v14, %v4789_v12  ;;  %v4799_v33 = vsel %vm3468_vm15, %v4789_v12, %v4798_v21  ;;  %v3134_v21 = vld [vmem:[#allocation4 + $0x68] sm:$0xff]  ;;  %v3183_v12 = vrot.slane %v3133_v62, 4 }
 0x2d4   : > { %7110 = vmatprep.mubr.msk.bf16.mxu1 %vm9720_vm5, %v4790_v49  ;;  %vm9732_vm5 = vmmov %vm9638_vm0  ;;  %v3185_v41 = vrot.slane %v3134_v21, 4 }
 0x2d5   : > { %7111 = vmatmul.mubr.msk.bf16.gmra.mrb[28].mxu1 %vm9721_vm1, %v4799_v33  ;;  %vm9733_vm1 = vmmov %vm9638_vm0  ;;  %v3135_v33 = vld [vmem:[#allocation4 + $0x70] sm:$0xff] }
 0x2d6   : > { %7118 = vmatprep.mubr.msk.bf16.mxu1 %vm9722_vm13, %v5091_v40  ;;  %vm9734_vm13 = vmmov %vm9638_vm0  ;;  %v9200_v49 = vsel %vm1369_vm10, %v3183_v12, %v3185_v41  ;;  %v3136_v40 = vld [vmem:[#allocation4 + $0x78] sm:$0xff] }
 0x2d8   : > { %6939 = vmatmul.mubr.msk.bf16.vlgmr.msra.gmra.mrb[32].mxu0 %vm9723_vm14, %v3164_v16  ;;  %vm9735_vm14 = vmmov %vm9638_vm0  ;;  %v3446_v16 = vld [vmem:[#allocation6] sm:$0xf0] }
 0x2d9   : > { %6971 = vmatpush3.bf16.msra.mxu0 %v8827_v24  ;;  %6942 = vmatprep.mubr.msk.bf16.mxu0 %vm9724_vm6, %v3166_v25  ;;  %v9131_v24 = vsel %vm1369_vm10, %v9100_v30, %v3167_v53  ;;  %vm9736_vm6 = vmmov %vm9638_vm0  ;;  %v5213_v53 = vshll.u32 %v5068_v22, 16  ;;  %v3449_v22 = vld [vmem:[#allocation6 + $0x18] sm:$0xff] }
 0x2da   : > { %6972 = vmatprep.subr.bf16.mxu0 %v7570_v27 }
 0x2dd   : > { %7119 = vmatmul.mubr.msk.bf16.vlgmr.msra.gmra.mrb[0].mxu1 %vm9725_vm7, %v8881_v32  ;;  %6973 = vmatpush3.bf16.msra.mxu0 %v7570_v27  ;;  %v9143_v32 = vld [vmem:[%s9563_s5 + $0x80] sm:$0xff]   ;;  %vm9737_vm7 = vmmov %vm9638_vm0  ;;  %v3187_v27 = vrot.slane %v3135_v33, 4 }
 0x2de   : > { %7151 = vmatpush3.bf16.msra.mxu1 %v8866_v42  ;;  %7122 = vmatprep.mubr.msk.bf16.mxu1 %vm9726_vm2, %v8907_v44  ;;  %v3171_v42 = vrot.slane %v3127_v57, 4  ;;  %v3173_v44 = vrot.slane %v3128_v29, 4  ;;  %vm9738_vm2 = vmmov %vm9638_vm0 }
 0x2df   : > { %7152 = vmatprep.subr.bf16.mxu1 %v7571_v50  ;;  %7006 = vmatprep.subr.bf16.mxu0 %v9125_v60  ;;  %v9211_v54 = vsel %vm1369_vm10, %v3185_v41, %v3187_v27  ;;  %v5222_v41 = vshll.u32 %v5069_v34, 16 }
 0x2e0   : > { %6943 = vmatmul.mubr.msk.bf16.gmra.mrb[36].mxu0 %vm9727_vm9, %v9131_v24  ;;  %v9153_v47 = vsel %vm1369_vm10, %v3169_v59, %v3171_v42  ;;  %v9158_v48 = vsel %vm1369_vm10, %v3171_v42, %v3173_v44  ;;  %vm9739_vm9 = vmmov %vm9638_vm0  ;;  %v3470_v59 = vshrl.u32 %v3446_v16, 16 }
 0x2e1   : > { %6946 = vmatprep.mubr.msk.bf16.mxu0 %vm9728_vm11, %v9137_v28  ;;  %vm9740_vm11 = vmmov %vm9638_vm0 }
 0x2e2   : > { %7153 = vmatpush3.bf16.msra.mxu1 %v7571_v50  ;;  %v3473_v50 = vshll.u32 %v3446_v16, 16 }
 0x2e3   : > { %7186 = vmatprep.subr.bf16.mxu1 %v9143_v32 }
 0x2e5   : > { %7123 = vmatmul.mubr.msk.bf16.gmra.mrb[4].mxu1 %vm9729_vm8, %v8917_v55  ;;  %v9167_v55 = vsel %vm1369_vm10, %v3173_v44, %v3175_v17  ;;  %vm9741_vm8 = vmmov %vm9638_vm0 }
 0x2e6   : > { %7126 = vmatprep.mubr.msk.bf16.mxu1 %vm9730_vm12, %v8941_v26  ;;  %v9172_v26 = vsel %vm1369_vm10, %v3175_v17, %v3177_v15  ;;  %vm9742_vm12 = vmmov %vm9638_vm0  ;;  %v5212_v17 = vrot.slane %v5210_v63, 3  ;;  %v5224_v63 = vrot.slane %v5222_v41, 4 }
 0x2e8   : > { %6947 = vmatmul.mubr.msk.bf16.gmra.mrb[40].mxu0 %vm9638_vm0, %v9153_v47 }
 0x2e9   : > { %6950 = vmatprep.mubr.msk.bf16.mxu0 %vm9731_vm3, %v9158_v48  ;;  %vm9743_vm3 = vmmov %vm9638_vm0 }
 0x2ed   : > { %7127 = vmatmul.mubr.msk.bf16.gmra.mrb[8].mxu1 %vm9732_vm5, %v8951_v43  ;;  %v9181_v43 = vsel %vm1369_vm10, %v3177_v15, %v3179_v38  ;;  %v5215_v15 = vrot.slane %v5213_v53, 4  ;;  %vm9744_vm5 = vmmov %vm9638_vm0  ;;  %v3496_v53 = vshrl.u32 %v3449_v22, 16 }
 0x2ee   : > { %7130 = vmatprep.mubr.msk.bf16.mxu1 %vm9733_vm1, %v8975_v37  ;;  %v9186_v37 = vsel %vm1369_vm10, %v3179_v38, %v3181_v58  ;;  %v3472_v38 = vrot.slane %v3470_v59, 4  ;;  %vm9745_vm1 = vmmov %vm9638_vm0  ;;  %v3499_v59 = vshll.u32 %v3449_v22, 16 }
 0x2ef   : > { %v5216_v33 = vor.u32 %v5215_v15, %v5212_v17  ;;  %v3498_v15 = vrot.slane %v3496_v53, 4  ;;  %v3452_v53 = vld [vmem:[#allocation6 + $0x30] sm:$0xff] }
 0x2f0   : > { %6951 = vmatmul.mubr.msk.bf16.gmra.mrb[44].mxu0 %vm9734_vm13, %v9167_v55  ;;  %vm9746_vm13 = vmmov %vm9638_vm0 }
 0x2f1   : > { %6954 = vmatprep.mubr.msk.bf16.mxu0 %vm9735_vm14, %v9172_v26  ;;  %vm9747_vm14 = vmmov %vm9638_vm0 }
 0x2f5   : > { %7131 = vmatmul.mubr.msk.bf16.gmra.mrb[12].mxu1 %vm9736_vm6, %v8985_v20  ;;  %v9195_v20 = vsel %vm1369_vm10, %v3181_v58, %v3183_v12  ;;  %v3475_v58 = vrot.slane %v3473_v50, 5  ;;  %v5219_v12 = vshrl.u32 %v5069_v34, 16  ;;  %v5480_v50 = vld [vmem:[#allocation4 + $0x10] sm:$0xf0]  ;;  %vm9748_vm6 = vmmov %vm9638_vm0 }
 0x2f6   : > { %7134 = vmatprep.mubr.msk.bf16.mxu1 %vm9737_vm7, %v9012_v46  ;;  %v5067_v46 = vld [vmem:[#allocation5 + $0x80] sm:$0xff]  ;;  %v5519_v34 = vrot.slane %v5480_v50, 4  ;;  %vm9749_vm7 = vmmov %vm9638_vm0 }
 0x2f7   : > { %v5201_v25 = vshrl.u32 %v5067_v46, 16  ;;  %v5204_v61 = vshll.u32 %v5067_v46, 16  ;;  %v3448_v46 = vld [vmem:[#allocation6 + $0x10] sm:$0xff] }
 0x2f8   : > { %6955 = vmatmul.mubr.msk.bf16.gmra.mrb[48].mxu0 %vm9738_vm2, %v9181_v43  ;;  %vm9750_vm2 = vmmov %vm9638_vm0 }
 0x2f9   : > { %6958 = vmatprep.mubr.msk.bf16.mxu0 %vm9739_vm9, %v9186_v37  ;;  %v5203_v42 = vrot.slane %v5201_v25, 3  ;;  %v5206_v44 = vrot.slane %v5204_v61, 4  ;;  %v5221_v25 = vrot.slane %v5219_v12, 3  ;;  %v3487_v61 = vshrl.u32 %v3448_v46, 16  ;;  %vm9751_vm9 = vmmov %vm9638_vm0 }
 0x2fb   : > { %v5225_v17 = vor.u32 %v5224_v63, %v5221_v25 }
 0x2fd   : > { %7135 = vmatmul.mubr.msk.bf16.gmra.mrb[16].mxu1 %vm9740_vm11, %v9022_v35  ;;  %v3447_v35 = vld [vmem:[#allocation6 + $0x8] sm:$0xff]  ;;  %vm9752_vm11 = vmmov %vm9638_vm0 }
 0x2fe   : > { %7138 = vmatprep.mubr.msk.bf16.mxu1 %vm9741_vm8, %v9053_v45  ;;  %v9206_v45 = vrot.slane %v3136_v40, 4  ;;  %v3478_v57 = vshrl.u32 %v3447_v35, 16  ;;  %v3481_v29 = vshll.u32 %v3447_v35, 16  ;;  %v3476_v40 = vor.u32 %v3475_v58, %v3472_v38  ;;  %v3450_v38 = vld [vmem:[#allocation6 + $0x20] sm:$0xff]  ;;  %v3451_v58 = vld [vmem:[#allocation6 + $0x28] sm:$0xff]  ;;  %vm9753_vm8 = vmmov %vm9638_vm0 }
 0x2ff   : > { %v3490_v35 = vshll.u32 %v3448_v46, 16  ;;  %v3505_v12 = vshrl.u32 %v3450_v38, 16  ;;  %v3508_v41 = vshll.u32 %v3450_v38, 16  ;;  %v5226_v46 = vsel %vm2715_vm4, %v5216_v33, %v5225_v17  ;;  %v3454_v38 = vld [vmem:[#allocation6 + $0x40] sm:$0xff] }
 0x300   : > { %6959 = vmatmul.mubr.msk.bf16.gmra.mrb[52].mxu0 %vm9742_vm12, %v9195_v20  ;;  %v9217_v39 = vsel %vm1369_vm10, %v3187_v27, %v9206_v45  ;;  %v3480_v62 = vrot.slane %v3478_v57, 4  ;;  %v3483_v21 = vrot.slane %v3481_v29, 5  ;;  %v3514_v22 = vshrl.u32 %v3451_v58, 16  ;;  %vm9754_vm12 = vmmov %vm9638_vm0 }
 0x301   : > { %6962 = vmatprep.mubr.msk.bf16.mxu0 %vm9638_vm0, %v9200_v49 }
 0x302   : > { %v3484_v16 = vor.u32 %v3483_v21, %v3480_v62  ;;  %v5521_v21 = vsel %vm1369_vm10, %v5519_v34, %v9100_v30  ;;  %v3510_v30 = vrot.slane %v3508_v41, 5 }
 0x305   : > { %7139 = vmatmul.mubr.msk.bf16.gmra.mrb[20].mxu1 %vm9743_vm3, %v9063_v56  ;;  %v9221_v56 = vor.u32 %v5206_v44, %v5203_v42  ;;  %v3489_v42 = vrot.slane %v3487_v61, 4  ;;  %v3492_v44 = vrot.slane %v3490_v35, 5  ;;  %v3517_v61 = vshll.u32 %v3451_v58, 16  ;;  %vm9755_vm3 = vmmov %vm9638_vm0 }
 0x306   : > { %7142 = vmatprep.mubr.msk.bf16.mxu1 %vm9744_vm5, %v9091_v19  ;;  %v3191_v19 = vrot.slane %v3137_v18, 4  ;;  %v3501_v18 = vrot.slane %v3499_v59, 5  ;;  %v3507_v35 = vrot.slane %v3505_v12, 4  ;;  %v3453_v59 = vld [vmem:[#allocation6 + $0x38] sm:$0xff]  ;;  %vm9756_vm5 = vmmov %vm9638_vm0  ;;  %v3541_v58 = vshrl.u32 %v3454_v38, 16 }
 0x307   : > { %v5208_v27 = vsel %vm2715_vm4, %v9087_v52, %v9221_v56  ;;  %v5217_v57 = vsel %vm2715_vm4, %v9221_v56, %v5216_v33  ;;  %v3485_v52 = vsel %vm3468_vm15, %v3476_v40, %v3484_v16  ;;  %v3493_v62 = vor.u32 %v3492_v44, %v3489_v42  ;;  %v7574_v40 = vld [vmem:[%s9563_s5 + $0x38] sm:$0xff]  }
 0x308   : > { %6963 = vmatmul.mubr.msk.bf16.gmra.mrb[56].mxu0 %vm9745_vm1, %v9211_v54  ;;  %v3192_v29 = vsel %vm1369_vm10, %v9206_v45, %v3191_v19  ;;  %v9240_v19 = vor.u32 %v3501_v18, %v3498_v15  ;;  %v3519_v63 = vrot.slane %v3517_v61, 5  ;;  %v3511_v50 = vor.u32 %v3510_v30, %v3507_v35  ;;  %vm9757_vm1 = vmmov %vm9638_vm0  ;;  %v3456_v30 = vld [vmem:[#allocation6 + $0x50] sm:$0xff] }
 0x309   : > { %6966 = vmatprep.mubr.msk.bf16.mxu0 %vm9746_vm13, %v9217_v39  ;;  %v3494_v25 = vsel %vm3468_vm15, %v3484_v16, %v3493_v62  ;;  %v7575_v16 = vld [vmem:[%s9563_s5 + $0x88] sm:$0xff]   ;;  %v3532_v44 = vshrl.u32 %v3453_v59, 16  ;;  %v3535_v34 = vshll.u32 %v3453_v59, 16  ;;  %vm9758_vm13 = vmmov %vm9638_vm0 }
 0x30a   : > { %v3503_v33 = vsel %vm3468_vm15, %v3493_v62, %v9240_v19  ;;  %v3544_v62 = vshll.u32 %v3454_v38, 16 }
 0x30b   : > { %v3537_v18 = vrot.slane %v3535_v34, 5 }
 0x30c   : > { %v3546_v61 = vrot.slane %v3544_v62, 5  ;;  %v3876_v62 = vld [vmem:[#allocation5 + $0x18] sm:$0xff] }
 0x30d   : > { %7143 = vmatmul.mubr.msk.bf16.gmra.mrb[24].mxu1 %vm9747_vm14, %v5208_v27  ;;  %v3516_v27 = vrot.slane %v3514_v22, 4  ;;  %vm9759_vm14 = vmmov %vm9638_vm0  ;;  %v3543_v22 = vrot.slane %v3541_v58, 4 }
 0x30e   : > { %7146 = vmatprep.mubr.msk.bf16.mxu1 %vm9748_vm6, %v5217_v57  ;;  %v3523_v57 = vshrl.u32 %v3452_v53, 16  ;;  %vm9760_vm6 = vmmov %vm9638_vm0 }
 0x30f   : > { %v3520_v42 = vor.u32 %v3519_v63, %v3516_v27 }
 0x310   : > { %6967 = vmatmul.mubr.msk.bf16.gmra.mrb[60].mxu0 %vm9749_vm7, %v3192_v29  ;;  %v3526_v29 = vshll.u32 %v3452_v53, 16  ;;  %vm9761_vm7 = vmmov %vm9638_vm0 }
 0x311   : > { %6974 = vmatprep.mubr.msk.bf16.mxu0 %vm9750_vm2, %v3485_v52  ;;  %v3525_v52 = vrot.slane %v3523_v57, 4  ;;  %v9268_v15 = vsel %vm3468_vm15, %v3511_v50, %v3520_v42  ;;  %vm9762_vm2 = vmmov %vm9638_vm0 }
 0x312   : > { %v3528_v17 = vrot.slane %v3526_v29, 5  ;;  %v3875_v29 = vld [vmem:[#allocation5 + $0x10] sm:$0xff] }
 0x315   : > { %7147 = vmatmul.mubr.msk.bf16.gmra.mrb[28].mxu1 %vm9751_vm9, %v5226_v46  ;;  %vm9763_vm9 = vmmov %vm9638_vm0 }
 0x316   : > { %7154 = vmatprep.mubr.msk.bf16.mxu1 %vm9752_vm11, %v5521_v21  ;;  %vm9764_vm11 = vmmov %vm9638_vm0 }
 0x318   : > { %6975 = vmatmul.mubr.msk.bf16.vlgmr.msra.gmra.mrb[32].mxu0 %vm9753_vm8, %v3494_v25  ;;  %vm9765_vm8 = vmmov %vm9638_vm0 }
 0x319   : > { %6978 = vmatprep.mubr.msk.bf16.mxu0 %vm9754_vm12, %v3503_v33  ;;  %7007 = vmatpush3.bf16.msra.mxu0 %v9125_v60  ;;  %v9263_v60 = vsel %vm3468_vm15, %v9240_v19, %v3511_v50  ;;  %v3559_v33 = vshrl.u32 %v3456_v30, 16  ;;  %vm9766_vm12 = vmmov %vm9638_vm0 }
 0x31a   : > { %7008 = vmatprep.subr.bf16.mxu0 %v7574_v40 }
 0x31b   : > { %v3561_v53 = vrot.slane %v3559_v33, 4 }
 0x31d   : > { %7155 = vmatmul.mubr.msk.bf16.vlgmr.msra.gmra.mrb[0].mxu1 %vm9638_vm0, %v9131_v24  ;;  %7009 = vmatpush3.bf16.msra.mxu0 %v7574_v40  ;;  %v3534_v24 = vrot.slane %v3532_v44, 4 }
 0x31e   : > { %7187 = vmatpush3.bf16.msra.mxu1 %v9143_v32  ;;  %7158 = vmatprep.mubr.msk.bf16.mxu1 %vm9755_vm3, %v9137_v28  ;;  %v3455_v28 = vld [vmem:[#allocation6 + $0x48] sm:$0xff]  ;;  %v3529_v32 = vor.u32 %v3528_v17, %v3525_v52  ;;  %vm9767_vm3 = vmmov %vm9638_vm0  ;;  %v3905_v52 = vshrl.u32 %v3875_v29, 16  ;;  %v3908_v17 = vshll.u32 %v3875_v29, 16  ;;  %v3878_v29 = vld [vmem:[#allocation5 + $0x28] sm:$0xff] }
 0x31f   : > { %7188 = vmatprep.subr.bf16.mxu1 %v7575_v16  ;;  %v3538_v21 = vor.u32 %v3537_v18, %v3534_v24  ;;  %v3550_v12 = vshrl.u32 %v3455_v28, 16  ;;  %v3553_v41 = vshll.u32 %v3455_v28, 16  ;;  %v5805_v18 = vld [vmem:[#allocation6 + $0x10] sm:$0xf0] }
 0x320   : > { %6979 = vmatmul.mubr.msk.bf16.gmra.mrb[36].mxu0 %vm9756_vm5, %v9263_v60  ;;  %v9277_v46 = vsel %vm3468_vm15, %v3520_v42, %v3529_v32  ;;  %vm9768_vm5 = vmmov %vm9638_vm0  ;;  %v3910_v58 = vrot.slane %v3908_v17, 4 }
 0x321   : > { %6982 = vmatprep.mubr.msk.bf16.mxu0 %vm9757_vm1, %v9268_v15  ;;  %v9282_v40 = vsel %vm3468_vm15, %v3529_v32, %v3538_v21  ;;  %v3552_v25 = vrot.slane %v3550_v12, 4  ;;  %v3555_v35 = vrot.slane %v3553_v41, 5  ;;  %vm9769_vm1 = vmmov %vm9638_vm0  ;;  %v3907_v32 = vrot.slane %v3905_v52, 3 }
 0x322   : > { %7189 = vmatpush3.bf16.msra.mxu1 %v7575_v16  ;;  %v5494_v16 = vld [vmem:[#allocation4 + $0x80] sm:$0xff]  ;;  %v5831_v12 = vshll.u32 %v5805_v18, 16  ;;  %v3935_v52 = vshll.u32 %v3878_v29, 16 }
 0x323   : > { %v3556_v27 = vor.u32 %v3555_v35, %v3552_v25  ;;  %v3914_v25 = vshrl.u32 %v3876_v62, 16 }
 0x325   : > { %7159 = vmatmul.mubr.msk.bf16.gmra.mrb[4].mxu1 %vm9758_vm13, %v9153_v47  ;;  %v3547_v47 = vor.u32 %v3546_v61, %v3543_v22  ;;  %vm9770_vm13 = vmmov %vm9638_vm0  ;;  %v5496_v61 = vld [vmem:[#allocation4 + $0x90] sm:$0xf] }
 0x326   : > { %7162 = vmatprep.mubr.msk.bf16.mxu1 %vm9759_vm14, %v9158_v48  ;;  %v3562_v48 = vshll.u32 %v3456_v30, 16  ;;  %vm9771_vm14 = vmmov %vm9638_vm0  ;;  %v3911_v30 = vor.u32 %v3910_v58, %v3907_v32  ;;  %v3880_v32 = vld [vmem:[#allocation5 + $0x38] sm:$0xff]  ;;  %v3881_v58 = vld [vmem:[#allocation5 + $0x40] sm:$0xff] }
 0x327   : > { %v9291_v63 = vsel %vm3468_vm15, %v3538_v21, %v3547_v47  ;;  %v9296_v50 = vsel %vm3468_vm15, %v3547_v47, %v3556_v27  ;;  %v5828_v21 = vshrl.u32 %v5805_v18, 16  ;;  %v3937_v18 = vrot.slane %v3935_v52, 4 }
 0x328   : > { %6983 = vmatmul.mubr.msk.bf16.gmra.mrb[40].mxu0 %vm9760_vm6, %v9277_v46  ;;  %v3564_v59 = vrot.slane %v3562_v48, 5  ;;  %vm9772_vm6 = vmmov %vm9638_vm0 }
 0x329   : > { %6986 = vmatprep.mubr.msk.bf16.mxu0 %vm9761_vm7, %v9282_v40  ;;  %vm9773_vm7 = vmmov %vm9638_vm0  ;;  %v5830_v48 = vrot.slane %v5828_v21, 4  ;;  %v3959_v21 = vshrl.u32 %v3881_v58, 16 }
 0x32a   : > { %v9300_v57 = vor.u32 %v3564_v59, %v3561_v53  ;;  %v3916_v53 = vrot.slane %v3914_v25, 3 }
 0x32d   : > { %7163 = vmatmul.mubr.msk.bf16.gmra.mrb[8].mxu1 %vm9762_vm2, %v9167_v55  ;;  %v9308_v55 = vsel %vm3468_vm15, %v3556_v27, %v9300_v57  ;;  %vm9774_vm2 = vmmov %vm9638_vm0  ;;  %v5833_v27 = vrot.slane %v5831_v12, 5  ;;  %v3962_v12 = vshll.u32 %v3881_v58, 16 }
 0x32e   : > { %7166 = vmatprep.mubr.msk.bf16.mxu1 %vm9763_vm9, %v9172_v26  ;;  %v3575_v26 = vsel %vm3468_vm15, %v9300_v57, %v9001_v51  ;;  %vm9775_vm9 = vmmov %vm9638_vm0 }
 0x330   : > { %6987 = vmatmul.mubr.msk.bf16.gmra.mrb[44].mxu0 %vm9764_vm11, %v9291_v63  ;;  %vm9776_vm11 = vmmov %vm9638_vm0 }
 0x331   : > { %6990 = vmatprep.mubr.msk.bf16.mxu0 %vm9765_vm8, %v9296_v50  ;;  %vm9777_vm8 = vmmov %vm9638_vm0 }
 0x335   : > { %7167 = vmatmul.mubr.msk.bf16.gmra.mrb[12].mxu1 %vm9766_vm12, %v9181_v43  ;;  %v3462_v43 = vld [vmem:[#allocation6 + $0x80] sm:$0x1f]  ;;  %vm9778_vm12 = vmmov %vm9638_vm0 }
 0x336   : > { %7170 = vmatprep.mubr.msk.bf16.mxu1 %vm9638_vm0, %v9186_v37  ;;  %v3874_v37 = vld [vmem:[#allocation5 + $0x8] sm:$0xf8]  ;;  %v3613_v42 = vshrl.u32 %v3462_v43, 16  ;;  %v3616_v51 = vshll.u32 %v3462_v43, 16 }
 0x337   : > { %v3897_v44 = vshrl.u32 %v3874_v37, 16  ;;  %v3900_v34 = vshll.u32 %v3874_v37, 16 }
 0x338   : > { %6991 = vmatmul.mubr.msk.bf16.gmra.mrb[48].mxu0 %vm9767_vm3, %v9308_v55  ;;  %v3618_v24 = vrot.slane %v3616_v51, 5  ;;  %vm9779_vm3 = vmmov %vm9638_vm0  ;;  %v5834_v51 = vor.u32 %v5833_v27, %v5830_v48  ;;  %v5814_v27 = vld [vmem:[#allocation6 + $0x58] sm:$0xff] }
 0x339   : > { %6994 = vmatprep.mubr.msk.bf16.mxu0 %vm9768_vm5, %v3575_v26  ;;  %v3899_v38 = vrot.slane %v3897_v44, 3  ;;  %v3902_v28 = vrot.slane %v3900_v34, 4  ;;  %v3932_v34 = vshrl.u32 %v3878_v29, 16  ;;  %vm9780_vm5 = vmmov %vm9638_vm0 }
 0x33b   : > { %v3903_v35 = vor.u32 %v3902_v28, %v3899_v38 }
 0x33d   : > { %7171 = vmatmul.mubr.msk.bf16.gmra.mrb[16].mxu1 %vm9769_vm1, %v9195_v20  ;;  %v5495_v20 = vld [vmem:[#allocation4 + $0x88] sm:$0xff]  ;;  %v3912_v26 = vsel %vm2715_vm4, %v3903_v35, %v3911_v30  ;;  %vm9781_vm1 = vmmov %vm9638_vm0  ;;  %v3964_v35 = vrot.slane %v3962_v12, 4 }
 0x33e   : > { %7174 = vmatprep.mubr.msk.bf16.mxu1 %vm9770_vm13, %v9200_v49  ;;  %v3615_v49 = vrot.slane %v3613_v42, 4  ;;  %vm9782_vm13 = vmmov %vm9638_vm0 }
 0x340   : > { %6995 = vmatmul.mubr.msk.bf16.gmra.mrb[52].mxu0 %vm9771_vm14, %v9033_v13  ;;  %v5546_v13 = vrot.slane %v5494_v16, 4  ;;  %v3619_v41 = vor.u32 %v3618_v24, %v3615_v49  ;;  %v3879_v16 = vld [vmem:[#allocation5 + $0x30] sm:$0xff]  ;;  %v3934_v24 = vrot.slane %v3932_v34, 3  ;;  %vm9784_vm14 = vmmov %vm9638_vm0 }
 0x341   : > { %6998 = vmatprep.mubr.msk.bf16.mxu0 %vm9772_vm6, %v9043_v23  ;;  %v5548_v23 = vrot.slane %v5495_v20, 4  ;;  %v3941_v17 = vshrl.u32 %v3879_v16, 16  ;;  %v3944_v20 = vshll.u32 %v3879_v16, 16  ;;  %vm9785_vm6 = vmmov %vm9638_vm0 }
 0x343   : > { %v5549_v22 = vsel %vm1369_vm10, %v5546_v13, %v5548_v23  ;;  %v3943_v38 = vrot.slane %v3941_v17, 3  ;;  %v3946_v28 = vrot.slane %v3944_v20, 4  ;;  %v5815_v17 = vld [vmem:[#allocation6 + $0x60] sm:$0xff] }
 0x345   : > { %7175 = vmatmul.mubr.msk.bf16.gmra.mrb[20].mxu1 %vm9773_vm7, %v9211_v54  ;;  %v3877_v54 = vld [vmem:[#allocation5 + $0x20] sm:$0xff]  ;;  %vm9786_vm7 = vmmov %vm9638_vm0 }
 0x346   : > { %7178 = vmatprep.mubr.msk.bf16.mxu1 %vm9774_vm2, %v9217_v39  ;;  %v5547_v39 = vsel %vm1369_vm10, %v9206_v45, %v5546_v13  ;;  %v3923_v47 = vshrl.u32 %v3877_v54, 16  ;;  %v3926_v33 = vshll.u32 %v3877_v54, 16  ;;  %v3620_v45 = vsel %vm3468_vm15, %v9079_v14, %v3619_v41  ;;  %vm9787_vm2 = vmmov %vm9638_vm0 }
 0x347   : > { %v5843_v13 = vsel %vm3468_vm15, %v5834_v51, %v9240_v19  ;;  %v3950_v54 = vshrl.u32 %v3880_v32, 16  ;;  %v3947_v19 = vor.u32 %v3946_v28, %v3943_v38  ;;  %v5908_v51 = vshrl.u32 %v5814_v27, 16  ;;  %v5816_v38 = vld [vmem:[#allocation6 + $0x68] sm:$0xff] }
 0x348   : > { %6999 = vmatmul.mubr.msk.bf16.gmra.mrb[56].mxu0 %vm9775_vm9, %v9072_v36  ;;  %v3917_v36 = vshll.u32 %v3876_v62, 16  ;;  %v3925_v43 = vrot.slane %v3923_v47, 3  ;;  %v3928_v37 = vrot.slane %v3926_v33, 4  ;;  %v3938_v62 = vor.u32 %v3937_v18, %v3934_v24  ;;  %v3883_v47 = vld [vmem:[#allocation5 + $0x50] sm:$0xff]  ;;  %vm9788_vm9 = vmmov %vm9638_vm0 }
 0x349   : > { %7002 = vmatprep.mubr.msk.bf16.mxu0 %vm9776_vm11, %v9083_v31  ;;  %v5550_v31 = vrot.slane %v5496_v61, 4  ;;  %vm9789_vm11 = vmmov %vm9638_vm0 }
 0x34a   : > { %v3919_v59 = vrot.slane %v3917_v36, 4  ;;  %v3929_v14 = vor.u32 %v3928_v37, %v3925_v43  ;;  %v3948_v25 = vsel %vm2715_vm4, %v3938_v62, %v3947_v19  ;;  %v3961_v36 = vrot.slane %v3959_v21, 3  ;;  %v3884_v43 = vld [vmem:[#allocation5 + $0x58] sm:$0xff] }
 0x34b   : > { %v5551_v42 = vsel %vm1369_vm10, %v5548_v23, %v5550_v31  ;;  %vm9783_vm10 = vmmov %vm9638_vm0  ;;  %v3989_v34 = vshll.u32 %v3884_v43, 16  ;;  %v5929_v21 = vshll.u32 %v5816_v38, 16 }
 0x34c   : > { %v3920_v44 = vor.u32 %v3919_v59, %v3916_v53  ;;  %v3939_v41 = vsel %vm2715_vm4, %v3929_v14, %v3938_v62  ;;  %v3965_v48 = vor.u32 %v3964_v35, %v3961_v36  ;;  %v5920_v62 = vshll.u32 %v5815_v17, 16 }
 0x34d   : > { %7179 = vmatmul.mubr.msk.bf16.gmra.mrb[24].mxu1 %vm9777_vm8, %v5547_v39  ;;  %v3953_v39 = vshll.u32 %v3880_v32, 16  ;;  %vm9790_vm8 = vmmov %vm9638_vm0  ;;  %v3991_v18 = vrot.slane %v3989_v34, 4 }
 0x34e   : > { %7182 = vmatprep.mubr.msk.bf16.mxu1 %vm9778_vm12, %v5549_v22  ;;  %v3921_v49 = vsel %vm2715_vm4, %v3911_v30, %v3920_v44  ;;  %v3930_v23 = vsel %vm2715_vm4, %v3920_v44, %v3929_v14  ;;  %v3952_v22 = vrot.slane %v3950_v54, 3  ;;  %v3882_v30 = vld [vmem:[#allocation5 + $0x48] sm:$0xff]  ;;  %vm9791_vm12 = vmmov %vm9638_vm0  ;;  %v3986_v44 = vshrl.u32 %v3884_v43, 16 }
 0x34f   : > { %v3955_v61 = vrot.slane %v3953_v39, 4  ;;  %v3968_v31 = vshrl.u32 %v3882_v30, 16  ;;  %v3886_v39 = vld [vmem:[#allocation5 + $0x68] sm:$0xff] }
 0x350   : > { %7003 = vmatmul.mubr.msk.bf16.gmra.mrb[60].mxu0 %vm9638_vm0, %v3620_v45  ;;  %v3977_v45 = vshrl.u32 %v3883_v47, 16  ;;  %v3988_v24 = vrot.slane %v3986_v44, 3  ;;  %v4007_v36 = vshll.u32 %v3886_v39, 16 }
 0x351   : > { %7010 = vmatprep.mubr.msk.bf16.mxu0 %vm9779_vm3, %v3912_v26  ;;  %v3956_v33 = vor.u32 %v3955_v61, %v3952_v22  ;;  %v3970_v59 = vrot.slane %v3968_v31, 3  ;;  %vm9792_vm3 = vmmov %vm9638_vm0  ;;  %v5922_v61 = vrot.slane %v5920_v62, 5  ;;  %v5931_v31 = vrot.slane %v5929_v21, 5 }
 0x352   : > { %v3979_v29 = vrot.slane %v3977_v45, 3  ;;  %v3992_v12 = vor.u32 %v3991_v18, %v3988_v24  ;;  %v5818_v45 = vld [vmem:[#allocation6 + $0x78] sm:$0xff]  ;;  %v5820_v24 = vld [vmem:[#allocation6 + $0x88] sm:$0xff] }
 0x353   : > { %v3957_v53 = vsel %vm2715_vm4, %v3947_v19, %v3956_v33  ;;  %v3966_v37 = vsel %vm2715_vm4, %v3956_v33, %v3965_v48  ;;  %v5926_v19 = vshrl.u32 %v5816_v38, 16 }
 0x355   : > { %7183 = vmatmul.mubr.msk.bf16.gmra.mrb[28].mxu1 %vm9780_vm5, %v5551_v42  ;;  %v3885_v42 = vld [vmem:[#allocation5 + $0x60] sm:$0xff]  ;;  %vm9793_vm5 = vmmov %vm9638_vm0  ;;  %v5928_v33 = vrot.slane %v5926_v19, 4  ;;  %v5965_v19 = vshll.u32 %v5820_v24, 16 }
 0x356   : > { %7190 = vmatprep.mubr.msk.bf16.mxu1 %vm9781_vm1, %v5843_v13  ;;  %v3995_v52 = vshrl.u32 %v3885_v42, 16  ;;  %v3998_v14 = vshll.u32 %v3885_v42, 16  ;;  %v5910_v13 = vrot.slane %v5908_v51, 4  ;;  %vm9794_vm1 = vmmov %vm9638_vm0  ;;  %v5947_v42 = vshll.u32 %v5818_v45, 16 }
 0x358   : > { %7011 = vmatmul.mubr.msk.bf16.vlgmr.msra.gmra.mrb[32].mxu0 %vm9782_vm13, %v3921_v49  ;;  %v3997_v32 = vrot.slane %v3995_v52, 3  ;;  %v4000_v58 = vrot.slane %v3998_v14, 4  ;;  %vm9795_vm13 = vmmov %vm9638_vm0 }
 0x359   : > { %7014 = vmatprep.mubr.msk.bf16.mxu0 %vm9783_vm10, %v3930_v23  ;;  %v5917_v23 = vshrl.u32 %v5815_v17, 16  ;;  %vm9796_vm10 = vmmov %vm9638_vm0 }
 0x35a   : > { %v4001_v22 = vor.u32 %v4000_v58, %v3997_v32 }
 0x35d   : > { %7191 = vmatmul.mubr.msk.bf16.vlgmr.msra.gmra.mrb[0].mxu1 %vm9784_vm14, %v9263_v60  ;;  %v3971_v60 = vshll.u32 %v3882_v30, 16  ;;  %vm9797_vm14 = vmmov %vm9638_vm0 }
 0x35e   : > { %7194 = vmatprep.mubr.msk.bf16.mxu1 %vm9785_vm6, %v9268_v15  ;;  %v3980_v15 = vshll.u32 %v3883_v47, 16  ;;  %vm9798_vm6 = vmmov %vm9638_vm0 }
 0x35f   : > { %v3973_v26 = vrot.slane %v3971_v60, 4  ;;  %v5817_v60 = vld [vmem:[#allocation6 + $0x70] sm:$0xff] }
 0x360   : > { %7015 = vmatmul.mubr.msk.bf16.gmra.mrb[36].mxu0 %vm9786_vm7, %v3939_v41  ;;  %v3982_v16 = vrot.slane %v3980_v15, 4  ;;  %v5919_v41 = vrot.slane %v5917_v23, 4  ;;  %v4002_v15 = vsel %vm2715_vm4, %v3992_v12, %v4001_v22  ;;  %v5935_v43 = vshrl.u32 %v5817_v60, 16  ;;  %vm9799_vm7 = vmmov %vm9638_vm0 }
 0x361   : > { %7018 = vmatprep.mubr.msk.bf16.mxu0 %vm9787_vm2, %v3948_v25  ;;  %v4004_v25 = vshrl.u32 %v3886_v39, 16  ;;  %vm9800_vm2 = vmmov %vm9638_vm0 }
 0x362   : > { %v3983_v20 = vor.u32 %v3982_v16, %v3979_v29  ;;  %v5932_v29 = vor.u32 %v5931_v31, %v5928_v33  ;;  %v5944_v16 = vshrl.u32 %v5818_v45, 16  ;;  %v5937_v52 = vrot.slane %v5935_v43, 4 }
 0x365   : > { %7195 = vmatmul.mubr.msk.bf16.gmra.mrb[4].mxu1 %vm9788_vm9, %v9277_v46  ;;  %v5911_v46 = vshll.u32 %v5814_v27, 16  ;;  %v5923_v27 = vor.u32 %v5922_v61, %v5919_v41  ;;  %vm9801_vm9 = vmmov %vm9638_vm0 }
 0x366   : > { %7198 = vmatprep.mubr.msk.bf16.mxu1 %vm9789_vm11, %v9282_v40  ;;  %v3974_v40 = vor.u32 %v3973_v26, %v3970_v59  ;;  %v4009_v59 = vrot.slane %v4007_v36, 4  ;;  %vm9802_vm11 = vmmov %vm9638_vm0 }
 0x367   : > { %v5913_v49 = vrot.slane %v5911_v46, 5  ;;  %v5933_v17 = vsel %vm3468_vm15, %v5923_v27, %v5932_v29 }
 0x368   : > { %7019 = vmatmul.mubr.msk.bf16.gmra.mrb[40].mxu0 %vm9790_vm8, %v3957_v53  ;;  %v3975_v28 = vsel %vm2715_vm4, %v3965_v48, %v3974_v40  ;;  %v3984_v54 = vsel %vm2715_vm4, %v3974_v40, %v3983_v20  ;;  %v3993_v48 = vsel %vm2715_vm4, %v3983_v20, %v3992_v12  ;;  %v4006_v53 = vrot.slane %v4004_v25, 3  ;;  %vm9803_vm8 = vmmov %vm9638_vm0 }
 0x369   : > { %7022 = vmatprep.mubr.msk.bf16.mxu0 %vm9791_vm12, %v3966_v37  ;;  %v5938_v37 = vshll.u32 %v5817_v60, 16  ;;  %v5946_v20 = vrot.slane %v5944_v16, 4  ;;  %vm9804_vm12 = vmmov %vm9638_vm0  ;;  %v9413_v16 = vld [vmem:[%s9564_s6] ss:$0 sm:$0xff] }
 0x36a   : > { %v4010_v51 = vor.u32 %v4009_v59, %v4006_v53 }
 0x36b   : > { %v5940_v14 = vrot.slane %v5938_v37, 5 }
 0x36c   : > { %v4011_v18 = vsel %vm2715_vm4, %v4001_v22, %v4010_v51 }
 0x36d   : > { %7199 = vmatmul.mubr.msk.bf16.gmra.mrb[8].mxu1 %vm9638_vm0, %v9291_v63  ;;  %v5914_v63 = vor.u32 %v5913_v49, %v5910_v13  ;;  %v5949_v13 = vrot.slane %v5947_v42, 5  ;;  %v5819_v49 = vld [vmem:[#allocation6 + $0x80] sm:$0xff]  ;;  %v5941_v32 = vor.u32 %v5940_v14, %v5937_v52  ;;  %v2664_v42 = vadd.f32 %v9413_v16, %v7711_v2 }
 0x36e   : > { %7202 = vmatprep.mubr.msk.bf16.mxu1 %vm9792_vm3, %v9296_v50  ;;  %v3887_v50 = vld [vmem:[#allocation5 + $0x70] sm:$0xff]  ;;  %v5953_v58 = vshrl.u32 %v5819_v49, 16  ;;  %v5956_v62 = vshll.u32 %v5819_v49, 16  ;;  %vm9805_vm3 = vmmov %vm9638_vm0 }
 0x36f   : > { %v4013_v35 = vshrl.u32 %v3887_v50, 16  ;;  %v4016_v30 = vshll.u32 %v3887_v50, 16  ;;  %v5915_v47 = vsel %vm3468_vm15, %v9300_v57, %v5914_v63  ;;  %v3888_v57 = vld [vmem:[#allocation5 + $0x78] sm:$0xff]  ;;  %v5924_v34 = vsel %vm3468_vm15, %v5914_v63, %v5923_v27 }
 0x370   : > { %7023 = vmatmul.mubr.msk.bf16.gmra.mrb[44].mxu0 %vm9793_vm5, %v3975_v28  ;;  %v4022_v46 = vshrl.u32 %v3888_v57, 16  ;;  %v4025_v44 = vshll.u32 %v3888_v57, 16  ;;  %v5950_v39 = vor.u32 %v5949_v13, %v5946_v20  ;;  %v5962_v63 = vshrl.u32 %v5820_v24, 16  ;;  %vm9806_vm5 = vmmov %vm9638_vm0 }
 0x371   : > { %7026 = vmatprep.mubr.msk.bf16.mxu0 %vm9794_vm1, %v3984_v54  ;;  %v4015_v26 = vrot.slane %v4013_v35, 3  ;;  %v3890_v54 = vld [vmem:[#allocation5 + $0x88] sm:$0xf]  ;;  %v5942_v41 = vsel %vm3468_vm15, %v5932_v29, %v5941_v32  ;;  %v5955_v22 = vrot.slane %v5953_v58, 4  ;;  %v5958_v61 = vrot.slane %v5956_v62, 5  ;;  %vm9807_vm1 = vmmov %vm9638_vm0 }
 0x372   : > { %v4024_v23 = vrot.slane %v4022_v46, 3  ;;  %v4027_v38 = vrot.slane %v4025_v44, 4  ;;  %v4040_v50 = vshrl.u32 %v3890_v54, 16  ;;  %v4043_v12 = vshll.u32 %v3890_v54, 16 }
 0x373   : > { %v5951_v25 = vsel %vm3468_vm15, %v5941_v32, %v5950_v39  ;;  %v5964_v36 = vrot.slane %v5962_v63, 4  ;;  %v5967_v35 = vrot.slane %v5965_v19, 5  ;;  %v2665_v44 = vadd.f32 %v9413_v16, %v7714_v3 }
 0x374   : > { %v4028_v21 = vor.u32 %v4027_v38, %v4024_v23  ;;  %v4042_v33 = vrot.slane %v4040_v50, 3  ;;  %v4045_v31 = vrot.slane %v4043_v12, 4  ;;  %v2668_v23 = vadd.f32 %v9413_v16, %v7723_v6 }
 0x375   : > { %7203 = vmatmul.mubr.msk.bf16.gmra.mrb[12].mxu1 %vm9795_vm13, %v9308_v55  ;;  %v4018_v55 = vrot.slane %v4016_v30, 4  ;;  %v5821_v30 = vld [vmem:[#allocation6 + $0x90] sm:$0x1f]  ;;  %v5968_v27 = vor.u32 %v5967_v35, %v5964_v36  ;;  %vm9808_vm13 = vmmov %vm9638_vm0  ;;  %v2666_v32 = vadd.f32 %v9413_v16, %v7717_v4  ;;  %v2669_v62 = vadd.f32 %v9413_v16, %v7726_v7 }
 0x376   : > { %7206 = vmatprep.mubr.msk.bf16.mxu1 %vm9796_vm10, %v5915_v47  ;;  %v4038_v60 = vsel %vm2715_vm4, %v4028_v21, %v9221_v56  ;;  %v5971_v45 = vshrl.u32 %v5821_v30, 16  ;;  %v4046_v53 = vor.u32 %v4045_v31, %v4042_v33  ;;  %vm9809_vm10 = vmmov %vm9638_vm0  ;;  %v2667_v6 = vadd.f32 %v9413_v16, %v7720_v5 }
 0x377   : > { %v4019_v40 = vor.u32 %v4018_v55, %v4015_v26  ;;  %v2673_v33 = vadd.f32 %v9413_v16, %v7738_v11 }
 0x378   : > { %7027 = vmatmul.mubr.msk.bf16.gmra.mrb[48].mxu0 %vm9797_vm14, %v3993_v48  ;;  %v5959_v48 = vor.u32 %v5958_v61, %v5955_v22  ;;  %v5973_v26 = vrot.slane %v5971_v45, 4  ;;  %v4047_v37 = vsel %vm2715_vm4, %v9221_v56, %v4046_v53  ;;  %v2662_v56 = vadd.f32 %v9413_v16, %v7705_v0  ;;  %vm9812_vm14 = vmmov %vm9638_vm0 }
 0x379   : > { %7030 = vmatprep.mubr.msk.bf16.mxu0 %vm9798_vm6, %v4002_v15  ;;  %v4020_v28 = vsel %vm2715_vm4, %v4010_v51, %v4019_v40  ;;  %v4029_v47 = vsel %vm2715_vm4, %v4019_v40, %v4028_v21  ;;  %v5974_v15 = vshll.u32 %v5821_v30, 16  ;;  %v2663_v40 = vadd.f32 %v9413_v16, %v7708_v1  ;;  %vm9810_vm4 = vmmov %vm9638_vm0 }
 0x37a   : > { %v5960_v59 = vsel %vm3468_vm15, %v5950_v39, %v5959_v48  ;;  %v5969_v43 = vsel %vm3468_vm15, %v5959_v48, %v5968_v27  ;;  %vm9813_vm6 = vmmov %vm9638_vm0  ;;  %v2670_v30 = vadd.f32 %v9413_v16, %v7729_v8 }
 0x37b   : > { %v5976_v55 = vrot.slane %v5974_v15, 5 }
 0x37d   : > { %7207 = vmatmul.mubr.msk.bf16.gmra.mrb[16].mxu1 %vm9799_vm7, %v5924_v34  ;;  %v5977_v57 = vor.u32 %v5976_v55, %v5973_v26  ;;  %vm9814_vm7 = vmmov %vm9638_vm0 }
 0x37e   : > { %7210 = vmatprep.mubr.msk.bf16.mxu1 %vm9800_vm2, %v5933_v17  ;;  %vm9815_vm2 = vmmov %vm9638_vm0 }
 0x37f   : > { %v5978_v29 = vsel %vm3468_vm15, %v5968_v27, %v5977_v57  ;;  %vm9811_vm15 = vmmov %vm9638_vm0 }
 0x380   : > { %7031 = vmatmul.mubr.msk.bf16.gmra.mrb[52].mxu0 %vm9801_vm9, %v4011_v18  ;;  %vm9816_vm9 = vmmov %vm9638_vm0 }
 0x381   : > { %7034 = vmatprep.mubr.msk.bf16.mxu0 %vm9802_vm11, %v4020_v28  ;;  %vm9817_vm11 = vmmov %vm9638_vm0 }
 0x385   : > { %7211 = vmatmul.mubr.msk.bf16.gmra.mrb[20].mxu1 %vm9803_vm8, %v5942_v41  ;;  %vm9818_vm8 = vmmov %vm9638_vm0 }
 0x386   : > { %7214 = vmatprep.mubr.msk.bf16.mxu1 %vm9804_vm12, %v5951_v25  ;;  %v2672_v25 = vadd.f32 %v9413_v16, %v7735_v10  ;;  %v2671_v10 = vadd.f32 %v9413_v16, %v7732_v9  ;;  %vm9820_vm12 = vmmov %vm9638_vm0 }
 0x388   : > { %7035 = vmatmul.mubr.msk.bf16.gmra.mrb[56].mxu0 %vm9638_vm0, %v4029_v47 }
 0x389   : > { %7038 = vmatprep.mubr.msk.bf16.mxu0 %vm9805_vm3, %v4038_v60  ;;  %vm9823_vm3 = vmmov %vm9638_vm0 }
 0x38d   : > { %7215 = vmatmul.mubr.msk.bf16.gmra.mrb[24].mxu1 %vm9806_vm5, %v5960_v59  ;;  %vm9825_vm5 = vmmov %vm9638_vm0 }
 0x38e   : > { %7218 = vmatprep.mubr.msk.bf16.mxu1 %vm9807_vm1, %v5969_v43  ;;  %v9819_v43 = vld [vmem:[#allocation9_spill] sm:$0xff]  ;;  %vm9827_vm1 = vmmov %vm9638_vm0 }
 0x390   : > { %7039 = vmatmul.mubr.msk.bf16.gmra.mrb[60].mxu0 %vm9808_vm13, %v4047_v37  ;;  %v2676_v37 = vadd.f32 %v9413_v16, %v9819_v43  ;;  %vm9829_vm13 = vmmov %vm9638_vm0 }
 0x395   : > { %7219 = vmatmul.mubr.msk.bf16.gmra.mrb[28].mxu1 %vm9809_vm10, %v5978_v29  ;;  %vm9831_vm10 = vmmov %vm9638_vm0 }
 0x42b   : > { %v7012_v51 = vpop.f32.mrb[32].mxu0 }
 0x42c   : > { %v4142_v46 = vpop.f32.mrb[33].mxu0  ;;  %v7222_v14 = vadd.f32 %v7012_v51, %v2664_v42  ;;  %v9821_v42 = vld [vmem:[#allocation7_spill] sm:$0xff] }
 0x42d   : > { %v7013_v34 = vpop.f32.mrb[34].mxu0  ;;  %v7224_v17 = vadd.f32 %v4142_v46, %v2662_v56  ;;  %v2674_v51 = vadd.f32 %v9413_v16, %v9821_v42  ;;  %v9822_v46 = vld [vmem:[#allocation10_spill] sm:$0xff] }
 0x42e   : > { %v4145_v52 = vpop.f32.mrb[35].mxu0  ;;  %v7226_v2 = vadd.f32 %v7013_v34, %v2665_v44  ;;  %v2677_v44 = vadd.f32 %v9413_v16, %v9822_v46 }
 0x42f   : > { %v7228_v24 = vadd.f32 %v4145_v52, %v2663_v40  ;;  %v9824_v40 = vld [vmem:[#allocation8_spill] sm:$0xff] }
 0x430   : > { %v7192_v20 = vpop.f32.mrb[0].mxu1  ;;  %v2675_v52 = vadd.f32 %v9413_v16, %v9824_v40 }
 0x431   : > { %v7223_v13 = vadd.f32 %v7222_v14, %v7192_v20  ;;  %v6073_v49 = vpop.f32.mrb[1].mxu1 }
 0x432   : > { %v7225_v0 = vadd.f32 %v7224_v17, %v6073_v49  ;;  %v7193_v18 = vpop.f32.mrb[2].mxu1 }
 0x433   : > { %6234 = vst.msk [vmem:[%s7702_s18 + $0x10] sm:$0xff] %vm9810_vm4, %v7223_v13  ;;  %v7227_v3 = vadd.f32 %v7226_v2, %v7193_v18  ;;  %v7016_v1 = vpop.f32.mrb[36].mxu0  ;;  %v6076_v38 = vpop.f32.mrb[3].mxu1  ;;  %vm9833_vm4 = vmmov %vm9638_vm0 }
 0x434   : > { %6232 = vst.msk [vmem:[%s7702_s18] sm:$0xff] %vm9811_vm15, %v7225_v0  ;;  %v7229_v28 = vadd.f32 %v7228_v24, %v6076_v38  ;;  %v4158_v58 = vpop.f32.mrb[37].mxu0  ;;  %v7230_v63 = vadd.f32 %v7016_v1, %v2668_v23  ;;  %v9826_v1 = vld [vmem:[#allocation13_spill] sm:$0xff]  ;;  %vm9835_vm15 = vmmov %vm9638_vm0 }
 0x435   : > { %6235 = vst.msk [vmem:[%s7702_s18 + $0x18] sm:$0xff] %vm9812_vm14, %v7227_v3  ;;  %v7017_v54 = vpop.f32.mrb[38].mxu0  ;;  %v7232_v19 = vadd.f32 %v4158_v58, %v2666_v32  ;;  %v2680_v38 = vadd.f32 %v9413_v16, %v9826_v1  ;;  %vm9837_vm14 = vmmov %vm9638_vm0 }
 0x436   : > { %6233 = vst.msk [vmem:[%s7702_s18 + $0x8] sm:$0xff] %vm9813_vm6, %v7229_v28  ;;  %v4161_v39 = vpop.f32.mrb[39].mxu0  ;;  %v7234_v4 = vadd.f32 %v7017_v54, %v2669_v62  ;;  %v9828_v62 = vld [vmem:[#allocation11_spill] sm:$0xff]  ;;  %vm9839_vm6 = vmmov %vm9638_vm0 }
 0x437   : > { %v7236_v41 = vadd.f32 %v4161_v39, %v2667_v6  ;;  %v2678_v54 = vadd.f32 %v9413_v16, %v9828_v62  ;;  %v9830_v39 = vld [vmem:[#allocation14_spill] sm:$0xff] }
 0x438   : > { %v7196_v21 = vpop.f32.mrb[4].mxu1 }
 0x439   : > { %v7231_v50 = vadd.f32 %v7230_v63, %v7196_v21  ;;  %v6089_v12 = vpop.f32.mrb[5].mxu1  ;;  %v2681_v63 = vadd.f32 %v9413_v16, %v9830_v39  ;;  %v9832_v21 = vld [vmem:[#allocation12_spill] sm:$0xff] }
 0x43a   : > { %v7233_v22 = vadd.f32 %v7232_v19, %v6089_v12  ;;  %v7197_v61 = vpop.f32.mrb[6].mxu1 }
 0x43b   : > { %6238 = vst.msk [vmem:[%s7702_s18 + $0x30] sm:$0xff] %vm9814_vm7, %v7231_v50  ;;  %v7235_v7 = vadd.f32 %v7234_v4, %v7197_v61  ;;  %v7020_v5 = vpop.f32.mrb[40].mxu0  ;;  %v6092_v36 = vpop.f32.mrb[7].mxu1  ;;  %v2679_v4 = vadd.f32 %v9413_v16, %v9832_v21  ;;  %vm9841_vm7 = vmmov %vm9638_vm0 }
 0x43c   : > { %6236 = vst.msk [vmem:[%s7702_s18 + $0x20] sm:$0xff] %vm9815_vm2, %v7233_v22  ;;  %v7237_v35 = vadd.f32 %v7236_v41, %v6092_v36  ;;  %v4174_v47 = vpop.f32.mrb[41].mxu0  ;;  %v7238_v48 = vadd.f32 %v7020_v5, %v2672_v25  ;;  %vm9843_vm2 = vmmov %vm9638_vm0 }
 0x43d   : > { %6239 = vst.msk [vmem:[%s7702_s18 + $0x38] sm:$0xff] %vm9816_vm9, %v7235_v7  ;;  %v7021_v31 = vpop.f32.mrb[42].mxu0  ;;  %v7240_v45 = vadd.f32 %v4174_v47, %v2670_v30  ;;  %v9834_v47 = vld [vmem:[#allocation17_spill] sm:$0xff]  ;;  %vm9845_vm9 = vmmov %vm9638_vm0 }
 0x43e   : > { %6237 = vst.msk [vmem:[%s7702_s18 + $0x28] sm:$0xff] %vm9817_vm11, %v7237_v35  ;;  %v4177_v60 = vpop.f32.mrb[43].mxu0  ;;  %v7242_v8 = vadd.f32 %v7021_v31, %v2673_v33  ;;  %v2684_v33 = vadd.f32 %v9413_v16, %v9834_v47  ;;  %vm9847_vm11 = vmmov %vm9638_vm0 }
 0x43f   : > { %v7244_v59 = vadd.f32 %v4177_v60, %v2671_v10 }
 0x440   : > { %v7200_v15 = vpop.f32.mrb[8].mxu1 }
 0x441   : > { %v7239_v27 = vadd.f32 %v7238_v48, %v7200_v15  ;;  %v6105_v53 = vpop.f32.mrb[9].mxu1  ;;  %v9836_v48 = vld [vmem:[#allocation15_spill] sm:$0xff] }
 0x442   : > { %v7241_v26 = vadd.f32 %v7240_v45, %v6105_v53  ;;  %v7201_v55 = vpop.f32.mrb[10].mxu1  ;;  %v2682_v45 = vadd.f32 %v9413_v16, %v9836_v48 }
 0x443   : > { %6242 = vst.msk [vmem:[%s7702_s18 + $0x50] sm:$0xff] %vm9818_vm8, %v7239_v27  ;;  %v7243_v11 = vadd.f32 %v7242_v8, %v7201_v55  ;;  %v7024_v9 = vpop.f32.mrb[44].mxu0  ;;  %v6108_v57 = vpop.f32.mrb[11].mxu1  ;;  %v9838_v8 = vld [vmem:[#allocation18_spill] sm:$0xff]  ;;  %vm9849_vm8 = vmmov %vm9638_vm0 }
 0x444   : > { %6240 = vst.msk [vmem:[%s7702_s18 + $0x40] sm:$0xff] %vm9820_vm12, %v7241_v26  ;;  %v7245_v29 = vadd.f32 %v7244_v59, %v6108_v57  ;;  %v4190_v56 = vpop.f32.mrb[45].mxu0  ;;  %v7246_v17 = vadd.f32 %v7024_v9, %v2676_v37  ;;  %v2685_v27 = vadd.f32 %v9413_v16, %v9838_v8  ;;  %v9840_v59 = vld [vmem:[#allocation16_spill] sm:$0xff]  ;;  %vm9851_vm12 = vmmov %vm9638_vm0 }
 0x445   : > { %6243 = vst.msk [vmem:[%s7702_s18 + $0x58] sm:$0xff] %vm9638_vm0, %v7243_v11  ;;  %v7025_v34 = vpop.f32.mrb[46].mxu0  ;;  %v7248_v20 = vadd.f32 %v4190_v56, %v2674_v51  ;;  %v2683_v26 = vadd.f32 %v9413_v16, %v9840_v59 }
 0x446   : > { %6241 = vst.msk [vmem:[%s7702_s18 + $0x48] sm:$0xff] %vm9823_vm3, %v7245_v29  ;;  %v4193_v14 = vpop.f32.mrb[47].mxu0  ;;  %v7250_v13 = vadd.f32 %v7025_v34, %v2677_v44  ;;  %v9842_v44 = vld [vmem:[#allocation21_spill] sm:$0xff]  ;;  %vm9854_vm3 = vmmov %vm9638_vm0 }
 0x447   : > { %v7252_v0 = vadd.f32 %v4193_v14, %v2675_v52  ;;  %v2688_v34 = vadd.f32 %v9413_v16, %v9842_v44 }
 0x448   : > { %v7204_v2 = vpop.f32.mrb[12].mxu1 }
 0x449   : > { %v7247_v49 = vadd.f32 %v7246_v17, %v7204_v2  ;;  %v6121_v24 = vpop.f32.mrb[13].mxu1  ;;  %v9844_v17 = vld [vmem:[#allocation19_spill] sm:$0xff] }
 0x44a   : > { %v7249_v18 = vadd.f32 %v7248_v20, %v6121_v24  ;;  %v7205_v3 = vpop.f32.mrb[14].mxu1  ;;  %v2686_v20 = vadd.f32 %v9413_v16, %v9844_v17 }
 0x44b   : > { %6246 = vst.msk [vmem:[%s7702_s18 + $0x70] sm:$0xff] %vm9825_vm5, %v7247_v49  ;;  %v7251_v23 = vadd.f32 %v7250_v13, %v7205_v3  ;;  %v7028_v28 = vpop.f32.mrb[48].mxu0  ;;  %v6124_v32 = vpop.f32.mrb[15].mxu1  ;;  %v9846_v13 = vld [vmem:[#allocation22_spill] sm:$0xff]  ;;  %vm9856_vm5 = vmmov %vm9638_vm0 }
 0x44c   : > { %6244 = vst.msk [vmem:[%s7702_s18 + $0x60] sm:$0xff] %vm9827_vm1, %v7249_v18  ;;  %v7253_v58 = vadd.f32 %v7252_v0, %v6124_v32  ;;  %v4206_v6 = vpop.f32.mrb[49].mxu0  ;;  %v7254_v12 = vadd.f32 %v7028_v28, %v2680_v38  ;;  %v2689_v49 = vadd.f32 %v9413_v16, %v9846_v13  ;;  %v9848_v0 = vld [vmem:[#allocation20_spill] sm:$0xff]  ;;  %vm9857_vm1 = vmmov %vm9638_vm0 }
 0x44d   : > { %6247 = vst.msk [vmem:[%s7702_s18 + $0x78] sm:$0xff] %vm9829_vm13, %v7251_v23  ;;  %v7029_v19 = vpop.f32.mrb[50].mxu0  ;;  %v7256_v41 = vadd.f32 %v4206_v6, %v2678_v54  ;;  %v2687_v18 = vadd.f32 %v9413_v16, %v9848_v0  ;;  %vm9858_vm13 = vmmov %vm9638_vm0 }
 0x44e   : > { %6245 = vst.msk [vmem:[%s7702_s18 + $0x68] sm:$0xff] %vm9831_vm10, %v7253_v58  ;;  %v4209_v50 = vpop.f32.mrb[51].mxu0  ;;  %v7258_v61 = vadd.f32 %v7029_v19, %v2681_v63  ;;  %v9850_v63 = vld [vmem:[#allocation25_spill] sm:$0xff]  ;;  %vm9859_vm10 = vmmov %vm9638_vm0 }
 0x44f   : > { %v7260_v5 = vadd.f32 %v4209_v50, %v2679_v4  ;;  %v2692_v19 = vadd.f32 %v9413_v16, %v9850_v63 }
 0x450   : > { %v7208_v22 = vpop.f32.mrb[16].mxu1 }
 0x451   : > { %v7255_v7 = vadd.f32 %v7254_v12, %v7208_v22  ;;  %v6137_v25 = vpop.f32.mrb[17].mxu1  ;;  %v9852_v12 = vld [vmem:[#allocation23_spill] sm:$0xff] }
 0x452   : > { %v7257_v36 = vadd.f32 %v7256_v41, %v6137_v25  ;;  %v7209_v35 = vpop.f32.mrb[18].mxu1  ;;  %v2690_v41 = vadd.f32 %v9413_v16, %v9852_v12 }
 0x453   : > { %6250 = vst.msk [vmem:[%s7702_s18 + $0x90] sm:$0xff] %vm9833_vm4, %v7255_v7  ;;  %v7259_v30 = vadd.f32 %v7258_v61, %v7209_v35  ;;  %v7032_v31 = vpop.f32.mrb[52].mxu0  ;;  %v6140_v10 = vpop.f32.mrb[19].mxu1  ;;  %v9853_v61 = vld [vmem:[#allocation26_spill] sm:$0xff] }
 0x454   : > { %6248 = vst.msk [vmem:[%s7702_s18 + $0x80] sm:$0xff] %vm9835_vm15, %v7257_v36  ;;  %v7261_v60 = vadd.f32 %v7260_v5, %v6140_v10  ;;  %v4222_v15 = vpop.f32.mrb[53].mxu0  ;;  %v7262_v11 = vadd.f32 %v7032_v31, %v2684_v33  ;;  %v2693_v7 = vadd.f32 %v9413_v16, %v9853_v61  ;;  %v9855_v5 = vld [vmem:[#allocation24_spill] sm:$0xff] }
 0x455   : > { %6251 = vst.msk [vmem:[%s7702_s18 + $0x98] sm:$0xff] %vm9837_vm14, %v7259_v30  ;;  %v7033_v53 = vpop.f32.mrb[54].mxu0  ;;  %v7264_v43 = vadd.f32 %v4222_v15, %v2682_v45  ;;  %v2691_v36 = vadd.f32 %v9413_v16, %v9855_v5 }
 0x456   : > { %6249 = vst.msk [vmem:[%s7702_s18 + $0x88] sm:$0xff] %vm9839_vm6, %v7261_v60  ;;  %v4225_v55 = vpop.f32.mrb[55].mxu0  ;;  %v7266_v9 = vadd.f32 %v7033_v53, %v2685_v27 }
 0x457   : > { %v7268_v42 = vadd.f32 %v4225_v55, %v2683_v26 }
 0x458   : > { %v7212_v37 = vpop.f32.mrb[20].mxu1 }
 0x459   : > { %v7263_v57 = vadd.f32 %v7262_v11, %v7212_v37  ;;  %v6153_v29 = vpop.f32.mrb[21].mxu1 }
 0x45a   : > { %v7265_v51 = vadd.f32 %v7264_v43, %v6153_v29  ;;  %v7213_v56 = vpop.f32.mrb[22].mxu1 }
 0x45b   : > { %6254 = vst.msk [vmem:[%s7702_s18 + $0xb0] sm:$0xff] %vm9841_vm7, %v7263_v57  ;;  %v7267_v46 = vadd.f32 %v7266_v9, %v7213_v56  ;;  %v7036_v40 = vpop.f32.mrb[56].mxu0  ;;  %v6156_v52 = vpop.f32.mrb[23].mxu1 }
 0x45c   : > { %6252 = vst.msk [vmem:[%s7702_s18 + $0xa0] sm:$0xff] %vm9843_vm2, %v7265_v51  ;;  %v7269_v14 = vadd.f32 %v7268_v42, %v6156_v52  ;;  %v4238_v2 = vpop.f32.mrb[57].mxu0  ;;  %v7270_v23 = vadd.f32 %v7036_v40, %v2688_v34 }
 0x45d   : > { %6255 = vst.msk [vmem:[%s7702_s18 + $0xb8] sm:$0xff] %vm9845_vm9, %v7267_v46  ;;  %v7037_v24 = vpop.f32.mrb[58].mxu0  ;;  %v7272_v1 = vadd.f32 %v4238_v2, %v2686_v20 }
 0x45e   : > { %6253 = vst.msk [vmem:[%s7702_s18 + $0xa8] sm:$0xff] %vm9847_vm11, %v7269_v14  ;;  %v4241_v3 = vpop.f32.mrb[59].mxu0  ;;  %v7274_v28 = vadd.f32 %v7037_v24, %v2689_v49 }
 0x45f   : > { %v7276_v62 = vadd.f32 %v4241_v3, %v2687_v18 }
 0x460   : > { %v7216_v38 = vpop.f32.mrb[24].mxu1 }
 0x461   : > { %v7271_v32 = vadd.f32 %v7270_v23, %v7216_v38  ;;  %v6169_v58 = vpop.f32.mrb[25].mxu1 }
 0x462   : > { %v7273_v54 = vadd.f32 %v7272_v1, %v6169_v58  ;;  %v7217_v6 = vpop.f32.mrb[26].mxu1 }
 0x463   : > { %6258 = vst.msk [vmem:[%s7702_s18 + $0xd0] sm:$0xff] %vm9849_vm8, %v7271_v32  ;;  %v7275_v39 = vadd.f32 %v7274_v28, %v7217_v6  ;;  %v7040_v21 = vpop.f32.mrb[60].mxu0  ;;  %v6172_v4 = vpop.f32.mrb[27].mxu1 }
 0x464   : > { %6256 = vst.msk [vmem:[%s7702_s18 + $0xc0] sm:$0xff] %vm9851_vm12, %v7273_v54  ;;  %v7277_v50 = vadd.f32 %v7276_v62, %v6172_v4  ;;  %v4254_v22 = vpop.f32.mrb[61].mxu0  ;;  %v7278_v30 = vadd.f32 %v7040_v21, %v2692_v19 }
 0x465   : > { %6259 = vst.msk [vmem:[%s7702_s18 + $0xd8] sm:$0xff] %vm9638_vm0, %v7275_v39  ;;  %v7041_v25 = vpop.f32.mrb[62].mxu0  ;;  %v7280_v47 = vadd.f32 %v4254_v22, %v2690_v41 }
 0x466   : > { %6257 = vst.msk [vmem:[%s7702_s18 + $0xc8] sm:$0xff] %vm9854_vm3, %v7277_v50  ;;  %v4257_v35 = vpop.f32.mrb[63].mxu0  ;;  %v7282_v31 = vadd.f32 %v7041_v25, %v2693_v7 }
 0x467   : > { %v7284_v48 = vadd.f32 %v4257_v35, %v2691_v36 }
 0x468   : > { %v7220_v33 = vpop.f32.mrb[28].mxu1 }
 0x469   : > { %v7279_v10 = vadd.f32 %v7278_v30, %v7220_v33  ;;  %v6185_v60 = vpop.f32.mrb[29].mxu1 }
 0x46a   : > { %v7281_v45 = vadd.f32 %v7280_v47, %v6185_v60  ;;  %v7221_v15 = vpop.f32.mrb[30].mxu1 }
 0x46b   : > { %6262 = vst.msk [vmem:[%s7702_s18 + $0xf0] sm:$0xff] %vm9856_vm5, %v7279_v10  ;;  %v7283_v8 = vadd.f32 %v7282_v31, %v7221_v15  ;;  %v6188_v27 = vpop.f32.mrb[31].mxu1 }
 0x46c   : > { %6260 = vst.msk [vmem:[%s7702_s18 + $0xe0] sm:$0xff] %vm9857_vm1, %v7281_v45  ;;  %v7285_v53 = vadd.f32 %v7284_v48, %v6188_v27 }
 0x46d   : > { %6263 = vst.msk [vmem:[%s7702_s18 + $0xf8] sm:$0xff] %vm9858_vm13, %v7283_v8 }
 0x46e   : > { %6261 = vst.msk [vmem:[%s7702_s18 + $0xe8] sm:$0xff] %vm9859_vm10, %v7285_v53 }
 0x46f PF: > { %s17_s28 = sadd.s32 1, %s7614_s28   ;;  %s9860_s24 = smov %s7606_s26 }
 0x470   : > { %p14_p9 = scmp.ge.s32.totalorder %s17_s28, 10   ;;  %s9861_s25 = smov %s7610_s27 }
 0x471   : > { %s9862_s26 = smov %s9865_s29  ;;  %s9863_s27 = smov %s9869_s30 }
 0x472   :  { %16 = sbr.rel (!%p14_p9) target bundleno = 3 (0x3), region = 106 }

</bundles_post_ra>
